<compile_context>
chip_gen: v7x
topology: tpu7x:2x2x1
jax: 0.10.0
libtpu: 0.0.40
codegen_flags: <defaults>
</compile_context>

<pallas_src>
import functools

import jax
import jax.numpy as jnp
from jax.experimental import pallas as pl
from jax.experimental.pallas import tpu as pltpu


_EPS = 1e-6
_ACT_DTYPE = jnp.bfloat16      # inter-stage activation storage (compute is f32)


@functools.lru_cache(maxsize=None)
def _vmem_limit_bytes():
    """Generation-aware VMEM limit (v5e/v6e: 128 MiB phys, v7x: 64 MiB)."""
    try:
        cap = int(pltpu.get_tpu_info().vmem_capacity_bytes)
    except Exception:
        cap = 64 * 1024 * 1024
    return max(32 * 1024 * 1024, min((cap * 3) // 4, 96 * 1024 * 1024))


def _compiler_params():
    return pltpu.CompilerParams(
        dimension_semantics=("parallel",),
        vmem_limit_bytes=_vmem_limit_bytes(),
    )


# ----------------------------- in-kernel helpers ----------------------------- #

def _shift_lanes(x, d):
    """y[:, p] = x[:, p + d]  (zero where p + d falls outside [0, HW))."""
    if d == 0:
        return x
    hw = x.shape[1]
    z = jnp.zeros((x.shape[0], abs(d)), x.dtype)
    if d > 0:
        return jnp.concatenate([x[:, d:], z], axis=1)
    return jnp.concatenate([z, x[:, :hw + d]], axis=1)


def _tap(x, dh, dw, w, ml, mr):
    """3x3 tap (dh, dw) of an (C, H*W) pixels-on-lanes tile, zero-padded.

    The flat lane shift handles the h boundary exactly (zero fill); the w
    boundary (row wrap) is handled by the precomputed masks ml / mr."""
    t = _shift_lanes(x, dh * w + dw)
    if dw == -1:
        return t * ml
    if dw == 1:
        return t * mr
    return t


# ------------------------------ fused kernels -------------------------------- #

def _naf_block_kernel(*refs, eps, w, has_skip):
    """One whole NAFBlock on a single (C, H*W) image tile kept in VMEM."""
    if has_skip:
        (x_ref, s_ref, ml_ref, mr_ref,
         n1g, n1b, w1, b1, w2, b2, scaw, scab, w3, b3, beta,
         n2g, n2b, w4, b4, w5, b5, gamma, o_ref) = refs
    else:
        (x_ref, ml_ref, mr_ref,
         n1g, n1b, w1, b1, w2, b2, scaw, scab, w3, b3, beta,
         n2g, n2b, w4, b4, w5, b5, gamma, o_ref) = refs

    x = x_ref[0].astype(jnp.float32)                       # (C, HW)
    if has_skip:
        x = x + s_ref[0].astype(jnp.float32)               # fused decoder skip-add
    ml = ml_ref[...]                                       # (1, HW)
    mr = mr_ref[...]

    # LayerNorm1 over channels (sublane axis) + 1x1 conv1 -> (2C, HW)
    mu = jnp.mean(x, axis=0, keepdims=True)
    xc = x - mu
    var = jnp.mean(xc * xc, axis=0, keepdims=True)
    xn = xc * jax.lax.rsqrt(var + eps) * n1g[...] + n1b[...]
    t = jnp.dot(w1[...], xn, preferred_element_type=jnp.float32) + b1[...]

    # depthwise 3x3 (taps via lane shifts + edge masks; weights (9, 2C, 1))
    acc = jnp.zeros_like(t)
    for dh in (-1, 0, 1):
        for dw in (-1, 0, 1):
            k = (dh + 1) * 3 + (dw + 1)
            acc = acc + _tap(t, dh, dw, w, ml, mr) * w2[k]
    acc = acc + b2[...]

    # SimpleGate + SCA (global average pool over the lane/pixel axis)
    c = acc.shape[0] // 2
    g = acc[:c] * acc[c:]                                  # (C, HW)
    pooled = jnp.mean(g, axis=1, keepdims=True)            # (C, 1)
    s = jnp.dot(scaw[...], pooled, preferred_element_type=jnp.float32) + scab[...]
    g = g * s

    # conv3 + beta residual
    x3 = jnp.dot(w3[...], g, preferred_element_type=jnp.float32) + b3[...]
    y = x + x3 * beta[...]

    # LayerNorm2 + conv4 + SimpleGate + conv5 + gamma residual
    mu2 = jnp.mean(y, axis=0, keepdims=True)
    yc = y - mu2
    var2 = jnp.mean(yc * yc, axis=0, keepdims=True)
    yn = yc * jax.lax.rsqrt(var2 + eps) * n2g[...] + n2b[...]
    x4 = jnp.dot(w4[...], yn, preferred_element_type=jnp.float32) + b4[...]
    g2 = x4[:c] * x4[c:]
    x5 = jnp.dot(w5[...], g2, preferred_element_type=jnp.float32) + b5[...]
    o_ref[0] = (y + x5 * gamma[...]).astype(o_ref.dtype)


def _conv3x3_kernel(x_ref, ml_ref, mr_ref, w_ref, b_ref, o_ref, *, w):
    """Dense 3x3 conv, padding=1, as 9 MXU dots on a (Cin, HW) image tile."""
    x = x_ref[0].astype(jnp.float32)                       # (Cin, HW)
    ml = ml_ref[...]
    mr = mr_ref[...]
    cout = o_ref.shape[1]
    acc = jnp.zeros((cout, x.shape[1]), jnp.float32)
    for dh in (-1, 0, 1):
        for dw in (-1, 0, 1):
            k = (dh + 1) * 3 + (dw + 1)
            acc = acc + jnp.dot(w_ref[k], _tap(x, dh, dw, w, ml, mr),
                                preferred_element_type=jnp.float32)
    o_ref[0] = (acc + b_ref[...]).astype(o_ref.dtype)


def _matmul_bias_kernel(x_ref, w_ref, b_ref, o_ref):
    y = jnp.dot(w_ref[...], x_ref[0].astype(jnp.float32),
                preferred_element_type=jnp.float32) + b_ref[...]
    o_ref[0] = y.astype(o_ref.dtype)


def _matmul_kernel(x_ref, w_ref, o_ref):
    o_ref[0] = jnp.dot(w_ref[...], x_ref[0].astype(jnp.float32),
                       preferred_element_type=jnp.float32).astype(o_ref.dtype)


# ------------------------------- call helpers -------------------------------- #

def _per_image_call(kernel, batched, shared, out_shape, out_dtype):
    """Grid over the batch axis: one (C, H*W) image tile per grid step; small
    parameter arrays are fetched whole with a constant index map."""
    b = batched[0].shape[0]
    in_specs = [pl.BlockSpec((1,) + a.shape[1:],
                             lambda i, n=a.ndim: (i,) + (0,) * (n - 1))
                for a in batched]
    in_specs += [pl.BlockSpec(a.shape, lambda i, n=a.ndim: (0,) * n)
                 for a in shared]
    return pl.pallas_call(
        kernel,
        grid=(b,),
        in_specs=in_specs,
        out_specs=pl.BlockSpec((1,) + out_shape[1:],
                               lambda i: (i,) + (0,) * (len(out_shape) - 1)),
        out_shape=jax.ShapeDtypeStruct(out_shape, out_dtype),
        compiler_params=_compiler_params(),
    )(*batched, *shared)


def _edge_masks(h, w):
    """Per-pixel validity masks for reading the left / right neighbour."""
    wi = jnp.arange(h * w, dtype=jnp.int32) % w
    ml = (wi >= 1).astype(jnp.float32).reshape(1, h * w)
    mr = (wi <= w - 2).astype(jnp.float32).reshape(1, h * w)
    return ml, mr


# -------------------------------- op wrappers -------------------------------- #

def conv3x3(x, w9, bias, h, w, out_dtype=None):
    # x: (B, Cin, H*W); w9: (9, Cout, Cin); bias: (Cout, 1)
    b, _, hw = x.shape
    cout = w9.shape[1]
    ml, mr = _edge_masks(h, w)
    return _per_image_call(
        functools.partial(_conv3x3_kernel, w=w),
        [x], [ml, mr, w9, bias],
        out_shape=(b, cout, hw),
        out_dtype=out_dtype if out_dtype is not None else _ACT_DTYPE)


def naf_block(p, x, h, w, skip=None):
    b, c, hw = x.shape
    ml, mr = _edge_masks(h, w)
    shared = [ml, mr,
              p['norm1_g'], p['norm1_b'], p['conv1_w'], p['conv1_b'],
              p['conv2_w'], p['conv2_b'], p['sca_w'], p['sca_b'],
              p['conv3_w'], p['conv3_b'], p['beta'],
              p['norm2_g'], p['norm2_b'], p['conv4_w'], p['conv4_b'],
              p['conv5_w'], p['conv5_b'], p['gamma']]
    batched = [x] if skip is None else [x, skip]
    return _per_image_call(
        functools.partial(_naf_block_kernel, eps=_EPS, w=w,
                          has_skip=skip is not None),
        batched, shared,
        out_shape=(b, c, hw), out_dtype=_ACT_DTYPE)


def down2x2(x, wmat, bias, h, w):
    # Conv2d(C, 2C, kernel=2, stride=2): space-to-depth + per-image matmul.
    b, c, _ = x.shape
    cout = wmat.shape[0]
    # TODO(synk): fold this space-to-depth into the matmul BlockSpec index_map
    # (strided pixel reads) to avoid the XLA transpose HBM round trip.
    x4 = (x.reshape(b, c, h // 2, 2, w // 2, 2)
           .transpose(0, 1, 3, 5, 2, 4)
           .reshape(b, 4 * c, (h // 2) * (w // 2)))
    return _per_image_call(_matmul_bias_kernel, [x4], [wmat, bias],
                           out_shape=(b, cout, (h // 2) * (w // 2)),
                           out_dtype=_ACT_DTYPE)


def up_pixelshuffle(x, wmat, h, w):
    # bias-free 1x1 conv C -> 2C, then PixelShuffle(2) -> channels C // 2.
    b, _, hw = x.shape
    c2 = wmat.shape[0]
    y = _per_image_call(_matmul_kernel, [x], [wmat],
                        out_shape=(b, c2, hw), out_dtype=_ACT_DTYPE)
    cps = c2 // 4
    # TODO(synk): fold the PixelShuffle permutation into the matmul out_spec
    # (or the following block's in_spec) instead of this XLA transpose.
    y = (y.reshape(b, cps, 2, 2, h, w)
          .transpose(0, 1, 4, 2, 5, 3)
          .reshape(b, cps, 4 * hw))
    return y


# -------------------------------- parameters --------------------------------- #

class KeyGen:
    def __init__(self, key):
        self.key = key

    def __call__(self):
        self.key, k = jax.random.split(self.key)
        return k


def _lin(kg, cout, cin):
    w = (1.0 / jnp.sqrt(cin)) * jax.random.normal(kg(), (cout, cin), jnp.float32)
    b = 0.01 * jax.random.normal(kg(), (cout, 1), jnp.float32)
    return w, b


def init_nafblock(kg, c):
    dw = 2 * c
    p = {}
    p['conv1_w'], p['conv1_b'] = _lin(kg, dw, c)
    p['conv2_w'] = (1.0 / 3.0) * jax.random.normal(kg(), (9, dw, 1), jnp.float32)
    p['conv2_b'] = 0.01 * jax.random.normal(kg(), (dw, 1), jnp.float32)
    p['sca_w'], p['sca_b'] = _lin(kg, c, c)
    p['conv3_w'], p['conv3_b'] = _lin(kg, c, c)
    p['conv4_w'], p['conv4_b'] = _lin(kg, dw, c)
    p['conv5_w'], p['conv5_b'] = _lin(kg, c, c)
    p['norm1_g'] = jnp.ones((c, 1), jnp.float32)
    p['norm1_b'] = jnp.zeros((c, 1), jnp.float32)
    p['norm2_g'] = jnp.ones((c, 1), jnp.float32)
    p['norm2_b'] = jnp.zeros((c, 1), jnp.float32)
    # PyTorch initializes beta/gamma to zeros (block == identity at init); small
    # random values keep the fused block compute observable in the output.
    p['beta'] = 0.1 * jax.random.normal(kg(), (c, 1), jnp.float32)
    p['gamma'] = 0.1 * jax.random.normal(kg(), (c, 1), jnp.float32)
    return p


def init_nafnet(key, img_channel=6, width=8, middle_blk_num=1,
                enc_blk_nums=(1, 1), dec_blk_nums=(1, 1)):
    kg = KeyGen(key)
    P = {}
    P['intro_w'] = (1.0 / jnp.sqrt(9 * img_channel)) * jax.random.normal(
        kg(), (9, width, img_channel), jnp.float32)
    P['intro_b'] = 0.01 * jax.random.normal(kg(), (width, 1), jnp.float32)
    P['ending_w'] = (1.0 / jnp.sqrt(9 * width)) * jax.random.normal(
        kg(), (9, 3, width), jnp.float32)
    P['ending_b'] = 0.01 * jax.random.normal(kg(), (3, 1), jnp.float32)

    chan = width
    P['encoders'], P['downs'] = [], []
    for num in enc_blk_nums:
        P['encoders'].append([init_nafblock(kg, chan) for _ in range(num)])
        dwm = (1.0 / jnp.sqrt(4 * chan)) * jax.random.normal(
            kg(), (2 * chan, 4 * chan), jnp.float32)
        dbm = 0.01 * jax.random.normal(kg(), (2 * chan, 1), jnp.float32)
        P['downs'].append({'w': dwm, 'b': dbm})
        chan *= 2

    P['middle'] = [init_nafblock(kg, chan) for _ in range(middle_blk_num)]

    P['ups'], P['decoders'] = [], []
    for num in dec_blk_nums:
        P['ups'].append((1.0 / jnp.sqrt(chan)) * jax.random.normal(
            kg(), (2 * chan, chan), jnp.float32))
        chan //= 2
        P['decoders'].append([init_nafblock(kg, chan) for _ in range(num)])

    P['padder_size'] = 2 ** len(enc_blk_nums)
    return P


# -------------------------------- forward pass -------------------------------- #

def nafnet_refine_forward(params, inp_nchw, pre_pred_nchw):
    bsz, _, hin, win = inp_nchw.shape
    ps = params['padder_size']
    pad_h = (ps - hin % ps) % ps
    pad_w = (ps - win % ps) % ps
    inp, pre = inp_nchw, pre_pred_nchw
    if pad_h or pad_w:
        inp = jnp.pad(inp, ((0, 0), (0, 0), (0, pad_h), (0, pad_w)))
        pre = jnp.pad(pre, ((0, 0), (0, 0), (0, pad_h), (0, pad_w)))
    h, w = hin + pad_h, win + pad_w

    # NCHW stays as-is: just flatten the spatial dims onto the lane axis.
    x = jnp.concatenate([inp, pre], axis=1)
    x = x.reshape(bsz, x.shape[1], h * w).astype(_ACT_DTYPE)
    x = conv3x3(x, params['intro_w'], params['intro_b'], h, w)

    encs, enc_hw = [], []
    for blocks, down in zip(params['encoders'], params['downs']):
        for bp in blocks:
            x = naf_block(bp, x, h, w)
        encs.append(x)
        enc_hw.append((h, w))
        x = down2x2(x, down['w'], down['b'], h, w)
        h //= 2
        w //= 2

    for bp in params['middle']:
        x = naf_block(bp, x, h, w)

    for blocks, up_w, skip, (sh, sw) in zip(params['decoders'], params['ups'],
                                            encs[::-1], enc_hw[::-1]):
        x = up_pixelshuffle(x, up_w, h, w)
        h, w = sh, sw
        if blocks:
            # Skip-add fused into the first decoder block's kernel.
            x = naf_block(blocks[0], x, h, w, skip=skip)
            for bp in blocks[1:]:
                x = naf_block(bp, x, h, w)
        else:
            x = (x.astype(jnp.float32) + skip.astype(jnp.float32)).astype(_ACT_DTYPE)

    x = conv3x3(x, params['ending_w'], params['ending_b'], h, w,
                out_dtype=jnp.float32)
    x = x.reshape(bsz, 3, h, w)
    # global_residual=False -> no residual add
    return x[:, :, :hin, :win]


# ------------------------------------ main ------------------------------------ #

if __name__ == "__main__":
    key = jax.random.PRNGKey(0)
    pkey, k1, k2 = jax.random.split(key, 3)

    # Small config consistent with the module: img_channel=6 (cat of inp +
    # pre_pred), width=8, 2 encoder/decoder levels, 1 middle block.
    params = init_nafnet(pkey, img_channel=6, width=8, middle_blk_num=1,
                         enc_blk_nums=(1, 1), dec_blk_nums=(1, 1))

    inp = jax.random.normal(k1, (2, 3, 16, 16), jnp.float32)
    pre_pred = jax.random.normal(k2, (2, 3, 16, 16), jnp.float32)

    fwd = jax.jit(functools.partial(nafnet_refine_forward, params))
    out = fwd(inp, pre_pred)
    jax.block_until_ready(out)

    assert out.shape == (2, 3, 16, 16), out.shape
    assert bool(jnp.all(jnp.isfinite(out)))
    print("KERNEL_OK")
</pallas_src>

<mosaic_0001>
module attributes {stable_mosaic.version = 11 : i64} {
  func.func @_conv3x3_kernel(%arg0: i32, %arg1: memref<1x6x256xbf16, #tpu.memory_space<vmem>>, %arg2: memref<1x256xf32, #tpu.memory_space<vmem>>, %arg3: memref<1x256xf32, #tpu.memory_space<vmem>>, %arg4: memref<9x8x6xf32, #tpu.memory_space<vmem>>, %arg5: memref<8x1xf32, #tpu.memory_space<vmem>>, %arg6: memref<1x8x256xbf16, #tpu.memory_space<vmem>>) attributes {dimension_semantics = [#tpu.dimension_semantics<parallel>], iteration_bounds = array<i64: 2>, scalar_prefetch = 0 : i64, scratch_operands = 0 : i64, tpu.core_type = #tpu.core_type<tc>, window_params = [{transform_indices = @transform_0, window_bounds = array<i64: 1, 6, 256>}, {pipeline_mode = #tpu.pipeline_mode<synchronous>, transform_indices = @transform_1, window_bounds = array<i64: 1, 256>}, {pipeline_mode = #tpu.pipeline_mode<synchronous>, transform_indices = @transform_2, window_bounds = array<i64: 1, 256>}, {pipeline_mode = #tpu.pipeline_mode<synchronous>, transform_indices = @transform_3, window_bounds = array<i64: 9, 8, 6>}, {pipeline_mode = #tpu.pipeline_mode<synchronous>, transform_indices = @transform_4, window_bounds = array<i64: 8, 1>}, {transform_indices = @transform_5, window_bounds = array<i64: 1, 8, 256>}]} {
    %c0 = arith.constant 0 : index
    %c0_0 = arith.constant 0 : index
    %c0_1 = arith.constant 0 : index
    %0 = vector.load %arg1[%c0, %c0_0, %c0_1] : memref<1x6x256xbf16, #tpu.memory_space<vmem>>, vector<1x6x256xbf16>
    %1 = vector.shape_cast %0 : vector<1x6x256xbf16> to vector<6x256xbf16>
    %2 = arith.extf %1 : vector<6x256xbf16> to vector<6x256xf32>
    %c0_2 = arith.constant 0 : index
    %c0_3 = arith.constant 0 : index
    %3 = vector.load %arg2[%c0_2, %c0_3] : memref<1x256xf32, #tpu.memory_space<vmem>>, vector<1x256xf32>
    %c0_4 = arith.constant 0 : index
    %c0_5 = arith.constant 0 : index
    %4 = vector.load %arg3[%c0_4, %c0_5] : memref<1x256xf32, #tpu.memory_space<vmem>>, vector<1x256xf32>
    %cst = arith.constant 0.000000e+00 : f32
    %5 = vector.broadcast %cst : f32 to vector<8x256xf32>
    %c0_6 = arith.constant 0 : index
    %c0_7 = arith.constant 0 : index
    %c0_8 = arith.constant 0 : index
    %6 = vector.load %arg4[%c0_6, %c0_7, %c0_8] : memref<9x8x6xf32, #tpu.memory_space<vmem>>, vector<1x8x6xf32>
    %7 = vector.shape_cast %6 : vector<1x8x6xf32> to vector<8x6xf32>
    %cst_9 = arith.constant 0.000000e+00 : f32
    %8 = vector.broadcast %cst_9 : f32 to vector<6x17xf32>
    %9 = vector.extract_strided_slice %2 {offsets = [0, 0], sizes = [6, 239], strides = [1, 1]} : vector<6x256xf32> to vector<6x239xf32>
    %10 = tpu.concatenate %8, %9 in 1 : vector<6x17xf32>, vector<6x239xf32> -> vector<6x256xf32>
    %11 = vector.broadcast %3 : vector<1x256xf32> to vector<6x256xf32>
    %12 = arith.mulf %10, %11 : vector<6x256xf32>
    %cst_10 = arith.constant dense<0.000000e+00> : vector<8x256xf32>
    %13 = tpu.matmul %7, %12, %cst_10 {dimension_numbers = #tpu.dot_dimension_numbers<[1], [0], [0], [1], [0, 0, 1, 1], [], []>} : vector<8x6xf32>, vector<6x256xf32>, vector<8x256xf32> -> vector<8x256xf32>
    %14 = arith.addf %5, %13 : vector<8x256xf32>
    %c1 = arith.constant 1 : index
    %c0_11 = arith.constant 0 : index
    %c0_12 = arith.constant 0 : index
    %15 = vector.load %arg4[%c1, %c0_11, %c0_12] : memref<9x8x6xf32, #tpu.memory_space<vmem>>, vector<1x8x6xf32>
    %16 = vector.shape_cast %15 : vector<1x8x6xf32> to vector<8x6xf32>
    %cst_13 = arith.constant 0.000000e+00 : f32
    %17 = vector.broadcast %cst_13 : f32 to vector<6x16xf32>
    %18 = vector.extract_strided_slice %2 {offsets = [0, 0], sizes = [6, 240], strides = [1, 1]} : vector<6x256xf32> to vector<6x240xf32>
    %19 = tpu.concatenate %17, %18 in 1 : vector<6x16xf32>, vector<6x240xf32> -> vector<6x256xf32>
    %cst_14 = arith.constant dense<0.000000e+00> : vector<8x256xf32>
    %20 = tpu.matmul %16, %19, %cst_14 {dimension_numbers = #tpu.dot_dimension_numbers<[1], [0], [0], [1], [0, 0, 1, 1], [], []>} : vector<8x6xf32>, vector<6x256xf32>, vector<8x256xf32> -> vector<8x256xf32>
    %21 = arith.addf %14, %20 : vector<8x256xf32>
    %c2 = arith.constant 2 : index
    %c0_15 = arith.constant 0 : index
    %c0_16 = arith.constant 0 : index
    %22 = vector.load %arg4[%c2, %c0_15, %c0_16] : memref<9x8x6xf32, #tpu.memory_space<vmem>>, vector<1x8x6xf32>
    %23 = vector.shape_cast %22 : vector<1x8x6xf32> to vector<8x6xf32>
    %cst_17 = arith.constant 0.000000e+00 : f32
    %24 = vector.broadcast %cst_17 : f32 to vector<6x15xf32>
    %25 = vector.extract_strided_slice %2 {offsets = [0, 0], sizes = [6, 241], strides = [1, 1]} : vector<6x256xf32> to vector<6x241xf32>
    %26 = tpu.concatenate %24, %25 in 1 : vector<6x15xf32>, vector<6x241xf32> -> vector<6x256xf32>
    %27 = vector.broadcast %4 : vector<1x256xf32> to vector<6x256xf32>
    %28 = arith.mulf %26, %27 : vector<6x256xf32>
    %cst_18 = arith.constant dense<0.000000e+00> : vector<8x256xf32>
    %29 = tpu.matmul %23, %28, %cst_18 {dimension_numbers = #tpu.dot_dimension_numbers<[1], [0], [0], [1], [0, 0, 1, 1], [], []>} : vector<8x6xf32>, vector<6x256xf32>, vector<8x256xf32> -> vector<8x256xf32>
    %30 = arith.addf %21, %29 : vector<8x256xf32>
    %c3 = arith.constant 3 : index
    %c0_19 = arith.constant 0 : index
    %c0_20 = arith.constant 0 : index
    %31 = vector.load %arg4[%c3, %c0_19, %c0_20] : memref<9x8x6xf32, #tpu.memory_space<vmem>>, vector<1x8x6xf32>
    %32 = vector.shape_cast %31 : vector<1x8x6xf32> to vector<8x6xf32>
    %cst_21 = arith.constant 0.000000e+00 : f32
    %33 = vector.broadcast %cst_21 : f32 to vector<6x1xf32>
    %34 = vector.extract_strided_slice %2 {offsets = [0, 0], sizes = [6, 255], strides = [1, 1]} : vector<6x256xf32> to vector<6x255xf32>
    %35 = tpu.concatenate %33, %34 in 1 : vector<6x1xf32>, vector<6x255xf32> -> vector<6x256xf32>
    %36 = vector.broadcast %3 : vector<1x256xf32> to vector<6x256xf32>
    %37 = arith.mulf %35, %36 : vector<6x256xf32>
    %cst_22 = arith.constant dense<0.000000e+00> : vector<8x256xf32>
    %38 = tpu.matmul %32, %37, %cst_22 {dimension_numbers = #tpu.dot_dimension_numbers<[1], [0], [0], [1], [0, 0, 1, 1], [], []>} : vector<8x6xf32>, vector<6x256xf32>, vector<8x256xf32> -> vector<8x256xf32>
    %39 = arith.addf %30, %38 : vector<8x256xf32>
    %c4 = arith.constant 4 : index
    %c0_23 = arith.constant 0 : index
    %c0_24 = arith.constant 0 : index
    %40 = vector.load %arg4[%c4, %c0_23, %c0_24] : memref<9x8x6xf32, #tpu.memory_space<vmem>>, vector<1x8x6xf32>
    %41 = vector.shape_cast %40 : vector<1x8x6xf32> to vector<8x6xf32>
    %cst_25 = arith.constant dense<0.000000e+00> : vector<8x256xf32>
    %42 = tpu.matmul %41, %2, %cst_25 {dimension_numbers = #tpu.dot_dimension_numbers<[1], [0], [0], [1], [0, 0, 1, 1], [], []>} : vector<8x6xf32>, vector<6x256xf32>, vector<8x256xf32> -> vector<8x256xf32>
    %43 = arith.addf %39, %42 : vector<8x256xf32>
    %c5 = arith.constant 5 : index
    %c0_26 = arith.constant 0 : index
    %c0_27 = arith.constant 0 : index
    %44 = vector.load %arg4[%c5, %c0_26, %c0_27] : memref<9x8x6xf32, #tpu.memory_space<vmem>>, vector<1x8x6xf32>
    %45 = vector.shape_cast %44 : vector<1x8x6xf32> to vector<8x6xf32>
    %cst_28 = arith.constant 0.000000e+00 : f32
    %46 = vector.broadcast %cst_28 : f32 to vector<6x1xf32>
    %47 = vector.extract_strided_slice %2 {offsets = [0, 1], sizes = [6, 255], strides = [1, 1]} : vector<6x256xf32> to vector<6x255xf32>
    %48 = tpu.concatenate %47, %46 in 1 : vector<6x255xf32>, vector<6x1xf32> -> vector<6x256xf32>
    %49 = vector.broadcast %4 : vector<1x256xf32> to vector<6x256xf32>
    %50 = arith.mulf %48, %49 : vector<6x256xf32>
    %cst_29 = arith.constant dense<0.000000e+00> : vector<8x256xf32>
    %51 = tpu.matmul %45, %50, %cst_29 {dimension_numbers = #tpu.dot_dimension_numbers<[1], [0], [0], [1], [0, 0, 1, 1], [], []>} : vector<8x6xf32>, vector<6x256xf32>, vector<8x256xf32> -> vector<8x256xf32>
    %52 = arith.addf %43, %51 : vector<8x256xf32>
    %c6 = arith.constant 6 : index
    %c0_30 = arith.constant 0 : index
    %c0_31 = arith.constant 0 : index
    %53 = vector.load %arg4[%c6, %c0_30, %c0_31] : memref<9x8x6xf32, #tpu.memory_space<vmem>>, vector<1x8x6xf32>
    %54 = vector.shape_cast %53 : vector<1x8x6xf32> to vector<8x6xf32>
    %cst_32 = arith.constant 0.000000e+00 : f32
    %55 = vector.broadcast %cst_32 : f32 to vector<6x15xf32>
    %56 = vector.extract_strided_slice %2 {offsets = [0, 15], sizes = [6, 241], strides = [1, 1]} : vector<6x256xf32> to vector<6x241xf32>
    %57 = tpu.concatenate %56, %55 in 1 : vector<6x241xf32>, vector<6x15xf32> -> vector<6x256xf32>
    %58 = vector.broadcast %3 : vector<1x256xf32> to vector<6x256xf32>
    %59 = arith.mulf %57, %58 : vector<6x256xf32>
    %cst_33 = arith.constant dense<0.000000e+00> : vector<8x256xf32>
    %60 = tpu.matmul %54, %59, %cst_33 {dimension_numbers = #tpu.dot_dimension_numbers<[1], [0], [0], [1], [0, 0, 1, 1], [], []>} : vector<8x6xf32>, vector<6x256xf32>, vector<8x256xf32> -> vector<8x256xf32>
    %61 = arith.addf %52, %60 : vector<8x256xf32>
    %c7 = arith.constant 7 : index
    %c0_34 = arith.constant 0 : index
    %c0_35 = arith.constant 0 : index
    %62 = vector.load %arg4[%c7, %c0_34, %c0_35] : memref<9x8x6xf32, #tpu.memory_space<vmem>>, vector<1x8x6xf32>
    %63 = vector.shape_cast %62 : vector<1x8x6xf32> to vector<8x6xf32>
    %cst_36 = arith.constant 0.000000e+00 : f32
    %64 = vector.broadcast %cst_36 : f32 to vector<6x16xf32>
    %65 = vector.extract_strided_slice %2 {offsets = [0, 16], sizes = [6, 240], strides = [1, 1]} : vector<6x256xf32> to vector<6x240xf32>
    %66 = tpu.concatenate %65, %64 in 1 : vector<6x240xf32>, vector<6x16xf32> -> vector<6x256xf32>
    %cst_37 = arith.constant dense<0.000000e+00> : vector<8x256xf32>
    %67 = tpu.matmul %63, %66, %cst_37 {dimension_numbers = #tpu.dot_dimension_numbers<[1], [0], [0], [1], [0, 0, 1, 1], [], []>} : vector<8x6xf32>, vector<6x256xf32>, vector<8x256xf32> -> vector<8x256xf32>
    %68 = arith.addf %61, %67 : vector<8x256xf32>
    %c8 = arith.constant 8 : index
    %c0_38 = arith.constant 0 : index
    %c0_39 = arith.constant 0 : index
    %69 = vector.load %arg4[%c8, %c0_38, %c0_39] : memref<9x8x6xf32, #tpu.memory_space<vmem>>, vector<1x8x6xf32>
    %70 = vector.shape_cast %69 : vector<1x8x6xf32> to vector<8x6xf32>
    %cst_40 = arith.constant 0.000000e+00 : f32
    %71 = vector.broadcast %cst_40 : f32 to vector<6x17xf32>
    %72 = vector.extract_strided_slice %2 {offsets = [0, 17], sizes = [6, 239], strides = [1, 1]} : vector<6x256xf32> to vector<6x239xf32>
    %73 = tpu.concatenate %72, %71 in 1 : vector<6x239xf32>, vector<6x17xf32> -> vector<6x256xf32>
    %74 = vector.broadcast %4 : vector<1x256xf32> to vector<6x256xf32>
    %75 = arith.mulf %73, %74 : vector<6x256xf32>
    %cst_41 = arith.constant dense<0.000000e+00> : vector<8x256xf32>
    %76 = tpu.matmul %70, %75, %cst_41 {dimension_numbers = #tpu.dot_dimension_numbers<[1], [0], [0], [1], [0, 0, 1, 1], [], []>} : vector<8x6xf32>, vector<6x256xf32>, vector<8x256xf32> -> vector<8x256xf32>
    %77 = arith.addf %68, %76 : vector<8x256xf32>
    %c0_42 = arith.constant 0 : index
    %c0_43 = arith.constant 0 : index
    %78 = vector.load %arg5[%c0_42, %c0_43] : memref<8x1xf32, #tpu.memory_space<vmem>>, vector<8x1xf32>
    %79 = vector.broadcast %78 : vector<8x1xf32> to vector<8x256xf32>
    %80 = arith.addf %77, %79 : vector<8x256xf32>
    %81 = arith.truncf %80 : vector<8x256xf32> to vector<8x256xbf16>
    %c0_44 = arith.constant 0 : index
    %c0_45 = arith.constant 0 : index
    %c0_46 = arith.constant 0 : index
    %82 = vector.load %arg6[%c0_44, %c0_45, %c0_46] : memref<1x8x256xbf16, #tpu.memory_space<vmem>>, vector<1x8x256xbf16>
    %83 = vector.shape_cast %82 : vector<1x8x256xbf16> to vector<8x256xbf16>
    %84 = vector.shape_cast %81 : vector<8x256xbf16> to vector<1x8x256xbf16>
    tpu.vector_store %arg6[%c0_44, %c0_45, %c0_46], %84 {strides = array<i32>} : memref<1x8x256xbf16, #tpu.memory_space<vmem>>, vector<1x8x256xbf16>,
    return
  }
  func.func @transform_0(%arg0: i32) -> (i32, i32, i32) {
    %c0_i32 = arith.constant 0 : i32
    %c0_i32_0 = arith.constant 0 : i32
    %c0_i32_1 = arith.constant 0 : i32
    return %arg0, %c0_i32, %c0_i32_0 : i32, i32, i32
  }
  func.func @transform_1(%arg0: i32) -> (i32, i32) {
    %c0_i32 = arith.constant 0 : i32
    %c0_i32_0 = arith.constant 0 : i32
    %c0_i32_1 = arith.constant 0 : i32
    return %c0_i32, %c0_i32_0 : i32, i32
  }
  func.func @transform_2(%arg0: i32) -> (i32, i32) {
    %c0_i32 = arith.constant 0 : i32
    %c0_i32_0 = arith.constant 0 : i32
    %c0_i32_1 = arith.constant 0 : i32
    return %c0_i32, %c0_i32_0 : i32, i32
  }
  func.func @transform_3(%arg0: i32) -> (i32, i32, i32) {
    %c0_i32 = arith.constant 0 : i32
    %c0_i32_0 = arith.constant 0 : i32
    %c0_i32_1 = arith.constant 0 : i32
    %c0_i32_2 = arith.constant 0 : i32
    return %c0_i32, %c0_i32_0, %c0_i32_1 : i32, i32, i32
  }
  func.func @transform_4(%arg0: i32) -> (i32, i32) {
    %c0_i32 = arith.constant 0 : i32
    %c0_i32_0 = arith.constant 0 : i32
    %c0_i32_1 = arith.constant 0 : i32
    return %c0_i32, %c0_i32_0 : i32, i32
  }
  func.func @transform_5(%arg0: i32) -> (i32, i32, i32) {
    %c0_i32 = arith.constant 0 : i32
    %c0_i32_0 = arith.constant 0 : i32
    %c0_i32_1 = arith.constant 0 : i32
    return %arg0, %c0_i32, %c0_i32_0 : i32, i32, i32
  }
}

module attributes {stable_mosaic.version = 11 : i64} {
  func.func @_naf_block_kernel(%arg0: i32, %arg1: memref<1x8x256xbf16, #tpu.memory_space<vmem>>, %arg2: memref<1x256xf32, #tpu.memory_space<vmem>>, %arg3: memref<1x256xf32, #tpu.memory_space<vmem>>, %arg4: memref<8x1xf32, #tpu.memory_space<vmem>>, %arg5: memref<8x1xf32, #tpu.memory_space<vmem>>, %arg6: memref<16x8xf32, #tpu.memory_space<vmem>>, %arg7: memref<16x1xf32, #tpu.memory_space<vmem>>, %arg8: memref<9x16x1xf32, #tpu.memory_space<vmem>>, %arg9: memref<16x1xf32, #tpu.memory_space<vmem>>, %arg10: memref<8x8xf32, #tpu.memory_space<vmem>>, %arg11: memref<8x1xf32, #tpu.memory_space<vmem>>, %arg12: memref<8x8xf32, #tpu.memory_space<vmem>>, %arg13: memref<8x1xf32, #tpu.memory_space<vmem>>, %arg14: memref<8x1xf32, #tpu.memory_space<vmem>>, %arg15: memref<8x1xf32, #tpu.memory_space<vmem>>, %arg16: memref<8x1xf32, #tpu.memory_space<vmem>>, %arg17: memref<16x8xf32, #tpu.memory_space<vmem>>, %arg18: memref<16x1xf32, #tpu.memory_space<vmem>>, %arg19: memref<8x8xf32, #tpu.memory_space<vmem>>, %arg20: memref<8x1xf32, #tpu.memory_space<vmem>>, %arg21: memref<8x1xf32, #tpu.memory_space<vmem>>, %arg22: memref<1x8x256xbf16, #tpu.memory_space<vmem>>) attributes {dimension_semantics = [#tpu.dimension_semantics<parallel>], iteration_bounds = array<i64: 2>, scalar_prefetch = 0 : i64, scratch_operands = 0 : i64, tpu.core_type = #tpu.core_type<tc>, window_params = [{transform_indices = @transform_0, window_bounds = array<i64: 1, 8, 256>}, {pipeline_mode = #tpu.pipeline_mode<synchronous>, transform_indices = @transform_1, window_bounds = array<i64: 1, 256>}, {pipeline_mode = #tpu.pipeline_mode<synchronous>, transform_indices = @transform_2, window_bounds = array<i64: 1, 256>}, {pipeline_mode = #tpu.pipeline_mode<synchronous>, transform_indices = @transform_3, window_bounds = array<i64: 8, 1>}, {pipeline_mode = #tpu.pipeline_mode<synchronous>, transform_indices = @transform_4, window_bounds = array<i64: 8, 1>}, {pipeline_mode = #tpu.pipeline_mode<synchronous>, transform_indices = @transform_5, window_bounds = array<i64: 16, 8>}, {pipeline_mode = #tpu.pipeline_mode<synchronous>, transform_indices = @transform_6, window_bounds = array<i64: 16, 1>}, {pipeline_mode = #tpu.pipeline_mode<synchronous>, transform_indices = @transform_7, window_bounds = array<i64: 9, 16, 1>}, {pipeline_mode = #tpu.pipeline_mode<synchronous>, transform_indices = @transform_8, window_bounds = array<i64: 16, 1>}, {pipeline_mode = #tpu.pipeline_mode<synchronous>, transform_indices = @transform_9, window_bounds = array<i64: 8, 8>}, {pipeline_mode = #tpu.pipeline_mode<synchronous>, transform_indices = @transform_10, window_bounds = array<i64: 8, 1>}, {pipeline_mode = #tpu.pipeline_mode<synchronous>, transform_indices = @transform_11, window_bounds = array<i64: 8, 8>}, {pipeline_mode = #tpu.pipeline_mode<synchronous>, transform_indices = @transform_12, window_bounds = array<i64: 8, 1>}, {pipeline_mode = #tpu.pipeline_mode<synchronous>, transform_indices = @transform_13, window_bounds = array<i64: 8, 1>}, {pipeline_mode = #tpu.pipeline_mode<synchronous>, transform_indices = @transform_14, window_bounds = array<i64: 8, 1>}, {pipeline_mode = #tpu.pipeline_mode<synchronous>, transform_indices = @transform_15, window_bounds = array<i64: 8, 1>}, {pipeline_mode = #tpu.pipeline_mode<synchronous>, transform_indices = @transform_16, window_bounds = array<i64: 16, 8>}, {pipeline_mode = #tpu.pipeline_mode<synchronous>, transform_indices = @transform_17, window_bounds = array<i64: 16, 1>}, {pipeline_mode = #tpu.pipeline_mode<synchronous>, transform_indices = @transform_18, window_bounds = array<i64: 8, 8>}, {pipeline_mode = #tpu.pipeline_mode<synchronous>, transform_indices = @transform_19, window_bounds = array<i64: 8, 1>}, {pipeline_mode = #tpu.pipeline_mode<synchronous>, transform_indices = @transform_20, window_bounds = array<i64: 8, 1>}, {transform_indices = @transform_21, window_bounds = array<i64: 1, 8, 256>}]} {
    %c0 = arith.constant 0 : index
    %c0_0 = arith.constant 0 : index
    %c0_1 = arith.constant 0 : index
    %0 = vector.load %arg1[%c0, %c0_0, %c0_1] : memref<1x8x256xbf16, #tpu.memory_space<vmem>>, vector<1x8x256xbf16>
    %1 = vector.shape_cast %0 : vector<1x8x256xbf16> to vector<8x256xbf16>
    %2 = arith.extf %1 : vector<8x256xbf16> to vector<8x256xf32>
    %c0_2 = arith.constant 0 : index
    %c0_3 = arith.constant 0 : index
    %3 = vector.load %arg2[%c0_2, %c0_3] : memref<1x256xf32, #tpu.memory_space<vmem>>, vector<1x256xf32>
    %c0_4 = arith.constant 0 : index
    %c0_5 = arith.constant 0 : index
    %4 = vector.load %arg3[%c0_4, %c0_5] : memref<1x256xf32, #tpu.memory_space<vmem>>, vector<1x256xf32>
    %cst = arith.constant dense<0.000000e+00> : vector<256xf32>
    %5 = vector.multi_reduction <add>, %2, %cst [0] : vector<8x256xf32> to vector<256xf32>
    %6 = vector.shape_cast %5 : vector<256xf32> to vector<1x256xf32>
    %cst_6 = arith.constant 8.000000e+00 : f32
    %7 = vector.broadcast %cst_6 : f32 to vector<1x256xf32>
    %8 = arith.divf %6, %7 : vector<1x256xf32>
    %9 = vector.broadcast %8 : vector<1x256xf32> to vector<8x256xf32>
    %10 = arith.subf %2, %9 : vector<8x256xf32>
    %11 = arith.mulf %10, %10 : vector<8x256xf32>
    %cst_7 = arith.constant dense<0.000000e+00> : vector<256xf32>
    %12 = vector.multi_reduction <add>, %11, %cst_7 [0] : vector<8x256xf32> to vector<256xf32>
    %13 = vector.shape_cast %12 : vector<256xf32> to vector<1x256xf32>
    %cst_8 = arith.constant 8.000000e+00 : f32
    %14 = vector.broadcast %cst_8 : f32 to vector<1x256xf32>
    %15 = arith.divf %13, %14 : vector<1x256xf32>
    %cst_9 = arith.constant 9.99999997E-7 : f32
    %16 = vector.broadcast %cst_9 : f32 to vector<1x256xf32>
    %17 = arith.addf %15, %16 : vector<1x256xf32>
    %18 = math.rsqrt %17 : vector<1x256xf32>
    %19 = vector.broadcast %18 : vector<1x256xf32> to vector<8x256xf32>
    %20 = arith.mulf %10, %19 : vector<8x256xf32>
    %c0_10 = arith.constant 0 : index
    %c0_11 = arith.constant 0 : index
    %21 = vector.load %arg4[%c0_10, %c0_11] : memref<8x1xf32, #tpu.memory_space<vmem>>, vector<8x1xf32>
    %22 = vector.broadcast %21 : vector<8x1xf32> to vector<8x256xf32>
    %23 = arith.mulf %20, %22 : vector<8x256xf32>
    %c0_12 = arith.constant 0 : index
    %c0_13 = arith.constant 0 : index
    %24 = vector.load %arg5[%c0_12, %c0_13] : memref<8x1xf32, #tpu.memory_space<vmem>>, vector<8x1xf32>
    %25 = vector.broadcast %24 : vector<8x1xf32> to vector<8x256xf32>
    %26 = arith.addf %23, %25 : vector<8x256xf32>
    %c0_14 = arith.constant 0 : index
    %c0_15 = arith.constant 0 : index
    %27 = vector.load %arg6[%c0_14, %c0_15] : memref<16x8xf32, #tpu.memory_space<vmem>>, vector<16x8xf32>
    %cst_16 = arith.constant dense<0.000000e+00> : vector<16x256xf32>
    %28 = tpu.matmul %27, %26, %cst_16 {dimension_numbers = #tpu.dot_dimension_numbers<[1], [0], [0], [1], [0, 0, 1, 1], [], []>} : vector<16x8xf32>, vector<8x256xf32>, vector<16x256xf32> -> vector<16x256xf32>
    %c0_17 = arith.constant 0 : index
    %c0_18 = arith.constant 0 : index
    %29 = vector.load %arg7[%c0_17, %c0_18] : memref<16x1xf32, #tpu.memory_space<vmem>>, vector<16x1xf32>
    %30 = vector.broadcast %29 : vector<16x1xf32> to vector<16x256xf32>
    %31 = arith.addf %28, %30 : vector<16x256xf32>
    %cst_19 = arith.constant 0.000000e+00 : f32
    %32 = vector.broadcast %cst_19 : f32 to vector<16x256xf32>
    %cst_20 = arith.constant 0.000000e+00 : f32
    %33 = vector.broadcast %cst_20 : f32 to vector<16x17xf32>
    %34 = vector.extract_strided_slice %31 {offsets = [0, 0], sizes = [16, 239], strides = [1, 1]} : vector<16x256xf32> to vector<16x239xf32>
    %35 = tpu.concatenate %33, %34 in 1 : vector<16x17xf32>, vector<16x239xf32> -> vector<16x256xf32>
    %36 = vector.broadcast %3 : vector<1x256xf32> to vector<16x256xf32>
    %37 = arith.mulf %35, %36 : vector<16x256xf32>
    %c0_21 = arith.constant 0 : index
    %c0_22 = arith.constant 0 : index
    %c0_23 = arith.constant 0 : index
    %38 = vector.load %arg8[%c0_21, %c0_22, %c0_23] : memref<9x16x1xf32, #tpu.memory_space<vmem>>, vector<1x16x1xf32>
    %39 = vector.shape_cast %38 : vector<1x16x1xf32> to vector<16x1xf32>
    %40 = vector.broadcast %39 : vector<16x1xf32> to vector<16x256xf32>
    %41 = arith.mulf %37, %40 : vector<16x256xf32>
    %42 = arith.addf %32, %41 : vector<16x256xf32>
    %cst_24 = arith.constant 0.000000e+00 : f32
    %43 = vector.broadcast %cst_24 : f32 to vector<16x16xf32>
    %44 = vector.extract_strided_slice %31 {offsets = [0, 0], sizes = [16, 240], strides = [1, 1]} : vector<16x256xf32> to vector<16x240xf32>
    %45 = tpu.concatenate %43, %44 in 1 : vector<16x16xf32>, vector<16x240xf32> -> vector<16x256xf32>
    %c1 = arith.constant 1 : index
    %c0_25 = arith.constant 0 : index
    %c0_26 = arith.constant 0 : index
    %46 = vector.load %arg8[%c1, %c0_25, %c0_26] : memref<9x16x1xf32, #tpu.memory_space<vmem>>, vector<1x16x1xf32>
    %47 = vector.shape_cast %46 : vector<1x16x1xf32> to vector<16x1xf32>
    %48 = vector.broadcast %47 : vector<16x1xf32> to vector<16x256xf32>
    %49 = arith.mulf %45, %48 : vector<16x256xf32>
    %50 = arith.addf %42, %49 : vector<16x256xf32>
    %cst_27 = arith.constant 0.000000e+00 : f32
    %51 = vector.broadcast %cst_27 : f32 to vector<16x15xf32>
    %52 = vector.extract_strided_slice %31 {offsets = [0, 0], sizes = [16, 241], strides = [1, 1]} : vector<16x256xf32> to vector<16x241xf32>
    %53 = tpu.concatenate %51, %52 in 1 : vector<16x15xf32>, vector<16x241xf32> -> vector<16x256xf32>
    %54 = vector.broadcast %4 : vector<1x256xf32> to vector<16x256xf32>
    %55 = arith.mulf %53, %54 : vector<16x256xf32>
    %c2 = arith.constant 2 : index
    %c0_28 = arith.constant 0 : index
    %c0_29 = arith.constant 0 : index
    %56 = vector.load %arg8[%c2, %c0_28, %c0_29] : memref<9x16x1xf32, #tpu.memory_space<vmem>>, vector<1x16x1xf32>
    %57 = vector.shape_cast %56 : vector<1x16x1xf32> to vector<16x1xf32>
    %58 = vector.broadcast %57 : vector<16x1xf32> to vector<16x256xf32>
    %59 = arith.mulf %55, %58 : vector<16x256xf32>
    %60 = arith.addf %50, %59 : vector<16x256xf32>
    %cst_30 = arith.constant 0.000000e+00 : f32
    %61 = vector.broadcast %cst_30 : f32 to vector<16x1xf32>
    %62 = vector.extract_strided_slice %31 {offsets = [0, 0], sizes = [16, 255], strides = [1, 1]} : vector<16x256xf32> to vector<16x255xf32>
    %63 = tpu.concatenate %61, %62 in 1 : vector<16x1xf32>, vector<16x255xf32> -> vector<16x256xf32>
    %64 = vector.broadcast %3 : vector<1x256xf32> to vector<16x256xf32>
    %65 = arith.mulf %63, %64 : vector<16x256xf32>
    %c3 = arith.constant 3 : index
    %c0_31 = arith.constant 0 : index
    %c0_32 = arith.constant 0 : index
    %66 = vector.load %arg8[%c3, %c0_31, %c0_32] : memref<9x16x1xf32, #tpu.memory_space<vmem>>, vector<1x16x1xf32>
    %67 = vector.shape_cast %66 : vector<1x16x1xf32> to vector<16x1xf32>
    %68 = vector.broadcast %67 : vector<16x1xf32> to vector<16x256xf32>
    %69 = arith.mulf %65, %68 : vector<16x256xf32>
    %70 = arith.addf %60, %69 : vector<16x256xf32>
    %c4 = arith.constant 4 : index
    %c0_33 = arith.constant 0 : index
    %c0_34 = arith.constant 0 : index
    %71 = vector.load %arg8[%c4, %c0_33, %c0_34] : memref<9x16x1xf32, #tpu.memory_space<vmem>>, vector<1x16x1xf32>
    %72 = vector.shape_cast %71 : vector<1x16x1xf32> to vector<16x1xf32>
    %73 = vector.broadcast %72 : vector<16x1xf32> to vector<16x256xf32>
    %74 = arith.mulf %31, %73 : vector<16x256xf32>
    %75 = arith.addf %70, %74 : vector<16x256xf32>
    %cst_35 = arith.constant 0.000000e+00 : f32
    %76 = vector.broadcast %cst_35 : f32 to vector<16x1xf32>
    %77 = vector.extract_strided_slice %31 {offsets = [0, 1], sizes = [16, 255], strides = [1, 1]} : vector<16x256xf32> to vector<16x255xf32>
    %78 = tpu.concatenate %77, %76 in 1 : vector<16x255xf32>, vector<16x1xf32> -> vector<16x256xf32>
    %79 = vector.broadcast %4 : vector<1x256xf32> to vector<16x256xf32>
    %80 = arith.mulf %78, %79 : vector<16x256xf32>
    %c5 = arith.constant 5 : index
    %c0_36 = arith.constant 0 : index
    %c0_37 = arith.constant 0 : index
    %81 = vector.load %arg8[%c5, %c0_36, %c0_37] : memref<9x16x1xf32, #tpu.memory_space<vmem>>, vector<1x16x1xf32>
    %82 = vector.shape_cast %81 : vector<1x16x1xf32> to vector<16x1xf32>
    %83 = vector.broadcast %82 : vector<16x1xf32> to vector<16x256xf32>
    %84 = arith.mulf %80, %83 : vector<16x256xf32>
    %85 = arith.addf %75, %84 : vector<16x256xf32>
    %cst_38 = arith.constant 0.000000e+00 : f32
    %86 = vector.broadcast %cst_38 : f32 to vector<16x15xf32>
    %87 = vector.extract_strided_slice %31 {offsets = [0, 15], sizes = [16, 241], strides = [1, 1]} : vector<16x256xf32> to vector<16x241xf32>
    %88 = tpu.concatenate %87, %86 in 1 : vector<16x241xf32>, vector<16x15xf32> -> vector<16x256xf32>
    %89 = vector.broadcast %3 : vector<1x256xf32> to vector<16x256xf32>
    %90 = arith.mulf %88, %89 : vector<16x256xf32>
    %c6 = arith.constant 6 : index
    %c0_39 = arith.constant 0 : index
    %c0_40 = arith.constant 0 : index
    %91 = vector.load %arg8[%c6, %c0_39, %c0_40] : memref<9x16x1xf32, #tpu.memory_space<vmem>>, vector<1x16x1xf32>
    %92 = vector.shape_cast %91 : vector<1x16x1xf32> to vector<16x1xf32>
    %93 = vector.broadcast %92 : vector<16x1xf32> to vector<16x256xf32>
    %94 = arith.mulf %90, %93 : vector<16x256xf32>
    %95 = arith.addf %85, %94 : vector<16x256xf32>
    %cst_41 = arith.constant 0.000000e+00 : f32
    %96 = vector.broadcast %cst_41 : f32 to vector<16x16xf32>
    %97 = vector.extract_strided_slice %31 {offsets = [0, 16], sizes = [16, 240], strides = [1, 1]} : vector<16x256xf32> to vector<16x240xf32>
    %98 = tpu.concatenate %97, %96 in 1 : vector<16x240xf32>, vector<16x16xf32> -> vector<16x256xf32>
    %c7 = arith.constant 7 : index
    %c0_42 = arith.constant 0 : index
    %c0_43 = arith.constant 0 : index
    %99 = vector.load %arg8[%c7, %c0_42, %c0_43] : memref<9x16x1xf32, #tpu.memory_space<vmem>>, vector<1x16x1xf32>
    %100 = vector.shape_cast %99 : vector<1x16x1xf32> to vector<16x1xf32>
    %101 = vector.broadcast %100 : vector<16x1xf32> to vector<16x256xf32>
    %102 = arith.mulf %98, %101 : vector<16x256xf32>
    %103 = arith.addf %95, %102 : vector<16x256xf32>
    %cst_44 = arith.constant 0.000000e+00 : f32
    %104 = vector.broadcast %cst_44 : f32 to vector<16x17xf32>
    %105 = vector.extract_strided_slice %31 {offsets = [0, 17], sizes = [16, 239], strides = [1, 1]} : vector<16x256xf32> to vector<16x239xf32>
    %106 = tpu.concatenate %105, %104 in 1 : vector<16x239xf32>, vector<16x17xf32> -> vector<16x256xf32>
    %107 = vector.broadcast %4 : vector<1x256xf32> to vector<16x256xf32>
    %108 = arith.mulf %106, %107 : vector<16x256xf32>
    %c8 = arith.constant 8 : index
    %c0_45 = arith.constant 0 : index
    %c0_46 = arith.constant 0 : index
    %109 = vector.load %arg8[%c8, %c0_45, %c0_46] : memref<9x16x1xf32, #tpu.memory_space<vmem>>, vector<1x16x1xf32>
    %110 = vector.shape_cast %109 : vector<1x16x1xf32> to vector<16x1xf32>
    %111 = vector.broadcast %110 : vector<16x1xf32> to vector<16x256xf32>
    %112 = arith.mulf %108, %111 : vector<16x256xf32>
    %113 = arith.addf %103, %112 : vector<16x256xf32>
    %c0_47 = arith.constant 0 : index
    %c0_48 = arith.constant 0 : index
    %114 = vector.load %arg9[%c0_47, %c0_48] : memref<16x1xf32, #tpu.memory_space<vmem>>, vector<16x1xf32>
    %115 = vector.broadcast %114 : vector<16x1xf32> to vector<16x256xf32>
    %116 = arith.addf %113, %115 : vector<16x256xf32>
    %117 = vector.extract_strided_slice %116 {offsets = [0, 0], sizes = [8, 256], strides = [1, 1]} : vector<16x256xf32> to vector<8x256xf32>
    %118 = vector.extract_strided_slice %116 {offsets = [8, 0], sizes = [8, 256], strides = [1, 1]} : vector<16x256xf32> to vector<8x256xf32>
    %119 = arith.mulf %117, %118 : vector<8x256xf32>
    %cst_49 = arith.constant dense<0.000000e+00> : vector<8xf32>
    %120 = vector.multi_reduction <add>, %119, %cst_49 [1] : vector<8x256xf32> to vector<8xf32>
    %121 = vector.shape_cast %120 : vector<8xf32> to vector<8x1xf32>
    %cst_50 = arith.constant 2.560000e+02 : f32
    %122 = vector.broadcast %cst_50 : f32 to vector<8x1xf32>
    %123 = arith.divf %121, %122 : vector<8x1xf32>
    %c0_51 = arith.constant 0 : index
    %c0_52 = arith.constant 0 : index
    %124 = vector.load %arg10[%c0_51, %c0_52] : memref<8x8xf32, #tpu.memory_space<vmem>>, vector<8x8xf32>
    %cst_53 = arith.constant dense<0.000000e+00> : vector<8x1xf32>
    %125 = tpu.matmul %124, %123, %cst_53 {dimension_numbers = #tpu.dot_dimension_numbers<[1], [0], [0], [1], [0, 0, 1, 1], [], []>} : vector<8x8xf32>, vector<8x1xf32>, vector<8x1xf32> -> vector<8x1xf32>
    %c0_54 = arith.constant 0 : index
    %c0_55 = arith.constant 0 : index
    %126 = vector.load %arg11[%c0_54, %c0_55] : memref<8x1xf32, #tpu.memory_space<vmem>>, vector<8x1xf32>
    %127 = arith.addf %125, %126 : vector<8x1xf32>
    %128 = vector.broadcast %127 : vector<8x1xf32> to vector<8x256xf32>
    %129 = arith.mulf %119, %128 : vector<8x256xf32>
    %c0_56 = arith.constant 0 : index
    %c0_57 = arith.constant 0 : index
    %130 = vector.load %arg12[%c0_56, %c0_57] : memref<8x8xf32, #tpu.memory_space<vmem>>, vector<8x8xf32>
    %cst_58 = arith.constant dense<0.000000e+00> : vector<8x256xf32>
    %131 = tpu.matmul %130, %129, %cst_58 {dimension_numbers = #tpu.dot_dimension_numbers<[1], [0], [0], [1], [0, 0, 1, 1], [], []>} : vector<8x8xf32>, vector<8x256xf32>, vector<8x256xf32> -> vector<8x256xf32>
    %c0_59 = arith.constant 0 : index
    %c0_60 = arith.constant 0 : index
    %132 = vector.load %arg13[%c0_59, %c0_60] : memref<8x1xf32, #tpu.memory_space<vmem>>, vector<8x1xf32>
    %133 = vector.broadcast %132 : vector<8x1xf32> to vector<8x256xf32>
    %134 = arith.addf %131, %133 : vector<8x256xf32>
    %c0_61 = arith.constant 0 : index
    %c0_62 = arith.constant 0 : index
    %135 = vector.load %arg14[%c0_61, %c0_62] : memref<8x1xf32, #tpu.memory_space<vmem>>, vector<8x1xf32>
    %136 = vector.broadcast %135 : vector<8x1xf32> to vector<8x256xf32>
    %137 = arith.mulf %134, %136 : vector<8x256xf32>
    %138 = arith.addf %2, %137 : vector<8x256xf32>
    %cst_63 = arith.constant dense<0.000000e+00> : vector<256xf32>
    %139 = vector.multi_reduction <add>, %138, %cst_63 [0] : vector<8x256xf32> to vector<256xf32>
    %140 = vector.shape_cast %139 : vector<256xf32> to vector<1x256xf32>
    %cst_64 = arith.constant 8.000000e+00 : f32
    %141 = vector.broadcast %cst_64 : f32 to vector<1x256xf32>
    %142 = arith.divf %140, %141 : vector<1x256xf32>
    %143 = vector.broadcast %142 : vector<1x256xf32> to vector<8x256xf32>
    %144 = arith.subf %138, %143 : vector<8x256xf32>
    %145 = arith.mulf %144, %144 : vector<8x256xf32>
    %cst_65 = arith.constant dense<0.000000e+00> : vector<256xf32>
    %146 = vector.multi_reduction <add>, %145, %cst_65 [0] : vector<8x256xf32> to vector<256xf32>
    %147 = vector.shape_cast %146 : vector<256xf32> to vector<1x256xf32>
    %cst_66 = arith.constant 8.000000e+00 : f32
    %148 = vector.broadcast %cst_66 : f32 to vector<1x256xf32>
    %149 = arith.divf %147, %148 : vector<1x256xf32>
    %cst_67 = arith.constant 9.99999997E-7 : f32
    %150 = vector.broadcast %cst_67 : f32 to vector<1x256xf32>
    %151 = arith.addf %149, %150 : vector<1x256xf32>
    %152 = math.rsqrt %151 : vector<1x256xf32>
    %153 = vector.broadcast %152 : vector<1x256xf32> to vector<8x256xf32>
    %154 = arith.mulf %144, %153 : vector<8x256xf32>
    %c0_68 = arith.constant 0 : index
    %c0_69 = arith.constant 0 : index
    %155 = vector.load %arg15[%c0_68, %c0_69] : memref<8x1xf32, #tpu.memory_space<vmem>>, vector<8x1xf32>
    %156 = vector.broadcast %155 : vector<8x1xf32> to vector<8x256xf32>
    %157 = arith.mulf %154, %156 : vector<8x256xf32>
    %c0_70 = arith.constant 0 : index
    %c0_71 = arith.constant 0 : index
    %158 = vector.load %arg16[%c0_70, %c0_71] : memref<8x1xf32, #tpu.memory_space<vmem>>, vector<8x1xf32>
    %159 = vector.broadcast %158 : vector<8x1xf32> to vector<8x256xf32>
    %160 = arith.addf %157, %159 : vector<8x256xf32>
    %c0_72 = arith.constant 0 : index
    %c0_73 = arith.constant 0 : index
    %161 = vector.load %arg17[%c0_72, %c0_73] : memref<16x8xf32, #tpu.memory_space<vmem>>, vector<16x8xf32>
    %cst_74 = arith.constant dense<0.000000e+00> : vector<16x256xf32>
    %162 = tpu.matmul %161, %160, %cst_74 {dimension_numbers = #tpu.dot_dimension_numbers<[1], [0], [0], [1], [0, 0, 1, 1], [], []>} : vector<16x8xf32>, vector<8x256xf32>, vector<16x256xf32> -> vector<16x256xf32>
    %c0_75 = arith.constant 0 : index
    %c0_76 = arith.constant 0 : index
    %163 = vector.load %arg18[%c0_75, %c0_76] : memref<16x1xf32, #tpu.memory_space<vmem>>, vector<16x1xf32>
    %164 = vector.broadcast %163 : vector<16x1xf32> to vector<16x256xf32>
    %165 = arith.addf %162, %164 : vector<16x256xf32>
    %166 = vector.extract_strided_slice %165 {offsets = [0, 0], sizes = [8, 256], strides = [1, 1]} : vector<16x256xf32> to vector<8x256xf32>
    %167 = vector.extract_strided_slice %165 {offsets = [8, 0], sizes = [8, 256], strides = [1, 1]} : vector<16x256xf32> to vector<8x256xf32>
    %168 = arith.mulf %166, %167 : vector<8x256xf32>
    %c0_77 = arith.constant 0 : index
    %c0_78 = arith.constant 0 : index
    %169 = vector.load %arg19[%c0_77, %c0_78] : memref<8x8xf32, #tpu.memory_space<vmem>>, vector<8x8xf32>
    %cst_79 = arith.constant dense<0.000000e+00> : vector<8x256xf32>
    %170 = tpu.matmul %169, %168, %cst_79 {dimension_numbers = #tpu.dot_dimension_numbers<[1], [0], [0], [1], [0, 0, 1, 1], [], []>} : vector<8x8xf32>, vector<8x256xf32>, vector<8x256xf32> -> vector<8x256xf32>
    %c0_80 = arith.constant 0 : index
    %c0_81 = arith.constant 0 : index
    %171 = vector.load %arg20[%c0_80, %c0_81] : memref<8x1xf32, #tpu.memory_space<vmem>>, vector<8x1xf32>
    %172 = vector.broadcast %171 : vector<8x1xf32> to vector<8x256xf32>
    %173 = arith.addf %170, %172 : vector<8x256xf32>
    %c0_82 = arith.constant 0 : index
    %c0_83 = arith.constant 0 : index
    %174 = vector.load %arg21[%c0_82, %c0_83] : memref<8x1xf32, #tpu.memory_space<vmem>>, vector<8x1xf32>
    %175 = vector.broadcast %174 : vector<8x1xf32> to vector<8x256xf32>
    %176 = arith.mulf %173, %175 : vector<8x256xf32>
    %177 = arith.addf %138, %176 : vector<8x256xf32>
    %178 = arith.truncf %177 : vector<8x256xf32> to vector<8x256xbf16>
    %c0_84 = arith.constant 0 : index
    %c0_85 = arith.constant 0 : index
    %c0_86 = arith.constant 0 : index
    %179 = vector.load %arg22[%c0_84, %c0_85, %c0_86] : memref<1x8x256xbf16, #tpu.memory_space<vmem>>, vector<1x8x256xbf16>
    %180 = vector.shape_cast %179 : vector<1x8x256xbf16> to vector<8x256xbf16>
    %181 = vector.shape_cast %178 : vector<8x256xbf16> to vector<1x8x256xbf16>
    tpu.vector_store %arg22[%c0_84, %c0_85, %c0_86], %181 {strides = array<i32>} : memref<1x8x256xbf16, #tpu.memory_space<vmem>>, vector<1x8x256xbf16>,
    return
  }
  func.func @transform_0(%arg0: i32) -> (i32, i32, i32) {
    %c0_i32 = arith.constant 0 : i32
    %c0_i32_0 = arith.constant 0 : i32
    %c0_i32_1 = arith.constant 0 : i32
    return %arg0, %c0_i32, %c0_i32_0 : i32, i32, i32
  }
  func.func @transform_1(%arg0: i32) -> (i32, i32) {
    %c0_i32 = arith.constant 0 : i32
    %c0_i32_0 = arith.constant 0 : i32
    %c0_i32_1 = arith.constant 0 : i32
    return %c0_i32, %c0_i32_0 : i32, i32
  }
  func.func @transform_2(%arg0: i32) -> (i32, i32) {
    %c0_i32 = arith.constant 0 : i32
    %c0_i32_0 = arith.constant 0 : i32
    %c0_i32_1 = arith.constant 0 : i32
    return %c0_i32, %c0_i32_0 : i32, i32
  }
  func.func @transform_3(%arg0: i32) -> (i32, i32) {
    %c0_i32 = arith.constant 0 : i32
    %c0_i32_0 = arith.constant 0 : i32
    %c0_i32_1 = arith.constant 0 : i32
    return %c0_i32, %c0_i32_0 : i32, i32
  }
  func.func @transform_4(%arg0: i32) -> (i32, i32) {
    %c0_i32 = arith.constant 0 : i32
    %c0_i32_0 = arith.constant 0 : i32
    %c0_i32_1 = arith.constant 0 : i32
    return %c0_i32, %c0_i32_0 : i32, i32
  }
  func.func @transform_5(%arg0: i32) -> (i32, i32) {
    %c0_i32 = arith.constant 0 : i32
    %c0_i32_0 = arith.constant 0 : i32
    %c0_i32_1 = arith.constant 0 : i32
    return %c0_i32, %c0_i32_0 : i32, i32
  }
  func.func @transform_6(%arg0: i32) -> (i32, i32) {
    %c0_i32 = arith.constant 0 : i32
    %c0_i32_0 = arith.constant 0 : i32
    %c0_i32_1 = arith.constant 0 : i32
    return %c0_i32, %c0_i32_0 : i32, i32
  }
  func.func @transform_7(%arg0: i32) -> (i32, i32, i32) {
    %c0_i32 = arith.constant 0 : i32
    %c0_i32_0 = arith.constant 0 : i32
    %c0_i32_1 = arith.constant 0 : i32
    %c0_i32_2 = arith.constant 0 : i32
    return %c0_i32, %c0_i32_0, %c0_i32_1 : i32, i32, i32
  }
  func.func @transform_8(%arg0: i32) -> (i32, i32) {
    %c0_i32 = arith.constant 0 : i32
    %c0_i32_0 = arith.constant 0 : i32
    %c0_i32_1 = arith.constant 0 : i32
    return %c0_i32, %c0_i32_0 : i32, i32
  }
  func.func @transform_9(%arg0: i32) -> (i32, i32) {
    %c0_i32 = arith.constant 0 : i32
    %c0_i32_0 = arith.constant 0 : i32
    %c0_i32_1 = arith.constant 0 : i32
    return %c0_i32, %c0_i32_0 : i32, i32
  }
  func.func @transform_10(%arg0: i32) -> (i32, i32) {
    %c0_i32 = arith.constant 0 : i32
    %c0_i32_0 = arith.constant 0 : i32
    %c0_i32_1 = arith.constant 0 : i32
    return %c0_i32, %c0_i32_0 : i32, i32
  }
  func.func @transform_11(%arg0: i32) -> (i32, i32) {
    %c0_i32 = arith.constant 0 : i32
    %c0_i32_0 = arith.constant 0 : i32
    %c0_i32_1 = arith.constant 0 : i32
    return %c0_i32, %c0_i32_0 : i32, i32
  }
  func.func @transform_12(%arg0: i32) -> (i32, i32) {
    %c0_i32 = arith.constant 0 : i32
    %c0_i32_0 = arith.constant 0 : i32
    %c0_i32_1 = arith.constant 0 : i32
    return %c0_i32, %c0_i32_0 : i32, i32
  }
  func.func @transform_13(%arg0: i32) -> (i32, i32) {
    %c0_i32 = arith.constant 0 : i32
    %c0_i32_0 = arith.constant 0 : i32
    %c0_i32_1 = arith.constant 0 : i32
    return %c0_i32, %c0_i32_0 : i32, i32
  }
  func.func @transform_14(%arg0: i32) -> (i32, i32) {
    %c0_i32 = arith.constant 0 : i32
    %c0_i32_0 = arith.constant 0 : i32
    %c0_i32_1 = arith.constant 0 : i32
    return %c0_i32, %c0_i32_0 : i32, i32
  }
  func.func @transform_15(%arg0: i32) -> (i32, i32) {
    %c0_i32 = arith.constant 0 : i32
    %c0_i32_0 = arith.constant 0 : i32
    %c0_i32_1 = arith.constant 0 : i32
    return %c0_i32, %c0_i32_0 : i32, i32
  }
  func.func @transform_16(%arg0: i32) -> (i32, i32) {
    %c0_i32 = arith.constant 0 : i32
    %c0_i32_0 = arith.constant 0 : i32
    %c0_i32_1 = arith.constant 0 : i32
    return %c0_i32, %c0_i32_0 : i32, i32
  }
  func.func @transform_17(%arg0: i32) -> (i32, i32) {
    %c0_i32 = arith.constant 0 : i32
    %c0_i32_0 = arith.constant 0 : i32
    %c0_i32_1 = arith.constant 0 : i32
    return %c0_i32, %c0_i32_0 : i32, i32
  }
  func.func @transform_18(%arg0: i32) -> (i32, i32) {
    %c0_i32 = arith.constant 0 : i32
    %c0_i32_0 = arith.constant 0 : i32
    %c0_i32_1 = arith.constant 0 : i32
    return %c0_i32, %c0_i32_0 : i32, i32
  }
  func.func @transform_19(%arg0: i32) -> (i32, i32) {
    %c0_i32 = arith.constant 0 : i32
    %c0_i32_0 = arith.constant 0 : i32
    %c0_i32_1 = arith.constant 0 : i32
    return %c0_i32, %c0_i32_0 : i32, i32
  }
  func.func @transform_20(%arg0: i32) -> (i32, i32) {
    %c0_i32 = arith.constant 0 : i32
    %c0_i32_0 = arith.constant 0 : i32
    %c0_i32_1 = arith.constant 0 : i32
    return %c0_i32, %c0_i32_0 : i32, i32
  }
  func.func @transform_21(%arg0: i32) -> (i32, i32, i32) {
    %c0_i32 = arith.constant 0 : i32
    %c0_i32_0 = arith.constant 0 : i32
    %c0_i32_1 = arith.constant 0 : i32
    return %arg0, %c0_i32, %c0_i32_0 : i32, i32, i32
  }
}

module attributes {stable_mosaic.version = 11 : i64} {
  func.func @_matmul_bias_kernel(%arg0: i32, %arg1: memref<1x32x64xbf16, #tpu.memory_space<vmem>>, %arg2: memref<16x32xf32, #tpu.memory_space<vmem>>, %arg3: memref<16x1xf32, #tpu.memory_space<vmem>>, %arg4: memref<1x16x64xbf16, #tpu.memory_space<vmem>>) attributes {dimension_semantics = [#tpu.dimension_semantics<parallel>], iteration_bounds = array<i64: 2>, scalar_prefetch = 0 : i64, scratch_operands = 0 : i64, tpu.core_type = #tpu.core_type<tc>, window_params = [{transform_indices = @transform_0, window_bounds = array<i64: 1, 32, 64>}, {pipeline_mode = #tpu.pipeline_mode<synchronous>, transform_indices = @transform_1, window_bounds = array<i64: 16, 32>}, {pipeline_mode = #tpu.pipeline_mode<synchronous>, transform_indices = @transform_2, window_bounds = array<i64: 16, 1>}, {transform_indices = @transform_3, window_bounds = array<i64: 1, 16, 64>}]} {
    %c0 = arith.constant 0 : index
    %c0_0 = arith.constant 0 : index
    %0 = vector.load %arg2[%c0, %c0_0] : memref<16x32xf32, #tpu.memory_space<vmem>>, vector<16x32xf32>
    %c0_1 = arith.constant 0 : index
    %c0_2 = arith.constant 0 : index
    %c0_3 = arith.constant 0 : index
    %1 = vector.load %arg1[%c0_1, %c0_2, %c0_3] : memref<1x32x64xbf16, #tpu.memory_space<vmem>>, vector<1x32x64xbf16>
    %2 = vector.shape_cast %1 : vector<1x32x64xbf16> to vector<32x64xbf16>
    %3 = arith.extf %2 : vector<32x64xbf16> to vector<32x64xf32>
    %cst = arith.constant dense<0.000000e+00> : vector<16x64xf32>
    %4 = tpu.matmul %0, %3, %cst {dimension_numbers = #tpu.dot_dimension_numbers<[1], [0], [0], [1], [0, 0, 1, 1], [], []>} : vector<16x32xf32>, vector<32x64xf32>, vector<16x64xf32> -> vector<16x64xf32>
    %c0_4 = arith.constant 0 : index
    %c0_5 = arith.constant 0 : index
    %5 = vector.load %arg3[%c0_4, %c0_5] : memref<16x1xf32, #tpu.memory_space<vmem>>, vector<16x1xf32>
    %6 = vector.broadcast %5 : vector<16x1xf32> to vector<16x64xf32>
    %7 = arith.addf %4, %6 : vector<16x64xf32>
    %8 = arith.truncf %7 : vector<16x64xf32> to vector<16x64xbf16>
    %c0_6 = arith.constant 0 : index
    %c0_7 = arith.constant 0 : index
    %c0_8 = arith.constant 0 : index
    %9 = vector.load %arg4[%c0_6, %c0_7, %c0_8] : memref<1x16x64xbf16, #tpu.memory_space<vmem>>, vector<1x16x64xbf16>
    %10 = vector.shape_cast %9 : vector<1x16x64xbf16> to vector<16x64xbf16>
    %11 = vector.shape_cast %8 : vector<16x64xbf16> to vector<1x16x64xbf16>
    tpu.vector_store %arg4[%c0_6, %c0_7, %c0_8], %11 {strides = array<i32>} : memref<1x16x64xbf16, #tpu.memory_space<vmem>>, vector<1x16x64xbf16>,
    return
  }
  func.func @transform_0(%arg0: i32) -> (i32, i32, i32) {
    %c0_i32 = arith.constant 0 : i32
    %c0_i32_0 = arith.constant 0 : i32
    %c0_i32_1 = arith.constant 0 : i32
    return %arg0, %c0_i32, %c0_i32_0 : i32, i32, i32
  }
  func.func @transform_1(%arg0: i32) -> (i32, i32) {
    %c0_i32 = arith.constant 0 : i32
    %c0_i32_0 = arith.constant 0 : i32
    %c0_i32_1 = arith.constant 0 : i32
    return %c0_i32, %c0_i32_0 : i32, i32
  }
  func.func @transform_2(%arg0: i32) -> (i32, i32) {
    %c0_i32 = arith.constant 0 : i32
    %c0_i32_0 = arith.constant 0 : i32
    %c0_i32_1 = arith.constant 0 : i32
    return %c0_i32, %c0_i32_0 : i32, i32
  }
  func.func @transform_3(%arg0: i32) -> (i32, i32, i32) {
    %c0_i32 = arith.constant 0 : i32
    %c0_i32_0 = arith.constant 0 : i32
    %c0_i32_1 = arith.constant 0 : i32
    return %arg0, %c0_i32, %c0_i32_0 : i32, i32, i32
  }
}

module attributes {stable_mosaic.version = 11 : i64} {
  func.func @_naf_block_kernel(%arg0: i32, %arg1: memref<1x16x64xbf16, #tpu.memory_space<vmem>>, %arg2: memref<1x64xf32, #tpu.memory_space<vmem>>, %arg3: memref<1x64xf32, #tpu.memory_space<vmem>>, %arg4: memref<16x1xf32, #tpu.memory_space<vmem>>, %arg5: memref<16x1xf32, #tpu.memory_space<vmem>>, %arg6: memref<32x16xf32, #tpu.memory_space<vmem>>, %arg7: memref<32x1xf32, #tpu.memory_space<vmem>>, %arg8: memref<9x32x1xf32, #tpu.memory_space<vmem>>, %arg9: memref<32x1xf32, #tpu.memory_space<vmem>>, %arg10: memref<16x16xf32, #tpu.memory_space<vmem>>, %arg11: memref<16x1xf32, #tpu.memory_space<vmem>>, %arg12: memref<16x16xf32, #tpu.memory_space<vmem>>, %arg13: memref<16x1xf32, #tpu.memory_space<vmem>>, %arg14: memref<16x1xf32, #tpu.memory_space<vmem>>, %arg15: memref<16x1xf32, #tpu.memory_space<vmem>>, %arg16: memref<16x1xf32, #tpu.memory_space<vmem>>, %arg17: memref<32x16xf32, #tpu.memory_space<vmem>>, %arg18: memref<32x1xf32, #tpu.memory_space<vmem>>, %arg19: memref<16x16xf32, #tpu.memory_space<vmem>>, %arg20: memref<16x1xf32, #tpu.memory_space<vmem>>, %arg21: memref<16x1xf32, #tpu.memory_space<vmem>>, %arg22: memref<1x16x64xbf16, #tpu.memory_space<vmem>>) attributes {dimension_semantics = [#tpu.dimension_semantics<parallel>], iteration_bounds = array<i64: 2>, scalar_prefetch = 0 : i64, scratch_operands = 0 : i64, tpu.core_type = #tpu.core_type<tc>, window_params = [{transform_indices = @transform_0, window_bounds = array<i64: 1, 16, 64>}, {pipeline_mode = #tpu.pipeline_mode<synchronous>, transform_indices = @transform_1, window_bounds = array<i64: 1, 64>}, {pipeline_mode = #tpu.pipeline_mode<synchronous>, transform_indices = @transform_2, window_bounds = array<i64: 1, 64>}, {pipeline_mode = #tpu.pipeline_mode<synchronous>, transform_indices = @transform_3, window_bounds = array<i64: 16, 1>}, {pipeline_mode = #tpu.pipeline_mode<synchronous>, transform_indices = @transform_4, window_bounds = array<i64: 16, 1>}, {pipeline_mode = #tpu.pipeline_mode<synchronous>, transform_indices = @transform_5, window_bounds = array<i64: 32, 16>}, {pipeline_mode = #tpu.pipeline_mode<synchronous>, transform_indices = @transform_6, window_bounds = array<i64: 32, 1>}, {pipeline_mode = #tpu.pipeline_mode<synchronous>, transform_indices = @transform_7, window_bounds = array<i64: 9, 32, 1>}, {pipeline_mode = #tpu.pipeline_mode<synchronous>, transform_indices = @transform_8, window_bounds = array<i64: 32, 1>}, {pipeline_mode = #tpu.pipeline_mode<synchronous>, transform_indices = @transform_9, window_bounds = array<i64: 16, 16>}, {pipeline_mode = #tpu.pipeline_mode<synchronous>, transform_indices = @transform_10, window_bounds = array<i64: 16, 1>}, {pipeline_mode = #tpu.pipeline_mode<synchronous>, transform_indices = @transform_11, window_bounds = array<i64: 16, 16>}, {pipeline_mode = #tpu.pipeline_mode<synchronous>, transform_indices = @transform_12, window_bounds = array<i64: 16, 1>}, {pipeline_mode = #tpu.pipeline_mode<synchronous>, transform_indices = @transform_13, window_bounds = array<i64: 16, 1>}, {pipeline_mode = #tpu.pipeline_mode<synchronous>, transform_indices = @transform_14, window_bounds = array<i64: 16, 1>}, {pipeline_mode = #tpu.pipeline_mode<synchronous>, transform_indices = @transform_15, window_bounds = array<i64: 16, 1>}, {pipeline_mode = #tpu.pipeline_mode<synchronous>, transform_indices = @transform_16, window_bounds = array<i64: 32, 16>}, {pipeline_mode = #tpu.pipeline_mode<synchronous>, transform_indices = @transform_17, window_bounds = array<i64: 32, 1>}, {pipeline_mode = #tpu.pipeline_mode<synchronous>, transform_indices = @transform_18, window_bounds = array<i64: 16, 16>}, {pipeline_mode = #tpu.pipeline_mode<synchronous>, transform_indices = @transform_19, window_bounds = array<i64: 16, 1>}, {pipeline_mode = #tpu.pipeline_mode<synchronous>, transform_indices = @transform_20, window_bounds = array<i64: 16, 1>}, {transform_indices = @transform_21, window_bounds = array<i64: 1, 16, 64>}]} {
    %c0 = arith.constant 0 : index
    %c0_0 = arith.constant 0 : index
    %c0_1 = arith.constant 0 : index
    %0 = vector.load %arg1[%c0, %c0_0, %c0_1] : memref<1x16x64xbf16, #tpu.memory_space<vmem>>, vector<1x16x64xbf16>
    %1 = vector.shape_cast %0 : vector<1x16x64xbf16> to vector<16x64xbf16>
    %2 = arith.extf %1 : vector<16x64xbf16> to vector<16x64xf32>
    %c0_2 = arith.constant 0 : index
    %c0_3 = arith.constant 0 : index
    %3 = vector.load %arg2[%c0_2, %c0_3] : memref<1x64xf32, #tpu.memory_space<vmem>>, vector<1x64xf32>
    %c0_4 = arith.constant 0 : index
    %c0_5 = arith.constant 0 : index
    %4 = vector.load %arg3[%c0_4, %c0_5] : memref<1x64xf32, #tpu.memory_space<vmem>>, vector<1x64xf32>
    %cst = arith.constant dense<0.000000e+00> : vector<64xf32>
    %5 = vector.multi_reduction <add>, %2, %cst [0] : vector<16x64xf32> to vector<64xf32>
    %6 = vector.shape_cast %5 : vector<64xf32> to vector<1x64xf32>
    %cst_6 = arith.constant 1.600000e+01 : f32
    %7 = vector.broadcast %cst_6 : f32 to vector<1x64xf32>
    %8 = arith.divf %6, %7 : vector<1x64xf32>
    %9 = vector.broadcast %8 : vector<1x64xf32> to vector<16x64xf32>
    %10 = arith.subf %2, %9 : vector<16x64xf32>
    %11 = arith.mulf %10, %10 : vector<16x64xf32>
    %cst_7 = arith.constant dense<0.000000e+00> : vector<64xf32>
    %12 = vector.multi_reduction <add>, %11, %cst_7 [0] : vector<16x64xf32> to vector<64xf32>
    %13 = vector.shape_cast %12 : vector<64xf32> to vector<1x64xf32>
    %cst_8 = arith.constant 1.600000e+01 : f32
    %14 = vector.broadcast %cst_8 : f32 to vector<1x64xf32>
    %15 = arith.divf %13, %14 : vector<1x64xf32>
    %cst_9 = arith.constant 9.99999997E-7 : f32
    %16 = vector.broadcast %cst_9 : f32 to vector<1x64xf32>
    %17 = arith.addf %15, %16 : vector<1x64xf32>
    %18 = math.rsqrt %17 : vector<1x64xf32>
    %19 = vector.broadcast %18 : vector<1x64xf32> to vector<16x64xf32>
    %20 = arith.mulf %10, %19 : vector<16x64xf32>
    %c0_10 = arith.constant 0 : index
    %c0_11 = arith.constant 0 : index
    %21 = vector.load %arg4[%c0_10, %c0_11] : memref<16x1xf32, #tpu.memory_space<vmem>>, vector<16x1xf32>
    %22 = vector.broadcast %21 : vector<16x1xf32> to vector<16x64xf32>
    %23 = arith.mulf %20, %22 : vector<16x64xf32>
    %c0_12 = arith.constant 0 : index
    %c0_13 = arith.constant 0 : index
    %24 = vector.load %arg5[%c0_12, %c0_13] : memref<16x1xf32, #tpu.memory_space<vmem>>, vector<16x1xf32>
    %25 = vector.broadcast %24 : vector<16x1xf32> to vector<16x64xf32>
    %26 = arith.addf %23, %25 : vector<16x64xf32>
    %c0_14 = arith.constant 0 : index
    %c0_15 = arith.constant 0 : index
    %27 = vector.load %arg6[%c0_14, %c0_15] : memref<32x16xf32, #tpu.memory_space<vmem>>, vector<32x16xf32>
    %cst_16 = arith.constant dense<0.000000e+00> : vector<32x64xf32>
    %28 = tpu.matmul %27, %26, %cst_16 {dimension_numbers = #tpu.dot_dimension_numbers<[1], [0], [0], [1], [0, 0, 1, 1], [], []>} : vector<32x16xf32>, vector<16x64xf32>, vector<32x64xf32> -> vector<32x64xf32>
    %c0_17 = arith.constant 0 : index
    %c0_18 = arith.constant 0 : index
    %29 = vector.load %arg7[%c0_17, %c0_18] : memref<32x1xf32, #tpu.memory_space<vmem>>, vector<32x1xf32>
    %30 = vector.broadcast %29 : vector<32x1xf32> to vector<32x64xf32>
    %31 = arith.addf %28, %30 : vector<32x64xf32>
    %cst_19 = arith.constant 0.000000e+00 : f32
    %32 = vector.broadcast %cst_19 : f32 to vector<32x64xf32>
    %cst_20 = arith.constant 0.000000e+00 : f32
    %33 = vector.broadcast %cst_20 : f32 to vector<32x9xf32>
    %34 = vector.extract_strided_slice %31 {offsets = [0, 0], sizes = [32, 55], strides = [1, 1]} : vector<32x64xf32> to vector<32x55xf32>
    %35 = tpu.concatenate %33, %34 in 1 : vector<32x9xf32>, vector<32x55xf32> -> vector<32x64xf32>
    %36 = vector.broadcast %3 : vector<1x64xf32> to vector<32x64xf32>
    %37 = arith.mulf %35, %36 : vector<32x64xf32>
    %c0_21 = arith.constant 0 : index
    %c0_22 = arith.constant 0 : index
    %c0_23 = arith.constant 0 : index
    %38 = vector.load %arg8[%c0_21, %c0_22, %c0_23] : memref<9x32x1xf32, #tpu.memory_space<vmem>>, vector<1x32x1xf32>
    %39 = vector.shape_cast %38 : vector<1x32x1xf32> to vector<32x1xf32>
    %40 = vector.broadcast %39 : vector<32x1xf32> to vector<32x64xf32>
    %41 = arith.mulf %37, %40 : vector<32x64xf32>
    %42 = arith.addf %32, %41 : vector<32x64xf32>
    %cst_24 = arith.constant 0.000000e+00 : f32
    %43 = vector.broadcast %cst_24 : f32 to vector<32x8xf32>
    %44 = vector.extract_strided_slice %31 {offsets = [0, 0], sizes = [32, 56], strides = [1, 1]} : vector<32x64xf32> to vector<32x56xf32>
    %45 = tpu.concatenate %43, %44 in 1 : vector<32x8xf32>, vector<32x56xf32> -> vector<32x64xf32>
    %c1 = arith.constant 1 : index
    %c0_25 = arith.constant 0 : index
    %c0_26 = arith.constant 0 : index
    %46 = vector.load %arg8[%c1, %c0_25, %c0_26] : memref<9x32x1xf32, #tpu.memory_space<vmem>>, vector<1x32x1xf32>
    %47 = vector.shape_cast %46 : vector<1x32x1xf32> to vector<32x1xf32>
    %48 = vector.broadcast %47 : vector<32x1xf32> to vector<32x64xf32>
    %49 = arith.mulf %45, %48 : vector<32x64xf32>
    %50 = arith.addf %42, %49 : vector<32x64xf32>
    %cst_27 = arith.constant 0.000000e+00 : f32
    %51 = vector.broadcast %cst_27 : f32 to vector<32x7xf32>
    %52 = vector.extract_strided_slice %31 {offsets = [0, 0], sizes = [32, 57], strides = [1, 1]} : vector<32x64xf32> to vector<32x57xf32>
    %53 = tpu.concatenate %51, %52 in 1 : vector<32x7xf32>, vector<32x57xf32> -> vector<32x64xf32>
    %54 = vector.broadcast %4 : vector<1x64xf32> to vector<32x64xf32>
    %55 = arith.mulf %53, %54 : vector<32x64xf32>
    %c2 = arith.constant 2 : index
    %c0_28 = arith.constant 0 : index
    %c0_29 = arith.constant 0 : index
    %56 = vector.load %arg8[%c2, %c0_28, %c0_29] : memref<9x32x1xf32, #tpu.memory_space<vmem>>, vector<1x32x1xf32>
    %57 = vector.shape_cast %56 : vector<1x32x1xf32> to vector<32x1xf32>
    %58 = vector.broadcast %57 : vector<32x1xf32> to vector<32x64xf32>
    %59 = arith.mulf %55, %58 : vector<32x64xf32>
    %60 = arith.addf %50, %59 : vector<32x64xf32>
    %cst_30 = arith.constant 0.000000e+00 : f32
    %61 = vector.broadcast %cst_30 : f32 to vector<32x1xf32>
    %62 = vector.extract_strided_slice %31 {offsets = [0, 0], sizes = [32, 63], strides = [1, 1]} : vector<32x64xf32> to vector<32x63xf32>
    %63 = tpu.concatenate %61, %62 in 1 : vector<32x1xf32>, vector<32x63xf32> -> vector<32x64xf32>
    %64 = vector.broadcast %3 : vector<1x64xf32> to vector<32x64xf32>
    %65 = arith.mulf %63, %64 : vector<32x64xf32>
    %c3 = arith.constant 3 : index
    %c0_31 = arith.constant 0 : index
    %c0_32 = arith.constant 0 : index
    %66 = vector.load %arg8[%c3, %c0_31, %c0_32] : memref<9x32x1xf32, #tpu.memory_space<vmem>>, vector<1x32x1xf32>
    %67 = vector.shape_cast %66 : vector<1x32x1xf32> to vector<32x1xf32>
    %68 = vector.broadcast %67 : vector<32x1xf32> to vector<32x64xf32>
    %69 = arith.mulf %65, %68 : vector<32x64xf32>
    %70 = arith.addf %60, %69 : vector<32x64xf32>
    %c4 = arith.constant 4 : index
    %c0_33 = arith.constant 0 : index
    %c0_34 = arith.constant 0 : index
    %71 = vector.load %arg8[%c4, %c0_33, %c0_34] : memref<9x32x1xf32, #tpu.memory_space<vmem>>, vector<1x32x1xf32>
    %72 = vector.shape_cast %71 : vector<1x32x1xf32> to vector<32x1xf32>
    %73 = vector.broadcast %72 : vector<32x1xf32> to vector<32x64xf32>
    %74 = arith.mulf %31, %73 : vector<32x64xf32>
    %75 = arith.addf %70, %74 : vector<32x64xf32>
    %cst_35 = arith.constant 0.000000e+00 : f32
    %76 = vector.broadcast %cst_35 : f32 to vector<32x1xf32>
    %77 = vector.extract_strided_slice %31 {offsets = [0, 1], sizes = [32, 63], strides = [1, 1]} : vector<32x64xf32> to vector<32x63xf32>
    %78 = tpu.concatenate %77, %76 in 1 : vector<32x63xf32>, vector<32x1xf32> -> vector<32x64xf32>
    %79 = vector.broadcast %4 : vector<1x64xf32> to vector<32x64xf32>
    %80 = arith.mulf %78, %79 : vector<32x64xf32>
    %c5 = arith.constant 5 : index
    %c0_36 = arith.constant 0 : index
    %c0_37 = arith.constant 0 : index
    %81 = vector.load %arg8[%c5, %c0_36, %c0_37] : memref<9x32x1xf32, #tpu.memory_space<vmem>>, vector<1x32x1xf32>
    %82 = vector.shape_cast %81 : vector<1x32x1xf32> to vector<32x1xf32>
    %83 = vector.broadcast %82 : vector<32x1xf32> to vector<32x64xf32>
    %84 = arith.mulf %80, %83 : vector<32x64xf32>
    %85 = arith.addf %75, %84 : vector<32x64xf32>
    %cst_38 = arith.constant 0.000000e+00 : f32
    %86 = vector.broadcast %cst_38 : f32 to vector<32x7xf32>
    %87 = vector.extract_strided_slice %31 {offsets = [0, 7], sizes = [32, 57], strides = [1, 1]} : vector<32x64xf32> to vector<32x57xf32>
    %88 = tpu.concatenate %87, %86 in 1 : vector<32x57xf32>, vector<32x7xf32> -> vector<32x64xf32>
    %89 = vector.broadcast %3 : vector<1x64xf32> to vector<32x64xf32>
    %90 = arith.mulf %88, %89 : vector<32x64xf32>
    %c6 = arith.constant 6 : index
    %c0_39 = arith.constant 0 : index
    %c0_40 = arith.constant 0 : index
    %91 = vector.load %arg8[%c6, %c0_39, %c0_40] : memref<9x32x1xf32, #tpu.memory_space<vmem>>, vector<1x32x1xf32>
    %92 = vector.shape_cast %91 : vector<1x32x1xf32> to vector<32x1xf32>
    %93 = vector.broadcast %92 : vector<32x1xf32> to vector<32x64xf32>
    %94 = arith.mulf %90, %93 : vector<32x64xf32>
    %95 = arith.addf %85, %94 : vector<32x64xf32>
    %cst_41 = arith.constant 0.000000e+00 : f32
    %96 = vector.broadcast %cst_41 : f32 to vector<32x8xf32>
    %97 = vector.extract_strided_slice %31 {offsets = [0, 8], sizes = [32, 56], strides = [1, 1]} : vector<32x64xf32> to vector<32x56xf32>
    %98 = tpu.concatenate %97, %96 in 1 : vector<32x56xf32>, vector<32x8xf32> -> vector<32x64xf32>
    %c7 = arith.constant 7 : index
    %c0_42 = arith.constant 0 : index
    %c0_43 = arith.constant 0 : index
    %99 = vector.load %arg8[%c7, %c0_42, %c0_43] : memref<9x32x1xf32, #tpu.memory_space<vmem>>, vector<1x32x1xf32>
    %100 = vector.shape_cast %99 : vector<1x32x1xf32> to vector<32x1xf32>
    %101 = vector.broadcast %100 : vector<32x1xf32> to vector<32x64xf32>
    %102 = arith.mulf %98, %101 : vector<32x64xf32>
    %103 = arith.addf %95, %102 : vector<32x64xf32>
    %cst_44 = arith.constant 0.000000e+00 : f32
    %104 = vector.broadcast %cst_44 : f32 to vector<32x9xf32>
    %105 = vector.extract_strided_slice %31 {offsets = [0, 9], sizes = [32, 55], strides = [1, 1]} : vector<32x64xf32> to vector<32x55xf32>
    %106 = tpu.concatenate %105, %104 in 1 : vector<32x55xf32>, vector<32x9xf32> -> vector<32x64xf32>
    %107 = vector.broadcast %4 : vector<1x64xf32> to vector<32x64xf32>
    %108 = arith.mulf %106, %107 : vector<32x64xf32>
    %c8 = arith.constant 8 : index
    %c0_45 = arith.constant 0 : index
    %c0_46 = arith.constant 0 : index
    %109 = vector.load %arg8[%c8, %c0_45, %c0_46] : memref<9x32x1xf32, #tpu.memory_space<vmem>>, vector<1x32x1xf32>
    %110 = vector.shape_cast %109 : vector<1x32x1xf32> to vector<32x1xf32>
    %111 = vector.broadcast %110 : vector<32x1xf32> to vector<32x64xf32>
    %112 = arith.mulf %108, %111 : vector<32x64xf32>
    %113 = arith.addf %103, %112 : vector<32x64xf32>
    %c0_47 = arith.constant 0 : index
    %c0_48 = arith.constant 0 : index
    %114 = vector.load %arg9[%c0_47, %c0_48] : memref<32x1xf32, #tpu.memory_space<vmem>>, vector<32x1xf32>
    %115 = vector.broadcast %114 : vector<32x1xf32> to vector<32x64xf32>
    %116 = arith.addf %113, %115 : vector<32x64xf32>
    %117 = vector.extract_strided_slice %116 {offsets = [0, 0], sizes = [16, 64], strides = [1, 1]} : vector<32x64xf32> to vector<16x64xf32>
    %118 = vector.extract_strided_slice %116 {offsets = [16, 0], sizes = [16, 64], strides = [1, 1]} : vector<32x64xf32> to vector<16x64xf32>
    %119 = arith.mulf %117, %118 : vector<16x64xf32>
    %cst_49 = arith.constant dense<0.000000e+00> : vector<16xf32>
    %120 = vector.multi_reduction <add>, %119, %cst_49 [1] : vector<16x64xf32> to vector<16xf32>
    %121 = vector.shape_cast %120 : vector<16xf32> to vector<16x1xf32>
    %cst_50 = arith.constant 6.400000e+01 : f32
    %122 = vector.broadcast %cst_50 : f32 to vector<16x1xf32>
    %123 = arith.divf %121, %122 : vector<16x1xf32>
    %c0_51 = arith.constant 0 : index
    %c0_52 = arith.constant 0 : index
    %124 = vector.load %arg10[%c0_51, %c0_52] : memref<16x16xf32, #tpu.memory_space<vmem>>, vector<16x16xf32>
    %cst_53 = arith.constant dense<0.000000e+00> : vector<16x1xf32>
    %125 = tpu.matmul %124, %123, %cst_53 {dimension_numbers = #tpu.dot_dimension_numbers<[1], [0], [0], [1], [0, 0, 1, 1], [], []>} : vector<16x16xf32>, vector<16x1xf32>, vector<16x1xf32> -> vector<16x1xf32>
    %c0_54 = arith.constant 0 : index
    %c0_55 = arith.constant 0 : index
    %126 = vector.load %arg11[%c0_54, %c0_55] : memref<16x1xf32, #tpu.memory_space<vmem>>, vector<16x1xf32>
    %127 = arith.addf %125, %126 : vector<16x1xf32>
    %128 = vector.broadcast %127 : vector<16x1xf32> to vector<16x64xf32>
    %129 = arith.mulf %119, %128 : vector<16x64xf32>
    %c0_56 = arith.constant 0 : index
    %c0_57 = arith.constant 0 : index
    %130 = vector.load %arg12[%c0_56, %c0_57] : memref<16x16xf32, #tpu.memory_space<vmem>>, vector<16x16xf32>
    %cst_58 = arith.constant dense<0.000000e+00> : vector<16x64xf32>
    %131 = tpu.matmul %130, %129, %cst_58 {dimension_numbers = #tpu.dot_dimension_numbers<[1], [0], [0], [1], [0, 0, 1, 1], [], []>} : vector<16x16xf32>, vector<16x64xf32>, vector<16x64xf32> -> vector<16x64xf32>
    %c0_59 = arith.constant 0 : index
    %c0_60 = arith.constant 0 : index
    %132 = vector.load %arg13[%c0_59, %c0_60] : memref<16x1xf32, #tpu.memory_space<vmem>>, vector<16x1xf32>
    %133 = vector.broadcast %132 : vector<16x1xf32> to vector<16x64xf32>
    %134 = arith.addf %131, %133 : vector<16x64xf32>
    %c0_61 = arith.constant 0 : index
    %c0_62 = arith.constant 0 : index
    %135 = vector.load %arg14[%c0_61, %c0_62] : memref<16x1xf32, #tpu.memory_space<vmem>>, vector<16x1xf32>
    %136 = vector.broadcast %135 : vector<16x1xf32> to vector<16x64xf32>
    %137 = arith.mulf %134, %136 : vector<16x64xf32>
    %138 = arith.addf %2, %137 : vector<16x64xf32>
    %cst_63 = arith.constant dense<0.000000e+00> : vector<64xf32>
    %139 = vector.multi_reduction <add>, %138, %cst_63 [0] : vector<16x64xf32> to vector<64xf32>
    %140 = vector.shape_cast %139 : vector<64xf32> to vector<1x64xf32>
    %cst_64 = arith.constant 1.600000e+01 : f32
    %141 = vector.broadcast %cst_64 : f32 to vector<1x64xf32>
    %142 = arith.divf %140, %141 : vector<1x64xf32>
    %143 = vector.broadcast %142 : vector<1x64xf32> to vector<16x64xf32>
    %144 = arith.subf %138, %143 : vector<16x64xf32>
    %145 = arith.mulf %144, %144 : vector<16x64xf32>
    %cst_65 = arith.constant dense<0.000000e+00> : vector<64xf32>
    %146 = vector.multi_reduction <add>, %145, %cst_65 [0] : vector<16x64xf32> to vector<64xf32>
    %147 = vector.shape_cast %146 : vector<64xf32> to vector<1x64xf32>
    %cst_66 = arith.constant 1.600000e+01 : f32
    %148 = vector.broadcast %cst_66 : f32 to vector<1x64xf32>
    %149 = arith.divf %147, %148 : vector<1x64xf32>
    %cst_67 = arith.constant 9.99999997E-7 : f32
    %150 = vector.broadcast %cst_67 : f32 to vector<1x64xf32>
    %151 = arith.addf %149, %150 : vector<1x64xf32>
    %152 = math.rsqrt %151 : vector<1x64xf32>
    %153 = vector.broadcast %152 : vector<1x64xf32> to vector<16x64xf32>
    %154 = arith.mulf %144, %153 : vector<16x64xf32>
    %c0_68 = arith.constant 0 : index
    %c0_69 = arith.constant 0 : index
    %155 = vector.load %arg15[%c0_68, %c0_69] : memref<16x1xf32, #tpu.memory_space<vmem>>, vector<16x1xf32>
    %156 = vector.broadcast %155 : vector<16x1xf32> to vector<16x64xf32>
    %157 = arith.mulf %154, %156 : vector<16x64xf32>
    %c0_70 = arith.constant 0 : index
    %c0_71 = arith.constant 0 : index
    %158 = vector.load %arg16[%c0_70, %c0_71] : memref<16x1xf32, #tpu.memory_space<vmem>>, vector<16x1xf32>
    %159 = vector.broadcast %158 : vector<16x1xf32> to vector<16x64xf32>
    %160 = arith.addf %157, %159 : vector<16x64xf32>
    %c0_72 = arith.constant 0 : index
    %c0_73 = arith.constant 0 : index
    %161 = vector.load %arg17[%c0_72, %c0_73] : memref<32x16xf32, #tpu.memory_space<vmem>>, vector<32x16xf32>
    %cst_74 = arith.constant dense<0.000000e+00> : vector<32x64xf32>
    %162 = tpu.matmul %161, %160, %cst_74 {dimension_numbers = #tpu.dot_dimension_numbers<[1], [0], [0], [1], [0, 0, 1, 1], [], []>} : vector<32x16xf32>, vector<16x64xf32>, vector<32x64xf32> -> vector<32x64xf32>
    %c0_75 = arith.constant 0 : index
    %c0_76 = arith.constant 0 : index
    %163 = vector.load %arg18[%c0_75, %c0_76] : memref<32x1xf32, #tpu.memory_space<vmem>>, vector<32x1xf32>
    %164 = vector.broadcast %163 : vector<32x1xf32> to vector<32x64xf32>
    %165 = arith.addf %162, %164 : vector<32x64xf32>
    %166 = vector.extract_strided_slice %165 {offsets = [0, 0], sizes = [16, 64], strides = [1, 1]} : vector<32x64xf32> to vector<16x64xf32>
    %167 = vector.extract_strided_slice %165 {offsets = [16, 0], sizes = [16, 64], strides = [1, 1]} : vector<32x64xf32> to vector<16x64xf32>
    %168 = arith.mulf %166, %167 : vector<16x64xf32>
    %c0_77 = arith.constant 0 : index
    %c0_78 = arith.constant 0 : index
    %169 = vector.load %arg19[%c0_77, %c0_78] : memref<16x16xf32, #tpu.memory_space<vmem>>, vector<16x16xf32>
    %cst_79 = arith.constant dense<0.000000e+00> : vector<16x64xf32>
    %170 = tpu.matmul %169, %168, %cst_79 {dimension_numbers = #tpu.dot_dimension_numbers<[1], [0], [0], [1], [0, 0, 1, 1], [], []>} : vector<16x16xf32>, vector<16x64xf32>, vector<16x64xf32> -> vector<16x64xf32>
    %c0_80 = arith.constant 0 : index
    %c0_81 = arith.constant 0 : index
    %171 = vector.load %arg20[%c0_80, %c0_81] : memref<16x1xf32, #tpu.memory_space<vmem>>, vector<16x1xf32>
    %172 = vector.broadcast %171 : vector<16x1xf32> to vector<16x64xf32>
    %173 = arith.addf %170, %172 : vector<16x64xf32>
    %c0_82 = arith.constant 0 : index
    %c0_83 = arith.constant 0 : index
    %174 = vector.load %arg21[%c0_82, %c0_83] : memref<16x1xf32, #tpu.memory_space<vmem>>, vector<16x1xf32>
    %175 = vector.broadcast %174 : vector<16x1xf32> to vector<16x64xf32>
    %176 = arith.mulf %173, %175 : vector<16x64xf32>
    %177 = arith.addf %138, %176 : vector<16x64xf32>
    %178 = arith.truncf %177 : vector<16x64xf32> to vector<16x64xbf16>
    %c0_84 = arith.constant 0 : index
    %c0_85 = arith.constant 0 : index
    %c0_86 = arith.constant 0 : index
    %179 = vector.load %arg22[%c0_84, %c0_85, %c0_86] : memref<1x16x64xbf16, #tpu.memory_space<vmem>>, vector<1x16x64xbf16>
    %180 = vector.shape_cast %179 : vector<1x16x64xbf16> to vector<16x64xbf16>
    %181 = vector.shape_cast %178 : vector<16x64xbf16> to vector<1x16x64xbf16>
    tpu.vector_store %arg22[%c0_84, %c0_85, %c0_86], %181 {strides = array<i32>} : memref<1x16x64xbf16, #tpu.memory_space<vmem>>, vector<1x16x64xbf16>,
    return
  }
  func.func @transform_0(%arg0: i32) -> (i32, i32, i32) {
    %c0_i32 = arith.constant 0 : i32
    %c0_i32_0 = arith.constant 0 : i32
    %c0_i32_1 = arith.constant 0 : i32
    return %arg0, %c0_i32, %c0_i32_0 : i32, i32, i32
  }
  func.func @transform_1(%arg0: i32) -> (i32, i32) {
    %c0_i32 = arith.constant 0 : i32
    %c0_i32_0 = arith.constant 0 : i32
    %c0_i32_1 = arith.constant 0 : i32
    return %c0_i32, %c0_i32_0 : i32, i32
  }
  func.func @transform_2(%arg0: i32) -> (i32, i32) {
    %c0_i32 = arith.constant 0 : i32
    %c0_i32_0 = arith.constant 0 : i32
    %c0_i32_1 = arith.constant 0 : i32
    return %c0_i32, %c0_i32_0 : i32, i32
  }
  func.func @transform_3(%arg0: i32) -> (i32, i32) {
    %c0_i32 = arith.constant 0 : i32
    %c0_i32_0 = arith.constant 0 : i32
    %c0_i32_1 = arith.constant 0 : i32
    return %c0_i32, %c0_i32_0 : i32, i32
  }
  func.func @transform_4(%arg0: i32) -> (i32, i32) {
    %c0_i32 = arith.constant 0 : i32
    %c0_i32_0 = arith.constant 0 : i32
    %c0_i32_1 = arith.constant 0 : i32
    return %c0_i32, %c0_i32_0 : i32, i32
  }
  func.func @transform_5(%arg0: i32) -> (i32, i32) {
    %c0_i32 = arith.constant 0 : i32
    %c0_i32_0 = arith.constant 0 : i32
    %c0_i32_1 = arith.constant 0 : i32
    return %c0_i32, %c0_i32_0 : i32, i32
  }
  func.func @transform_6(%arg0: i32) -> (i32, i32) {
    %c0_i32 = arith.constant 0 : i32
    %c0_i32_0 = arith.constant 0 : i32
    %c0_i32_1 = arith.constant 0 : i32
    return %c0_i32, %c0_i32_0 : i32, i32
  }
  func.func @transform_7(%arg0: i32) -> (i32, i32, i32) {
    %c0_i32 = arith.constant 0 : i32
    %c0_i32_0 = arith.constant 0 : i32
    %c0_i32_1 = arith.constant 0 : i32
    %c0_i32_2 = arith.constant 0 : i32
    return %c0_i32, %c0_i32_0, %c0_i32_1 : i32, i32, i32
  }
  func.func @transform_8(%arg0: i32) -> (i32, i32) {
    %c0_i32 = arith.constant 0 : i32
    %c0_i32_0 = arith.constant 0 : i32
    %c0_i32_1 = arith.constant 0 : i32
    return %c0_i32, %c0_i32_0 : i32, i32
  }
  func.func @transform_9(%arg0: i32) -> (i32, i32) {
    %c0_i32 = arith.constant 0 : i32
    %c0_i32_0 = arith.constant 0 : i32
    %c0_i32_1 = arith.constant 0 : i32
    return %c0_i32, %c0_i32_0 : i32, i32
  }
  func.func @transform_10(%arg0: i32) -> (i32, i32) {
    %c0_i32 = arith.constant 0 : i32
    %c0_i32_0 = arith.constant 0 : i32
    %c0_i32_1 = arith.constant 0 : i32
    return %c0_i32, %c0_i32_0 : i32, i32
  }
  func.func @transform_11(%arg0: i32) -> (i32, i32) {
    %c0_i32 = arith.constant 0 : i32
    %c0_i32_0 = arith.constant 0 : i32
    %c0_i32_1 = arith.constant 0 : i32
    return %c0_i32, %c0_i32_0 : i32, i32
  }
  func.func @transform_12(%arg0: i32) -> (i32, i32) {
    %c0_i32 = arith.constant 0 : i32
    %c0_i32_0 = arith.constant 0 : i32
    %c0_i32_1 = arith.constant 0 : i32
    return %c0_i32, %c0_i32_0 : i32, i32
  }
  func.func @transform_13(%arg0: i32) -> (i32, i32) {
    %c0_i32 = arith.constant 0 : i32
    %c0_i32_0 = arith.constant 0 : i32
    %c0_i32_1 = arith.constant 0 : i32
    return %c0_i32, %c0_i32_0 : i32, i32
  }
  func.func @transform_14(%arg0: i32) -> (i32, i32) {
    %c0_i32 = arith.constant 0 : i32
    %c0_i32_0 = arith.constant 0 : i32
    %c0_i32_1 = arith.constant 0 : i32
    return %c0_i32, %c0_i32_0 : i32, i32
  }
  func.func @transform_15(%arg0: i32) -> (i32, i32) {
    %c0_i32 = arith.constant 0 : i32
    %c0_i32_0 = arith.constant 0 : i32
    %c0_i32_1 = arith.constant 0 : i32
    return %c0_i32, %c0_i32_0 : i32, i32
  }
  func.func @transform_16(%arg0: i32) -> (i32, i32) {
    %c0_i32 = arith.constant 0 : i32
    %c0_i32_0 = arith.constant 0 : i32
    %c0_i32_1 = arith.constant 0 : i32
    return %c0_i32, %c0_i32_0 : i32, i32
  }
  func.func @transform_17(%arg0: i32) -> (i32, i32) {
    %c0_i32 = arith.constant 0 : i32
    %c0_i32_0 = arith.constant 0 : i32
    %c0_i32_1 = arith.constant 0 : i32
    return %c0_i32, %c0_i32_0 : i32, i32
  }
  func.func @transform_18(%arg0: i32) -> (i32, i32) {
    %c0_i32 = arith.constant 0 : i32
    %c0_i32_0 = arith.constant 0 : i32
    %c0_i32_1 = arith.constant 0 : i32
    return %c0_i32, %c0_i32_0 : i32, i32
  }
  func.func @transform_19(%arg0: i32) -> (i32, i32) {
    %c0_i32 = arith.constant 0 : i32
    %c0_i32_0 = arith.constant 0 : i32
    %c0_i32_1 = arith.constant 0 : i32
    return %c0_i32, %c0_i32_0 : i32, i32
  }
  func.func @transform_20(%arg0: i32) -> (i32, i32) {
    %c0_i32 = arith.constant 0 : i32
    %c0_i32_0 = arith.constant 0 : i32
    %c0_i32_1 = arith.constant 0 : i32
    return %c0_i32, %c0_i32_0 : i32, i32
  }
  func.func @transform_21(%arg0: i32) -> (i32, i32, i32) {
    %c0_i32 = arith.constant 0 : i32
    %c0_i32_0 = arith.constant 0 : i32
    %c0_i32_1 = arith.constant 0 : i32
    return %arg0, %c0_i32, %c0_i32_0 : i32, i32, i32
  }
}

module attributes {stable_mosaic.version = 11 : i64} {
  func.func @_matmul_bias_kernel(%arg0: i32, %arg1: memref<1x64x16xbf16, #tpu.memory_space<vmem>>, %arg2: memref<32x64xf32, #tpu.memory_space<vmem>>, %arg3: memref<32x1xf32, #tpu.memory_space<vmem>>, %arg4: memref<1x32x16xbf16, #tpu.memory_space<vmem>>) attributes {dimension_semantics = [#tpu.dimension_semantics<parallel>], iteration_bounds = array<i64: 2>, scalar_prefetch = 0 : i64, scratch_operands = 0 : i64, tpu.core_type = #tpu.core_type<tc>, window_params = [{transform_indices = @transform_0, window_bounds = array<i64: 1, 64, 16>}, {pipeline_mode = #tpu.pipeline_mode<synchronous>, transform_indices = @transform_1, window_bounds = array<i64: 32, 64>}, {pipeline_mode = #tpu.pipeline_mode<synchronous>, transform_indices = @transform_2, window_bounds = array<i64: 32, 1>}, {transform_indices = @transform_3, window_bounds = array<i64: 1, 32, 16>}]} {
    %c0 = arith.constant 0 : index
    %c0_0 = arith.constant 0 : index
    %0 = vector.load %arg2[%c0, %c0_0] : memref<32x64xf32, #tpu.memory_space<vmem>>, vector<32x64xf32>
    %c0_1 = arith.constant 0 : index
    %c0_2 = arith.constant 0 : index
    %c0_3 = arith.constant 0 : index
    %1 = vector.load %arg1[%c0_1, %c0_2, %c0_3] : memref<1x64x16xbf16, #tpu.memory_space<vmem>>, vector<1x64x16xbf16>
    %2 = vector.shape_cast %1 : vector<1x64x16xbf16> to vector<64x16xbf16>
    %3 = arith.extf %2 : vector<64x16xbf16> to vector<64x16xf32>
    %cst = arith.constant dense<0.000000e+00> : vector<32x16xf32>
    %4 = tpu.matmul %0, %3, %cst {dimension_numbers = #tpu.dot_dimension_numbers<[1], [0], [0], [1], [0, 0, 1, 1], [], []>} : vector<32x64xf32>, vector<64x16xf32>, vector<32x16xf32> -> vector<32x16xf32>
    %c0_4 = arith.constant 0 : index
    %c0_5 = arith.constant 0 : index
    %5 = vector.load %arg3[%c0_4, %c0_5] : memref<32x1xf32, #tpu.memory_space<vmem>>, vector<32x1xf32>
    %6 = vector.broadcast %5 : vector<32x1xf32> to vector<32x16xf32>
    %7 = arith.addf %4, %6 : vector<32x16xf32>
    %8 = arith.truncf %7 : vector<32x16xf32> to vector<32x16xbf16>
    %c0_6 = arith.constant 0 : index
    %c0_7 = arith.constant 0 : index
    %c0_8 = arith.constant 0 : index
    %9 = vector.load %arg4[%c0_6, %c0_7, %c0_8] : memref<1x32x16xbf16, #tpu.memory_space<vmem>>, vector<1x32x16xbf16>
    %10 = vector.shape_cast %9 : vector<1x32x16xbf16> to vector<32x16xbf16>
    %11 = vector.shape_cast %8 : vector<32x16xbf16> to vector<1x32x16xbf16>
    tpu.vector_store %arg4[%c0_6, %c0_7, %c0_8], %11 {strides = array<i32>} : memref<1x32x16xbf16, #tpu.memory_space<vmem>>, vector<1x32x16xbf16>,
    return
  }
  func.func @transform_0(%arg0: i32) -> (i32, i32, i32) {
    %c0_i32 = arith.constant 0 : i32
    %c0_i32_0 = arith.constant 0 : i32
    %c0_i32_1 = arith.constant 0 : i32
    return %arg0, %c0_i32, %c0_i32_0 : i32, i32, i32
  }
  func.func @transform_1(%arg0: i32) -> (i32, i32) {
    %c0_i32 = arith.constant 0 : i32
    %c0_i32_0 = arith.constant 0 : i32
    %c0_i32_1 = arith.constant 0 : i32
    return %c0_i32, %c0_i32_0 : i32, i32
  }
  func.func @transform_2(%arg0: i32) -> (i32, i32) {
    %c0_i32 = arith.constant 0 : i32
    %c0_i32_0 = arith.constant 0 : i32
    %c0_i32_1 = arith.constant 0 : i32
    return %c0_i32, %c0_i32_0 : i32, i32
  }
  func.func @transform_3(%arg0: i32) -> (i32, i32, i32) {
    %c0_i32 = arith.constant 0 : i32
    %c0_i32_0 = arith.constant 0 : i32
    %c0_i32_1 = arith.constant 0 : i32
    return %arg0, %c0_i32, %c0_i32_0 : i32, i32, i32
  }
}

module attributes {stable_mosaic.version = 11 : i64} {
  func.func @_matmul_kernel(%arg0: i32, %arg1: memref<1x32x16xbf16, #tpu.memory_space<vmem>>, %arg2: memref<64x32xf32, #tpu.memory_space<vmem>>, %arg3: memref<1x64x16xbf16, #tpu.memory_space<vmem>>) attributes {dimension_semantics = [#tpu.dimension_semantics<parallel>], iteration_bounds = array<i64: 2>, scalar_prefetch = 0 : i64, scratch_operands = 0 : i64, tpu.core_type = #tpu.core_type<tc>, window_params = [{transform_indices = @transform_0, window_bounds = array<i64: 1, 32, 16>}, {pipeline_mode = #tpu.pipeline_mode<synchronous>, transform_indices = @transform_1, window_bounds = array<i64: 64, 32>}, {transform_indices = @transform_2, window_bounds = array<i64: 1, 64, 16>}]} {
    %c0 = arith.constant 0 : index
    %c0_0 = arith.constant 0 : index
    %0 = vector.load %arg2[%c0, %c0_0] : memref<64x32xf32, #tpu.memory_space<vmem>>, vector<64x32xf32>
    %c0_1 = arith.constant 0 : index
    %c0_2 = arith.constant 0 : index
    %c0_3 = arith.constant 0 : index
    %1 = vector.load %arg1[%c0_1, %c0_2, %c0_3] : memref<1x32x16xbf16, #tpu.memory_space<vmem>>, vector<1x32x16xbf16>
    %2 = vector.shape_cast %1 : vector<1x32x16xbf16> to vector<32x16xbf16>
    %3 = arith.extf %2 : vector<32x16xbf16> to vector<32x16xf32>
    %cst = arith.constant dense<0.000000e+00> : vector<64x16xf32>
    %4 = tpu.matmul %0, %3, %cst {dimension_numbers = #tpu.dot_dimension_numbers<[1], [0], [0], [1], [0, 0, 1, 1], [], []>} : vector<64x32xf32>, vector<32x16xf32>, vector<64x16xf32> -> vector<64x16xf32>
    %5 = arith.truncf %4 : vector<64x16xf32> to vector<64x16xbf16>
    %c0_4 = arith.constant 0 : index
    %c0_5 = arith.constant 0 : index
    %c0_6 = arith.constant 0 : index
    %6 = vector.load %arg3[%c0_4, %c0_5, %c0_6] : memref<1x64x16xbf16, #tpu.memory_space<vmem>>, vector<1x64x16xbf16>
    %7 = vector.shape_cast %6 : vector<1x64x16xbf16> to vector<64x16xbf16>
    %8 = vector.shape_cast %5 : vector<64x16xbf16> to vector<1x64x16xbf16>
    tpu.vector_store %arg3[%c0_4, %c0_5, %c0_6], %8 {strides = array<i32>} : memref<1x64x16xbf16, #tpu.memory_space<vmem>>, vector<1x64x16xbf16>,
    return
  }
  func.func @transform_0(%arg0: i32) -> (i32, i32, i32) {
    %c0_i32 = arith.constant 0 : i32
    %c0_i32_0 = arith.constant 0 : i32
    %c0_i32_1 = arith.constant 0 : i32
    return %arg0, %c0_i32, %c0_i32_0 : i32, i32, i32
  }
  func.func @transform_1(%arg0: i32) -> (i32, i32) {
    %c0_i32 = arith.constant 0 : i32
    %c0_i32_0 = arith.constant 0 : i32
    %c0_i32_1 = arith.constant 0 : i32
    return %c0_i32, %c0_i32_0 : i32, i32
  }
  func.func @transform_2(%arg0: i32) -> (i32, i32, i32) {
    %c0_i32 = arith.constant 0 : i32
    %c0_i32_0 = arith.constant 0 : i32
    %c0_i32_1 = arith.constant 0 : i32
    return %arg0, %c0_i32, %c0_i32_0 : i32, i32, i32
  }
}

module attributes {stable_mosaic.version = 11 : i64} {
  func.func @_naf_block_kernel(%arg0: i32, %arg1: memref<1x32x16xbf16, #tpu.memory_space<vmem>>, %arg2: memref<1x16xf32, #tpu.memory_space<vmem>>, %arg3: memref<1x16xf32, #tpu.memory_space<vmem>>, %arg4: memref<32x1xf32, #tpu.memory_space<vmem>>, %arg5: memref<32x1xf32, #tpu.memory_space<vmem>>, %arg6: memref<64x32xf32, #tpu.memory_space<vmem>>, %arg7: memref<64x1xf32, #tpu.memory_space<vmem>>, %arg8: memref<9x64x1xf32, #tpu.memory_space<vmem>>, %arg9: memref<64x1xf32, #tpu.memory_space<vmem>>, %arg10: memref<32x32xf32, #tpu.memory_space<vmem>>, %arg11: memref<32x1xf32, #tpu.memory_space<vmem>>, %arg12: memref<32x32xf32, #tpu.memory_space<vmem>>, %arg13: memref<32x1xf32, #tpu.memory_space<vmem>>, %arg14: memref<32x1xf32, #tpu.memory_space<vmem>>, %arg15: memref<32x1xf32, #tpu.memory_space<vmem>>, %arg16: memref<32x1xf32, #tpu.memory_space<vmem>>, %arg17: memref<64x32xf32, #tpu.memory_space<vmem>>, %arg18: memref<64x1xf32, #tpu.memory_space<vmem>>, %arg19: memref<32x32xf32, #tpu.memory_space<vmem>>, %arg20: memref<32x1xf32, #tpu.memory_space<vmem>>, %arg21: memref<32x1xf32, #tpu.memory_space<vmem>>, %arg22: memref<1x32x16xbf16, #tpu.memory_space<vmem>>) attributes {dimension_semantics = [#tpu.dimension_semantics<parallel>], iteration_bounds = array<i64: 2>, scalar_prefetch = 0 : i64, scratch_operands = 0 : i64, tpu.core_type = #tpu.core_type<tc>, window_params = [{transform_indices = @transform_0, window_bounds = array<i64: 1, 32, 16>}, {pipeline_mode = #tpu.pipeline_mode<synchronous>, transform_indices = @transform_1, window_bounds = array<i64: 1, 16>}, {pipeline_mode = #tpu.pipeline_mode<synchronous>, transform_indices = @transform_2, window_bounds = array<i64: 1, 16>}, {pipeline_mode = #tpu.pipeline_mode<synchronous>, transform_indices = @transform_3, window_bounds = array<i64: 32, 1>}, {pipeline_mode = #tpu.pipeline_mode<synchronous>, transform_indices = @transform_4, window_bounds = array<i64: 32, 1>}, {pipeline_mode = #tpu.pipeline_mode<synchronous>, transform_indices = @transform_5, window_bounds = array<i64: 64, 32>}, {pipeline_mode = #tpu.pipeline_mode<synchronous>, transform_indices = @transform_6, window_bounds = array<i64: 64, 1>}, {pipeline_mode = #tpu.pipeline_mode<synchronous>, transform_indices = @transform_7, window_bounds = array<i64: 9, 64, 1>}, {pipeline_mode = #tpu.pipeline_mode<synchronous>, transform_indices = @transform_8, window_bounds = array<i64: 64, 1>}, {pipeline_mode = #tpu.pipeline_mode<synchronous>, transform_indices = @transform_9, window_bounds = array<i64: 32, 32>}, {pipeline_mode = #tpu.pipeline_mode<synchronous>, transform_indices = @transform_10, window_bounds = array<i64: 32, 1>}, {pipeline_mode = #tpu.pipeline_mode<synchronous>, transform_indices = @transform_11, window_bounds = array<i64: 32, 32>}, {pipeline_mode = #tpu.pipeline_mode<synchronous>, transform_indices = @transform_12, window_bounds = array<i64: 32, 1>}, {pipeline_mode = #tpu.pipeline_mode<synchronous>, transform_indices = @transform_13, window_bounds = array<i64: 32, 1>}, {pipeline_mode = #tpu.pipeline_mode<synchronous>, transform_indices = @transform_14, window_bounds = array<i64: 32, 1>}, {pipeline_mode = #tpu.pipeline_mode<synchronous>, transform_indices = @transform_15, window_bounds = array<i64: 32, 1>}, {pipeline_mode = #tpu.pipeline_mode<synchronous>, transform_indices = @transform_16, window_bounds = array<i64: 64, 32>}, {pipeline_mode = #tpu.pipeline_mode<synchronous>, transform_indices = @transform_17, window_bounds = array<i64: 64, 1>}, {pipeline_mode = #tpu.pipeline_mode<synchronous>, transform_indices = @transform_18, window_bounds = array<i64: 32, 32>}, {pipeline_mode = #tpu.pipeline_mode<synchronous>, transform_indices = @transform_19, window_bounds = array<i64: 32, 1>}, {pipeline_mode = #tpu.pipeline_mode<synchronous>, transform_indices = @transform_20, window_bounds = array<i64: 32, 1>}, {transform_indices = @transform_21, window_bounds = array<i64: 1, 32, 16>}]} {
    %c0 = arith.constant 0 : index
    %c0_0 = arith.constant 0 : index
    %c0_1 = arith.constant 0 : index
    %0 = vector.load %arg1[%c0, %c0_0, %c0_1] : memref<1x32x16xbf16, #tpu.memory_space<vmem>>, vector<1x32x16xbf16>
    %1 = vector.shape_cast %0 : vector<1x32x16xbf16> to vector<32x16xbf16>
    %2 = arith.extf %1 : vector<32x16xbf16> to vector<32x16xf32>
    %c0_2 = arith.constant 0 : index
    %c0_3 = arith.constant 0 : index
    %3 = vector.load %arg2[%c0_2, %c0_3] : memref<1x16xf32, #tpu.memory_space<vmem>>, vector<1x16xf32>
    %c0_4 = arith.constant 0 : index
    %c0_5 = arith.constant 0 : index
    %4 = vector.load %arg3[%c0_4, %c0_5] : memref<1x16xf32, #tpu.memory_space<vmem>>, vector<1x16xf32>
    %cst = arith.constant dense<0.000000e+00> : vector<16xf32>
    %5 = vector.multi_reduction <add>, %2, %cst [0] : vector<32x16xf32> to vector<16xf32>
    %6 = vector.shape_cast %5 : vector<16xf32> to vector<1x16xf32>
    %cst_6 = arith.constant 3.200000e+01 : f32
    %7 = vector.broadcast %cst_6 : f32 to vector<1x16xf32>
    %8 = arith.divf %6, %7 : vector<1x16xf32>
    %9 = vector.broadcast %8 : vector<1x16xf32> to vector<32x16xf32>
    %10 = arith.subf %2, %9 : vector<32x16xf32>
    %11 = arith.mulf %10, %10 : vector<32x16xf32>
    %cst_7 = arith.constant dense<0.000000e+00> : vector<16xf32>
    %12 = vector.multi_reduction <add>, %11, %cst_7 [0] : vector<32x16xf32> to vector<16xf32>
    %13 = vector.shape_cast %12 : vector<16xf32> to vector<1x16xf32>
    %cst_8 = arith.constant 3.200000e+01 : f32
    %14 = vector.broadcast %cst_8 : f32 to vector<1x16xf32>
    %15 = arith.divf %13, %14 : vector<1x16xf32>
    %cst_9 = arith.constant 9.99999997E-7 : f32
    %16 = vector.broadcast %cst_9 : f32 to vector<1x16xf32>
    %17 = arith.addf %15, %16 : vector<1x16xf32>
    %18 = math.rsqrt %17 : vector<1x16xf32>
    %19 = vector.broadcast %18 : vector<1x16xf32> to vector<32x16xf32>
    %20 = arith.mulf %10, %19 : vector<32x16xf32>
    %c0_10 = arith.constant 0 : index
    %c0_11 = arith.constant 0 : index
    %21 = vector.load %arg4[%c0_10, %c0_11] : memref<32x1xf32, #tpu.memory_space<vmem>>, vector<32x1xf32>
    %22 = vector.broadcast %21 : vector<32x1xf32> to vector<32x16xf32>
    %23 = arith.mulf %20, %22 : vector<32x16xf32>
    %c0_12 = arith.constant 0 : index
    %c0_13 = arith.constant 0 : index
    %24 = vector.load %arg5[%c0_12, %c0_13] : memref<32x1xf32, #tpu.memory_space<vmem>>, vector<32x1xf32>
    %25 = vector.broadcast %24 : vector<32x1xf32> to vector<32x16xf32>
    %26 = arith.addf %23, %25 : vector<32x16xf32>
    %c0_14 = arith.constant 0 : index
    %c0_15 = arith.constant 0 : index
    %27 = vector.load %arg6[%c0_14, %c0_15] : memref<64x32xf32, #tpu.memory_space<vmem>>, vector<64x32xf32>
    %cst_16 = arith.constant dense<0.000000e+00> : vector<64x16xf32>
    %28 = tpu.matmul %27, %26, %cst_16 {dimension_numbers = #tpu.dot_dimension_numbers<[1], [0], [0], [1], [0, 0, 1, 1], [], []>} : vector<64x32xf32>, vector<32x16xf32>, vector<64x16xf32> -> vector<64x16xf32>
    %c0_17 = arith.constant 0 : index
    %c0_18 = arith.constant 0 : index
    %29 = vector.load %arg7[%c0_17, %c0_18] : memref<64x1xf32, #tpu.memory_space<vmem>>, vector<64x1xf32>
    %30 = vector.broadcast %29 : vector<64x1xf32> to vector<64x16xf32>
    %31 = arith.addf %28, %30 : vector<64x16xf32>
    %cst_19 = arith.constant 0.000000e+00 : f32
    %32 = vector.broadcast %cst_19 : f32 to vector<64x16xf32>
    %cst_20 = arith.constant 0.000000e+00 : f32
    %33 = vector.broadcast %cst_20 : f32 to vector<64x5xf32>
    %34 = vector.extract_strided_slice %31 {offsets = [0, 0], sizes = [64, 11], strides = [1, 1]} : vector<64x16xf32> to vector<64x11xf32>
    %35 = tpu.concatenate %33, %34 in 1 : vector<64x5xf32>, vector<64x11xf32> -> vector<64x16xf32>
    %36 = vector.broadcast %3 : vector<1x16xf32> to vector<64x16xf32>
    %37 = arith.mulf %35, %36 : vector<64x16xf32>
    %c0_21 = arith.constant 0 : index
    %c0_22 = arith.constant 0 : index
    %c0_23 = arith.constant 0 : index
    %38 = vector.load %arg8[%c0_21, %c0_22, %c0_23] : memref<9x64x1xf32, #tpu.memory_space<vmem>>, vector<1x64x1xf32>
    %39 = vector.shape_cast %38 : vector<1x64x1xf32> to vector<64x1xf32>
    %40 = vector.broadcast %39 : vector<64x1xf32> to vector<64x16xf32>
    %41 = arith.mulf %37, %40 : vector<64x16xf32>
    %42 = arith.addf %32, %41 : vector<64x16xf32>
    %cst_24 = arith.constant 0.000000e+00 : f32
    %43 = vector.broadcast %cst_24 : f32 to vector<64x4xf32>
    %44 = vector.extract_strided_slice %31 {offsets = [0, 0], sizes = [64, 12], strides = [1, 1]} : vector<64x16xf32> to vector<64x12xf32>
    %45 = tpu.concatenate %43, %44 in 1 : vector<64x4xf32>, vector<64x12xf32> -> vector<64x16xf32>
    %c1 = arith.constant 1 : index
    %c0_25 = arith.constant 0 : index
    %c0_26 = arith.constant 0 : index
    %46 = vector.load %arg8[%c1, %c0_25, %c0_26] : memref<9x64x1xf32, #tpu.memory_space<vmem>>, vector<1x64x1xf32>
    %47 = vector.shape_cast %46 : vector<1x64x1xf32> to vector<64x1xf32>
    %48 = vector.broadcast %47 : vector<64x1xf32> to vector<64x16xf32>
    %49 = arith.mulf %45, %48 : vector<64x16xf32>
    %50 = arith.addf %42, %49 : vector<64x16xf32>
    %cst_27 = arith.constant 0.000000e+00 : f32
    %51 = vector.broadcast %cst_27 : f32 to vector<64x3xf32>
    %52 = vector.extract_strided_slice %31 {offsets = [0, 0], sizes = [64, 13], strides = [1, 1]} : vector<64x16xf32> to vector<64x13xf32>
    %53 = tpu.concatenate %51, %52 in 1 : vector<64x3xf32>, vector<64x13xf32> -> vector<64x16xf32>
    %54 = vector.broadcast %4 : vector<1x16xf32> to vector<64x16xf32>
    %55 = arith.mulf %53, %54 : vector<64x16xf32>
    %c2 = arith.constant 2 : index
    %c0_28 = arith.constant 0 : index
    %c0_29 = arith.constant 0 : index
    %56 = vector.load %arg8[%c2, %c0_28, %c0_29] : memref<9x64x1xf32, #tpu.memory_space<vmem>>, vector<1x64x1xf32>
    %57 = vector.shape_cast %56 : vector<1x64x1xf32> to vector<64x1xf32>
    %58 = vector.broadcast %57 : vector<64x1xf32> to vector<64x16xf32>
    %59 = arith.mulf %55, %58 : vector<64x16xf32>
    %60 = arith.addf %50, %59 : vector<64x16xf32>
    %cst_30 = arith.constant 0.000000e+00 : f32
    %61 = vector.broadcast %cst_30 : f32 to vector<64x1xf32>
    %62 = vector.extract_strided_slice %31 {offsets = [0, 0], sizes = [64, 15], strides = [1, 1]} : vector<64x16xf32> to vector<64x15xf32>
    %63 = tpu.concatenate %61, %62 in 1 : vector<64x1xf32>, vector<64x15xf32> -> vector<64x16xf32>
    %64 = vector.broadcast %3 : vector<1x16xf32> to vector<64x16xf32>
    %65 = arith.mulf %63, %64 : vector<64x16xf32>
    %c3 = arith.constant 3 : index
    %c0_31 = arith.constant 0 : index
    %c0_32 = arith.constant 0 : index
    %66 = vector.load %arg8[%c3, %c0_31, %c0_32] : memref<9x64x1xf32, #tpu.memory_space<vmem>>, vector<1x64x1xf32>
    %67 = vector.shape_cast %66 : vector<1x64x1xf32> to vector<64x1xf32>
    %68 = vector.broadcast %67 : vector<64x1xf32> to vector<64x16xf32>
    %69 = arith.mulf %65, %68 : vector<64x16xf32>
    %70 = arith.addf %60, %69 : vector<64x16xf32>
    %c4 = arith.constant 4 : index
    %c0_33 = arith.constant 0 : index
    %c0_34 = arith.constant 0 : index
    %71 = vector.load %arg8[%c4, %c0_33, %c0_34] : memref<9x64x1xf32, #tpu.memory_space<vmem>>, vector<1x64x1xf32>
    %72 = vector.shape_cast %71 : vector<1x64x1xf32> to vector<64x1xf32>
    %73 = vector.broadcast %72 : vector<64x1xf32> to vector<64x16xf32>
    %74 = arith.mulf %31, %73 : vector<64x16xf32>
    %75 = arith.addf %70, %74 : vector<64x16xf32>
    %cst_35 = arith.constant 0.000000e+00 : f32
    %76 = vector.broadcast %cst_35 : f32 to vector<64x1xf32>
    %77 = vector.extract_strided_slice %31 {offsets = [0, 1], sizes = [64, 15], strides = [1, 1]} : vector<64x16xf32> to vector<64x15xf32>
    %78 = tpu.concatenate %77, %76 in 1 : vector<64x15xf32>, vector<64x1xf32> -> vector<64x16xf32>
    %79 = vector.broadcast %4 : vector<1x16xf32> to vector<64x16xf32>
    %80 = arith.mulf %78, %79 : vector<64x16xf32>
    %c5 = arith.constant 5 : index
    %c0_36 = arith.constant 0 : index
    %c0_37 = arith.constant 0 : index
    %81 = vector.load %arg8[%c5, %c0_36, %c0_37] : memref<9x64x1xf32, #tpu.memory_space<vmem>>, vector<1x64x1xf32>
    %82 = vector.shape_cast %81 : vector<1x64x1xf32> to vector<64x1xf32>
    %83 = vector.broadcast %82 : vector<64x1xf32> to vector<64x16xf32>
    %84 = arith.mulf %80, %83 : vector<64x16xf32>
    %85 = arith.addf %75, %84 : vector<64x16xf32>
    %cst_38 = arith.constant 0.000000e+00 : f32
    %86 = vector.broadcast %cst_38 : f32 to vector<64x3xf32>
    %87 = vector.extract_strided_slice %31 {offsets = [0, 3], sizes = [64, 13], strides = [1, 1]} : vector<64x16xf32> to vector<64x13xf32>
    %88 = tpu.concatenate %87, %86 in 1 : vector<64x13xf32>, vector<64x3xf32> -> vector<64x16xf32>
    %89 = vector.broadcast %3 : vector<1x16xf32> to vector<64x16xf32>
    %90 = arith.mulf %88, %89 : vector<64x16xf32>
    %c6 = arith.constant 6 : index
    %c0_39 = arith.constant 0 : index
    %c0_40 = arith.constant 0 : index
    %91 = vector.load %arg8[%c6, %c0_39, %c0_40] : memref<9x64x1xf32, #tpu.memory_space<vmem>>, vector<1x64x1xf32>
    %92 = vector.shape_cast %91 : vector<1x64x1xf32> to vector<64x1xf32>
    %93 = vector.broadcast %92 : vector<64x1xf32> to vector<64x16xf32>
    %94 = arith.mulf %90, %93 : vector<64x16xf32>
    %95 = arith.addf %85, %94 : vector<64x16xf32>
    %cst_41 = arith.constant 0.000000e+00 : f32
    %96 = vector.broadcast %cst_41 : f32 to vector<64x4xf32>
    %97 = vector.extract_strided_slice %31 {offsets = [0, 4], sizes = [64, 12], strides = [1, 1]} : vector<64x16xf32> to vector<64x12xf32>
    %98 = tpu.concatenate %97, %96 in 1 : vector<64x12xf32>, vector<64x4xf32> -> vector<64x16xf32>
    %c7 = arith.constant 7 : index
    %c0_42 = arith.constant 0 : index
    %c0_43 = arith.constant 0 : index
    %99 = vector.load %arg8[%c7, %c0_42, %c0_43] : memref<9x64x1xf32, #tpu.memory_space<vmem>>, vector<1x64x1xf32>
    %100 = vector.shape_cast %99 : vector<1x64x1xf32> to vector<64x1xf32>
    %101 = vector.broadcast %100 : vector<64x1xf32> to vector<64x16xf32>
    %102 = arith.mulf %98, %101 : vector<64x16xf32>
    %103 = arith.addf %95, %102 : vector<64x16xf32>
    %cst_44 = arith.constant 0.000000e+00 : f32
    %104 = vector.broadcast %cst_44 : f32 to vector<64x5xf32>
    %105 = vector.extract_strided_slice %31 {offsets = [0, 5], sizes = [64, 11], strides = [1, 1]} : vector<64x16xf32> to vector<64x11xf32>
    %106 = tpu.concatenate %105, %104 in 1 : vector<64x11xf32>, vector<64x5xf32> -> vector<64x16xf32>
    %107 = vector.broadcast %4 : vector<1x16xf32> to vector<64x16xf32>
    %108 = arith.mulf %106, %107 : vector<64x16xf32>
    %c8 = arith.constant 8 : index
    %c0_45 = arith.constant 0 : index
    %c0_46 = arith.constant 0 : index
    %109 = vector.load %arg8[%c8, %c0_45, %c0_46] : memref<9x64x1xf32, #tpu.memory_space<vmem>>, vector<1x64x1xf32>
    %110 = vector.shape_cast %109 : vector<1x64x1xf32> to vector<64x1xf32>
    %111 = vector.broadcast %110 : vector<64x1xf32> to vector<64x16xf32>
    %112 = arith.mulf %108, %111 : vector<64x16xf32>
    %113 = arith.addf %103, %112 : vector<64x16xf32>
    %c0_47 = arith.constant 0 : index
    %c0_48 = arith.constant 0 : index
    %114 = vector.load %arg9[%c0_47, %c0_48] : memref<64x1xf32, #tpu.memory_space<vmem>>, vector<64x1xf32>
    %115 = vector.broadcast %114 : vector<64x1xf32> to vector<64x16xf32>
    %116 = arith.addf %113, %115 : vector<64x16xf32>
    %117 = vector.extract_strided_slice %116 {offsets = [0, 0], sizes = [32, 16], strides = [1, 1]} : vector<64x16xf32> to vector<32x16xf32>
    %118 = vector.extract_strided_slice %116 {offsets = [32, 0], sizes = [32, 16], strides = [1, 1]} : vector<64x16xf32> to vector<32x16xf32>
    %119 = arith.mulf %117, %118 : vector<32x16xf32>
    %cst_49 = arith.constant dense<0.000000e+00> : vector<32xf32>
    %120 = vector.multi_reduction <add>, %119, %cst_49 [1] : vector<32x16xf32> to vector<32xf32>
    %121 = vector.shape_cast %120 : vector<32xf32> to vector<32x1xf32>
    %cst_50 = arith.constant 1.600000e+01 : f32
    %122 = vector.broadcast %cst_50 : f32 to vector<32x1xf32>
    %123 = arith.divf %121, %122 : vector<32x1xf32>
    %c0_51 = arith.constant 0 : index
    %c0_52 = arith.constant 0 : index
    %124 = vector.load %arg10[%c0_51, %c0_52] : memref<32x32xf32, #tpu.memory_space<vmem>>, vector<32x32xf32>
    %cst_53 = arith.constant dense<0.000000e+00> : vector<32x1xf32>
    %125 = tpu.matmul %124, %123, %cst_53 {dimension_numbers = #tpu.dot_dimension_numbers<[1], [0], [0], [1], [0, 0, 1, 1], [], []>} : vector<32x32xf32>, vector<32x1xf32>, vector<32x1xf32> -> vector<32x1xf32>
    %c0_54 = arith.constant 0 : index
    %c0_55 = arith.constant 0 : index
    %126 = vector.load %arg11[%c0_54, %c0_55] : memref<32x1xf32, #tpu.memory_space<vmem>>, vector<32x1xf32>
    %127 = arith.addf %125, %126 : vector<32x1xf32>
    %128 = vector.broadcast %127 : vector<32x1xf32> to vector<32x16xf32>
    %129 = arith.mulf %119, %128 : vector<32x16xf32>
    %c0_56 = arith.constant 0 : index
    %c0_57 = arith.constant 0 : index
    %130 = vector.load %arg12[%c0_56, %c0_57] : memref<32x32xf32, #tpu.memory_space<vmem>>, vector<32x32xf32>
    %cst_58 = arith.constant dense<0.000000e+00> : vector<32x16xf32>
    %131 = tpu.matmul %130, %129, %cst_58 {dimension_numbers = #tpu.dot_dimension_numbers<[1], [0], [0], [1], [0, 0, 1, 1], [], []>} : vector<32x32xf32>, vector<32x16xf32>, vector<32x16xf32> -> vector<32x16xf32>
    %c0_59 = arith.constant 0 : index
    %c0_60 = arith.constant 0 : index
    %132 = vector.load %arg13[%c0_59, %c0_60] : memref<32x1xf32, #tpu.memory_space<vmem>>, vector<32x1xf32>
    %133 = vector.broadcast %132 : vector<32x1xf32> to vector<32x16xf32>
    %134 = arith.addf %131, %133 : vector<32x16xf32>
    %c0_61 = arith.constant 0 : index
    %c0_62 = arith.constant 0 : index
    %135 = vector.load %arg14[%c0_61, %c0_62] : memref<32x1xf32, #tpu.memory_space<vmem>>, vector<32x1xf32>
    %136 = vector.broadcast %135 : vector<32x1xf32> to vector<32x16xf32>
    %137 = arith.mulf %134, %136 : vector<32x16xf32>
    %138 = arith.addf %2, %137 : vector<32x16xf32>
    %cst_63 = arith.constant dense<0.000000e+00> : vector<16xf32>
    %139 = vector.multi_reduction <add>, %138, %cst_63 [0] : vector<32x16xf32> to vector<16xf32>
    %140 = vector.shape_cast %139 : vector<16xf32> to vector<1x16xf32>
    %cst_64 = arith.constant 3.200000e+01 : f32
    %141 = vector.broadcast %cst_64 : f32 to vector<1x16xf32>
    %142 = arith.divf %140, %141 : vector<1x16xf32>
    %143 = vector.broadcast %142 : vector<1x16xf32> to vector<32x16xf32>
    %144 = arith.subf %138, %143 : vector<32x16xf32>
    %145 = arith.mulf %144, %144 : vector<32x16xf32>
    %cst_65 = arith.constant dense<0.000000e+00> : vector<16xf32>
    %146 = vector.multi_reduction <add>, %145, %cst_65 [0] : vector<32x16xf32> to vector<16xf32>
    %147 = vector.shape_cast %146 : vector<16xf32> to vector<1x16xf32>
    %cst_66 = arith.constant 3.200000e+01 : f32
    %148 = vector.broadcast %cst_66 : f32 to vector<1x16xf32>
    %149 = arith.divf %147, %148 : vector<1x16xf32>
    %cst_67 = arith.constant 9.99999997E-7 : f32
    %150 = vector.broadcast %cst_67 : f32 to vector<1x16xf32>
    %151 = arith.addf %149, %150 : vector<1x16xf32>
    %152 = math.rsqrt %151 : vector<1x16xf32>
    %153 = vector.broadcast %152 : vector<1x16xf32> to vector<32x16xf32>
    %154 = arith.mulf %144, %153 : vector<32x16xf32>
    %c0_68 = arith.constant 0 : index
    %c0_69 = arith.constant 0 : index
    %155 = vector.load %arg15[%c0_68, %c0_69] : memref<32x1xf32, #tpu.memory_space<vmem>>, vector<32x1xf32>
    %156 = vector.broadcast %155 : vector<32x1xf32> to vector<32x16xf32>
    %157 = arith.mulf %154, %156 : vector<32x16xf32>
    %c0_70 = arith.constant 0 : index
    %c0_71 = arith.constant 0 : index
    %158 = vector.load %arg16[%c0_70, %c0_71] : memref<32x1xf32, #tpu.memory_space<vmem>>, vector<32x1xf32>
    %159 = vector.broadcast %158 : vector<32x1xf32> to vector<32x16xf32>
    %160 = arith.addf %157, %159 : vector<32x16xf32>
    %c0_72 = arith.constant 0 : index
    %c0_73 = arith.constant 0 : index
    %161 = vector.load %arg17[%c0_72, %c0_73] : memref<64x32xf32, #tpu.memory_space<vmem>>, vector<64x32xf32>
    %cst_74 = arith.constant dense<0.000000e+00> : vector<64x16xf32>
    %162 = tpu.matmul %161, %160, %cst_74 {dimension_numbers = #tpu.dot_dimension_numbers<[1], [0], [0], [1], [0, 0, 1, 1], [], []>} : vector<64x32xf32>, vector<32x16xf32>, vector<64x16xf32> -> vector<64x16xf32>
    %c0_75 = arith.constant 0 : index
    %c0_76 = arith.constant 0 : index
    %163 = vector.load %arg18[%c0_75, %c0_76] : memref<64x1xf32, #tpu.memory_space<vmem>>, vector<64x1xf32>
    %164 = vector.broadcast %163 : vector<64x1xf32> to vector<64x16xf32>
    %165 = arith.addf %162, %164 : vector<64x16xf32>
    %166 = vector.extract_strided_slice %165 {offsets = [0, 0], sizes = [32, 16], strides = [1, 1]} : vector<64x16xf32> to vector<32x16xf32>
    %167 = vector.extract_strided_slice %165 {offsets = [32, 0], sizes = [32, 16], strides = [1, 1]} : vector<64x16xf32> to vector<32x16xf32>
    %168 = arith.mulf %166, %167 : vector<32x16xf32>
    %c0_77 = arith.constant 0 : index
    %c0_78 = arith.constant 0 : index
    %169 = vector.load %arg19[%c0_77, %c0_78] : memref<32x32xf32, #tpu.memory_space<vmem>>, vector<32x32xf32>
    %cst_79 = arith.constant dense<0.000000e+00> : vector<32x16xf32>
    %170 = tpu.matmul %169, %168, %cst_79 {dimension_numbers = #tpu.dot_dimension_numbers<[1], [0], [0], [1], [0, 0, 1, 1], [], []>} : vector<32x32xf32>, vector<32x16xf32>, vector<32x16xf32> -> vector<32x16xf32>
    %c0_80 = arith.constant 0 : index
    %c0_81 = arith.constant 0 : index
    %171 = vector.load %arg20[%c0_80, %c0_81] : memref<32x1xf32, #tpu.memory_space<vmem>>, vector<32x1xf32>
    %172 = vector.broadcast %171 : vector<32x1xf32> to vector<32x16xf32>
    %173 = arith.addf %170, %172 : vector<32x16xf32>
    %c0_82 = arith.constant 0 : index
    %c0_83 = arith.constant 0 : index
    %174 = vector.load %arg21[%c0_82, %c0_83] : memref<32x1xf32, #tpu.memory_space<vmem>>, vector<32x1xf32>
    %175 = vector.broadcast %174 : vector<32x1xf32> to vector<32x16xf32>
    %176 = arith.mulf %173, %175 : vector<32x16xf32>
    %177 = arith.addf %138, %176 : vector<32x16xf32>
    %178 = arith.truncf %177 : vector<32x16xf32> to vector<32x16xbf16>
    %c0_84 = arith.constant 0 : index
    %c0_85 = arith.constant 0 : index
    %c0_86 = arith.constant 0 : index
    %179 = vector.load %arg22[%c0_84, %c0_85, %c0_86] : memref<1x32x16xbf16, #tpu.memory_space<vmem>>, vector<1x32x16xbf16>
    %180 = vector.shape_cast %179 : vector<1x32x16xbf16> to vector<32x16xbf16>
    %181 = vector.shape_cast %178 : vector<32x16xbf16> to vector<1x32x16xbf16>
    tpu.vector_store %arg22[%c0_84, %c0_85, %c0_86], %181 {strides = array<i32>} : memref<1x32x16xbf16, #tpu.memory_space<vmem>>, vector<1x32x16xbf16>,
    return
  }
  func.func @transform_0(%arg0: i32) -> (i32, i32, i32) {
    %c0_i32 = arith.constant 0 : i32
    %c0_i32_0 = arith.constant 0 : i32
    %c0_i32_1 = arith.constant 0 : i32
    return %arg0, %c0_i32, %c0_i32_0 : i32, i32, i32
  }
  func.func @transform_1(%arg0: i32) -> (i32, i32) {
    %c0_i32 = arith.constant 0 : i32
    %c0_i32_0 = arith.constant 0 : i32
    %c0_i32_1 = arith.constant 0 : i32
    return %c0_i32, %c0_i32_0 : i32, i32
  }
  func.func @transform_2(%arg0: i32) -> (i32, i32) {
    %c0_i32 = arith.constant 0 : i32
    %c0_i32_0 = arith.constant 0 : i32
    %c0_i32_1 = arith.constant 0 : i32
    return %c0_i32, %c0_i32_0 : i32, i32
  }
  func.func @transform_3(%arg0: i32) -> (i32, i32) {
    %c0_i32 = arith.constant 0 : i32
    %c0_i32_0 = arith.constant 0 : i32
    %c0_i32_1 = arith.constant 0 : i32
    return %c0_i32, %c0_i32_0 : i32, i32
  }
  func.func @transform_4(%arg0: i32) -> (i32, i32) {
    %c0_i32 = arith.constant 0 : i32
    %c0_i32_0 = arith.constant 0 : i32
    %c0_i32_1 = arith.constant 0 : i32
    return %c0_i32, %c0_i32_0 : i32, i32
  }
  func.func @transform_5(%arg0: i32) -> (i32, i32) {
    %c0_i32 = arith.constant 0 : i32
    %c0_i32_0 = arith.constant 0 : i32
    %c0_i32_1 = arith.constant 0 : i32
    return %c0_i32, %c0_i32_0 : i32, i32
  }
  func.func @transform_6(%arg0: i32) -> (i32, i32) {
    %c0_i32 = arith.constant 0 : i32
    %c0_i32_0 = arith.constant 0 : i32
    %c0_i32_1 = arith.constant 0 : i32
    return %c0_i32, %c0_i32_0 : i32, i32
  }
  func.func @transform_7(%arg0: i32) -> (i32, i32, i32) {
    %c0_i32 = arith.constant 0 : i32
    %c0_i32_0 = arith.constant 0 : i32
    %c0_i32_1 = arith.constant 0 : i32
    %c0_i32_2 = arith.constant 0 : i32
    return %c0_i32, %c0_i32_0, %c0_i32_1 : i32, i32, i32
  }
  func.func @transform_8(%arg0: i32) -> (i32, i32) {
    %c0_i32 = arith.constant 0 : i32
    %c0_i32_0 = arith.constant 0 : i32
    %c0_i32_1 = arith.constant 0 : i32
    return %c0_i32, %c0_i32_0 : i32, i32
  }
  func.func @transform_9(%arg0: i32) -> (i32, i32) {
    %c0_i32 = arith.constant 0 : i32
    %c0_i32_0 = arith.constant 0 : i32
    %c0_i32_1 = arith.constant 0 : i32
    return %c0_i32, %c0_i32_0 : i32, i32
  }
  func.func @transform_10(%arg0: i32) -> (i32, i32) {
    %c0_i32 = arith.constant 0 : i32
    %c0_i32_0 = arith.constant 0 : i32
    %c0_i32_1 = arith.constant 0 : i32
    return %c0_i32, %c0_i32_0 : i32, i32
  }
  func.func @transform_11(%arg0: i32) -> (i32, i32) {
    %c0_i32 = arith.constant 0 : i32
    %c0_i32_0 = arith.constant 0 : i32
    %c0_i32_1 = arith.constant 0 : i32
    return %c0_i32, %c0_i32_0 : i32, i32
  }
  func.func @transform_12(%arg0: i32) -> (i32, i32) {
    %c0_i32 = arith.constant 0 : i32
    %c0_i32_0 = arith.constant 0 : i32
    %c0_i32_1 = arith.constant 0 : i32
    return %c0_i32, %c0_i32_0 : i32, i32
  }
  func.func @transform_13(%arg0: i32) -> (i32, i32) {
    %c0_i32 = arith.constant 0 : i32
    %c0_i32_0 = arith.constant 0 : i32
    %c0_i32_1 = arith.constant 0 : i32
    return %c0_i32, %c0_i32_0 : i32, i32
  }
  func.func @transform_14(%arg0: i32) -> (i32, i32) {
    %c0_i32 = arith.constant 0 : i32
    %c0_i32_0 = arith.constant 0 : i32
    %c0_i32_1 = arith.constant 0 : i32
    return %c0_i32, %c0_i32_0 : i32, i32
  }
  func.func @transform_15(%arg0: i32) -> (i32, i32) {
    %c0_i32 = arith.constant 0 : i32
    %c0_i32_0 = arith.constant 0 : i32
    %c0_i32_1 = arith.constant 0 : i32
    return %c0_i32, %c0_i32_0 : i32, i32
  }
  func.func @transform_16(%arg0: i32) -> (i32, i32) {
    %c0_i32 = arith.constant 0 : i32
    %c0_i32_0 = arith.constant 0 : i32
    %c0_i32_1 = arith.constant 0 : i32
    return %c0_i32, %c0_i32_0 : i32, i32
  }
  func.func @transform_17(%arg0: i32) -> (i32, i32) {
    %c0_i32 = arith.constant 0 : i32
    %c0_i32_0 = arith.constant 0 : i32
    %c0_i32_1 = arith.constant 0 : i32
    return %c0_i32, %c0_i32_0 : i32, i32
  }
  func.func @transform_18(%arg0: i32) -> (i32, i32) {
    %c0_i32 = arith.constant 0 : i32
    %c0_i32_0 = arith.constant 0 : i32
    %c0_i32_1 = arith.constant 0 : i32
    return %c0_i32, %c0_i32_0 : i32, i32
  }
  func.func @transform_19(%arg0: i32) -> (i32, i32) {
    %c0_i32 = arith.constant 0 : i32
    %c0_i32_0 = arith.constant 0 : i32
    %c0_i32_1 = arith.constant 0 : i32
    return %c0_i32, %c0_i32_0 : i32, i32
  }
  func.func @transform_20(%arg0: i32) -> (i32, i32) {
    %c0_i32 = arith.constant 0 : i32
    %c0_i32_0 = arith.constant 0 : i32
    %c0_i32_1 = arith.constant 0 : i32
    return %c0_i32, %c0_i32_0 : i32, i32
  }
  func.func @transform_21(%arg0: i32) -> (i32, i32, i32) {
    %c0_i32 = arith.constant 0 : i32
    %c0_i32_0 = arith.constant 0 : i32
    %c0_i32_1 = arith.constant 0 : i32
    return %arg0, %c0_i32, %c0_i32_0 : i32, i32, i32
  }
}

module attributes {stable_mosaic.version = 11 : i64} {
  func.func @_matmul_kernel(%arg0: i32, %arg1: memref<1x16x64xbf16, #tpu.memory_space<vmem>>, %arg2: memref<32x16xf32, #tpu.memory_space<vmem>>, %arg3: memref<1x32x64xbf16, #tpu.memory_space<vmem>>) attributes {dimension_semantics = [#tpu.dimension_semantics<parallel>], iteration_bounds = array<i64: 2>, scalar_prefetch = 0 : i64, scratch_operands = 0 : i64, tpu.core_type = #tpu.core_type<tc>, window_params = [{transform_indices = @transform_0, window_bounds = array<i64: 1, 16, 64>}, {pipeline_mode = #tpu.pipeline_mode<synchronous>, transform_indices = @transform_1, window_bounds = array<i64: 32, 16>}, {transform_indices = @transform_2, window_bounds = array<i64: 1, 32, 64>}]} {
    %c0 = arith.constant 0 : index
    %c0_0 = arith.constant 0 : index
    %0 = vector.load %arg2[%c0, %c0_0] : memref<32x16xf32, #tpu.memory_space<vmem>>, vector<32x16xf32>
    %c0_1 = arith.constant 0 : index
    %c0_2 = arith.constant 0 : index
    %c0_3 = arith.constant 0 : index
    %1 = vector.load %arg1[%c0_1, %c0_2, %c0_3] : memref<1x16x64xbf16, #tpu.memory_space<vmem>>, vector<1x16x64xbf16>
    %2 = vector.shape_cast %1 : vector<1x16x64xbf16> to vector<16x64xbf16>
    %3 = arith.extf %2 : vector<16x64xbf16> to vector<16x64xf32>
    %cst = arith.constant dense<0.000000e+00> : vector<32x64xf32>
    %4 = tpu.matmul %0, %3, %cst {dimension_numbers = #tpu.dot_dimension_numbers<[1], [0], [0], [1], [0, 0, 1, 1], [], []>} : vector<32x16xf32>, vector<16x64xf32>, vector<32x64xf32> -> vector<32x64xf32>
    %5 = arith.truncf %4 : vector<32x64xf32> to vector<32x64xbf16>
    %c0_4 = arith.constant 0 : index
    %c0_5 = arith.constant 0 : index
    %c0_6 = arith.constant 0 : index
    %6 = vector.load %arg3[%c0_4, %c0_5, %c0_6] : memref<1x32x64xbf16, #tpu.memory_space<vmem>>, vector<1x32x64xbf16>
    %7 = vector.shape_cast %6 : vector<1x32x64xbf16> to vector<32x64xbf16>
    %8 = vector.shape_cast %5 : vector<32x64xbf16> to vector<1x32x64xbf16>
    tpu.vector_store %arg3[%c0_4, %c0_5, %c0_6], %8 {strides = array<i32>} : memref<1x32x64xbf16, #tpu.memory_space<vmem>>, vector<1x32x64xbf16>,
    return
  }
  func.func @transform_0(%arg0: i32) -> (i32, i32, i32) {
    %c0_i32 = arith.constant 0 : i32
    %c0_i32_0 = arith.constant 0 : i32
    %c0_i32_1 = arith.constant 0 : i32
    return %arg0, %c0_i32, %c0_i32_0 : i32, i32, i32
  }
  func.func @transform_1(%arg0: i32) -> (i32, i32) {
    %c0_i32 = arith.constant 0 : i32
    %c0_i32_0 = arith.constant 0 : i32
    %c0_i32_1 = arith.constant 0 : i32
    return %c0_i32, %c0_i32_0 : i32, i32
  }
  func.func @transform_2(%arg0: i32) -> (i32, i32, i32) {
    %c0_i32 = arith.constant 0 : i32
    %c0_i32_0 = arith.constant 0 : i32
    %c0_i32_1 = arith.constant 0 : i32
    return %arg0, %c0_i32, %c0_i32_0 : i32, i32, i32
  }
}

module attributes {stable_mosaic.version = 11 : i64} {
  func.func @_naf_block_kernel(%arg0: i32, %arg1: memref<1x16x64xbf16, #tpu.memory_space<vmem>>, %arg2: memref<1x16x64xbf16, #tpu.memory_space<vmem>>, %arg3: memref<1x64xf32, #tpu.memory_space<vmem>>, %arg4: memref<1x64xf32, #tpu.memory_space<vmem>>, %arg5: memref<16x1xf32, #tpu.memory_space<vmem>>, %arg6: memref<16x1xf32, #tpu.memory_space<vmem>>, %arg7: memref<32x16xf32, #tpu.memory_space<vmem>>, %arg8: memref<32x1xf32, #tpu.memory_space<vmem>>, %arg9: memref<9x32x1xf32, #tpu.memory_space<vmem>>, %arg10: memref<32x1xf32, #tpu.memory_space<vmem>>, %arg11: memref<16x16xf32, #tpu.memory_space<vmem>>, %arg12: memref<16x1xf32, #tpu.memory_space<vmem>>, %arg13: memref<16x16xf32, #tpu.memory_space<vmem>>, %arg14: memref<16x1xf32, #tpu.memory_space<vmem>>, %arg15: memref<16x1xf32, #tpu.memory_space<vmem>>, %arg16: memref<16x1xf32, #tpu.memory_space<vmem>>, %arg17: memref<16x1xf32, #tpu.memory_space<vmem>>, %arg18: memref<32x16xf32, #tpu.memory_space<vmem>>, %arg19: memref<32x1xf32, #tpu.memory_space<vmem>>, %arg20: memref<16x16xf32, #tpu.memory_space<vmem>>, %arg21: memref<16x1xf32, #tpu.memory_space<vmem>>, %arg22: memref<16x1xf32, #tpu.memory_space<vmem>>, %arg23: memref<1x16x64xbf16, #tpu.memory_space<vmem>>) attributes {dimension_semantics = [#tpu.dimension_semantics<parallel>], iteration_bounds = array<i64: 2>, scalar_prefetch = 0 : i64, scratch_operands = 0 : i64, tpu.core_type = #tpu.core_type<tc>, window_params = [{transform_indices = @transform_0, window_bounds = array<i64: 1, 16, 64>}, {transform_indices = @transform_1, window_bounds = array<i64: 1, 16, 64>}, {pipeline_mode = #tpu.pipeline_mode<synchronous>, transform_indices = @transform_2, window_bounds = array<i64: 1, 64>}, {pipeline_mode = #tpu.pipeline_mode<synchronous>, transform_indices = @transform_3, window_bounds = array<i64: 1, 64>}, {pipeline_mode = #tpu.pipeline_mode<synchronous>, transform_indices = @transform_4, window_bounds = array<i64: 16, 1>}, {pipeline_mode = #tpu.pipeline_mode<synchronous>, transform_indices = @transform_5, window_bounds = array<i64: 16, 1>}, {pipeline_mode = #tpu.pipeline_mode<synchronous>, transform_indices = @transform_6, window_bounds = array<i64: 32, 16>}, {pipeline_mode = #tpu.pipeline_mode<synchronous>, transform_indices = @transform_7, window_bounds = array<i64: 32, 1>}, {pipeline_mode = #tpu.pipeline_mode<synchronous>, transform_indices = @transform_8, window_bounds = array<i64: 9, 32, 1>}, {pipeline_mode = #tpu.pipeline_mode<synchronous>, transform_indices = @transform_9, window_bounds = array<i64: 32, 1>}, {pipeline_mode = #tpu.pipeline_mode<synchronous>, transform_indices = @transform_10, window_bounds = array<i64: 16, 16>}, {pipeline_mode = #tpu.pipeline_mode<synchronous>, transform_indices = @transform_11, window_bounds = array<i64: 16, 1>}, {pipeline_mode = #tpu.pipeline_mode<synchronous>, transform_indices = @transform_12, window_bounds = array<i64: 16, 16>}, {pipeline_mode = #tpu.pipeline_mode<synchronous>, transform_indices = @transform_13, window_bounds = array<i64: 16, 1>}, {pipeline_mode = #tpu.pipeline_mode<synchronous>, transform_indices = @transform_14, window_bounds = array<i64: 16, 1>}, {pipeline_mode = #tpu.pipeline_mode<synchronous>, transform_indices = @transform_15, window_bounds = array<i64: 16, 1>}, {pipeline_mode = #tpu.pipeline_mode<synchronous>, transform_indices = @transform_16, window_bounds = array<i64: 16, 1>}, {pipeline_mode = #tpu.pipeline_mode<synchronous>, transform_indices = @transform_17, window_bounds = array<i64: 32, 16>}, {pipeline_mode = #tpu.pipeline_mode<synchronous>, transform_indices = @transform_18, window_bounds = array<i64: 32, 1>}, {pipeline_mode = #tpu.pipeline_mode<synchronous>, transform_indices = @transform_19, window_bounds = array<i64: 16, 16>}, {pipeline_mode = #tpu.pipeline_mode<synchronous>, transform_indices = @transform_20, window_bounds = array<i64: 16, 1>}, {pipeline_mode = #tpu.pipeline_mode<synchronous>, transform_indices = @transform_21, window_bounds = array<i64: 16, 1>}, {transform_indices = @transform_22, window_bounds = array<i64: 1, 16, 64>}]} {
    %c0 = arith.constant 0 : index
    %c0_0 = arith.constant 0 : index
    %c0_1 = arith.constant 0 : index
    %0 = vector.load %arg1[%c0, %c0_0, %c0_1] : memref<1x16x64xbf16, #tpu.memory_space<vmem>>, vector<1x16x64xbf16>
    %1 = vector.shape_cast %0 : vector<1x16x64xbf16> to vector<16x64xbf16>
    %2 = arith.extf %1 : vector<16x64xbf16> to vector<16x64xf32>
    %c0_2 = arith.constant 0 : index
    %c0_3 = arith.constant 0 : index
    %c0_4 = arith.constant 0 : index
    %3 = vector.load %arg2[%c0_2, %c0_3, %c0_4] : memref<1x16x64xbf16, #tpu.memory_space<vmem>>, vector<1x16x64xbf16>
    %4 = vector.shape_cast %3 : vector<1x16x64xbf16> to vector<16x64xbf16>
    %5 = arith.extf %4 : vector<16x64xbf16> to vector<16x64xf32>
    %6 = arith.addf %2, %5 : vector<16x64xf32>
    %c0_5 = arith.constant 0 : index
    %c0_6 = arith.constant 0 : index
    %7 = vector.load %arg3[%c0_5, %c0_6] : memref<1x64xf32, #tpu.memory_space<vmem>>, vector<1x64xf32>
    %c0_7 = arith.constant 0 : index
    %c0_8 = arith.constant 0 : index
    %8 = vector.load %arg4[%c0_7, %c0_8] : memref<1x64xf32, #tpu.memory_space<vmem>>, vector<1x64xf32>
    %cst = arith.constant dense<0.000000e+00> : vector<64xf32>
    %9 = vector.multi_reduction <add>, %6, %cst [0] : vector<16x64xf32> to vector<64xf32>
    %10 = vector.shape_cast %9 : vector<64xf32> to vector<1x64xf32>
    %cst_9 = arith.constant 1.600000e+01 : f32
    %11 = vector.broadcast %cst_9 : f32 to vector<1x64xf32>
    %12 = arith.divf %10, %11 : vector<1x64xf32>
    %13 = vector.broadcast %12 : vector<1x64xf32> to vector<16x64xf32>
    %14 = arith.subf %6, %13 : vector<16x64xf32>
    %15 = arith.mulf %14, %14 : vector<16x64xf32>
    %cst_10 = arith.constant dense<0.000000e+00> : vector<64xf32>
    %16 = vector.multi_reduction <add>, %15, %cst_10 [0] : vector<16x64xf32> to vector<64xf32>
    %17 = vector.shape_cast %16 : vector<64xf32> to vector<1x64xf32>
    %cst_11 = arith.constant 1.600000e+01 : f32
    %18 = vector.broadcast %cst_11 : f32 to vector<1x64xf32>
    %19 = arith.divf %17, %18 : vector<1x64xf32>
    %cst_12 = arith.constant 9.99999997E-7 : f32
    %20 = vector.broadcast %cst_12 : f32 to vector<1x64xf32>
    %21 = arith.addf %19, %20 : vector<1x64xf32>
    %22 = math.rsqrt %21 : vector<1x64xf32>
    %23 = vector.broadcast %22 : vector<1x64xf32> to vector<16x64xf32>
    %24 = arith.mulf %14, %23 : vector<16x64xf32>
    %c0_13 = arith.constant 0 : index
    %c0_14 = arith.constant 0 : index
    %25 = vector.load %arg5[%c0_13, %c0_14] : memref<16x1xf32, #tpu.memory_space<vmem>>, vector<16x1xf32>
    %26 = vector.broadcast %25 : vector<16x1xf32> to vector<16x64xf32>
    %27 = arith.mulf %24, %26 : vector<16x64xf32>
    %c0_15 = arith.constant 0 : index
    %c0_16 = arith.constant 0 : index
    %28 = vector.load %arg6[%c0_15, %c0_16] : memref<16x1xf32, #tpu.memory_space<vmem>>, vector<16x1xf32>
    %29 = vector.broadcast %28 : vector<16x1xf32> to vector<16x64xf32>
    %30 = arith.addf %27, %29 : vector<16x64xf32>
    %c0_17 = arith.constant 0 : index
    %c0_18 = arith.constant 0 : index
    %31 = vector.load %arg7[%c0_17, %c0_18] : memref<32x16xf32, #tpu.memory_space<vmem>>, vector<32x16xf32>
    %cst_19 = arith.constant dense<0.000000e+00> : vector<32x64xf32>
    %32 = tpu.matmul %31, %30, %cst_19 {dimension_numbers = #tpu.dot_dimension_numbers<[1], [0], [0], [1], [0, 0, 1, 1], [], []>} : vector<32x16xf32>, vector<16x64xf32>, vector<32x64xf32> -> vector<32x64xf32>
    %c0_20 = arith.constant 0 : index
    %c0_21 = arith.constant 0 : index
    %33 = vector.load %arg8[%c0_20, %c0_21] : memref<32x1xf32, #tpu.memory_space<vmem>>, vector<32x1xf32>
    %34 = vector.broadcast %33 : vector<32x1xf32> to vector<32x64xf32>
    %35 = arith.addf %32, %34 : vector<32x64xf32>
    %cst_22 = arith.constant 0.000000e+00 : f32
    %36 = vector.broadcast %cst_22 : f32 to vector<32x64xf32>
    %cst_23 = arith.constant 0.000000e+00 : f32
    %37 = vector.broadcast %cst_23 : f32 to vector<32x9xf32>
    %38 = vector.extract_strided_slice %35 {offsets = [0, 0], sizes = [32, 55], strides = [1, 1]} : vector<32x64xf32> to vector<32x55xf32>
    %39 = tpu.concatenate %37, %38 in 1 : vector<32x9xf32>, vector<32x55xf32> -> vector<32x64xf32>
    %40 = vector.broadcast %7 : vector<1x64xf32> to vector<32x64xf32>
    %41 = arith.mulf %39, %40 : vector<32x64xf32>
    %c0_24 = arith.constant 0 : index
    %c0_25 = arith.constant 0 : index
    %c0_26 = arith.constant 0 : index
    %42 = vector.load %arg9[%c0_24, %c0_25, %c0_26] : memref<9x32x1xf32, #tpu.memory_space<vmem>>, vector<1x32x1xf32>
    %43 = vector.shape_cast %42 : vector<1x32x1xf32> to vector<32x1xf32>
    %44 = vector.broadcast %43 : vector<32x1xf32> to vector<32x64xf32>
    %45 = arith.mulf %41, %44 : vector<32x64xf32>
    %46 = arith.addf %36, %45 : vector<32x64xf32>
    %cst_27 = arith.constant 0.000000e+00 : f32
    %47 = vector.broadcast %cst_27 : f32 to vector<32x8xf32>
    %48 = vector.extract_strided_slice %35 {offsets = [0, 0], sizes = [32, 56], strides = [1, 1]} : vector<32x64xf32> to vector<32x56xf32>
    %49 = tpu.concatenate %47, %48 in 1 : vector<32x8xf32>, vector<32x56xf32> -> vector<32x64xf32>
    %c1 = arith.constant 1 : index
    %c0_28 = arith.constant 0 : index
    %c0_29 = arith.constant 0 : index
    %50 = vector.load %arg9[%c1, %c0_28, %c0_29] : memref<9x32x1xf32, #tpu.memory_space<vmem>>, vector<1x32x1xf32>
    %51 = vector.shape_cast %50 : vector<1x32x1xf32> to vector<32x1xf32>
    %52 = vector.broadcast %51 : vector<32x1xf32> to vector<32x64xf32>
    %53 = arith.mulf %49, %52 : vector<32x64xf32>
    %54 = arith.addf %46, %53 : vector<32x64xf32>
    %cst_30 = arith.constant 0.000000e+00 : f32
    %55 = vector.broadcast %cst_30 : f32 to vector<32x7xf32>
    %56 = vector.extract_strided_slice %35 {offsets = [0, 0], sizes = [32, 57], strides = [1, 1]} : vector<32x64xf32> to vector<32x57xf32>
    %57 = tpu.concatenate %55, %56 in 1 : vector<32x7xf32>, vector<32x57xf32> -> vector<32x64xf32>
    %58 = vector.broadcast %8 : vector<1x64xf32> to vector<32x64xf32>
    %59 = arith.mulf %57, %58 : vector<32x64xf32>
    %c2 = arith.constant 2 : index
    %c0_31 = arith.constant 0 : index
    %c0_32 = arith.constant 0 : index
    %60 = vector.load %arg9[%c2, %c0_31, %c0_32] : memref<9x32x1xf32, #tpu.memory_space<vmem>>, vector<1x32x1xf32>
    %61 = vector.shape_cast %60 : vector<1x32x1xf32> to vector<32x1xf32>
    %62 = vector.broadcast %61 : vector<32x1xf32> to vector<32x64xf32>
    %63 = arith.mulf %59, %62 : vector<32x64xf32>
    %64 = arith.addf %54, %63 : vector<32x64xf32>
    %cst_33 = arith.constant 0.000000e+00 : f32
    %65 = vector.broadcast %cst_33 : f32 to vector<32x1xf32>
    %66 = vector.extract_strided_slice %35 {offsets = [0, 0], sizes = [32, 63], strides = [1, 1]} : vector<32x64xf32> to vector<32x63xf32>
    %67 = tpu.concatenate %65, %66 in 1 : vector<32x1xf32>, vector<32x63xf32> -> vector<32x64xf32>
    %68 = vector.broadcast %7 : vector<1x64xf32> to vector<32x64xf32>
    %69 = arith.mulf %67, %68 : vector<32x64xf32>
    %c3 = arith.constant 3 : index
    %c0_34 = arith.constant 0 : index
    %c0_35 = arith.constant 0 : index
    %70 = vector.load %arg9[%c3, %c0_34, %c0_35] : memref<9x32x1xf32, #tpu.memory_space<vmem>>, vector<1x32x1xf32>
    %71 = vector.shape_cast %70 : vector<1x32x1xf32> to vector<32x1xf32>
    %72 = vector.broadcast %71 : vector<32x1xf32> to vector<32x64xf32>
    %73 = arith.mulf %69, %72 : vector<32x64xf32>
    %74 = arith.addf %64, %73 : vector<32x64xf32>
    %c4 = arith.constant 4 : index
    %c0_36 = arith.constant 0 : index
    %c0_37 = arith.constant 0 : index
    %75 = vector.load %arg9[%c4, %c0_36, %c0_37] : memref<9x32x1xf32, #tpu.memory_space<vmem>>, vector<1x32x1xf32>
    %76 = vector.shape_cast %75 : vector<1x32x1xf32> to vector<32x1xf32>
    %77 = vector.broadcast %76 : vector<32x1xf32> to vector<32x64xf32>
    %78 = arith.mulf %35, %77 : vector<32x64xf32>
    %79 = arith.addf %74, %78 : vector<32x64xf32>
    %cst_38 = arith.constant 0.000000e+00 : f32
    %80 = vector.broadcast %cst_38 : f32 to vector<32x1xf32>
    %81 = vector.extract_strided_slice %35 {offsets = [0, 1], sizes = [32, 63], strides = [1, 1]} : vector<32x64xf32> to vector<32x63xf32>
    %82 = tpu.concatenate %81, %80 in 1 : vector<32x63xf32>, vector<32x1xf32> -> vector<32x64xf32>
    %83 = vector.broadcast %8 : vector<1x64xf32> to vector<32x64xf32>
    %84 = arith.mulf %82, %83 : vector<32x64xf32>
    %c5 = arith.constant 5 : index
    %c0_39 = arith.constant 0 : index
    %c0_40 = arith.constant 0 : index
    %85 = vector.load %arg9[%c5, %c0_39, %c0_40] : memref<9x32x1xf32, #tpu.memory_space<vmem>>, vector<1x32x1xf32>
    %86 = vector.shape_cast %85 : vector<1x32x1xf32> to vector<32x1xf32>
    %87 = vector.broadcast %86 : vector<32x1xf32> to vector<32x64xf32>
    %88 = arith.mulf %84, %87 : vector<32x64xf32>
    %89 = arith.addf %79, %88 : vector<32x64xf32>
    %cst_41 = arith.constant 0.000000e+00 : f32
    %90 = vector.broadcast %cst_41 : f32 to vector<32x7xf32>
    %91 = vector.extract_strided_slice %35 {offsets = [0, 7], sizes = [32, 57], strides = [1, 1]} : vector<32x64xf32> to vector<32x57xf32>
    %92 = tpu.concatenate %91, %90 in 1 : vector<32x57xf32>, vector<32x7xf32> -> vector<32x64xf32>
    %93 = vector.broadcast %7 : vector<1x64xf32> to vector<32x64xf32>
    %94 = arith.mulf %92, %93 : vector<32x64xf32>
    %c6 = arith.constant 6 : index
    %c0_42 = arith.constant 0 : index
    %c0_43 = arith.constant 0 : index
    %95 = vector.load %arg9[%c6, %c0_42, %c0_43] : memref<9x32x1xf32, #tpu.memory_space<vmem>>, vector<1x32x1xf32>
    %96 = vector.shape_cast %95 : vector<1x32x1xf32> to vector<32x1xf32>
    %97 = vector.broadcast %96 : vector<32x1xf32> to vector<32x64xf32>
    %98 = arith.mulf %94, %97 : vector<32x64xf32>
    %99 = arith.addf %89, %98 : vector<32x64xf32>
    %cst_44 = arith.constant 0.000000e+00 : f32
    %100 = vector.broadcast %cst_44 : f32 to vector<32x8xf32>
    %101 = vector.extract_strided_slice %35 {offsets = [0, 8], sizes = [32, 56], strides = [1, 1]} : vector<32x64xf32> to vector<32x56xf32>
    %102 = tpu.concatenate %101, %100 in 1 : vector<32x56xf32>, vector<32x8xf32> -> vector<32x64xf32>
    %c7 = arith.constant 7 : index
    %c0_45 = arith.constant 0 : index
    %c0_46 = arith.constant 0 : index
    %103 = vector.load %arg9[%c7, %c0_45, %c0_46] : memref<9x32x1xf32, #tpu.memory_space<vmem>>, vector<1x32x1xf32>
    %104 = vector.shape_cast %103 : vector<1x32x1xf32> to vector<32x1xf32>
    %105 = vector.broadcast %104 : vector<32x1xf32> to vector<32x64xf32>
    %106 = arith.mulf %102, %105 : vector<32x64xf32>
    %107 = arith.addf %99, %106 : vector<32x64xf32>
    %cst_47 = arith.constant 0.000000e+00 : f32
    %108 = vector.broadcast %cst_47 : f32 to vector<32x9xf32>
    %109 = vector.extract_strided_slice %35 {offsets = [0, 9], sizes = [32, 55], strides = [1, 1]} : vector<32x64xf32> to vector<32x55xf32>
    %110 = tpu.concatenate %109, %108 in 1 : vector<32x55xf32>, vector<32x9xf32> -> vector<32x64xf32>
    %111 = vector.broadcast %8 : vector<1x64xf32> to vector<32x64xf32>
    %112 = arith.mulf %110, %111 : vector<32x64xf32>
    %c8 = arith.constant 8 : index
    %c0_48 = arith.constant 0 : index
    %c0_49 = arith.constant 0 : index
    %113 = vector.load %arg9[%c8, %c0_48, %c0_49] : memref<9x32x1xf32, #tpu.memory_space<vmem>>, vector<1x32x1xf32>
    %114 = vector.shape_cast %113 : vector<1x32x1xf32> to vector<32x1xf32>
    %115 = vector.broadcast %114 : vector<32x1xf32> to vector<32x64xf32>
    %116 = arith.mulf %112, %115 : vector<32x64xf32>
    %117 = arith.addf %107, %116 : vector<32x64xf32>
    %c0_50 = arith.constant 0 : index
    %c0_51 = arith.constant 0 : index
    %118 = vector.load %arg10[%c0_50, %c0_51] : memref<32x1xf32, #tpu.memory_space<vmem>>, vector<32x1xf32>
    %119 = vector.broadcast %118 : vector<32x1xf32> to vector<32x64xf32>
    %120 = arith.addf %117, %119 : vector<32x64xf32>
    %121 = vector.extract_strided_slice %120 {offsets = [0, 0], sizes = [16, 64], strides = [1, 1]} : vector<32x64xf32> to vector<16x64xf32>
    %122 = vector.extract_strided_slice %120 {offsets = [16, 0], sizes = [16, 64], strides = [1, 1]} : vector<32x64xf32> to vector<16x64xf32>
    %123 = arith.mulf %121, %122 : vector<16x64xf32>
    %cst_52 = arith.constant dense<0.000000e+00> : vector<16xf32>
    %124 = vector.multi_reduction <add>, %123, %cst_52 [1] : vector<16x64xf32> to vector<16xf32>
    %125 = vector.shape_cast %124 : vector<16xf32> to vector<16x1xf32>
    %cst_53 = arith.constant 6.400000e+01 : f32
    %126 = vector.broadcast %cst_53 : f32 to vector<16x1xf32>
    %127 = arith.divf %125, %126 : vector<16x1xf32>
    %c0_54 = arith.constant 0 : index
    %c0_55 = arith.constant 0 : index
    %128 = vector.load %arg11[%c0_54, %c0_55] : memref<16x16xf32, #tpu.memory_space<vmem>>, vector<16x16xf32>
    %cst_56 = arith.constant dense<0.000000e+00> : vector<16x1xf32>
    %129 = tpu.matmul %128, %127, %cst_56 {dimension_numbers = #tpu.dot_dimension_numbers<[1], [0], [0], [1], [0, 0, 1, 1], [], []>} : vector<16x16xf32>, vector<16x1xf32>, vector<16x1xf32> -> vector<16x1xf32>
    %c0_57 = arith.constant 0 : index
    %c0_58 = arith.constant 0 : index
    %130 = vector.load %arg12[%c0_57, %c0_58] : memref<16x1xf32, #tpu.memory_space<vmem>>, vector<16x1xf32>
    %131 = arith.addf %129, %130 : vector<16x1xf32>
    %132 = vector.broadcast %131 : vector<16x1xf32> to vector<16x64xf32>
    %133 = arith.mulf %123, %132 : vector<16x64xf32>
    %c0_59 = arith.constant 0 : index
    %c0_60 = arith.constant 0 : index
    %134 = vector.load %arg13[%c0_59, %c0_60] : memref<16x16xf32, #tpu.memory_space<vmem>>, vector<16x16xf32>
    %cst_61 = arith.constant dense<0.000000e+00> : vector<16x64xf32>
    %135 = tpu.matmul %134, %133, %cst_61 {dimension_numbers = #tpu.dot_dimension_numbers<[1], [0], [0], [1], [0, 0, 1, 1], [], []>} : vector<16x16xf32>, vector<16x64xf32>, vector<16x64xf32> -> vector<16x64xf32>
    %c0_62 = arith.constant 0 : index
    %c0_63 = arith.constant 0 : index
    %136 = vector.load %arg14[%c0_62, %c0_63] : memref<16x1xf32, #tpu.memory_space<vmem>>, vector<16x1xf32>
    %137 = vector.broadcast %136 : vector<16x1xf32> to vector<16x64xf32>
    %138 = arith.addf %135, %137 : vector<16x64xf32>
    %c0_64 = arith.constant 0 : index
    %c0_65 = arith.constant 0 : index
    %139 = vector.load %arg15[%c0_64, %c0_65] : memref<16x1xf32, #tpu.memory_space<vmem>>, vector<16x1xf32>
    %140 = vector.broadcast %139 : vector<16x1xf32> to vector<16x64xf32>
    %141 = arith.mulf %138, %140 : vector<16x64xf32>
    %142 = arith.addf %6, %141 : vector<16x64xf32>
    %cst_66 = arith.constant dense<0.000000e+00> : vector<64xf32>
    %143 = vector.multi_reduction <add>, %142, %cst_66 [0] : vector<16x64xf32> to vector<64xf32>
    %144 = vector.shape_cast %143 : vector<64xf32> to vector<1x64xf32>
    %cst_67 = arith.constant 1.600000e+01 : f32
    %145 = vector.broadcast %cst_67 : f32 to vector<1x64xf32>
    %146 = arith.divf %144, %145 : vector<1x64xf32>
    %147 = vector.broadcast %146 : vector<1x64xf32> to vector<16x64xf32>
    %148 = arith.subf %142, %147 : vector<16x64xf32>
    %149 = arith.mulf %148, %148 : vector<16x64xf32>
    %cst_68 = arith.constant dense<0.000000e+00> : vector<64xf32>
    %150 = vector.multi_reduction <add>, %149, %cst_68 [0] : vector<16x64xf32> to vector<64xf32>
    %151 = vector.shape_cast %150 : vector<64xf32> to vector<1x64xf32>
    %cst_69 = arith.constant 1.600000e+01 : f32
    %152 = vector.broadcast %cst_69 : f32 to vector<1x64xf32>
    %153 = arith.divf %151, %152 : vector<1x64xf32>
    %cst_70 = arith.constant 9.99999997E-7 : f32
    %154 = vector.broadcast %cst_70 : f32 to vector<1x64xf32>
    %155 = arith.addf %153, %154 : vector<1x64xf32>
    %156 = math.rsqrt %155 : vector<1x64xf32>
    %157 = vector.broadcast %156 : vector<1x64xf32> to vector<16x64xf32>
    %158 = arith.mulf %148, %157 : vector<16x64xf32>
    %c0_71 = arith.constant 0 : index
    %c0_72 = arith.constant 0 : index
    %159 = vector.load %arg16[%c0_71, %c0_72] : memref<16x1xf32, #tpu.memory_space<vmem>>, vector<16x1xf32>
    %160 = vector.broadcast %159 : vector<16x1xf32> to vector<16x64xf32>
    %161 = arith.mulf %158, %160 : vector<16x64xf32>
    %c0_73 = arith.constant 0 : index
    %c0_74 = arith.constant 0 : index
    %162 = vector.load %arg17[%c0_73, %c0_74] : memref<16x1xf32, #tpu.memory_space<vmem>>, vector<16x1xf32>
    %163 = vector.broadcast %162 : vector<16x1xf32> to vector<16x64xf32>
    %164 = arith.addf %161, %163 : vector<16x64xf32>
    %c0_75 = arith.constant 0 : index
    %c0_76 = arith.constant 0 : index
    %165 = vector.load %arg18[%c0_75, %c0_76] : memref<32x16xf32, #tpu.memory_space<vmem>>, vector<32x16xf32>
    %cst_77 = arith.constant dense<0.000000e+00> : vector<32x64xf32>
    %166 = tpu.matmul %165, %164, %cst_77 {dimension_numbers = #tpu.dot_dimension_numbers<[1], [0], [0], [1], [0, 0, 1, 1], [], []>} : vector<32x16xf32>, vector<16x64xf32>, vector<32x64xf32> -> vector<32x64xf32>
    %c0_78 = arith.constant 0 : index
    %c0_79 = arith.constant 0 : index
    %167 = vector.load %arg19[%c0_78, %c0_79] : memref<32x1xf32, #tpu.memory_space<vmem>>, vector<32x1xf32>
    %168 = vector.broadcast %167 : vector<32x1xf32> to vector<32x64xf32>
    %169 = arith.addf %166, %168 : vector<32x64xf32>
    %170 = vector.extract_strided_slice %169 {offsets = [0, 0], sizes = [16, 64], strides = [1, 1]} : vector<32x64xf32> to vector<16x64xf32>
    %171 = vector.extract_strided_slice %169 {offsets = [16, 0], sizes = [16, 64], strides = [1, 1]} : vector<32x64xf32> to vector<16x64xf32>
    %172 = arith.mulf %170, %171 : vector<16x64xf32>
    %c0_80 = arith.constant 0 : index
    %c0_81 = arith.constant 0 : index
    %173 = vector.load %arg20[%c0_80, %c0_81] : memref<16x16xf32, #tpu.memory_space<vmem>>, vector<16x16xf32>
    %cst_82 = arith.constant dense<0.000000e+00> : vector<16x64xf32>
    %174 = tpu.matmul %173, %172, %cst_82 {dimension_numbers = #tpu.dot_dimension_numbers<[1], [0], [0], [1], [0, 0, 1, 1], [], []>} : vector<16x16xf32>, vector<16x64xf32>, vector<16x64xf32> -> vector<16x64xf32>
    %c0_83 = arith.constant 0 : index
    %c0_84 = arith.constant 0 : index
    %175 = vector.load %arg21[%c0_83, %c0_84] : memref<16x1xf32, #tpu.memory_space<vmem>>, vector<16x1xf32>
    %176 = vector.broadcast %175 : vector<16x1xf32> to vector<16x64xf32>
    %177 = arith.addf %174, %176 : vector<16x64xf32>
    %c0_85 = arith.constant 0 : index
    %c0_86 = arith.constant 0 : index
    %178 = vector.load %arg22[%c0_85, %c0_86] : memref<16x1xf32, #tpu.memory_space<vmem>>, vector<16x1xf32>
    %179 = vector.broadcast %178 : vector<16x1xf32> to vector<16x64xf32>
    %180 = arith.mulf %177, %179 : vector<16x64xf32>
    %181 = arith.addf %142, %180 : vector<16x64xf32>
    %182 = arith.truncf %181 : vector<16x64xf32> to vector<16x64xbf16>
    %c0_87 = arith.constant 0 : index
    %c0_88 = arith.constant 0 : index
    %c0_89 = arith.constant 0 : index
    %183 = vector.load %arg23[%c0_87, %c0_88, %c0_89] : memref<1x16x64xbf16, #tpu.memory_space<vmem>>, vector<1x16x64xbf16>
    %184 = vector.shape_cast %183 : vector<1x16x64xbf16> to vector<16x64xbf16>
    %185 = vector.shape_cast %182 : vector<16x64xbf16> to vector<1x16x64xbf16>
    tpu.vector_store %arg23[%c0_87, %c0_88, %c0_89], %185 {strides = array<i32>} : memref<1x16x64xbf16, #tpu.memory_space<vmem>>, vector<1x16x64xbf16>,
    return
  }
  func.func @transform_0(%arg0: i32) -> (i32, i32, i32) {
    %c0_i32 = arith.constant 0 : i32
    %c0_i32_0 = arith.constant 0 : i32
    %c0_i32_1 = arith.constant 0 : i32
    return %arg0, %c0_i32, %c0_i32_0 : i32, i32, i32
  }
  func.func @transform_1(%arg0: i32) -> (i32, i32, i32) {
    %c0_i32 = arith.constant 0 : i32
    %c0_i32_0 = arith.constant 0 : i32
    %c0_i32_1 = arith.constant 0 : i32
    return %arg0, %c0_i32, %c0_i32_0 : i32, i32, i32
  }
  func.func @transform_2(%arg0: i32) -> (i32, i32) {
    %c0_i32 = arith.constant 0 : i32
    %c0_i32_0 = arith.constant 0 : i32
    %c0_i32_1 = arith.constant 0 : i32
    return %c0_i32, %c0_i32_0 : i32, i32
  }
  func.func @transform_3(%arg0: i32) -> (i32, i32) {
    %c0_i32 = arith.constant 0 : i32
    %c0_i32_0 = arith.constant 0 : i32
    %c0_i32_1 = arith.constant 0 : i32
    return %c0_i32, %c0_i32_0 : i32, i32
  }
  func.func @transform_4(%arg0: i32) -> (i32, i32) {
    %c0_i32 = arith.constant 0 : i32
    %c0_i32_0 = arith.constant 0 : i32
    %c0_i32_1 = arith.constant 0 : i32
    return %c0_i32, %c0_i32_0 : i32, i32
  }
  func.func @transform_5(%arg0: i32) -> (i32, i32) {
    %c0_i32 = arith.constant 0 : i32
    %c0_i32_0 = arith.constant 0 : i32
    %c0_i32_1 = arith.constant 0 : i32
    return %c0_i32, %c0_i32_0 : i32, i32
  }
  func.func @transform_6(%arg0: i32) -> (i32, i32) {
    %c0_i32 = arith.constant 0 : i32
    %c0_i32_0 = arith.constant 0 : i32
    %c0_i32_1 = arith.constant 0 : i32
    return %c0_i32, %c0_i32_0 : i32, i32
  }
  func.func @transform_7(%arg0: i32) -> (i32, i32) {
    %c0_i32 = arith.constant 0 : i32
    %c0_i32_0 = arith.constant 0 : i32
    %c0_i32_1 = arith.constant 0 : i32
    return %c0_i32, %c0_i32_0 : i32, i32
  }
  func.func @transform_8(%arg0: i32) -> (i32, i32, i32) {
    %c0_i32 = arith.constant 0 : i32
    %c0_i32_0 = arith.constant 0 : i32
    %c0_i32_1 = arith.constant 0 : i32
    %c0_i32_2 = arith.constant 0 : i32
    return %c0_i32, %c0_i32_0, %c0_i32_1 : i32, i32, i32
  }
  func.func @transform_9(%arg0: i32) -> (i32, i32) {
    %c0_i32 = arith.constant 0 : i32
    %c0_i32_0 = arith.constant 0 : i32
    %c0_i32_1 = arith.constant 0 : i32
    return %c0_i32, %c0_i32_0 : i32, i32
  }
  func.func @transform_10(%arg0: i32) -> (i32, i32) {
    %c0_i32 = arith.constant 0 : i32
    %c0_i32_0 = arith.constant 0 : i32
    %c0_i32_1 = arith.constant 0 : i32
    return %c0_i32, %c0_i32_0 : i32, i32
  }
  func.func @transform_11(%arg0: i32) -> (i32, i32) {
    %c0_i32 = arith.constant 0 : i32
    %c0_i32_0 = arith.constant 0 : i32
    %c0_i32_1 = arith.constant 0 : i32
    return %c0_i32, %c0_i32_0 : i32, i32
  }
  func.func @transform_12(%arg0: i32) -> (i32, i32) {
    %c0_i32 = arith.constant 0 : i32
    %c0_i32_0 = arith.constant 0 : i32
    %c0_i32_1 = arith.constant 0 : i32
    return %c0_i32, %c0_i32_0 : i32, i32
  }
  func.func @transform_13(%arg0: i32) -> (i32, i32) {
    %c0_i32 = arith.constant 0 : i32
    %c0_i32_0 = arith.constant 0 : i32
    %c0_i32_1 = arith.constant 0 : i32
    return %c0_i32, %c0_i32_0 : i32, i32
  }
  func.func @transform_14(%arg0: i32) -> (i32, i32) {
    %c0_i32 = arith.constant 0 : i32
    %c0_i32_0 = arith.constant 0 : i32
    %c0_i32_1 = arith.constant 0 : i32
    return %c0_i32, %c0_i32_0 : i32, i32
  }
  func.func @transform_15(%arg0: i32) -> (i32, i32) {
    %c0_i32 = arith.constant 0 : i32
    %c0_i32_0 = arith.constant 0 : i32
    %c0_i32_1 = arith.constant 0 : i32
    return %c0_i32, %c0_i32_0 : i32, i32
  }
  func.func @transform_16(%arg0: i32) -> (i32, i32) {
    %c0_i32 = arith.constant 0 : i32
    %c0_i32_0 = arith.constant 0 : i32
    %c0_i32_1 = arith.constant 0 : i32
    return %c0_i32, %c0_i32_0 : i32, i32
  }
  func.func @transform_17(%arg0: i32) -> (i32, i32) {
    %c0_i32 = arith.constant 0 : i32
    %c0_i32_0 = arith.constant 0 : i32
    %c0_i32_1 = arith.constant 0 : i32
    return %c0_i32, %c0_i32_0 : i32, i32
  }
  func.func @transform_18(%arg0: i32) -> (i32, i32) {
    %c0_i32 = arith.constant 0 : i32
    %c0_i32_0 = arith.constant 0 : i32
    %c0_i32_1 = arith.constant 0 : i32
    return %c0_i32, %c0_i32_0 : i32, i32
  }
  func.func @transform_19(%arg0: i32) -> (i32, i32) {
    %c0_i32 = arith.constant 0 : i32
    %c0_i32_0 = arith.constant 0 : i32
    %c0_i32_1 = arith.constant 0 : i32
    return %c0_i32, %c0_i32_0 : i32, i32
  }
  func.func @transform_20(%arg0: i32) -> (i32, i32) {
    %c0_i32 = arith.constant 0 : i32
    %c0_i32_0 = arith.constant 0 : i32
    %c0_i32_1 = arith.constant 0 : i32
    return %c0_i32, %c0_i32_0 : i32, i32
  }
  func.func @transform_21(%arg0: i32) -> (i32, i32) {
    %c0_i32 = arith.constant 0 : i32
    %c0_i32_0 = arith.constant 0 : i32
    %c0_i32_1 = arith.constant 0 : i32
    return %c0_i32, %c0_i32_0 : i32, i32
  }
  func.func @transform_22(%arg0: i32) -> (i32, i32, i32) {
    %c0_i32 = arith.constant 0 : i32
    %c0_i32_0 = arith.constant 0 : i32
    %c0_i32_1 = arith.constant 0 : i32
    return %arg0, %c0_i32, %c0_i32_0 : i32, i32, i32
  }
}

module attributes {stable_mosaic.version = 11 : i64} {
  func.func @_naf_block_kernel(%arg0: i32, %arg1: memref<1x8x256xbf16, #tpu.memory_space<vmem>>, %arg2: memref<1x8x256xbf16, #tpu.memory_space<vmem>>, %arg3: memref<1x256xf32, #tpu.memory_space<vmem>>, %arg4: memref<1x256xf32, #tpu.memory_space<vmem>>, %arg5: memref<8x1xf32, #tpu.memory_space<vmem>>, %arg6: memref<8x1xf32, #tpu.memory_space<vmem>>, %arg7: memref<16x8xf32, #tpu.memory_space<vmem>>, %arg8: memref<16x1xf32, #tpu.memory_space<vmem>>, %arg9: memref<9x16x1xf32, #tpu.memory_space<vmem>>, %arg10: memref<16x1xf32, #tpu.memory_space<vmem>>, %arg11: memref<8x8xf32, #tpu.memory_space<vmem>>, %arg12: memref<8x1xf32, #tpu.memory_space<vmem>>, %arg13: memref<8x8xf32, #tpu.memory_space<vmem>>, %arg14: memref<8x1xf32, #tpu.memory_space<vmem>>, %arg15: memref<8x1xf32, #tpu.memory_space<vmem>>, %arg16: memref<8x1xf32, #tpu.memory_space<vmem>>, %arg17: memref<8x1xf32, #tpu.memory_space<vmem>>, %arg18: memref<16x8xf32, #tpu.memory_space<vmem>>, %arg19: memref<16x1xf32, #tpu.memory_space<vmem>>, %arg20: memref<8x8xf32, #tpu.memory_space<vmem>>, %arg21: memref<8x1xf32, #tpu.memory_space<vmem>>, %arg22: memref<8x1xf32, #tpu.memory_space<vmem>>, %arg23: memref<1x8x256xbf16, #tpu.memory_space<vmem>>) attributes {dimension_semantics = [#tpu.dimension_semantics<parallel>], iteration_bounds = array<i64: 2>, scalar_prefetch = 0 : i64, scratch_operands = 0 : i64, tpu.core_type = #tpu.core_type<tc>, window_params = [{transform_indices = @transform_0, window_bounds = array<i64: 1, 8, 256>}, {transform_indices = @transform_1, window_bounds = array<i64: 1, 8, 256>}, {pipeline_mode = #tpu.pipeline_mode<synchronous>, transform_indices = @transform_2, window_bounds = array<i64: 1, 256>}, {pipeline_mode = #tpu.pipeline_mode<synchronous>, transform_indices = @transform_3, window_bounds = array<i64: 1, 256>}, {pipeline_mode = #tpu.pipeline_mode<synchronous>, transform_indices = @transform_4, window_bounds = array<i64: 8, 1>}, {pipeline_mode = #tpu.pipeline_mode<synchronous>, transform_indices = @transform_5, window_bounds = array<i64: 8, 1>}, {pipeline_mode = #tpu.pipeline_mode<synchronous>, transform_indices = @transform_6, window_bounds = array<i64: 16, 8>}, {pipeline_mode = #tpu.pipeline_mode<synchronous>, transform_indices = @transform_7, window_bounds = array<i64: 16, 1>}, {pipeline_mode = #tpu.pipeline_mode<synchronous>, transform_indices = @transform_8, window_bounds = array<i64: 9, 16, 1>}, {pipeline_mode = #tpu.pipeline_mode<synchronous>, transform_indices = @transform_9, window_bounds = array<i64: 16, 1>}, {pipeline_mode = #tpu.pipeline_mode<synchronous>, transform_indices = @transform_10, window_bounds = array<i64: 8, 8>}, {pipeline_mode = #tpu.pipeline_mode<synchronous>, transform_indices = @transform_11, window_bounds = array<i64: 8, 1>}, {pipeline_mode = #tpu.pipeline_mode<synchronous>, transform_indices = @transform_12, window_bounds = array<i64: 8, 8>}, {pipeline_mode = #tpu.pipeline_mode<synchronous>, transform_indices = @transform_13, window_bounds = array<i64: 8, 1>}, {pipeline_mode = #tpu.pipeline_mode<synchronous>, transform_indices = @transform_14, window_bounds = array<i64: 8, 1>}, {pipeline_mode = #tpu.pipeline_mode<synchronous>, transform_indices = @transform_15, window_bounds = array<i64: 8, 1>}, {pipeline_mode = #tpu.pipeline_mode<synchronous>, transform_indices = @transform_16, window_bounds = array<i64: 8, 1>}, {pipeline_mode = #tpu.pipeline_mode<synchronous>, transform_indices = @transform_17, window_bounds = array<i64: 16, 8>}, {pipeline_mode = #tpu.pipeline_mode<synchronous>, transform_indices = @transform_18, window_bounds = array<i64: 16, 1>}, {pipeline_mode = #tpu.pipeline_mode<synchronous>, transform_indices = @transform_19, window_bounds = array<i64: 8, 8>}, {pipeline_mode = #tpu.pipeline_mode<synchronous>, transform_indices = @transform_20, window_bounds = array<i64: 8, 1>}, {pipeline_mode = #tpu.pipeline_mode<synchronous>, transform_indices = @transform_21, window_bounds = array<i64: 8, 1>}, {transform_indices = @transform_22, window_bounds = array<i64: 1, 8, 256>}]} {
    %c0 = arith.constant 0 : index
    %c0_0 = arith.constant 0 : index
    %c0_1 = arith.constant 0 : index
    %0 = vector.load %arg1[%c0, %c0_0, %c0_1] : memref<1x8x256xbf16, #tpu.memory_space<vmem>>, vector<1x8x256xbf16>
    %1 = vector.shape_cast %0 : vector<1x8x256xbf16> to vector<8x256xbf16>
    %2 = arith.extf %1 : vector<8x256xbf16> to vector<8x256xf32>
    %c0_2 = arith.constant 0 : index
    %c0_3 = arith.constant 0 : index
    %c0_4 = arith.constant 0 : index
    %3 = vector.load %arg2[%c0_2, %c0_3, %c0_4] : memref<1x8x256xbf16, #tpu.memory_space<vmem>>, vector<1x8x256xbf16>
    %4 = vector.shape_cast %3 : vector<1x8x256xbf16> to vector<8x256xbf16>
    %5 = arith.extf %4 : vector<8x256xbf16> to vector<8x256xf32>
    %6 = arith.addf %2, %5 : vector<8x256xf32>
    %c0_5 = arith.constant 0 : index
    %c0_6 = arith.constant 0 : index
    %7 = vector.load %arg3[%c0_5, %c0_6] : memref<1x256xf32, #tpu.memory_space<vmem>>, vector<1x256xf32>
    %c0_7 = arith.constant 0 : index
    %c0_8 = arith.constant 0 : index
    %8 = vector.load %arg4[%c0_7, %c0_8] : memref<1x256xf32, #tpu.memory_space<vmem>>, vector<1x256xf32>
    %cst = arith.constant dense<0.000000e+00> : vector<256xf32>
    %9 = vector.multi_reduction <add>, %6, %cst [0] : vector<8x256xf32> to vector<256xf32>
    %10 = vector.shape_cast %9 : vector<256xf32> to vector<1x256xf32>
    %cst_9 = arith.constant 8.000000e+00 : f32
    %11 = vector.broadcast %cst_9 : f32 to vector<1x256xf32>
    %12 = arith.divf %10, %11 : vector<1x256xf32>
    %13 = vector.broadcast %12 : vector<1x256xf32> to vector<8x256xf32>
    %14 = arith.subf %6, %13 : vector<8x256xf32>
    %15 = arith.mulf %14, %14 : vector<8x256xf32>
    %cst_10 = arith.constant dense<0.000000e+00> : vector<256xf32>
    %16 = vector.multi_reduction <add>, %15, %cst_10 [0] : vector<8x256xf32> to vector<256xf32>
    %17 = vector.shape_cast %16 : vector<256xf32> to vector<1x256xf32>
    %cst_11 = arith.constant 8.000000e+00 : f32
    %18 = vector.broadcast %cst_11 : f32 to vector<1x256xf32>
    %19 = arith.divf %17, %18 : vector<1x256xf32>
    %cst_12 = arith.constant 9.99999997E-7 : f32
    %20 = vector.broadcast %cst_12 : f32 to vector<1x256xf32>
    %21 = arith.addf %19, %20 : vector<1x256xf32>
    %22 = math.rsqrt %21 : vector<1x256xf32>
    %23 = vector.broadcast %22 : vector<1x256xf32> to vector<8x256xf32>
    %24 = arith.mulf %14, %23 : vector<8x256xf32>
    %c0_13 = arith.constant 0 : index
    %c0_14 = arith.constant 0 : index
    %25 = vector.load %arg5[%c0_13, %c0_14] : memref<8x1xf32, #tpu.memory_space<vmem>>, vector<8x1xf32>
    %26 = vector.broadcast %25 : vector<8x1xf32> to vector<8x256xf32>
    %27 = arith.mulf %24, %26 : vector<8x256xf32>
    %c0_15 = arith.constant 0 : index
    %c0_16 = arith.constant 0 : index
    %28 = vector.load %arg6[%c0_15, %c0_16] : memref<8x1xf32, #tpu.memory_space<vmem>>, vector<8x1xf32>
    %29 = vector.broadcast %28 : vector<8x1xf32> to vector<8x256xf32>
    %30 = arith.addf %27, %29 : vector<8x256xf32>
    %c0_17 = arith.constant 0 : index
    %c0_18 = arith.constant 0 : index
    %31 = vector.load %arg7[%c0_17, %c0_18] : memref<16x8xf32, #tpu.memory_space<vmem>>, vector<16x8xf32>
    %cst_19 = arith.constant dense<0.000000e+00> : vector<16x256xf32>
    %32 = tpu.matmul %31, %30, %cst_19 {dimension_numbers = #tpu.dot_dimension_numbers<[1], [0], [0], [1], [0, 0, 1, 1], [], []>} : vector<16x8xf32>, vector<8x256xf32>, vector<16x256xf32> -> vector<16x256xf32>
    %c0_20 = arith.constant 0 : index
    %c0_21 = arith.constant 0 : index
    %33 = vector.load %arg8[%c0_20, %c0_21] : memref<16x1xf32, #tpu.memory_space<vmem>>, vector<16x1xf32>
    %34 = vector.broadcast %33 : vector<16x1xf32> to vector<16x256xf32>
    %35 = arith.addf %32, %34 : vector<16x256xf32>
    %cst_22 = arith.constant 0.000000e+00 : f32
    %36 = vector.broadcast %cst_22 : f32 to vector<16x256xf32>
    %cst_23 = arith.constant 0.000000e+00 : f32
    %37 = vector.broadcast %cst_23 : f32 to vector<16x17xf32>
    %38 = vector.extract_strided_slice %35 {offsets = [0, 0], sizes = [16, 239], strides = [1, 1]} : vector<16x256xf32> to vector<16x239xf32>
    %39 = tpu.concatenate %37, %38 in 1 : vector<16x17xf32>, vector<16x239xf32> -> vector<16x256xf32>
    %40 = vector.broadcast %7 : vector<1x256xf32> to vector<16x256xf32>
    %41 = arith.mulf %39, %40 : vector<16x256xf32>
    %c0_24 = arith.constant 0 : index
    %c0_25 = arith.constant 0 : index
    %c0_26 = arith.constant 0 : index
    %42 = vector.load %arg9[%c0_24, %c0_25, %c0_26] : memref<9x16x1xf32, #tpu.memory_space<vmem>>, vector<1x16x1xf32>
    %43 = vector.shape_cast %42 : vector<1x16x1xf32> to vector<16x1xf32>
    %44 = vector.broadcast %43 : vector<16x1xf32> to vector<16x256xf32>
    %45 = arith.mulf %41, %44 : vector<16x256xf32>
    %46 = arith.addf %36, %45 : vector<16x256xf32>
    %cst_27 = arith.constant 0.000000e+00 : f32
    %47 = vector.broadcast %cst_27 : f32 to vector<16x16xf32>
    %48 = vector.extract_strided_slice %35 {offsets = [0, 0], sizes = [16, 240], strides = [1, 1]} : vector<16x256xf32> to vector<16x240xf32>
    %49 = tpu.concatenate %47, %48 in 1 : vector<16x16xf32>, vector<16x240xf32> -> vector<16x256xf32>
    %c1 = arith.constant 1 : index
    %c0_28 = arith.constant 0 : index
    %c0_29 = arith.constant 0 : index
    %50 = vector.load %arg9[%c1, %c0_28, %c0_29] : memref<9x16x1xf32, #tpu.memory_space<vmem>>, vector<1x16x1xf32>
    %51 = vector.shape_cast %50 : vector<1x16x1xf32> to vector<16x1xf32>
    %52 = vector.broadcast %51 : vector<16x1xf32> to vector<16x256xf32>
    %53 = arith.mulf %49, %52 : vector<16x256xf32>
    %54 = arith.addf %46, %53 : vector<16x256xf32>
    %cst_30 = arith.constant 0.000000e+00 : f32
    %55 = vector.broadcast %cst_30 : f32 to vector<16x15xf32>
    %56 = vector.extract_strided_slice %35 {offsets = [0, 0], sizes = [16, 241], strides = [1, 1]} : vector<16x256xf32> to vector<16x241xf32>
    %57 = tpu.concatenate %55, %56 in 1 : vector<16x15xf32>, vector<16x241xf32> -> vector<16x256xf32>
    %58 = vector.broadcast %8 : vector<1x256xf32> to vector<16x256xf32>
    %59 = arith.mulf %57, %58 : vector<16x256xf32>
    %c2 = arith.constant 2 : index
    %c0_31 = arith.constant 0 : index
    %c0_32 = arith.constant 0 : index
    %60 = vector.load %arg9[%c2, %c0_31, %c0_32] : memref<9x16x1xf32, #tpu.memory_space<vmem>>, vector<1x16x1xf32>
    %61 = vector.shape_cast %60 : vector<1x16x1xf32> to vector<16x1xf32>
    %62 = vector.broadcast %61 : vector<16x1xf32> to vector<16x256xf32>
    %63 = arith.mulf %59, %62 : vector<16x256xf32>
    %64 = arith.addf %54, %63 : vector<16x256xf32>
    %cst_33 = arith.constant 0.000000e+00 : f32
    %65 = vector.broadcast %cst_33 : f32 to vector<16x1xf32>
    %66 = vector.extract_strided_slice %35 {offsets = [0, 0], sizes = [16, 255], strides = [1, 1]} : vector<16x256xf32> to vector<16x255xf32>
    %67 = tpu.concatenate %65, %66 in 1 : vector<16x1xf32>, vector<16x255xf32> -> vector<16x256xf32>
    %68 = vector.broadcast %7 : vector<1x256xf32> to vector<16x256xf32>
    %69 = arith.mulf %67, %68 : vector<16x256xf32>
    %c3 = arith.constant 3 : index
    %c0_34 = arith.constant 0 : index
    %c0_35 = arith.constant 0 : index
    %70 = vector.load %arg9[%c3, %c0_34, %c0_35] : memref<9x16x1xf32, #tpu.memory_space<vmem>>, vector<1x16x1xf32>
    %71 = vector.shape_cast %70 : vector<1x16x1xf32> to vector<16x1xf32>
    %72 = vector.broadcast %71 : vector<16x1xf32> to vector<16x256xf32>
    %73 = arith.mulf %69, %72 : vector<16x256xf32>
    %74 = arith.addf %64, %73 : vector<16x256xf32>
    %c4 = arith.constant 4 : index
    %c0_36 = arith.constant 0 : index
    %c0_37 = arith.constant 0 : index
    %75 = vector.load %arg9[%c4, %c0_36, %c0_37] : memref<9x16x1xf32, #tpu.memory_space<vmem>>, vector<1x16x1xf32>
    %76 = vector.shape_cast %75 : vector<1x16x1xf32> to vector<16x1xf32>
    %77 = vector.broadcast %76 : vector<16x1xf32> to vector<16x256xf32>
    %78 = arith.mulf %35, %77 : vector<16x256xf32>
    %79 = arith.addf %74, %78 : vector<16x256xf32>
    %cst_38 = arith.constant 0.000000e+00 : f32
    %80 = vector.broadcast %cst_38 : f32 to vector<16x1xf32>
    %81 = vector.extract_strided_slice %35 {offsets = [0, 1], sizes = [16, 255], strides = [1, 1]} : vector<16x256xf32> to vector<16x255xf32>
    %82 = tpu.concatenate %81, %80 in 1 : vector<16x255xf32>, vector<16x1xf32> -> vector<16x256xf32>
    %83 = vector.broadcast %8 : vector<1x256xf32> to vector<16x256xf32>
    %84 = arith.mulf %82, %83 : vector<16x256xf32>
    %c5 = arith.constant 5 : index
    %c0_39 = arith.constant 0 : index
    %c0_40 = arith.constant 0 : index
    %85 = vector.load %arg9[%c5, %c0_39, %c0_40] : memref<9x16x1xf32, #tpu.memory_space<vmem>>, vector<1x16x1xf32>
    %86 = vector.shape_cast %85 : vector<1x16x1xf32> to vector<16x1xf32>
    %87 = vector.broadcast %86 : vector<16x1xf32> to vector<16x256xf32>
    %88 = arith.mulf %84, %87 : vector<16x256xf32>
    %89 = arith.addf %79, %88 : vector<16x256xf32>
    %cst_41 = arith.constant 0.000000e+00 : f32
    %90 = vector.broadcast %cst_41 : f32 to vector<16x15xf32>
    %91 = vector.extract_strided_slice %35 {offsets = [0, 15], sizes = [16, 241], strides = [1, 1]} : vector<16x256xf32> to vector<16x241xf32>
    %92 = tpu.concatenate %91, %90 in 1 : vector<16x241xf32>, vector<16x15xf32> -> vector<16x256xf32>
    %93 = vector.broadcast %7 : vector<1x256xf32> to vector<16x256xf32>
    %94 = arith.mulf %92, %93 : vector<16x256xf32>
    %c6 = arith.constant 6 : index
    %c0_42 = arith.constant 0 : index
    %c0_43 = arith.constant 0 : index
    %95 = vector.load %arg9[%c6, %c0_42, %c0_43] : memref<9x16x1xf32, #tpu.memory_space<vmem>>, vector<1x16x1xf32>
    %96 = vector.shape_cast %95 : vector<1x16x1xf32> to vector<16x1xf32>
    %97 = vector.broadcast %96 : vector<16x1xf32> to vector<16x256xf32>
    %98 = arith.mulf %94, %97 : vector<16x256xf32>
    %99 = arith.addf %89, %98 : vector<16x256xf32>
    %cst_44 = arith.constant 0.000000e+00 : f32
    %100 = vector.broadcast %cst_44 : f32 to vector<16x16xf32>
    %101 = vector.extract_strided_slice %35 {offsets = [0, 16], sizes = [16, 240], strides = [1, 1]} : vector<16x256xf32> to vector<16x240xf32>
    %102 = tpu.concatenate %101, %100 in 1 : vector<16x240xf32>, vector<16x16xf32> -> vector<16x256xf32>
    %c7 = arith.constant 7 : index
    %c0_45 = arith.constant 0 : index
    %c0_46 = arith.constant 0 : index
    %103 = vector.load %arg9[%c7, %c0_45, %c0_46] : memref<9x16x1xf32, #tpu.memory_space<vmem>>, vector<1x16x1xf32>
    %104 = vector.shape_cast %103 : vector<1x16x1xf32> to vector<16x1xf32>
    %105 = vector.broadcast %104 : vector<16x1xf32> to vector<16x256xf32>
    %106 = arith.mulf %102, %105 : vector<16x256xf32>
    %107 = arith.addf %99, %106 : vector<16x256xf32>
    %cst_47 = arith.constant 0.000000e+00 : f32
    %108 = vector.broadcast %cst_47 : f32 to vector<16x17xf32>
    %109 = vector.extract_strided_slice %35 {offsets = [0, 17], sizes = [16, 239], strides = [1, 1]} : vector<16x256xf32> to vector<16x239xf32>
    %110 = tpu.concatenate %109, %108 in 1 : vector<16x239xf32>, vector<16x17xf32> -> vector<16x256xf32>
    %111 = vector.broadcast %8 : vector<1x256xf32> to vector<16x256xf32>
    %112 = arith.mulf %110, %111 : vector<16x256xf32>
    %c8 = arith.constant 8 : index
    %c0_48 = arith.constant 0 : index
    %c0_49 = arith.constant 0 : index
    %113 = vector.load %arg9[%c8, %c0_48, %c0_49] : memref<9x16x1xf32, #tpu.memory_space<vmem>>, vector<1x16x1xf32>
    %114 = vector.shape_cast %113 : vector<1x16x1xf32> to vector<16x1xf32>
    %115 = vector.broadcast %114 : vector<16x1xf32> to vector<16x256xf32>
    %116 = arith.mulf %112, %115 : vector<16x256xf32>
    %117 = arith.addf %107, %116 : vector<16x256xf32>
    %c0_50 = arith.constant 0 : index
    %c0_51 = arith.constant 0 : index
    %118 = vector.load %arg10[%c0_50, %c0_51] : memref<16x1xf32, #tpu.memory_space<vmem>>, vector<16x1xf32>
    %119 = vector.broadcast %118 : vector<16x1xf32> to vector<16x256xf32>
    %120 = arith.addf %117, %119 : vector<16x256xf32>
    %121 = vector.extract_strided_slice %120 {offsets = [0, 0], sizes = [8, 256], strides = [1, 1]} : vector<16x256xf32> to vector<8x256xf32>
    %122 = vector.extract_strided_slice %120 {offsets = [8, 0], sizes = [8, 256], strides = [1, 1]} : vector<16x256xf32> to vector<8x256xf32>
    %123 = arith.mulf %121, %122 : vector<8x256xf32>
    %cst_52 = arith.constant dense<0.000000e+00> : vector<8xf32>
    %124 = vector.multi_reduction <add>, %123, %cst_52 [1] : vector<8x256xf32> to vector<8xf32>
    %125 = vector.shape_cast %124 : vector<8xf32> to vector<8x1xf32>
    %cst_53 = arith.constant 2.560000e+02 : f32
    %126 = vector.broadcast %cst_53 : f32 to vector<8x1xf32>
    %127 = arith.divf %125, %126 : vector<8x1xf32>
    %c0_54 = arith.constant 0 : index
    %c0_55 = arith.constant 0 : index
    %128 = vector.load %arg11[%c0_54, %c0_55] : memref<8x8xf32, #tpu.memory_space<vmem>>, vector<8x8xf32>
    %cst_56 = arith.constant dense<0.000000e+00> : vector<8x1xf32>
    %129 = tpu.matmul %128, %127, %cst_56 {dimension_numbers = #tpu.dot_dimension_numbers<[1], [0], [0], [1], [0, 0, 1, 1], [], []>} : vector<8x8xf32>, vector<8x1xf32>, vector<8x1xf32> -> vector<8x1xf32>
    %c0_57 = arith.constant 0 : index
    %c0_58 = arith.constant 0 : index
    %130 = vector.load %arg12[%c0_57, %c0_58] : memref<8x1xf32, #tpu.memory_space<vmem>>, vector<8x1xf32>
    %131 = arith.addf %129, %130 : vector<8x1xf32>
    %132 = vector.broadcast %131 : vector<8x1xf32> to vector<8x256xf32>
    %133 = arith.mulf %123, %132 : vector<8x256xf32>
    %c0_59 = arith.constant 0 : index
    %c0_60 = arith.constant 0 : index
    %134 = vector.load %arg13[%c0_59, %c0_60] : memref<8x8xf32, #tpu.memory_space<vmem>>, vector<8x8xf32>
    %cst_61 = arith.constant dense<0.000000e+00> : vector<8x256xf32>
    %135 = tpu.matmul %134, %133, %cst_61 {dimension_numbers = #tpu.dot_dimension_numbers<[1], [0], [0], [1], [0, 0, 1, 1], [], []>} : vector<8x8xf32>, vector<8x256xf32>, vector<8x256xf32> -> vector<8x256xf32>
    %c0_62 = arith.constant 0 : index
    %c0_63 = arith.constant 0 : index
    %136 = vector.load %arg14[%c0_62, %c0_63] : memref<8x1xf32, #tpu.memory_space<vmem>>, vector<8x1xf32>
    %137 = vector.broadcast %136 : vector<8x1xf32> to vector<8x256xf32>
    %138 = arith.addf %135, %137 : vector<8x256xf32>
    %c0_64 = arith.constant 0 : index
    %c0_65 = arith.constant 0 : index
    %139 = vector.load %arg15[%c0_64, %c0_65] : memref<8x1xf32, #tpu.memory_space<vmem>>, vector<8x1xf32>
    %140 = vector.broadcast %139 : vector<8x1xf32> to vector<8x256xf32>
    %141 = arith.mulf %138, %140 : vector<8x256xf32>
    %142 = arith.addf %6, %141 : vector<8x256xf32>
    %cst_66 = arith.constant dense<0.000000e+00> : vector<256xf32>
    %143 = vector.multi_reduction <add>, %142, %cst_66 [0] : vector<8x256xf32> to vector<256xf32>
    %144 = vector.shape_cast %143 : vector<256xf32> to vector<1x256xf32>
    %cst_67 = arith.constant 8.000000e+00 : f32
    %145 = vector.broadcast %cst_67 : f32 to vector<1x256xf32>
    %146 = arith.divf %144, %145 : vector<1x256xf32>
    %147 = vector.broadcast %146 : vector<1x256xf32> to vector<8x256xf32>
    %148 = arith.subf %142, %147 : vector<8x256xf32>
    %149 = arith.mulf %148, %148 : vector<8x256xf32>
    %cst_68 = arith.constant dense<0.000000e+00> : vector<256xf32>
    %150 = vector.multi_reduction <add>, %149, %cst_68 [0] : vector<8x256xf32> to vector<256xf32>
    %151 = vector.shape_cast %150 : vector<256xf32> to vector<1x256xf32>
    %cst_69 = arith.constant 8.000000e+00 : f32
    %152 = vector.broadcast %cst_69 : f32 to vector<1x256xf32>
    %153 = arith.divf %151, %152 : vector<1x256xf32>
    %cst_70 = arith.constant 9.99999997E-7 : f32
    %154 = vector.broadcast %cst_70 : f32 to vector<1x256xf32>
    %155 = arith.addf %153, %154 : vector<1x256xf32>
    %156 = math.rsqrt %155 : vector<1x256xf32>
    %157 = vector.broadcast %156 : vector<1x256xf32> to vector<8x256xf32>
    %158 = arith.mulf %148, %157 : vector<8x256xf32>
    %c0_71 = arith.constant 0 : index
    %c0_72 = arith.constant 0 : index
    %159 = vector.load %arg16[%c0_71, %c0_72] : memref<8x1xf32, #tpu.memory_space<vmem>>, vector<8x1xf32>
    %160 = vector.broadcast %159 : vector<8x1xf32> to vector<8x256xf32>
    %161 = arith.mulf %158, %160 : vector<8x256xf32>
    %c0_73 = arith.constant 0 : index
    %c0_74 = arith.constant 0 : index
    %162 = vector.load %arg17[%c0_73, %c0_74] : memref<8x1xf32, #tpu.memory_space<vmem>>, vector<8x1xf32>
    %163 = vector.broadcast %162 : vector<8x1xf32> to vector<8x256xf32>
    %164 = arith.addf %161, %163 : vector<8x256xf32>
    %c0_75 = arith.constant 0 : index
    %c0_76 = arith.constant 0 : index
    %165 = vector.load %arg18[%c0_75, %c0_76] : memref<16x8xf32, #tpu.memory_space<vmem>>, vector<16x8xf32>
    %cst_77 = arith.constant dense<0.000000e+00> : vector<16x256xf32>
    %166 = tpu.matmul %165, %164, %cst_77 {dimension_numbers = #tpu.dot_dimension_numbers<[1], [0], [0], [1], [0, 0, 1, 1], [], []>} : vector<16x8xf32>, vector<8x256xf32>, vector<16x256xf32> -> vector<16x256xf32>
    %c0_78 = arith.constant 0 : index
    %c0_79 = arith.constant 0 : index
    %167 = vector.load %arg19[%c0_78, %c0_79] : memref<16x1xf32, #tpu.memory_space<vmem>>, vector<16x1xf32>
    %168 = vector.broadcast %167 : vector<16x1xf32> to vector<16x256xf32>
    %169 = arith.addf %166, %168 : vector<16x256xf32>
    %170 = vector.extract_strided_slice %169 {offsets = [0, 0], sizes = [8, 256], strides = [1, 1]} : vector<16x256xf32> to vector<8x256xf32>
    %171 = vector.extract_strided_slice %169 {offsets = [8, 0], sizes = [8, 256], strides = [1, 1]} : vector<16x256xf32> to vector<8x256xf32>
    %172 = arith.mulf %170, %171 : vector<8x256xf32>
    %c0_80 = arith.constant 0 : index
    %c0_81 = arith.constant 0 : index
    %173 = vector.load %arg20[%c0_80, %c0_81] : memref<8x8xf32, #tpu.memory_space<vmem>>, vector<8x8xf32>
    %cst_82 = arith.constant dense<0.000000e+00> : vector<8x256xf32>
    %174 = tpu.matmul %173, %172, %cst_82 {dimension_numbers = #tpu.dot_dimension_numbers<[1], [0], [0], [1], [0, 0, 1, 1], [], []>} : vector<8x8xf32>, vector<8x256xf32>, vector<8x256xf32> -> vector<8x256xf32>
    %c0_83 = arith.constant 0 : index
    %c0_84 = arith.constant 0 : index
    %175 = vector.load %arg21[%c0_83, %c0_84] : memref<8x1xf32, #tpu.memory_space<vmem>>, vector<8x1xf32>
    %176 = vector.broadcast %175 : vector<8x1xf32> to vector<8x256xf32>
    %177 = arith.addf %174, %176 : vector<8x256xf32>
    %c0_85 = arith.constant 0 : index
    %c0_86 = arith.constant 0 : index
    %178 = vector.load %arg22[%c0_85, %c0_86] : memref<8x1xf32, #tpu.memory_space<vmem>>, vector<8x1xf32>
    %179 = vector.broadcast %178 : vector<8x1xf32> to vector<8x256xf32>
    %180 = arith.mulf %177, %179 : vector<8x256xf32>
    %181 = arith.addf %142, %180 : vector<8x256xf32>
    %182 = arith.truncf %181 : vector<8x256xf32> to vector<8x256xbf16>
    %c0_87 = arith.constant 0 : index
    %c0_88 = arith.constant 0 : index
    %c0_89 = arith.constant 0 : index
    %183 = vector.load %arg23[%c0_87, %c0_88, %c0_89] : memref<1x8x256xbf16, #tpu.memory_space<vmem>>, vector<1x8x256xbf16>
    %184 = vector.shape_cast %183 : vector<1x8x256xbf16> to vector<8x256xbf16>
    %185 = vector.shape_cast %182 : vector<8x256xbf16> to vector<1x8x256xbf16>
    tpu.vector_store %arg23[%c0_87, %c0_88, %c0_89], %185 {strides = array<i32>} : memref<1x8x256xbf16, #tpu.memory_space<vmem>>, vector<1x8x256xbf16>,
    return
  }
  func.func @transform_0(%arg0: i32) -> (i32, i32, i32) {
    %c0_i32 = arith.constant 0 : i32
    %c0_i32_0 = arith.constant 0 : i32
    %c0_i32_1 = arith.constant 0 : i32
    return %arg0, %c0_i32, %c0_i32_0 : i32, i32, i32
  }
  func.func @transform_1(%arg0: i32) -> (i32, i32, i32) {
    %c0_i32 = arith.constant 0 : i32
    %c0_i32_0 = arith.constant 0 : i32
    %c0_i32_1 = arith.constant 0 : i32
    return %arg0, %c0_i32, %c0_i32_0 : i32, i32, i32
  }
  func.func @transform_2(%arg0: i32) -> (i32, i32) {
    %c0_i32 = arith.constant 0 : i32
    %c0_i32_0 = arith.constant 0 : i32
    %c0_i32_1 = arith.constant 0 : i32
    return %c0_i32, %c0_i32_0 : i32, i32
  }
  func.func @transform_3(%arg0: i32) -> (i32, i32) {
    %c0_i32 = arith.constant 0 : i32
    %c0_i32_0 = arith.constant 0 : i32
    %c0_i32_1 = arith.constant 0 : i32
    return %c0_i32, %c0_i32_0 : i32, i32
  }
  func.func @transform_4(%arg0: i32) -> (i32, i32) {
    %c0_i32 = arith.constant 0 : i32
    %c0_i32_0 = arith.constant 0 : i32
    %c0_i32_1 = arith.constant 0 : i32
    return %c0_i32, %c0_i32_0 : i32, i32
  }
  func.func @transform_5(%arg0: i32) -> (i32, i32) {
    %c0_i32 = arith.constant 0 : i32
    %c0_i32_0 = arith.constant 0 : i32
    %c0_i32_1 = arith.constant 0 : i32
    return %c0_i32, %c0_i32_0 : i32, i32
  }
  func.func @transform_6(%arg0: i32) -> (i32, i32) {
    %c0_i32 = arith.constant 0 : i32
    %c0_i32_0 = arith.constant 0 : i32
    %c0_i32_1 = arith.constant 0 : i32
    return %c0_i32, %c0_i32_0 : i32, i32
  }
  func.func @transform_7(%arg0: i32) -> (i32, i32) {
    %c0_i32 = arith.constant 0 : i32
    %c0_i32_0 = arith.constant 0 : i32
    %c0_i32_1 = arith.constant 0 : i32
    return %c0_i32, %c0_i32_0 : i32, i32
  }
  func.func @transform_8(%arg0: i32) -> (i32, i32, i32) {
    %c0_i32 = arith.constant 0 : i32
    %c0_i32_0 = arith.constant 0 : i32
    %c0_i32_1 = arith.constant 0 : i32
    %c0_i32_2 = arith.constant 0 : i32
    return %c0_i32, %c0_i32_0, %c0_i32_1 : i32, i32, i32
  }
  func.func @transform_9(%arg0: i32) -> (i32, i32) {
    %c0_i32 = arith.constant 0 : i32
    %c0_i32_0 = arith.constant 0 : i32
    %c0_i32_1 = arith.constant 0 : i32
    return %c0_i32, %c0_i32_0 : i32, i32
  }
  func.func @transform_10(%arg0: i32) -> (i32, i32) {
    %c0_i32 = arith.constant 0 : i32
    %c0_i32_0 = arith.constant 0 : i32
    %c0_i32_1 = arith.constant 0 : i32
    return %c0_i32, %c0_i32_0 : i32, i32
  }
  func.func @transform_11(%arg0: i32) -> (i32, i32) {
    %c0_i32 = arith.constant 0 : i32
    %c0_i32_0 = arith.constant 0 : i32
    %c0_i32_1 = arith.constant 0 : i32
    return %c0_i32, %c0_i32_0 : i32, i32
  }
  func.func @transform_12(%arg0: i32) -> (i32, i32) {
    %c0_i32 = arith.constant 0 : i32
    %c0_i32_0 = arith.constant 0 : i32
    %c0_i32_1 = arith.constant 0 : i32
    return %c0_i32, %c0_i32_0 : i32, i32
  }
  func.func @transform_13(%arg0: i32) -> (i32, i32) {
    %c0_i32 = arith.constant 0 : i32
    %c0_i32_0 = arith.constant 0 : i32
    %c0_i32_1 = arith.constant 0 : i32
    return %c0_i32, %c0_i32_0 : i32, i32
  }
  func.func @transform_14(%arg0: i32) -> (i32, i32) {
    %c0_i32 = arith.constant 0 : i32
    %c0_i32_0 = arith.constant 0 : i32
    %c0_i32_1 = arith.constant 0 : i32
    return %c0_i32, %c0_i32_0 : i32, i32
  }
  func.func @transform_15(%arg0: i32) -> (i32, i32) {
    %c0_i32 = arith.constant 0 : i32
    %c0_i32_0 = arith.constant 0 : i32
    %c0_i32_1 = arith.constant 0 : i32
    return %c0_i32, %c0_i32_0 : i32, i32
  }
  func.func @transform_16(%arg0: i32) -> (i32, i32) {
    %c0_i32 = arith.constant 0 : i32
    %c0_i32_0 = arith.constant 0 : i32
    %c0_i32_1 = arith.constant 0 : i32
    return %c0_i32, %c0_i32_0 : i32, i32
  }
  func.func @transform_17(%arg0: i32) -> (i32, i32) {
    %c0_i32 = arith.constant 0 : i32
    %c0_i32_0 = arith.constant 0 : i32
    %c0_i32_1 = arith.constant 0 : i32
    return %c0_i32, %c0_i32_0 : i32, i32
  }
  func.func @transform_18(%arg0: i32) -> (i32, i32) {
    %c0_i32 = arith.constant 0 : i32
    %c0_i32_0 = arith.constant 0 : i32
    %c0_i32_1 = arith.constant 0 : i32
    return %c0_i32, %c0_i32_0 : i32, i32
  }
  func.func @transform_19(%arg0: i32) -> (i32, i32) {
    %c0_i32 = arith.constant 0 : i32
    %c0_i32_0 = arith.constant 0 : i32
    %c0_i32_1 = arith.constant 0 : i32
    return %c0_i32, %c0_i32_0 : i32, i32
  }
  func.func @transform_20(%arg0: i32) -> (i32, i32) {
    %c0_i32 = arith.constant 0 : i32
    %c0_i32_0 = arith.constant 0 : i32
    %c0_i32_1 = arith.constant 0 : i32
    return %c0_i32, %c0_i32_0 : i32, i32
  }
  func.func @transform_21(%arg0: i32) -> (i32, i32) {
    %c0_i32 = arith.constant 0 : i32
    %c0_i32_0 = arith.constant 0 : i32
    %c0_i32_1 = arith.constant 0 : i32
    return %c0_i32, %c0_i32_0 : i32, i32
  }
  func.func @transform_22(%arg0: i32) -> (i32, i32, i32) {
    %c0_i32 = arith.constant 0 : i32
    %c0_i32_0 = arith.constant 0 : i32
    %c0_i32_1 = arith.constant 0 : i32
    return %arg0, %c0_i32, %c0_i32_0 : i32, i32, i32
  }
}

module attributes {stable_mosaic.version = 11 : i64} {
  func.func @_conv3x3_kernel(%arg0: i32, %arg1: memref<1x8x256xbf16, #tpu.memory_space<vmem>>, %arg2: memref<1x256xf32, #tpu.memory_space<vmem>>, %arg3: memref<1x256xf32, #tpu.memory_space<vmem>>, %arg4: memref<9x3x8xf32, #tpu.memory_space<vmem>>, %arg5: memref<3x1xf32, #tpu.memory_space<vmem>>, %arg6: memref<1x3x256xf32, #tpu.memory_space<vmem>>) attributes {dimension_semantics = [#tpu.dimension_semantics<parallel>], iteration_bounds = array<i64: 2>, scalar_prefetch = 0 : i64, scratch_operands = 0 : i64, tpu.core_type = #tpu.core_type<tc>, window_params = [{transform_indices = @transform_0, window_bounds = array<i64: 1, 8, 256>}, {pipeline_mode = #tpu.pipeline_mode<synchronous>, transform_indices = @transform_1, window_bounds = array<i64: 1, 256>}, {pipeline_mode = #tpu.pipeline_mode<synchronous>, transform_indices = @transform_2, window_bounds = array<i64: 1, 256>}, {pipeline_mode = #tpu.pipeline_mode<synchronous>, transform_indices = @transform_3, window_bounds = array<i64: 9, 3, 8>}, {pipeline_mode = #tpu.pipeline_mode<synchronous>, transform_indices = @transform_4, window_bounds = array<i64: 3, 1>}, {transform_indices = @transform_5, window_bounds = array<i64: 1, 3, 256>}]} {
    %c0 = arith.constant 0 : index
    %c0_0 = arith.constant 0 : index
    %c0_1 = arith.constant 0 : index
    %0 = vector.load %arg1[%c0, %c0_0, %c0_1] : memref<1x8x256xbf16, #tpu.memory_space<vmem>>, vector<1x8x256xbf16>
    %1 = vector.shape_cast %0 : vector<1x8x256xbf16> to vector<8x256xbf16>
    %2 = arith.extf %1 : vector<8x256xbf16> to vector<8x256xf32>
    %c0_2 = arith.constant 0 : index
    %c0_3 = arith.constant 0 : index
    %3 = vector.load %arg2[%c0_2, %c0_3] : memref<1x256xf32, #tpu.memory_space<vmem>>, vector<1x256xf32>
    %c0_4 = arith.constant 0 : index
    %c0_5 = arith.constant 0 : index
    %4 = vector.load %arg3[%c0_4, %c0_5] : memref<1x256xf32, #tpu.memory_space<vmem>>, vector<1x256xf32>
    %cst = arith.constant 0.000000e+00 : f32
    %5 = vector.broadcast %cst : f32 to vector<3x256xf32>
    %c0_6 = arith.constant 0 : index
    %c0_7 = arith.constant 0 : index
    %c0_8 = arith.constant 0 : index
    %6 = vector.load %arg4[%c0_6, %c0_7, %c0_8] : memref<9x3x8xf32, #tpu.memory_space<vmem>>, vector<1x3x8xf32>
    %7 = vector.shape_cast %6 : vector<1x3x8xf32> to vector<3x8xf32>
    %cst_9 = arith.constant 0.000000e+00 : f32
    %8 = vector.broadcast %cst_9 : f32 to vector<8x17xf32>
    %9 = vector.extract_strided_slice %2 {offsets = [0, 0], sizes = [8, 239], strides = [1, 1]} : vector<8x256xf32> to vector<8x239xf32>
    %10 = tpu.concatenate %8, %9 in 1 : vector<8x17xf32>, vector<8x239xf32> -> vector<8x256xf32>
    %11 = vector.broadcast %3 : vector<1x256xf32> to vector<8x256xf32>
    %12 = arith.mulf %10, %11 : vector<8x256xf32>
    %cst_10 = arith.constant dense<0.000000e+00> : vector<3x256xf32>
    %13 = tpu.matmul %7, %12, %cst_10 {dimension_numbers = #tpu.dot_dimension_numbers<[1], [0], [0], [1], [0, 0, 1, 1], [], []>} : vector<3x8xf32>, vector<8x256xf32>, vector<3x256xf32> -> vector<3x256xf32>
    %14 = arith.addf %5, %13 : vector<3x256xf32>
    %c1 = arith.constant 1 : index
    %c0_11 = arith.constant 0 : index
    %c0_12 = arith.constant 0 : index
    %15 = vector.load %arg4[%c1, %c0_11, %c0_12] : memref<9x3x8xf32, #tpu.memory_space<vmem>>, vector<1x3x8xf32>
    %16 = vector.shape_cast %15 : vector<1x3x8xf32> to vector<3x8xf32>
    %cst_13 = arith.constant 0.000000e+00 : f32
    %17 = vector.broadcast %cst_13 : f32 to vector<8x16xf32>
    %18 = vector.extract_strided_slice %2 {offsets = [0, 0], sizes = [8, 240], strides = [1, 1]} : vector<8x256xf32> to vector<8x240xf32>
    %19 = tpu.concatenate %17, %18 in 1 : vector<8x16xf32>, vector<8x240xf32> -> vector<8x256xf32>
    %cst_14 = arith.constant dense<0.000000e+00> : vector<3x256xf32>
    %20 = tpu.matmul %16, %19, %cst_14 {dimension_numbers = #tpu.dot_dimension_numbers<[1], [0], [0], [1], [0, 0, 1, 1], [], []>} : vector<3x8xf32>, vector<8x256xf32>, vector<3x256xf32> -> vector<3x256xf32>
    %21 = arith.addf %14, %20 : vector<3x256xf32>
    %c2 = arith.constant 2 : index
    %c0_15 = arith.constant 0 : index
    %c0_16 = arith.constant 0 : index
    %22 = vector.load %arg4[%c2, %c0_15, %c0_16] : memref<9x3x8xf32, #tpu.memory_space<vmem>>, vector<1x3x8xf32>
    %23 = vector.shape_cast %22 : vector<1x3x8xf32> to vector<3x8xf32>
    %cst_17 = arith.constant 0.000000e+00 : f32
    %24 = vector.broadcast %cst_17 : f32 to vector<8x15xf32>
    %25 = vector.extract_strided_slice %2 {offsets = [0, 0], sizes = [8, 241], strides = [1, 1]} : vector<8x256xf32> to vector<8x241xf32>
    %26 = tpu.concatenate %24, %25 in 1 : vector<8x15xf32>, vector<8x241xf32> -> vector<8x256xf32>
    %27 = vector.broadcast %4 : vector<1x256xf32> to vector<8x256xf32>
    %28 = arith.mulf %26, %27 : vector<8x256xf32>
    %cst_18 = arith.constant dense<0.000000e+00> : vector<3x256xf32>
    %29 = tpu.matmul %23, %28, %cst_18 {dimension_numbers = #tpu.dot_dimension_numbers<[1], [0], [0], [1], [0, 0, 1, 1], [], []>} : vector<3x8xf32>, vector<8x256xf32>, vector<3x256xf32> -> vector<3x256xf32>
    %30 = arith.addf %21, %29 : vector<3x256xf32>
    %c3 = arith.constant 3 : index
    %c0_19 = arith.constant 0 : index
    %c0_20 = arith.constant 0 : index
    %31 = vector.load %arg4[%c3, %c0_19, %c0_20] : memref<9x3x8xf32, #tpu.memory_space<vmem>>, vector<1x3x8xf32>
    %32 = vector.shape_cast %31 : vector<1x3x8xf32> to vector<3x8xf32>
    %cst_21 = arith.constant 0.000000e+00 : f32
    %33 = vector.broadcast %cst_21 : f32 to vector<8x1xf32>
    %34 = vector.extract_strided_slice %2 {offsets = [0, 0], sizes = [8, 255], strides = [1, 1]} : vector<8x256xf32> to vector<8x255xf32>
    %35 = tpu.concatenate %33, %34 in 1 : vector<8x1xf32>, vector<8x255xf32> -> vector<8x256xf32>
    %36 = vector.broadcast %3 : vector<1x256xf32> to vector<8x256xf32>
    %37 = arith.mulf %35, %36 : vector<8x256xf32>
    %cst_22 = arith.constant dense<0.000000e+00> : vector<3x256xf32>
    %38 = tpu.matmul %32, %37, %cst_22 {dimension_numbers = #tpu.dot_dimension_numbers<[1], [0], [0], [1], [0, 0, 1, 1], [], []>} : vector<3x8xf32>, vector<8x256xf32>, vector<3x256xf32> -> vector<3x256xf32>
    %39 = arith.addf %30, %38 : vector<3x256xf32>
    %c4 = arith.constant 4 : index
    %c0_23 = arith.constant 0 : index
    %c0_24 = arith.constant 0 : index
    %40 = vector.load %arg4[%c4, %c0_23, %c0_24] : memref<9x3x8xf32, #tpu.memory_space<vmem>>, vector<1x3x8xf32>
    %41 = vector.shape_cast %40 : vector<1x3x8xf32> to vector<3x8xf32>
    %cst_25 = arith.constant dense<0.000000e+00> : vector<3x256xf32>
    %42 = tpu.matmul %41, %2, %cst_25 {dimension_numbers = #tpu.dot_dimension_numbers<[1], [0], [0], [1], [0, 0, 1, 1], [], []>} : vector<3x8xf32>, vector<8x256xf32>, vector<3x256xf32> -> vector<3x256xf32>
    %43 = arith.addf %39, %42 : vector<3x256xf32>
    %c5 = arith.constant 5 : index
    %c0_26 = arith.constant 0 : index
    %c0_27 = arith.constant 0 : index
    %44 = vector.load %arg4[%c5, %c0_26, %c0_27] : memref<9x3x8xf32, #tpu.memory_space<vmem>>, vector<1x3x8xf32>
    %45 = vector.shape_cast %44 : vector<1x3x8xf32> to vector<3x8xf32>
    %cst_28 = arith.constant 0.000000e+00 : f32
    %46 = vector.broadcast %cst_28 : f32 to vector<8x1xf32>
    %47 = vector.extract_strided_slice %2 {offsets = [0, 1], sizes = [8, 255], strides = [1, 1]} : vector<8x256xf32> to vector<8x255xf32>
    %48 = tpu.concatenate %47, %46 in 1 : vector<8x255xf32>, vector<8x1xf32> -> vector<8x256xf32>
    %49 = vector.broadcast %4 : vector<1x256xf32> to vector<8x256xf32>
    %50 = arith.mulf %48, %49 : vector<8x256xf32>
    %cst_29 = arith.constant dense<0.000000e+00> : vector<3x256xf32>
    %51 = tpu.matmul %45, %50, %cst_29 {dimension_numbers = #tpu.dot_dimension_numbers<[1], [0], [0], [1], [0, 0, 1, 1], [], []>} : vector<3x8xf32>, vector<8x256xf32>, vector<3x256xf32> -> vector<3x256xf32>
    %52 = arith.addf %43, %51 : vector<3x256xf32>
    %c6 = arith.constant 6 : index
    %c0_30 = arith.constant 0 : index
    %c0_31 = arith.constant 0 : index
    %53 = vector.load %arg4[%c6, %c0_30, %c0_31] : memref<9x3x8xf32, #tpu.memory_space<vmem>>, vector<1x3x8xf32>
    %54 = vector.shape_cast %53 : vector<1x3x8xf32> to vector<3x8xf32>
    %cst_32 = arith.constant 0.000000e+00 : f32
    %55 = vector.broadcast %cst_32 : f32 to vector<8x15xf32>
    %56 = vector.extract_strided_slice %2 {offsets = [0, 15], sizes = [8, 241], strides = [1, 1]} : vector<8x256xf32> to vector<8x241xf32>
    %57 = tpu.concatenate %56, %55 in 1 : vector<8x241xf32>, vector<8x15xf32> -> vector<8x256xf32>
    %58 = vector.broadcast %3 : vector<1x256xf32> to vector<8x256xf32>
    %59 = arith.mulf %57, %58 : vector<8x256xf32>
    %cst_33 = arith.constant dense<0.000000e+00> : vector<3x256xf32>
    %60 = tpu.matmul %54, %59, %cst_33 {dimension_numbers = #tpu.dot_dimension_numbers<[1], [0], [0], [1], [0, 0, 1, 1], [], []>} : vector<3x8xf32>, vector<8x256xf32>, vector<3x256xf32> -> vector<3x256xf32>
    %61 = arith.addf %52, %60 : vector<3x256xf32>
    %c7 = arith.constant 7 : index
    %c0_34 = arith.constant 0 : index
    %c0_35 = arith.constant 0 : index
    %62 = vector.load %arg4[%c7, %c0_34, %c0_35] : memref<9x3x8xf32, #tpu.memory_space<vmem>>, vector<1x3x8xf32>
    %63 = vector.shape_cast %62 : vector<1x3x8xf32> to vector<3x8xf32>
    %cst_36 = arith.constant 0.000000e+00 : f32
    %64 = vector.broadcast %cst_36 : f32 to vector<8x16xf32>
    %65 = vector.extract_strided_slice %2 {offsets = [0, 16], sizes = [8, 240], strides = [1, 1]} : vector<8x256xf32> to vector<8x240xf32>
    %66 = tpu.concatenate %65, %64 in 1 : vector<8x240xf32>, vector<8x16xf32> -> vector<8x256xf32>
    %cst_37 = arith.constant dense<0.000000e+00> : vector<3x256xf32>
    %67 = tpu.matmul %63, %66, %cst_37 {dimension_numbers = #tpu.dot_dimension_numbers<[1], [0], [0], [1], [0, 0, 1, 1], [], []>} : vector<3x8xf32>, vector<8x256xf32>, vector<3x256xf32> -> vector<3x256xf32>
    %68 = arith.addf %61, %67 : vector<3x256xf32>
    %c8 = arith.constant 8 : index
    %c0_38 = arith.constant 0 : index
    %c0_39 = arith.constant 0 : index
    %69 = vector.load %arg4[%c8, %c0_38, %c0_39] : memref<9x3x8xf32, #tpu.memory_space<vmem>>, vector<1x3x8xf32>
    %70 = vector.shape_cast %69 : vector<1x3x8xf32> to vector<3x8xf32>
    %cst_40 = arith.constant 0.000000e+00 : f32
    %71 = vector.broadcast %cst_40 : f32 to vector<8x17xf32>
    %72 = vector.extract_strided_slice %2 {offsets = [0, 17], sizes = [8, 239], strides = [1, 1]} : vector<8x256xf32> to vector<8x239xf32>
    %73 = tpu.concatenate %72, %71 in 1 : vector<8x239xf32>, vector<8x17xf32> -> vector<8x256xf32>
    %74 = vector.broadcast %4 : vector<1x256xf32> to vector<8x256xf32>
    %75 = arith.mulf %73, %74 : vector<8x256xf32>
    %cst_41 = arith.constant dense<0.000000e+00> : vector<3x256xf32>
    %76 = tpu.matmul %70, %75, %cst_41 {dimension_numbers = #tpu.dot_dimension_numbers<[1], [0], [0], [1], [0, 0, 1, 1], [], []>} : vector<3x8xf32>, vector<8x256xf32>, vector<3x256xf32> -> vector<3x256xf32>
    %77 = arith.addf %68, %76 : vector<3x256xf32>
    %c0_42 = arith.constant 0 : index
    %c0_43 = arith.constant 0 : index
    %78 = vector.load %arg5[%c0_42, %c0_43] : memref<3x1xf32, #tpu.memory_space<vmem>>, vector<3x1xf32>
    %79 = vector.broadcast %78 : vector<3x1xf32> to vector<3x256xf32>
    %80 = arith.addf %77, %79 : vector<3x256xf32>
    %c0_44 = arith.constant 0 : index
    %c0_45 = arith.constant 0 : index
    %c0_46 = arith.constant 0 : index
    %81 = vector.load %arg6[%c0_44, %c0_45, %c0_46] : memref<1x3x256xf32, #tpu.memory_space<vmem>>, vector<1x3x256xf32>
    %82 = vector.shape_cast %81 : vector<1x3x256xf32> to vector<3x256xf32>
    %83 = vector.shape_cast %80 : vector<3x256xf32> to vector<1x3x256xf32>
    tpu.vector_store %arg6[%c0_44, %c0_45, %c0_46], %83 {strides = array<i32>} : memref<1x3x256xf32, #tpu.memory_space<vmem>>, vector<1x3x256xf32>,
    return
  }
  func.func @transform_0(%arg0: i32) -> (i32, i32, i32) {
    %c0_i32 = arith.constant 0 : i32
    %c0_i32_0 = arith.constant 0 : i32
    %c0_i32_1 = arith.constant 0 : i32
    return %arg0, %c0_i32, %c0_i32_0 : i32, i32, i32
  }
  func.func @transform_1(%arg0: i32) -> (i32, i32) {
    %c0_i32 = arith.constant 0 : i32
    %c0_i32_0 = arith.constant 0 : i32
    %c0_i32_1 = arith.constant 0 : i32
    return %c0_i32, %c0_i32_0 : i32, i32
  }
  func.func @transform_2(%arg0: i32) -> (i32, i32) {
    %c0_i32 = arith.constant 0 : i32
    %c0_i32_0 = arith.constant 0 : i32
    %c0_i32_1 = arith.constant 0 : i32
    return %c0_i32, %c0_i32_0 : i32, i32
  }
  func.func @transform_3(%arg0: i32) -> (i32, i32, i32) {
    %c0_i32 = arith.constant 0 : i32
    %c0_i32_0 = arith.constant 0 : i32
    %c0_i32_1 = arith.constant 0 : i32
    %c0_i32_2 = arith.constant 0 : i32
    return %c0_i32, %c0_i32_0, %c0_i32_1 : i32, i32, i32
  }
  func.func @transform_4(%arg0: i32) -> (i32, i32) {
    %c0_i32 = arith.constant 0 : i32
    %c0_i32_0 = arith.constant 0 : i32
    %c0_i32_1 = arith.constant 0 : i32
    return %c0_i32, %c0_i32_0 : i32, i32
  }
  func.func @transform_5(%arg0: i32) -> (i32, i32, i32) {
    %c0_i32 = arith.constant 0 : i32
    %c0_i32_0 = arith.constant 0 : i32
    %c0_i32_1 = arith.constant 0 : i32
    return %arg0, %c0_i32, %c0_i32_0 : i32, i32, i32
  }
}

</mosaic_0001>

<bundles_post_ra>
// kernel: nafnet_refine_forward.11
= control target key start
LH: loop header
LB: loop body
LE: loop exit
PB: predicated region body
PF: predicated region fallthrough
CT: control target
= control target key end

     0   :  { %s1330_s18 = smov 0   ;;  %s1454_s0 = inlined_call_operand.vmem [shape: bf16[2,6,256], index: 0, kind: input, shape index: {}]   ;;  %s1455_s1 = inlined_call_operand.vmem [shape: f32[1,256], index: 1, kind: input, shape index: {}]   ;;  %s1456_s2 = inlined_call_operand.vmem [shape: f32[1,256], index: 2, kind: input, shape index: {}]   ;;  %s1457_s3 = inlined_call_operand.vmem [shape: f32[9,8,6], index: 3, kind: input, shape index: {}]   ;;  %s1458_s4 = inlined_call_operand.vmem [shape: f32[8,1], index: 4, kind: input, shape index: {}]   ;;  %s1459_s5 = inlined_call_operand.vmem [shape: bf16[2,8,256], index: 5, kind: output, shape index: {}]  }
   0x1 LB: > { %s1157_s19 = sadd.s32 4294967295, %s1288_s18   ;;  %p1161_p0 = scmp.ge.s32.totalorder %s1288_s18, 1  ;;  %s1288_s18 = sphi %s1330_s18, %s15_s18  }
   0x2   : > { %p187_p1 = scmp.lt.s32.totalorder %s1288_s18, 3 }
   0x4   : > { %p188_p2 = pnand %p1161_p0, %p187_p1 }
   0x5   : > { %p215_p3 = scmp.lt.s32.totalorder (!%p188_p2), %s1157_s19, 1  ;;  %v1290_v0 = vmov (!%p188_p2), 0.0   ;;  %vm269_vm0 = vcmask (!%p188_p2), 1045504   ;;  %vm265_vm1 = vcmask (!%p188_p2), 48128   ;;  %v1181_v6 = vld [vmem:[%s1457_s3 + $0x20] sm:$0xff] (!%p188_p2)  ;;  %s1291_s26 = smov (!%p188_p2), 127   ;;  %v243_v9 = vlaneseq (!%p188_p2) }
   0x6   : > { %191 = sbr.rel (%p188_p2) target bundleno = 389 (0x185), region = 40  ;;  %700 = vmatprep.mubr.f32.mxu0 (!%p188_p2), %v1290_v0  ;;  %339 = vmatprep.mubr.f32.mxu1 (!%p188_p2), %v1290_v0  ;;  %s1292_s27 = smov (!%p188_p2), 17   ;;  %v1085_v7 = vld [vmem:[%s1458_s4] sm:$0xff] (!%p188_p2)  ;;  %v1299_v8 = vmov (!%p188_p2), 0   ;;  %vm715_vm2 = vcmask (!%p188_p2), 1039360   ;;  %vm237_vm3 = vcmask (!%p188_p2), 138240  }
   0x7   : > { %s1293_s28 = smov (!%p188_p2), 16   ;;  %s1294_s29 = smov (!%p188_p2), 113   ;;  %1281 = vset.pattern.permute.xlu0 (!%p188_p2), %v1299_v8  ;;  %v244_v10 = vshrl.u32 (!%p188_p2), %v243_v9, 7  ;;  %v229_v13 = vld [vmem:[%s1456_s2] sm:$0x3] (!%p188_p2)  ;;  %vm810_vm4 = vcmask (!%p188_p2), 924672  }
   0x8   : > { %s1295_s30 = smov (!%p188_p2), 15   ;;  %s1296_s6 = smov (!%p188_p2), 112   ;;  %v228_v14 = vld [vmem:[%s1455_s1] sm:$0x3] (!%p188_p2)  ;;  %vm261_vm5 = vcmask (!%p188_p2), 130048   ;;  %v1185_v37 = vld [vmem:[%s1457_s3 + $0x28] sm:$0xff] (!%p188_p2) }
   0x9   : > { %s1297_s7 = smov (!%p188_p2), 111   ;;  %s1298_s8 = smov (!%p188_p2), 1   ;;  %v245_v11 = vsub.s32 (!%p188_p2), 0, %v244_v10  ;;  %v249_v12 = vsub.s32 (!%p188_p2), 1, %v244_v10  ;;  %v1166_v44 = vld [vmem:[%s1457_s3 + $0x8] sm:$0xff] (!%p188_p2)  ;;  %vm432_vm6 = vcmask (!%p188_p2), 121856  }
   0xa   : > { %vm905_vm7 = vcmask (!%p188_p2), 916480   ;;  %vm996_vm8 = vcmask (!%p188_p2), 908288   ;;  %vm538_vm9 = vcmask (!%p188_p2), 7168   ;;  %v1189_v59 = vld [vmem:[%s1457_s3 + $0x30] sm:$0xff] (!%p188_p2) }
   0xb   : > { %v1364_v15 = vrot.slane (!%p188_p2), %v229_v13, %v245_v11  ;;  %v1366_v16 = vrot.slane (!%p188_p2), %v229_v13, %v249_v12  ;;  %v1368_v23 = vrot.slane (!%p188_p2), %v228_v14, %v245_v11  ;;  %v1370_v24 = vrot.slane (!%p188_p2), %v228_v14, %v249_v12  ;;  %v1193_v11 = vld [vmem:[%s1457_s3 + $0x38] sm:$0xff] (!%p188_p2)  ;;  %v1173_v13 = vld [vmem:[%s1457_s3 + $0x10] sm:$0xff] (!%p188_p2)  ;;  %v1197_v14 = vld [vmem:[%s1457_s3 + $0x40] sm:$0xff] (!%p188_p2) }
   0xd   : > { %s1461_s19 = smov (!%p215_p3, %s1157_s19), 1 }
   0xe   : > { %s1204_s20 = sshll.u32 %s1461_s19, 3 }
   0xf   : > { %s219_s23 = scalar_lea.vmem %s1454_s0, %s1204_s20  ;;  %s224_s11 = scalar_lea.vmem %s1459_s5, %s1204_s20 }
  0x10   : > { %v225_v1 = vld [vmem:[%s219_s23] sm:$0x77] }
  0x11   : > { %v226_v2 = vunpack.c.l.bf16 %v225_v1  ;;  %v227_v3 = vunpack.c.h.bf16 %v225_v1 }
  0x13   : > { %v1241_v4 = vpack.i.bf16 %v226_v2, %v227_v3  ;;  %v1251_v5 = vpack.i.bf16 %v227_v3, %v226_v2  ;;  %1182 = vmatprep.subr.msk.mxu0 %vm269_vm0, %v227_v3  ;;  %v230_v3 = vld [vmem:[%s1457_s3] sm:$0xff] }
  0x14   : > { %1183 = vmatpush1.msk.msra.mxu0 %vm269_vm0, %v226_v2 }
  0x15   : > { %1242 = vrot.lane.b32.xlu0 %v1241_v4, %s1291_s26  ;;  %1252 = vrot.lane.b32.xlu1 %v1251_v5, %s1292_s27 }
  0x16   : > { %1184 = vmatmul.mubr.msk.f32.vlgmr.msra.gmra.mrb[0].mxu0 %vm265_vm1, %v1181_v6 }
  0x17   : > { %795 = vmatprep.mubr.f32.mxu0 %v1290_v0 }
  0x19   : > { %1247 = vrot.lane.b32.xlu0 %v1251_v5, %s1293_s28  ;;  %1257 = vrot.lane.b32.xlu1 %v1241_v4, %s1294_s29 }
  0x1d   : > { %1262 = vrot.lane.b32.xlu0 %v1251_v5, %s1295_s30  ;;  %1267 = vrot.lane.b32.xlu1 %v1241_v4, %s1296_s6 }
  0x21   : > { %1277 = vrot.lane.b32.xlu1 %v1241_v4, %s1297_s7  ;;  %1272 = vrot.lane.b32.xlu0 %v1251_v5, %s1298_s8 }
  0x25   : > { %1088 = vperm.xlu0 %1281, %v1085_v7  }
  0x87   : > { %v1243_v17 = vpop.permute.xlu0 %1242  ;;  %v1253_v18 = vpop.permute.xlu1 %1252 }
  0x88   : > { %v1245_v19 = vunpack.i.h.bf16 %v1243_v17  ;;  %v1244_v20 = vunpack.i.l.bf16 %v1243_v17  ;;  %v1255_v21 = vunpack.i.h.bf16 %v1253_v18  ;;  %v1254_v22 = vunpack.i.l.bf16 %v1253_v18 }
  0x8a   : > { %v716_v25 = vsel %vm715_vm2, %v1245_v19, %v1244_v20  ;;  %v719_v26 = vsel %vm715_vm2, %v1244_v20, 0.0  ;;  %v238_v27 = vsel %vm237_vm3, %v1254_v22, %v1255_v21  ;;  %v241_v28 = vsel %vm237_vm3, 0.0, %v1254_v22 }
  0x8b   : > { %v720_v29 = vmul.f32 %v716_v25, %v1364_v15  ;;  %v721_v30 = vmul.f32 %v719_v26, %v1366_v16  ;;  %v1248_v31 = vpop.permute.xlu0 %1247  ;;  %v1258_v32 = vpop.permute.xlu1 %1257  ;;  %v253_v38 = vmul.f32 %v1368_v23, %v241_v28  ;;  %v254_v39 = vmul.f32 %v1370_v24, %v238_v27 }
  0x8c   : > { %v1250_v33 = vunpack.i.h.bf16 %v1248_v31  ;;  %v1249_v34 = vunpack.i.l.bf16 %v1248_v31  ;;  %v1260_v35 = vunpack.i.h.bf16 %v1258_v32  ;;  %v1259_v36 = vunpack.i.l.bf16 %v1258_v32 }
  0x8d   : > { %1186 = vmatprep.subr.msk.mxu0 %vm269_vm0, %v721_v30 }
  0x8e   : > { %v811_v40 = vsel %vm810_vm4, %v1260_v35, %v1259_v36  ;;  %v814_v41 = vsel %vm810_vm4, %v1259_v36, 0.0  ;;  %1187 = vmatpush1.msk.msra.mxu0 %vm269_vm0, %v720_v29  ;;  %v262_v42 = vsel %vm261_vm5, %v1249_v34, %v1250_v33  ;;  %v264_v43 = vsel %vm261_vm5, 0.0, %v1249_v34 }
  0x8f   : > { %v815_v45 = vmul.f32 %v811_v40, %v1368_v23  ;;  %v816_v46 = vmul.f32 %v814_v41, %v1370_v24  ;;  %1167 = vmatprep.subr.msk.mxu1 %vm269_vm0, %v262_v42  ;;  %1188 = vmatmul.mubr.msk.f32.vlgmr.msra.gmra.mrb[0].mxu0 %vm265_vm1, %v1185_v37  ;;  %v1263_v47 = vpop.permute.xlu0 %1262  ;;  %v1268_v48 = vpop.permute.xlu1 %1267 }
  0x90   : > { %1168 = vmatpush1.msk.msra.mxu1 %vm269_vm0, %v264_v43  ;;  %v1265_v49 = vunpack.i.h.bf16 %v1263_v47  ;;  %v1264_v50 = vunpack.i.l.bf16 %v1263_v47  ;;  %890 = vmatprep.mubr.f32.mxu0 %v1290_v0  ;;  %v1269_v51 = vunpack.i.l.bf16 %v1268_v48  ;;  %v1270_v52 = vunpack.i.h.bf16 %v1268_v48 }
  0x91   : > { %1169 = vmatmul.mubr.msk.f32.vlgmr.msra.gmra.mrb[0].mxu1 %vm265_vm1, %v1166_v44  ;;  %1170 = vmatprep.subr.msk.mxu1 %vm269_vm0, %v254_v39 }
  0x92   : > { %1171 = vmatpush1.msk.msra.mxu1 %vm269_vm0, %v253_v38  ;;  %1190 = vmatprep.subr.msk.mxu0 %vm269_vm0, %v816_v46  ;;  %v433_v53 = vsel %vm432_vm6, %v1264_v50, %v1265_v49  ;;  %v908_v54 = vsel %vm905_vm7, %v1269_v51, 0.0  ;;  %v436_v55 = vsel %vm432_vm6, 0.0, %v1264_v50  ;;  %v906_v63 = vsel %vm905_vm7, %v1270_v52, %v1269_v51 }
  0x93   : > { %1191 = vmatpush1.msk.msra.mxu0 %vm269_vm0, %v815_v45  ;;  %v449_v56 = vmul.f32 %v1366_v16, %v433_v53  ;;  %419 = vmatprep.mubr.f32.mxu1 %v1290_v0  ;;  %v1278_v57 = vpop.permute.xlu1 %1277  ;;  %v1273_v58 = vpop.permute.xlu0 %1272  ;;  %v448_v2 = vmul.f32 %v1364_v15, %v436_v55 }
  0x94   : > { %1194 = vmatprep.subr.msk.mxu0 %vm269_vm0, %v908_v54  ;;  %v1279_v60 = vunpack.i.l.bf16 %v1278_v57  ;;  %v1275_v61 = vunpack.i.h.bf16 %v1273_v58  ;;  %v1274_v62 = vunpack.i.l.bf16 %v1273_v58  ;;  %v1280_v1 = vunpack.i.h.bf16 %v1278_v57 }
  0x95   : > { %1174 = vmatprep.subr.msk.mxu1 %vm269_vm0, %v449_v56 }
  0x96   : > { %v1000_v4 = vsel %vm996_vm8, %v1279_v60, 0.0  ;;  %v539_v5 = vsel %vm538_vm9, %v1274_v62, %v1275_v61  ;;  %v997_v8 = vsel %vm996_vm8, %v1280_v1, %v1279_v60  ;;  %v542_v9 = vsel %vm538_vm9, 0.0, %v1274_v62 }
  0x97   : > { %1192 = vmatmul.mubr.msk.f32.vlgmr.msra.gmra.mrb[0].mxu0 %vm265_vm1, %v1189_v59  ;;  %v1002_v6 = vmul.f32 %v1000_v4, %v1366_v16  ;;  %v544_v7 = vmul.f32 %v539_v5, %v1370_v24  ;;  %v1001_v10 = vmul.f32 %v997_v8, %v1364_v15  ;;  %v543_v12 = vmul.f32 %v542_v9, %v1368_v23  ;;  %v1177_v15 = vld [vmem:[%s1457_s3 + $0x18] sm:$0xff] }
  0x98   : > { %1195 = vmatpush1.msk.msra.mxu0 %vm269_vm0, %v906_v63  ;;  %981 = vmatprep.mubr.f32.mxu0 %v1290_v0 }
  0x99   : > { %1172 = vmatmul.mubr.msk.f32.vlgmr.msra.gmra.mrb[0].mxu1 %vm265_vm1, %v230_v3  ;;  %1198 = vmatprep.subr.msk.mxu0 %vm269_vm0, %v1002_v6 }
  0x9a   : > { %1175 = vmatpush1.msk.msra.mxu1 %vm269_vm0, %v448_v2  ;;  %523 = vmatprep.mubr.f32.mxu1 %v1290_v0 }
  0x9b   : > { %1178 = vmatprep.subr.msk.mxu1 %vm269_vm0, %v544_v7 }
  0x9f   : > { %1196 = vmatmul.mubr.msk.f32.vlgmr.msra.gmra.mrb[0].mxu0 %vm265_vm1, %v1193_v11 }
  0xa0   : > { %1199 = vmatpush1.msk.msra.mxu0 %vm269_vm0, %v1001_v10  ;;  %1076 = vmatprep.mubr.f32.mxu0 %v1290_v0 }
  0xa1   : > { %1176 = vmatmul.mubr.msk.f32.vlgmr.msra.gmra.mrb[0].mxu1 %vm265_vm1, %v1173_v13 }
  0xa2   : > { %1179 = vmatpush1.msk.msra.mxu1 %vm269_vm0, %v543_v12  ;;  %618 = vmatprep.mubr.f32.mxu1 %v1290_v0 }
  0xa4   : > { %v1089_v19 = vpop.permute.xlu0 %1088 }
  0xa7   : > { %1200 = vmatmul.mubr.msk.f32.vlgmr.msra.gmra.mrb[0].mxu0 %vm265_vm1, %v1197_v14 }
  0xa9   : > { %1180 = vmatmul.mubr.msk.f32.vlgmr.msra.gmra.mrb[0].mxu1 %vm265_vm1, %v1177_v15 }
 0x17a   : > { %v1078_v16 = vpop.f32.mrb[0].mxu0 }
 0x17b   : > { %v1080_v17 = vpop.f32.mrb[1].mxu0 }
 0x17c   : > { %v620_v18 = vpop.f32.mrb[0].mxu1 }
 0x17d   : > { %v1207_v20 = vadd.f32 %v1078_v16, %v620_v18  ;;  %v622_v21 = vpop.f32.mrb[1].mxu1 }
 0x17e   : > { %v1208_v22 = vadd.f32 %v1080_v17, %v622_v21 }
 0x17f   : > { %v1091_v0 = vadd.f32 %v1207_v20, %v1089_v19 }
 0x180   : > { %v1092_v23 = vadd.f32 %v1208_v22, %v1089_v19 }
 0x182   : > { %v1206_v24 = vpack.c.bf16 %v1092_v23, %v1091_v0 }
 0x184   : > { %1101 = vst [vmem:[%s224_s11] sm:$0xff] %v1206_v24 }
 0x185 PF: > { %s15_s18 = sadd.s32 1, %s1288_s18  }
 0x186   : > { %p12_p4 = scmp.ge.s32.totalorder %s15_s18, 4  }
 0x188   :  { %14 = sbr.rel (!%p12_p4) target bundleno = 1 (0x1), region = 78 }

// kernel: nafnet_refine_forward.13
= control target key start
LH: loop header
LB: loop body
LE: loop exit
PB: predicated region body
PF: predicated region fallthrough
CT: control target
= control target key end

     0   :  { %s433_s12 = smov 0   ;;  %s464_s0 = inlined_call_operand.vmem [shape: bf16[2,32,64], index: 0, kind: input, shape index: {}]   ;;  %s465_s1 = inlined_call_operand.vmem [shape: f32[16,32], index: 1, kind: input, shape index: {}]   ;;  %s466_s2 = inlined_call_operand.vmem [shape: f32[16,1], index: 2, kind: input, shape index: {}]   ;;  %s467_s3 = inlined_call_operand.vmem [shape: bf16[2,16,64], index: 3, kind: output, shape index: {}]  }
   0x1 LB: > { %s341_s13 = sadd.s32 4294967295, %s410_s12   ;;  %p345_p0 = scmp.ge.s32.totalorder %s410_s12, 1  ;;  %s410_s12 = sphi %s433_s12, %s13_s12  }
   0x2   : > { %p137_p1 = scmp.lt.s32.totalorder %s410_s12, 3 }
   0x4   : > { %p138_p2 = pnand %p345_p0, %p137_p1 }
   0x5   : > { %p161_p3 = scmp.lt.s32.totalorder (!%p138_p2), %s341_s13, 1  ;;  %v171_v0 = vld [vmem:[%s465_s1] sm:$0xff] (!%p138_p2)  ;;  %vm193_vm0 = vcmask (!%p138_p2), 261120   ;;  %v412_v2 = vmov (!%p138_p2), 0   ;;  %v182_v3 = vld [vmem:[%s466_s2 + $0x8] sm:$0xff] (!%p138_p2)  ;;  %vm283_vm1 = vcmask (!%p138_p2), 519168  }
   0x6   : > { %141 = sbr.rel (%p138_p2) target bundleno = 243 (0xf3), region = 32  ;;  %v181_v1 = vld [vmem:[%s466_s2] sm:$0xff] (!%p138_p2)  ;;  %383 = vmatprep.mubr.msk.f32.mxu0 (!%p138_p2), %vm193_vm0, %v171_v0  ;;  %403 = vset.pattern.permute.xlu0 (!%p138_p2), %v412_v2  ;;  %v172_v6 = vld [vmem:[%s465_s1 + $0x8] sm:$0xff] (!%p138_p2) }
   0x7   : > { %185 = vperm.xlu0 (!%p138_p2), %403, %v181_v1  }
   0xb   : > { %190 = vperm.xlu0 (!%p138_p2), %403, %v182_v3  }
   0xd   : > { %s469_s13 = smov (!%p161_p3, %s341_s13), 1 }
   0xe   : > { %s356_s20 = sshll.u32 %s469_s13, 4  ;;  %s357_s26 = sshll.u32 %s469_s13, 3 }
   0xf   : > { %s165_s23 = scalar_lea.vmem %s464_s0, %s356_s20  ;;  %s170_s29 = scalar_lea.vmem %s467_s3, %s357_s26 }
  0x10   : > { %v361_v4 = vld [vmem:[%s165_s23] sm:$0xff]   ;;  %v368_v5 = vld [vmem:[%s165_s23 + $0x8] sm:$0xff]  }
  0x11   : > { %387 = vmatprep.subr.bf16.mxu0 %v361_v4 }
  0x12   : > { %389 = vmatpush3.bf16.msra.mxu0 %v361_v4 }
  0x13   : > { %391 = vmatprep.subr.bf16.mxu0 %v368_v5 }
  0x16   : > { %393 = vmatpush3.bf16.msra.mxu0 %v368_v5 }
  0x19   : > { %384 = vmatmul.mubr.msk.f32.vlgmr.msra.gmra.mrb[0].mxu0 %vm193_vm0, %v172_v6 }
  0x86   : > { %v186_v7 = vpop.permute.xlu0 %185 }
  0x8a   : > { %v191_v8 = vpop.permute.xlu0 %190 }
  0xec   : > { %v385_v9 = vpop.f32.mrb[0].mxu0 }
  0xed   : > { %v272_v10 = vadd.f32 %v385_v9, %v191_v8  ;;  %v266_v11 = vpop.f32.mrb[1].mxu0 }
  0xee   : > { %v267_v12 = vadd.f32 %v266_v11, %v186_v7 }
  0xef   : > { %v359_v13 = vpack.c.bf16 %v272_v10, %v272_v10 }
  0xf0   : > { %v358_v14 = vpack.c.bf16 %v267_v12, %v267_v12 }
  0xf1   : > { %285 = vst.msk [vmem:[%s170_s29 + $0x4] sm:$0xf] %vm283_vm1, %v359_v13 }
  0xf2   : > { %284 = vst.msk [vmem:[%s170_s29] sm:$0xf] %vm283_vm1, %v358_v14 }
  0xf3 PF: > { %s13_s12 = sadd.s32 1, %s410_s12  }
  0xf4   : > { %p10_p4 = scmp.ge.s32.totalorder %s13_s12, 4  }
  0xf6   :  { %12 = sbr.rel (!%p10_p4) target bundleno = 1 (0x1), region = 62 }

// kernel: nafnet_refine_forward.12
= control target key start
LH: loop header
LB: loop body
LE: loop exit
PB: predicated region body
PF: predicated region fallthrough
CT: control target
= control target key end

     0   :  { %s2255_s0 = inlined_call_operand.vmem [shape: bf16[2,8,256], index: 0, kind: input, shape index: {}]   ;;  %s2256_s1 = inlined_call_operand.vmem [shape: f32[1,256], index: 1, kind: input, shape index: {}]   ;;  %s2257_s2 = inlined_call_operand.vmem [shape: f32[1,256], index: 2, kind: input, shape index: {}]   ;;  %s2258_s3 = inlined_call_operand.vmem [shape: f32[8,1], index: 3, kind: input, shape index: {}, may-alias: {3,14}]   ;;  %s2259_s4 = inlined_call_operand.vmem [shape: f32[8,1], index: 4, kind: input, shape index: {}, may-alias: {4,15}]   ;;  %s2260_s5 = inlined_call_operand.vmem [shape: f32[16,8], index: 5, kind: input, shape index: {}]   ;;  %s2261_s6 = inlined_call_operand.vmem [shape: f32[16,1], index: 6, kind: input, shape index: {}]   ;;  %s2262_s7 = inlined_call_operand.vmem [shape: f32[9,16,1], index: 7, kind: input, shape index: {}]   ;;  %s2263_s8 = inlined_call_operand.vmem [shape: f32[16,1], index: 8, kind: input, shape index: {}]   ;;  %s2264_s9 = inlined_call_operand.vmem [shape: f32[8,8], index: 9, kind: input, shape index: {}]   ;;  %s2265_s10 = inlined_call_operand.vmem [shape: f32[8,1], index: 10, kind: input, shape index: {}]   ;;  %s2266_s11 = inlined_call_operand.vmem [shape: f32[8,8], index: 11, kind: input, shape index: {}]   ;;  %s2267_s12 = inlined_call_operand.vmem [shape: f32[8,1], index: 12, kind: input, shape index: {}]   ;;  %s2268_s13 = inlined_call_operand.vmem [shape: f32[8,1], index: 13, kind: input, shape index: {}]   ;;  %s2269_s14 = inlined_call_operand.vmem [shape: f32[8,1], index: 14, kind: input, shape index: {}, may-alias: {3,14}]   ;;  %s2270_s15 = inlined_call_operand.vmem [shape: f32[8,1], index: 15, kind: input, shape index: {}, may-alias: {4,15}]   ;;  %s2271_s16 = inlined_call_operand.vmem [shape: f32[16,8], index: 16, kind: input, shape index: {}]   ;;  %s2272_s17 = inlined_call_operand.vmem [shape: f32[16,1], index: 17, kind: input, shape index: {}]   ;;  %s2273_s18 = inlined_call_operand.vmem [shape: f32[8,8], index: 18, kind: input, shape index: {}]   ;;  %s2274_s19 = inlined_call_operand.vmem [shape: f32[8,1], index: 19, kind: input, shape index: {}]   ;;  %s2275_s20 = inlined_call_operand.vmem [shape: f32[8,1], index: 20, kind: input, shape index: {}]   ;;  %s2276_s21 = inlined_call_operand.vmem [shape: bf16[2,8,256], index: 21, kind: output, shape index: {}]  }
   0x1   :  { %2278 = sst [smem:[#allocation2_spill]] %s2255_s0 }
   0x2   :  { %2279 = sst [smem:[#allocation3_spill]] %s2256_s1 }
   0x3   :  { %2280 = sst [smem:[#allocation4_spill]] %s2257_s2  ;;  %s1896_s2 = smov 0  }
   0x4   :  { %2281 = sst [smem:[#allocation5_spill]] %s2258_s3 }
   0x5   :  { %2282 = sst [smem:[#allocation6_spill]] %s2259_s4 }
   0x6   :  { %2283 = sst [smem:[#allocation7_spill]] %s2260_s5 }
   0x7 LB: > { %s1693_s25 = sadd.s32 4294967295, %s1773_s2   ;;  %p1697_p0 = scmp.ge.s32.totalorder %s1773_s2, 1  ;;  %s1773_s2 = sphi %s1896_s2, %s31_s2  }
   0x8   : > { %p587_p1 = scmp.lt.s32.totalorder %s1773_s2, 3 }
   0xa   : > { %p588_p2 = pnand %p1697_p0, %p587_p1 }
   0xb   : > { %s2284_s3 = sld [smem:[#allocation5_spill]] (!%p588_p2)  ;;  %v1775_v1 = vmov (!%p588_p2), 0   ;;  %s2285_s0 = sld [smem:[#allocation6_spill]] (!%p588_p2)  ;;  %v851_v3 = vld [vmem:[%s2262_s7] sm:$0xff] (!%p588_p2)  ;;  %v1776_v4 = vmov (!%p588_p2), 0.0   ;;  %v1704_v5 = vld [vmem:[%s2262_s7 + $0x10] sm:$0xff] (!%p588_p2) }
   0xc   : > { %591 = sbr.rel (%p588_p2) target bundleno = 1775 (0x6ef), region = 104  ;;  %1757 = vset.pattern.permute.xlu0 (!%p588_p2), %v1775_v1  ;;  %1758 = vset.pattern.permute.xlu1 (!%p588_p2), %v1775_v1  ;;  %v1706_v6 = vld [vmem:[%s2262_s7 + $0x20] sm:$0xff] (!%p588_p2)  ;;  %v1708_v7 = vld [vmem:[%s2262_s7 + $0x30] sm:$0xff] (!%p588_p2)  ;;  %p647_p3 = scmp.lt.s32.totalorder (!%p588_p2), %s1693_s25, 1  ;;  %v720_v17 = vld [vmem:[%s2261_s6 + $0x8] sm:$0xff] (!%p588_p2)  ;;  %vm731_vm0 = vcmask (!%p588_p2), 64512  }
   0xd   : > { %802 = vmatprep.mubr.f32.mxu0 (!%p588_p2), %v1776_v4  ;;  %1733 = vmatprep.subr.mxu1 (!%p588_p2), %v1776_v4  ;;  %v1710_v8 = vld [vmem:[%s2262_s7 + $0x40] sm:$0xff] (!%p588_p2)  ;;  %v1712_v9 = vld [vmem:[%s2262_s7 + $0x50] sm:$0xff] (!%p588_p2)  ;;  %s2286_s24 = sld [smem:[#allocation2_spill]] (!%p588_p2)  ;;  %v852_v20 = vld [vmem:[%s2262_s7 + $0x8] sm:$0xff] (!%p588_p2)  ;;  %s2287_s28 = sld [smem:[#allocation7_spill]] (!%p588_p2)  ;;  %vm827_vm1 = vcmask (!%p588_p2), 138240  }
   0xe   : > { %v1714_v10 = vld [vmem:[%s2262_s7 + $0x60] sm:$0xff] (!%p588_p2)  ;;  %v1716_v11 = vld [vmem:[%s2262_s7 + $0x70] sm:$0xff] (!%p588_p2)  ;;  %v1705_v23 = vld [vmem:[%s2262_s7 + $0x18] sm:$0xff] (!%p588_p2)  ;;  %s1777_s4 = smov (!%p588_p2), 17   ;;  %s1778_s5 = smov (!%p588_p2), 16   ;;  %vm879_vm2 = vcmask (!%p588_p2), 130048  }
   0xf   : > { %v1718_v12 = vld [vmem:[%s2262_s7 + $0x80] sm:$0xff] (!%p588_p2)  ;;  %v1707_v26 = vld [vmem:[%s2262_s7 + $0x28] sm:$0xff] (!%p588_p2)  ;;  %v1709_v29 = vld [vmem:[%s2262_s7 + $0x38] sm:$0xff] (!%p588_p2)  ;;  %s1779_s22 = smov (!%p588_p2), 15   ;;  %s1780_s23 = smov (!%p588_p2), 1   ;;  %vm917_vm3 = vcmask (!%p588_p2), 121856  }
  0x10   : > { %v719_v14 = vld [vmem:[%s2261_s6] sm:$0xff] (!%p588_p2)  ;;  %v1711_v32 = vld [vmem:[%s2262_s7 + $0x48] sm:$0xff] (!%p588_p2)  ;;  %v1713_v35 = vld [vmem:[%s2262_s7 + $0x58] sm:$0xff] (!%p588_p2)  ;;  %s1781_s1 = smov (!%p588_p2), 127   ;;  %s1784_s27 = smov (!%p588_p2), 111   ;;  %vm970_vm4 = vcmask (!%p588_p2), 7168  }
  0x11   : > { %v701_v0 = vld [vmem:[%s2284_s3] sm:$0xff] (!%p588_p2)  ;;  %723 = vperm.xlu1 (!%p588_p2), %1758, %v719_v14   ;;  %v1715_v38 = vld [vmem:[%s2262_s7 + $0x68] sm:$0xff] (!%p588_p2)  ;;  %v1717_v41 = vld [vmem:[%s2262_s7 + $0x78] sm:$0xff] (!%p588_p2)  ;;  %vm1033_vm5 = vcmask (!%p588_p2), 1039360   ;;  %vm1075_vm6 = vcmask (!%p588_p2), 924672   ;;  %vm1117_vm7 = vcmask (!%p588_p2), 916480  }
  0x12   : > { %704 = vperm.xlu0 (!%p588_p2), %1757, %v701_v0   ;;  %v709_v2 = vld [vmem:[%s2285_s0] sm:$0xff] (!%p588_p2)  ;;  %v1719_v44 = vld [vmem:[%s2262_s7 + $0x88] sm:$0xff] (!%p588_p2)  ;;  %vm1155_vm8 = vcmask (!%p588_p2), 908288   ;;  %vm1785_vm9 = vmmov (!%p588_p2), 0  }
  0x13   : > { %s2291_s25 = smov (!%p647_p3, %s1693_s25), 1  ;;  %1735 = vmatprep.mubr.msk.f32.mxu1 %vm1785_vm9, %v1776_v4 }
  0x14   : > { %s1728_s30 = sshll.u32 %s2291_s25, 3 }
  0x15   : > { %s651_s26 = scalar_lea.vmem %s2286_s24, %s1728_s30  ;;  %728 = vperm.xlu1 %1758, %v720_v17   ;;  %s1782_s24 = smov 113  }
  0x16   : > { %712 = vperm.xlu0 %1757, %v709_v2   ;;  %v657_v13 = vld [vmem:[%s651_s26] sm:$0xff]  ;;  %s1783_s26 = smov 112  }
  0x17   : > { %v1950_v15 = vunpack.c.l.bf16 %v657_v13  ;;  %v1952_v16 = vunpack.c.h.bf16 %v657_v13 }
  0x19   : > { %v662_v18 = vrot.slane %v1950_v15, 4  ;;  %v668_v19 = vrot.slane %v1952_v16, 4  ;;  %860 = vperm.xlu1 %1758, %v852_v20  }
  0x1a   : > { %855 = vperm.xlu0 %1757, %v851_v3  }
  0x1b   : > { %v663_v21 = vadd.f32 %v662_v18, %v1950_v15  ;;  %v669_v22 = vadd.f32 %v668_v19, %v1952_v16 }
  0x1d   : > { %v664_v24 = vrot.slane %v663_v21, 2  ;;  %898 = vperm.xlu1 %1758, %v1705_v23   ;;  %v670_v25 = vrot.slane %v669_v22, 2 }
  0x1e   : > { %893 = vperm.xlu0 %1757, %v1704_v5  }
  0x1f   : > { %v665_v27 = vadd.f32 %v664_v24, %v663_v21  ;;  %v671_v28 = vadd.f32 %v670_v25, %v669_v22  ;;  %v1189_v22 = vld [vmem:[%s2263_s8] sm:$0xff]  ;;  %v1190_v24 = vld [vmem:[%s2263_s8 + $0x8] sm:$0xff] }
  0x21   : > { %951 = vperm.xlu1 %1758, %v1707_v26   ;;  %v666_v30 = vrot.slane %v665_v27, 1  ;;  %v672_v31 = vrot.slane %v671_v28, 1 }
  0x22   : > { %946 = vperm.xlu0 %1757, %v1706_v6  }
  0x23   : > { %v667_v33 = vadd.f32 %v666_v30, %v665_v27  ;;  %v673_v34 = vadd.f32 %v672_v31, %v671_v28 }
  0x25   : > { %993 = vperm.xlu1 %1758, %v1709_v29   ;;  %v675_v36 = vmul.f32 0.125, %v667_v33  ;;  %v676_v37 = vmul.f32 0.125, %v673_v34 }
  0x26   : > { %988 = vperm.xlu0 %1757, %v1708_v7  }
  0x27   : > { %v677_v39 = vsub.f32 %v1950_v15, %v675_v36  ;;  %v678_v40 = vsub.f32 %v1952_v16, %v676_v37 }
  0x29   : > { %1014 = vperm.xlu1 %1758, %v1711_v32   ;;  %v679_v42 = vmul.f32 %v677_v39, %v677_v39  ;;  %v680_v43 = vmul.f32 %v678_v40, %v678_v40 }
  0x2a   : > { %1009 = vperm.xlu0 %1757, %v1710_v8   ;;  %v717_v8 = vld [vmem:[%s2287_s28] sm:$0xff] }
  0x2b   : > { %v681_v45 = vrot.slane %v679_v42, 4  ;;  %v687_v46 = vrot.slane %v680_v43, 4 }
  0x2d   : > { %1056 = vperm.xlu1 %1758, %v1713_v35   ;;  %v682_v47 = vadd.f32 %v681_v45, %v679_v42  ;;  %v688_v48 = vadd.f32 %v687_v46, %v680_v43 }
  0x2e   : > { %1051 = vperm.xlu0 %1757, %v1712_v9   ;;  %v718_v9 = vld [vmem:[%s2287_s28 + $0x8] sm:$0xff] }
  0x2f   : > { %v683_v49 = vrot.slane %v682_v47, 2  ;;  %v689_v50 = vrot.slane %v688_v48, 2 }
  0x31   : > { %1098 = vperm.xlu1 %1758, %v1715_v38   ;;  %v684_v51 = vadd.f32 %v683_v49, %v682_v47  ;;  %v690_v52 = vadd.f32 %v689_v50, %v688_v48 }
  0x32   : > { %1093 = vperm.xlu0 %1757, %v1714_v10  }
  0x33   : > { %v685_v53 = vrot.slane %v684_v51, 1  ;;  %v691_v54 = vrot.slane %v690_v52, 1 }
  0x35   : > { %1136 = vperm.xlu1 %1758, %v1717_v41   ;;  %v686_v55 = vadd.f32 %v685_v53, %v684_v51  ;;  %v692_v56 = vadd.f32 %v691_v54, %v690_v52 }
  0x36   : > { %1131 = vperm.xlu0 %1757, %v1716_v11  }
  0x37   : > { %v693_v57 = vmul.f32 0.125, %v686_v55  ;;  %v694_v58 = vmul.f32 0.125, %v692_v56 }
  0x39   : > { %1178 = vperm.xlu1 %1758, %v1719_v44   ;;  %v695_v59 = vadd.f32 1e-06, %v693_v57  ;;  %v696_v60 = vadd.f32 1e-06, %v694_v58 }
  0x3a   : > { %1173 = vperm.xlu0 %1757, %v1718_v12  }
  0x3b   : > { %1759 = vrsqrt.f32 %v695_v59 }
  0x3c   : > { %1761 = vrsqrt.f32 %v696_v60 }
  0x45   : > { %v1760_v61 = vpop.eup %1759 }
  0x46   : > { %v1762_v62 = vpop.eup %1761  ;;  %v699_v63 = vmul.f32 %v1760_v61, %v677_v39 }
  0x47   : > { %v700_v0 = vmul.f32 %v1762_v62, %v678_v40  ;;  %v837_v40 = vlaneseq }
  0x49   : > { %v838_v42 = vshrl.u32 %v837_v40, 7 }
  0x4b   : > { %v839_v44 = vsub.s32 0, %v838_v42  ;;  %v843_v47 = vsub.s32 1, %v838_v42 }
  0x90   : > { %v724_v10 = vpop.permute.xlu1 %723 }
  0x91   : > { %v705_v1 = vpop.permute.xlu0 %704 }
  0x92   : > { %v707_v2 = vmul.f32 %v705_v1, %v699_v63  ;;  %v708_v3 = vmul.f32 %v705_v1, %v700_v0 }
  0x94   : > { %v729_v19 = vpop.permute.xlu1 %728 }
  0x95   : > { %v713_v5 = vpop.permute.xlu0 %712 }
  0x96   : > { %v716_v6 = vadd.f32 %v713_v5, %v708_v3  ;;  %v715_v7 = vadd.f32 %v713_v5, %v707_v2 }
  0x98   : > { %738 = vmatprep.subr.mxu0 %v716_v6  ;;  %v2046_v25 = vpop.permute.xlu1 %860 }
  0x99   : > { %739 = vmatpush1.msra.mxu0 %v715_v7  ;;  %v856_v23 = vpop.permute.xlu0 %855 }
  0x9a   : > { %1702 = vmatmul.mubr.msk.f32.vlgmr.msra.gmra.mrb[0].mxu0 %vm731_vm0, %v717_v8 }
  0x9b   : > { %808 = vmatprep.mubr.f32.mxu0 %v1776_v4 }
  0x9c   : > { %v2048_v27 = vpop.permute.xlu1 %898 }
  0x9d   : > { %v894_v26 = vpop.permute.xlu0 %893 }
  0x9e   : > { %1703 = vmatmul.mubr.msk.f32.gmra.mrb[2].mxu0 %vm731_vm0, %v718_v9 }
  0x9f   : > { %1523 = vmatprep.mubr.f32.mxu0 %v1776_v4 }
  0xa0   : > { %v2050_v29 = vpop.permute.xlu1 %951 }
  0xa1   : > { %v947_v28 = vpop.permute.xlu0 %946 }
  0xa4   : > { %v2052_v31 = vpop.permute.xlu1 %993 }
  0xa5   : > { %v989_v30 = vpop.permute.xlu0 %988 }
  0xa8   : > { %v2056_v33 = vpop.permute.xlu1 %1014 }
  0xa9   : > { %v2054_v32 = vpop.permute.xlu0 %1009 }
  0xac   : > { %v2060_v35 = vpop.permute.xlu1 %1056 }
  0xad   : > { %v2058_v34 = vpop.permute.xlu0 %1051 }
  0xb0   : > { %v2064_v37 = vpop.permute.xlu1 %1098 }
  0xb1   : > { %v2062_v36 = vpop.permute.xlu0 %1093 }
  0xb4   : > { %v2068_v39 = vpop.permute.xlu1 %1136 }
  0xb5   : > { %v2066_v38 = vpop.permute.xlu0 %1131 }
  0xb8   : > { %v2072_v43 = vpop.permute.xlu1 %1178 }
  0xb9   : > { %v2070_v41 = vpop.permute.xlu0 %1173 }
 0x16d   : > { %v804_v11 = vpop.f32.mrb[0].mxu0 }
 0x16e   : > { %v2000_v12 = vadd.f32 %v804_v11, %v724_v10  ;;  %v806_v13 = vpop.f32.mrb[1].mxu0 }
 0x16f   : > { %v2002_v14 = vadd.f32 %v806_v13, %v724_v10 }
 0x170   : > { %819 = vrot.lane.b32.xlu0 %v2000_v12, %s1777_s4 }
 0x171   : > { %v810_v17 = vpop.f32.mrb[2].mxu0  ;;  %821 = vrot.lane.b32.xlu1 %v2002_v14, %s1777_s4 }
 0x172   : > { %v812_v18 = vpop.f32.mrb[3].mxu0  ;;  %v2020_v20 = vadd.f32 %v810_v17, %v729_v19 }
 0x173   : > { %v2022_v21 = vadd.f32 %v812_v18, %v729_v19 }
 0x174   : > { %871 = vrot.lane.b32.xlu0 %v2000_v12, %s1778_s5 }
 0x175   : > { %873 = vrot.lane.b32.xlu1 %v2002_v14, %s1778_s5 }
 0x178   : > { %909 = vrot.lane.b32.xlu0 %v2000_v12, %s1779_s22 }
 0x179   : > { %911 = vrot.lane.b32.xlu1 %v2002_v14, %s1779_s22 }
 0x17c   : > { %962 = vrot.lane.b32.xlu0 %v2000_v12, %s1780_s23 }
 0x17d   : > { %964 = vrot.lane.b32.xlu1 %v2002_v14, %s1780_s23 }
 0x180   : > { %1025 = vrot.lane.b32.xlu0 %v2000_v12, %s1781_s1 }
 0x181   : > { %1027 = vrot.lane.b32.xlu1 %v2002_v14, %s1781_s1 }
 0x184   : > { %1067 = vrot.lane.b32.xlu0 %v2000_v12, %s1782_s24 }
 0x185   : > { %1069 = vrot.lane.b32.xlu1 %v2002_v14, %s1782_s24 }
 0x188   : > { %1109 = vrot.lane.b32.xlu0 %v2000_v12, %s1783_s26 }
 0x189   : > { %1111 = vrot.lane.b32.xlu1 %v2002_v14, %s1783_s26 }
 0x18c   : > { %1147 = vrot.lane.b32.xlu0 %v2000_v12, %s1784_s27 }
 0x18d   : > { %1149 = vrot.lane.b32.xlu1 %v2002_v14, %s1784_s27 }
 0x190   : > { %823 = vrot.lane.b32.xlu0 %v2020_v20, %s1777_s4 }
 0x191   : > { %825 = vrot.lane.b32.xlu1 %v2022_v21, %s1777_s4 }
 0x194   : > { %875 = vrot.lane.b32.xlu0 %v2020_v20, %s1778_s5 }
 0x195   : > { %877 = vrot.lane.b32.xlu1 %v2022_v21, %s1778_s5 }
 0x198   : > { %913 = vrot.lane.b32.xlu0 %v2020_v20, %s1779_s22 }
 0x199   : > { %915 = vrot.lane.b32.xlu1 %v2022_v21, %s1779_s22 }
 0x19c   : > { %966 = vrot.lane.b32.xlu0 %v2020_v20, %s1780_s23 }
 0x19d   : > { %968 = vrot.lane.b32.xlu1 %v2022_v21, %s1780_s23  ;;  %s2288_s23 = sld [smem:[#allocation3_spill]] }
 0x1a0   : > { %1029 = vrot.lane.b32.xlu0 %v2020_v20, %s1781_s1 }
 0x1a1   : > { %1031 = vrot.lane.b32.xlu1 %v2022_v21, %s1781_s1  ;;  %s656_s1 = scalar_lea.vmem %s2276_s21, %s1728_s30 }
 0x1a3   : > { %v660_v46 = vld [vmem:[%s2288_s23] sm:$0x3] }
 0x1a4   : > { %1071 = vrot.lane.b32.xlu0 %v2020_v20, %s1782_s24  ;;  %v2080_v50 = vrot.slane %v660_v46, %v839_v44  ;;  %v2083_v53 = vrot.slane %v660_v46, %v843_v47 }
 0x1a5   : > { %1073 = vrot.lane.b32.xlu1 %v2022_v21, %s1782_s24 }
 0x1a8   : > { %1113 = vrot.lane.b32.xlu0 %v2020_v20, %s1783_s26 }
 0x1a9   : > { %1115 = vrot.lane.b32.xlu1 %v2022_v21, %s1783_s26  ;;  %s2289_s26 = sld [smem:[#allocation4_spill]] }
 0x1ac   : > { %1151 = vrot.lane.b32.xlu0 %v2020_v20, %s1784_s27 }
 0x1ad   : > { %1153 = vrot.lane.b32.xlu1 %v2022_v21, %s1784_s27 }
 0x1af   : > { %v661_v49 = vld [vmem:[%s2289_s26] sm:$0x3] }
 0x1b0   : > { %1193 = vperm.xlu0 %1757, %v1189_v22   ;;  %v2086_v56 = vrot.slane %v661_v49, %v839_v44  ;;  %v2089_v58 = vrot.slane %v661_v49, %v843_v47 }
 0x1b1   : > { %1198 = vperm.xlu1 %1758, %v1190_v24  }
 0x1e2   : > { %v820_v45 = vpop.permute.xlu0 %819 }
 0x1e3   : > { %v822_v48 = vpop.permute.xlu1 %821  ;;  %v834_v52 = vsel %vm827_vm1, 0.0, %v820_v45 }
 0x1e4   : > { %v828_v55 = vsel %vm827_vm1, %v820_v45, %v822_v48  ;;  %v847_v59 = vmul.f32 %v2080_v50, %v834_v52 }
 0x1e5   : > { %v848_v62 = vmul.f32 %v2083_v53, %v828_v55  ;;  %v1018_v55 = vmul.f32 %v2054_v32, %v2002_v14 }
 0x1e6   : > { %v872_v51 = vpop.permute.xlu0 %871  ;;  %v863_v7 = vmul.f32 %v856_v23, %v847_v59 }
 0x1e7   : > { %v874_v54 = vpop.permute.xlu1 %873  ;;  %v886_v57 = vsel %vm879_vm2, 0.0, %v872_v51  ;;  %v864_v10 = vmul.f32 %v856_v23, %v848_v62 }
 0x1e8   : > { %v880_v60 = vsel %vm879_vm2, %v872_v51, %v874_v54  ;;  %v901_v1 = vmul.f32 %v894_v26, %v886_v57  ;;  %v1017_v54 = vmul.f32 %v2054_v32, %v2000_v12 }
 0x1e9   : > { %v902_v5 = vmul.f32 %v894_v26, %v880_v60 }
 0x1ea   : > { %v910_v61 = vpop.permute.xlu0 %909  ;;  %v905_v18 = vadd.f32 %v901_v1, %v863_v7 }
 0x1eb   : > { %v924_v63 = vsel %vm917_vm3, 0.0, %v910_v61  ;;  %v912_v0 = vpop.permute.xlu1 %911  ;;  %v906_v24 = vadd.f32 %v902_v5, %v864_v10 }
 0x1ec   : > { %v937_v2 = vmul.f32 %v2086_v56, %v924_v63  ;;  %v918_v3 = vsel %vm917_vm3, %v910_v61, %v912_v0 }
 0x1ed   : > { %v938_v6 = vmul.f32 %v2089_v58, %v918_v3 }
 0x1ee   : > { %v954_v8 = vmul.f32 %v947_v28, %v937_v2  ;;  %v963_v9 = vpop.permute.xlu0 %962 }
 0x1ef   : > { %v955_v11 = vmul.f32 %v947_v28, %v938_v6  ;;  %v977_v13 = vsel %vm970_vm4, 0.0, %v963_v9  ;;  %v965_v17 = vpop.permute.xlu1 %964 }
 0x1f0   : > { %v979_v19 = vmul.f32 %v977_v13, %v2080_v50  ;;  %v971_v22 = vsel %vm970_vm4, %v963_v9, %v965_v17  ;;  %v958_v26 = vadd.f32 %v954_v8, %v905_v18 }
 0x1f1   : > { %v980_v40 = vmul.f32 %v971_v22, %v2083_v53  ;;  %v959_v45 = vadd.f32 %v955_v11, %v906_v24 }
 0x1f2   : > { %v996_v42 = vmul.f32 %v989_v30, %v979_v19  ;;  %v1026_v44 = vpop.permute.xlu0 %1025 }
 0x1f3   : > { %v997_v46 = vmul.f32 %v989_v30, %v980_v40  ;;  %v1028_v47 = vpop.permute.xlu1 %1027 }
 0x1f4   : > { %v1000_v23 = vadd.f32 %v996_v42, %v958_v26  ;;  %v1034_v28 = vsel %vm1033_vm5, %v1026_v44, %v1028_v47  ;;  %v1040_v48 = vsel %vm1033_vm5, %v1028_v47, 0.0 }
 0x1f5   : > { %v1001_v49 = vadd.f32 %v997_v46, %v959_v45  ;;  %v1042_v51 = vmul.f32 %v1034_v28, %v2086_v56  ;;  %v1043_v52 = vmul.f32 %v1040_v48, %v2089_v58 }
 0x1f6   : > { %v1068_v57 = vpop.permute.xlu0 %1067  ;;  %v1021_v59 = vadd.f32 %v1017_v54, %v1000_v23 }
 0x1f7   : > { %v1070_v30 = vpop.permute.xlu1 %1069  ;;  %v1022_v60 = vadd.f32 %v1018_v55, %v1001_v49  ;;  %v1059_v63 = vmul.f32 %v2058_v34, %v1042_v51  ;;  %v1060_v0 = vmul.f32 %v2058_v34, %v1043_v52 }
 0x1f8   : > { %v1076_v61 = vsel %vm1075_vm6, %v1068_v57, %v1070_v30  ;;  %v1082_v62 = vsel %vm1075_vm6, %v1070_v30, 0.0 }
 0x1f9   : > { %v1084_v1 = vmul.f32 %v1076_v61, %v2080_v50  ;;  %v1085_v12 = vmul.f32 %v1082_v62, %v2083_v53  ;;  %v1063_v7 = vadd.f32 %v1059_v63, %v1021_v59  ;;  %v1064_v8 = vadd.f32 %v1060_v0, %v1022_v60 }
 0x1fa   : > { %v1110_v2 = vpop.permute.xlu0 %1109 }
 0x1fb   : > { %v1101_v14 = vmul.f32 %v2062_v36, %v1084_v1  ;;  %v1102_v32 = vmul.f32 %v2062_v36, %v1085_v12  ;;  %v1112_v3 = vpop.permute.xlu1 %1111 }
 0x1fc   : > { %v1118_v5 = vsel %vm1117_vm7, %v1110_v2, %v1112_v3  ;;  %v1124_v6 = vsel %vm1117_vm7, %v1112_v3, 0.0 }
 0x1fd   : > { %v1105_v10 = vadd.f32 %v1101_v14, %v1063_v7  ;;  %v1106_v34 = vadd.f32 %v1102_v32, %v1064_v8  ;;  %v1139_v11 = vmul.f32 %v2066_v38, %v1118_v5  ;;  %v1140_v13 = vmul.f32 %v2066_v38, %v1124_v6 }
 0x1fe   : > { %v1148_v9 = vpop.permute.xlu0 %1147 }
 0x1ff   : > { %v1150_v17 = vpop.permute.xlu1 %1149  ;;  %v1143_v40 = vadd.f32 %v1139_v11, %v1105_v10  ;;  %v1144_v26 = vadd.f32 %v1140_v13, %v1106_v34 }
 0x200   : > { %v1156_v18 = vsel %vm1155_vm8, %v1148_v9, %v1150_v17  ;;  %v1162_v36 = vsel %vm1155_vm8, %v1150_v17, 0.0 }
 0x201   : > { %v1164_v19 = vmul.f32 %v1156_v18, %v2086_v56  ;;  %v1165_v22 = vmul.f32 %v1162_v36, %v2089_v58 }
 0x202   : > { %v824_v24 = vpop.permute.xlu0 %823 }
 0x203   : > { %v1181_v42 = vmul.f32 %v2070_v41, %v1164_v19  ;;  %v1182_v44 = vmul.f32 %v2070_v41, %v1165_v22  ;;  %v826_v45 = vpop.permute.xlu1 %825  ;;  %v835_v23 = vsel %vm827_vm1, 0.0, %v824_v24  ;;  %v1019_v22 = vmul.f32 %v2056_v33, %v2020_v20 }
 0x204   : > { %v829_v48 = vsel %vm827_vm1, %v824_v24, %v826_v45  ;;  %v849_v51 = vmul.f32 %v2080_v50, %v835_v23  ;;  %v1020_v24 = vmul.f32 %v2056_v33, %v2022_v21 }
 0x205   : > { %v2128_v46 = vadd.f32 %v1182_v44, %v1144_v26  ;;  %v2130_v38 = vadd.f32 %v1181_v42, %v1143_v40  ;;  %v850_v41 = vmul.f32 %v2083_v53, %v829_v48 }
 0x206   : > { %v876_v47 = vpop.permute.xlu0 %875  ;;  %v865_v63 = vmul.f32 %v2046_v25, %v849_v51 }
 0x207   : > { %v878_v28 = vpop.permute.xlu1 %877  ;;  %v887_v49 = vsel %vm879_vm2, 0.0, %v876_v47  ;;  %v866_v12 = vmul.f32 %v2046_v25, %v850_v41 }
 0x208   : > { %v881_v52 = vsel %vm879_vm2, %v876_v47, %v878_v28  ;;  %v903_v30 = vmul.f32 %v2048_v27, %v887_v49 }
 0x209   : > { %v904_v61 = vmul.f32 %v2048_v27, %v881_v52 }
 0x20a   : > { %v914_v54 = vpop.permute.xlu0 %913  ;;  %v907_v3 = vadd.f32 %v903_v30, %v865_v63 }
 0x20b   : > { %v925_v55 = vsel %vm917_vm3, 0.0, %v914_v54  ;;  %v916_v57 = vpop.permute.xlu1 %915  ;;  %v908_v27 = vadd.f32 %v904_v61, %v866_v12 }
 0x20c   : > { %v939_v59 = vmul.f32 %v2086_v56, %v925_v55  ;;  %v919_v60 = vsel %vm917_vm3, %v914_v54, %v916_v57 }
 0x20d   : > { %v940_v62 = vmul.f32 %v2089_v58, %v919_v60 }
 0x20e   : > { %v956_v0 = vmul.f32 %v2050_v29, %v939_v59  ;;  %v967_v1 = vpop.permute.xlu0 %966 }
 0x20f   : > { %v957_v2 = vmul.f32 %v2050_v29, %v940_v62  ;;  %v978_v14 = vsel %vm970_vm4, 0.0, %v967_v1  ;;  %v969_v32 = vpop.permute.xlu1 %968 }
 0x210   : > { %v981_v5 = vmul.f32 %v978_v14, %v2080_v50  ;;  %v972_v6 = vsel %vm970_vm4, %v967_v1, %v969_v32  ;;  %v960_v8 = vadd.f32 %v956_v0, %v907_v3 }
 0x211   : > { %v982_v7 = vmul.f32 %v972_v6, %v2083_v53  ;;  %v961_v34 = vadd.f32 %v957_v2, %v908_v27 }
 0x212   : > { %v998_v9 = vmul.f32 %v2052_v31, %v981_v5  ;;  %v1030_v10 = vpop.permute.xlu0 %1029 }
 0x213   : > { %v999_v25 = vmul.f32 %v2052_v31, %v982_v7  ;;  %v1032_v11 = vpop.permute.xlu1 %1031 }
 0x214   : > { %v1002_v29 = vadd.f32 %v998_v9, %v960_v8  ;;  %v1035_v13 = vsel %vm1033_vm5, %v1030_v10, %v1032_v11  ;;  %v1041_v17 = vsel %vm1033_vm5, %v1032_v11, 0.0  ;;  %v1375_v11 = vld [vmem:[%s2268_s13] sm:$0xff] }
 0x215   : > { %v1003_v18 = vadd.f32 %v999_v25, %v961_v34  ;;  %v1044_v36 = vmul.f32 %v1035_v13, %v2086_v56  ;;  %v1045_v19 = vmul.f32 %v1041_v17, %v2089_v58  ;;  %v1295_v25 = vld [vmem:[%s2267_s12] sm:$0xff] }
 0x216   : > { %v1072_v40 = vpop.permute.xlu0 %1071  ;;  %v1023_v31 = vadd.f32 %v1019_v22, %v1002_v29  ;;  %v1423_v29 = vld [vmem:[%s2269_s14] sm:$0xff] }
 0x217   : > { %v1074_v26 = vpop.permute.xlu1 %1073  ;;  %v1024_v42 = vadd.f32 %v1020_v24, %v1003_v18  ;;  %v1061_v47 = vmul.f32 %v2060_v35, %v1044_v36  ;;  %v1062_v23 = vmul.f32 %v2060_v35, %v1045_v19  ;;  %v1431_v13 = vld [vmem:[%s2270_s15] sm:$0xff]  ;;  %v1442_v18 = vld [vmem:[%s2272_s17 + $0x8] sm:$0xff] }
 0x218   : > { %v1077_v44 = vsel %vm1075_vm6, %v1072_v40, %v1074_v26  ;;  %v1083_v45 = vsel %vm1075_vm6, %v1074_v26, 0.0  ;;  %v1441_v17 = vld [vmem:[%s2272_s17] sm:$0xff] }
 0x219   : > { %v1086_v28 = vmul.f32 %v1077_v44, %v2080_v50  ;;  %v1087_v48 = vmul.f32 %v1083_v45, %v2083_v53  ;;  %v1065_v54 = vadd.f32 %v1061_v47, %v1023_v31  ;;  %v1066_v41 = vadd.f32 %v1062_v23, %v1024_v42  ;;  %v1539_v36 = vld [vmem:[%s2274_s19] sm:$0xff] }
 0x21a   : > { %v1114_v20 = vpop.permute.xlu0 %1113  ;;  %v1294_v40 = vld [vmem:[%s2266_s11] sm:$0xff] }
 0x21b   : > { %v1103_v49 = vmul.f32 %v2064_v37, %v1086_v28  ;;  %v1104_v21 = vmul.f32 %v2064_v37, %v1087_v48  ;;  %v1116_v33 = vpop.permute.xlu1 %1115 }
 0x21c   : > { %v1119_v51 = vsel %vm1117_vm7, %v1114_v20, %v1116_v33  ;;  %v1125_v52 = vsel %vm1117_vm7, %v1116_v33, 0.0 }
 0x21d   : > { %v1107_v57 = vadd.f32 %v1103_v49, %v1065_v54  ;;  %v1108_v30 = vadd.f32 %v1104_v21, %v1066_v41  ;;  %v1141_v35 = vmul.f32 %v2068_v39, %v1119_v51  ;;  %v1142_v50 = vmul.f32 %v2068_v39, %v1125_v52 }
 0x21e   : > { %v1152_v55 = vpop.permute.xlu0 %1151 }
 0x21f   : > { %v1154_v53 = vpop.permute.xlu1 %1153  ;;  %v1145_v62 = vadd.f32 %v1141_v35, %v1107_v57  ;;  %v1146_v63 = vadd.f32 %v1142_v50, %v1108_v30 }
 0x220   : > { %v1157_v59 = vsel %vm1155_vm8, %v1152_v55, %v1154_v53  ;;  %v1163_v60 = vsel %vm1155_vm8, %v1154_v53, 0.0 }
 0x221   : > { %v1166_v37 = vmul.f32 %v1157_v59, %v2086_v56  ;;  %v1167_v61 = vmul.f32 %v1163_v60, %v2089_v58 }
 0x223   : > { %v1183_v0 = vmul.f32 %v2072_v43, %v1166_v37  ;;  %v1184_v1 = vmul.f32 %v2072_v43, %v1167_v61  ;;  %v1619_v43 = vld [vmem:[%s2275_s20] sm:$0xff] }
 0x225   : > { %v1187_v12 = vadd.f32 %v1183_v0, %v1145_v62  ;;  %v1188_v2 = vadd.f32 %v1184_v1, %v1146_v63 }
 0x22f   : > { %v1194_v14 = vpop.permute.xlu0 %1193 }
 0x230   : > { %v1201_v39 = vadd.f32 %v1194_v14, %v2130_v38  ;;  %v1202_v32 = vadd.f32 %v1194_v14, %v2128_v46  ;;  %v1199_v3 = vpop.permute.xlu1 %1198  ;;  %v1212_v46 = vld [vmem:[%s2264_s9] sm:$0xff] }
 0x231   : > { %v1203_v5 = vadd.f32 %v1199_v3, %v1187_v12  ;;  %v1204_v6 = vadd.f32 %v1199_v3, %v1188_v2  ;;  %v1213_v38 = vld [vmem:[%s2265_s10] sm:$0xff] }
 0x233   : > { %v1205_v27 = vmul.f32 %v1203_v5, %v1201_v39  ;;  %v1206_v56 = vmul.f32 %v1204_v6, %v1202_v32 }
 0x235   : > { %v1207_v7 = vadd.f32 %v1206_v56, %v1205_v27 }
 0x237   : > { %1208 = vadd.xlane.f32.xlu0 %v1207_v7 }
 0x24d   : > { %1622 = vperm.xlu0 %1757, %v1619_v43  }
 0x2c4   : > { %v1209_v58 = vpop.xlane.xlu0 %1208 }
 0x2c5   : > { %v1211_v8 = vmul.f32 0.00390625, %v1209_v58 }
 0x2c7   : > { %1734 = vmatpush3.msra.mxu1 %v1211_v8 }
 0x2c8   : > { %1736 = vmatmul.mubr.msk.f32.vlgmr.msra.gmra.mrb[0].mxu1 %vm731_vm0, %v1212_v46 }
 0x2c9   : > { %1368 = vmatprep.mubr.f32.mxu1 %v1776_v4 }
 0x39b   : > { %v1283_v9 = vpop.f32.mrb[0].mxu1 }
 0x39c   : > { %v1284_v10 = vadd.f32 %v1283_v9, %v1213_v38  ;;  %v1737_v34 = vpop.f32.mrb[1].mxu1 }
 0x39e   : > { %1289 = vperm.xlu1 %1758, %v1284_v10  }
 0x3a2   : > { %1298 = vperm.xlu1 %1758, %v1295_v25  }
 0x3a6   : > { %1378 = vperm.xlu1 %1758, %v1375_v11  }
 0x3aa   : > { %1426 = vperm.xlu1 %1758, %v1423_v29   ;;  %v1439_v29 = vld [vmem:[%s2271_s16] sm:$0xff] }
 0x3ae   : > { %1434 = vperm.xlu1 %1758, %v1431_v13   ;;  %v1440_v13 = vld [vmem:[%s2271_s16 + $0x8] sm:$0xff] }
 0x3b2   : > { %1445 = vperm.xlu1 %1758, %v1441_v17  }
 0x3b6   : > { %1450 = vperm.xlu1 %1758, %v1442_v18  }
 0x3ba   : > { %1542 = vperm.xlu1 %1758, %v1539_v36  }
 0x41d   : > { %v1290_v19 = vpop.permute.xlu1 %1289 }
 0x41e   : > { %v1292_v22 = vmul.f32 %v1290_v19, %v1205_v27  ;;  %v1293_v24 = vmul.f32 %v1290_v19, %v1206_v56 }
 0x420   : > { %1304 = vmatprep.subr.mxu1 %v1293_v24 }
 0x421   : > { %1305 = vmatpush1.msra.mxu1 %v1292_v22  ;;  %v1299_v26 = vpop.permute.xlu1 %1298 }
 0x422   : > { %1721 = vmatmul.mubr.msk.f32.vlgmr.msra.gmra.mrb[2].mxu1 %vm731_vm0, %v1294_v40 }
 0x423   : > { %1612 = vmatprep.mubr.f32.mxu1 %v1776_v4 }
 0x425   : > { %v1379_v45 = vpop.permute.xlu1 %1378 }
 0x429   : > { %v1427_v43 = vpop.permute.xlu1 %1426 }
 0x42d   : > { %v1435_v34 = vpop.permute.xlu1 %1434 }
 0x431   : > { %v1446_v17 = vpop.permute.xlu1 %1445 }
 0x435   : > { %v1451_v19 = vpop.permute.xlu1 %1450 }
 0x4f5   : > { %v1370_v31 = vpop.f32.mrb[2].mxu1 }
 0x4f6   : > { %v1371_v42 = vadd.f32 %v1370_v31, %v1299_v26  ;;  %v1372_v44 = vpop.f32.mrb[3].mxu1 }
 0x4f7   : > { %v1373_v47 = vadd.f32 %v1372_v44, %v1299_v26 }
 0x4f8   : > { %v1381_v23 = vmul.f32 %v1379_v45, %v1371_v42 }
 0x4f9   : > { %v1382_v28 = vmul.f32 %v1379_v45, %v1373_v47  ;;  %v1543_v47 = vpop.permute.xlu1 %1542 }
 0x4fa   : > { %v2221_v48 = vadd.f32 %v1381_v23, %v1950_v15 }
 0x4fb   : > { %v2224_v20 = vadd.f32 %v1382_v28, %v1952_v16 }
 0x4fc   : > { %v1385_v49 = vrot.slane %v2221_v48, 4 }
 0x4fd   : > { %v1391_v21 = vrot.slane %v2224_v20, 4 }
 0x4fe   : > { %v1386_v33 = vadd.f32 %v1385_v49, %v2221_v48 }
 0x4ff   : > { %v1392_v51 = vadd.f32 %v1391_v21, %v2224_v20  ;;  %v1623_v21 = vpop.permute.xlu0 %1622 }
 0x500   : > { %v1387_v52 = vrot.slane %v1386_v33, 2 }
 0x501   : > { %v1393_v54 = vrot.slane %v1392_v51, 2 }
 0x502   : > { %v1388_v41 = vadd.f32 %v1387_v52, %v1386_v33 }
 0x503   : > { %v1394_v55 = vadd.f32 %v1393_v54, %v1392_v51 }
 0x504   : > { %v1389_v57 = vrot.slane %v1388_v41, 1 }
 0x505   : > { %v1395_v30 = vrot.slane %v1394_v55, 1 }
 0x506   : > { %v1390_v35 = vadd.f32 %v1389_v57, %v1388_v41 }
 0x507   : > { %v1396_v15 = vadd.f32 %v1395_v30, %v1394_v55 }
 0x508   : > { %v1397_v50 = vmul.f32 0.125, %v1390_v35 }
 0x509   : > { %v1398_v53 = vmul.f32 0.125, %v1396_v15 }
 0x50a   : > { %v1399_v16 = vsub.f32 %v2221_v48, %v1397_v50 }
 0x50b   : > { %v1400_v59 = vsub.f32 %v2224_v20, %v1398_v53 }
 0x50c   : > { %v1401_v60 = vmul.f32 %v1399_v16, %v1399_v16 }
 0x50d   : > { %v1402_v37 = vmul.f32 %v1400_v59, %v1400_v59 }
 0x50e   : > { %v1403_v61 = vrot.slane %v1401_v60, 4 }
 0x50f   : > { %v1409_v62 = vrot.slane %v1402_v37, 4 }
 0x510   : > { %v1404_v63 = vadd.f32 %v1403_v61, %v1401_v60 }
 0x511   : > { %v1410_v0 = vadd.f32 %v1409_v62, %v1402_v37 }
 0x512   : > { %v1405_v1 = vrot.slane %v1404_v63, 2 }
 0x513   : > { %v1411_v12 = vrot.slane %v1410_v0, 2 }
 0x514   : > { %v1406_v2 = vadd.f32 %v1405_v1, %v1404_v63 }
 0x515   : > { %v1412_v14 = vadd.f32 %v1411_v12, %v1410_v0 }
 0x516   : > { %v1407_v39 = vrot.slane %v1406_v2, 1 }
 0x517   : > { %v1413_v32 = vrot.slane %v1412_v14, 1 }
 0x518   : > { %v1408_v3 = vadd.f32 %v1407_v39, %v1406_v2 }
 0x519   : > { %v1414_v5 = vadd.f32 %v1413_v32, %v1412_v14 }
 0x51a   : > { %v1415_v6 = vmul.f32 0.125, %v1408_v3 }
 0x51b   : > { %v1416_v27 = vmul.f32 0.125, %v1414_v5 }
 0x51c   : > { %v1417_v56 = vadd.f32 1e-06, %v1415_v6 }
 0x51d   : > { %v1418_v7 = vadd.f32 1e-06, %v1416_v27 }
 0x51e   : > { %1763 = vrsqrt.f32 %v1417_v56 }
 0x51f   : > { %1765 = vrsqrt.f32 %v1418_v7 }
 0x528   : > { %v1764_v58 = vpop.eup %1763 }
 0x529   : > { %v1766_v8 = vpop.eup %1765  ;;  %v1421_v46 = vmul.f32 %v1764_v58, %v1399_v16 }
 0x52a   : > { %v1422_v38 = vmul.f32 %v1766_v8, %v1400_v59 }
 0x52b   : > { %v1429_v9 = vmul.f32 %v1427_v43, %v1421_v46 }
 0x52c   : > { %v1430_v10 = vmul.f32 %v1427_v43, %v1422_v38 }
 0x52d   : > { %v1437_v11 = vadd.f32 %v1435_v34, %v1429_v9 }
 0x52e   : > { %v1438_v25 = vadd.f32 %v1435_v34, %v1430_v10 }
 0x530   : > { %1459 = vmatprep.subr.mxu0 %v1438_v25 }
 0x531   : > { %1460 = vmatpush1.msra.mxu0 %v1437_v11 }
 0x532   : > { %1722 = vmatmul.mubr.msk.f32.vlgmr.msra.gmra.mrb[4].mxu0 %vm731_vm0, %v1439_v29 }
 0x533   : > { %1529 = vmatprep.mubr.f32.mxu0 %v1776_v4  ;;  %v1538_v4 = vld [vmem:[%s2273_s18] sm:$0xff] }
 0x536   : > { %1723 = vmatmul.mubr.msk.f32.gmra.mrb[6].mxu0 %vm731_vm0, %v1440_v13 }
 0x605   : > { %v1525_v18 = vpop.f32.mrb[4].mxu0 }
 0x606   : > { %v1527_v36 = vpop.f32.mrb[5].mxu0  ;;  %v1526_v24 = vadd.f32 %v1525_v18, %v1446_v17 }
 0x607   : > { %v1528_v31 = vadd.f32 %v1527_v36, %v1446_v17 }
 0x609   : > { %v1531_v22 = vpop.f32.mrb[6].mxu0 }
 0x60a   : > { %v1532_v40 = vadd.f32 %v1531_v22, %v1451_v19  ;;  %v1533_v26 = vpop.f32.mrb[7].mxu0 }
 0x60b   : > { %v1534_v42 = vadd.f32 %v1533_v26, %v1451_v19 }
 0x60c   : > { %v1536_v44 = vmul.f32 %v1532_v40, %v1526_v24 }
 0x60d   : > { %v1537_v45 = vmul.f32 %v1534_v42, %v1528_v31 }
 0x60f   : > { %1548 = vmatprep.subr.mxu1 %v1537_v45 }
 0x610   : > { %1549 = vmatpush1.msra.mxu1 %v1536_v44 }
 0x611   : > { %1724 = vmatmul.mubr.msk.f32.vlgmr.msra.gmra.mrb[4].mxu1 %vm731_vm0, %v1538_v4 }
 0x6e4   : > { %v1614_v23 = vpop.f32.mrb[4].mxu1 }
 0x6e5   : > { %v1615_v28 = vadd.f32 %v1614_v23, %v1543_v47  ;;  %v1616_v49 = vpop.f32.mrb[5].mxu1 }
 0x6e6   : > { %v1617_v33 = vadd.f32 %v1616_v49, %v1543_v47 }
 0x6e7   : > { %v1625_v51 = vmul.f32 %v1623_v21, %v1615_v28 }
 0x6e8   : > { %v1626_v52 = vmul.f32 %v1623_v21, %v1617_v33 }
 0x6e9   : > { %v1627_v54 = vadd.f32 %v1625_v51, %v2221_v48 }
 0x6ea   : > { %v1628_v41 = vadd.f32 %v1626_v52, %v2224_v20 }
 0x6ec   : > { %v1730_v55 = vpack.c.bf16 %v1628_v41, %v1627_v54 }
 0x6ee   : > { %1637 = vst [vmem:[%s656_s1] sm:$0xff] %v1730_v55 }
 0x6ef PF: > { %s31_s2 = sadd.s32 1, %s1773_s2  }
 0x6f0   : > { %p28_p4 = scmp.ge.s32.totalorder %s31_s2, 4  }
 0x6f2   :  { %30 = sbr.rel (!%p28_p4) target bundleno = 7 (0x7), region = 142 }

// kernel: nafnet_refine_forward.15
= control target key start
LH: loop header
LB: loop body
LE: loop exit
PB: predicated region body
PF: predicated region fallthrough
CT: control target
= control target key end

     0   :  { %s531_s12 = smov 0   ;;  %s580_s0 = inlined_call_operand.vmem [shape: bf16[2,64,16], index: 0, kind: input, shape index: {}]   ;;  %s581_s1 = inlined_call_operand.vmem [shape: f32[32,64], index: 1, kind: input, shape index: {}]   ;;  %s582_s2 = inlined_call_operand.vmem [shape: f32[32,1], index: 2, kind: input, shape index: {}]   ;;  %s583_s3 = inlined_call_operand.vmem [shape: bf16[2,32,16], index: 3, kind: output, shape index: {}]  }
   0x1 LB: > { %s389_s13 = sadd.s32 4294967295, %s508_s12   ;;  %p393_p0 = scmp.ge.s32.totalorder %s508_s12, 1  ;;  %s508_s12 = sphi %s531_s12, %s13_s12  }
   0x2   : > { %p137_p1 = scmp.lt.s32.totalorder %s508_s12, 3 }
   0x4   : > { %p138_p2 = pnand %p393_p0, %p137_p1 }
   0x5   : > { %p161_p3 = scmp.lt.s32.totalorder (!%p138_p2), %s389_s13, 1  ;;  %v171_v0 = vld [vmem:[%s581_s1] sm:$0xff] (!%p138_p2)  ;;  %vm215_vm0 = vcmask (!%p138_p2), 523264   ;;  %v173_v1 = vld [vmem:[%s581_s1 + $0x10] sm:$0xff] (!%p138_p2)  ;;  %v510_v4 = vmov (!%p138_p2), 0   ;;  %v194_v7 = vld [vmem:[%s582_s2 + $0x18] sm:$0xff] (!%p138_p2) }
   0x6   : > { %141 = sbr.rel (%p138_p2) target bundleno = 251 (0xfb), region = 32  ;;  %461 = vmatprep.mubr.msk.f32.mxu0 (!%p138_p2), %vm215_vm0, %v171_v0  ;;  %464 = vmatprep.mubr.msk.f32.mxu1 (!%p138_p2), %vm215_vm0, %v173_v1  ;;  %v193_v2 = vld [vmem:[%s582_s2 + $0x10] sm:$0xff] (!%p138_p2)  ;;  %v191_v3 = vld [vmem:[%s582_s2] sm:$0xff] (!%p138_p2)  ;;  %v192_v8 = vld [vmem:[%s582_s2 + $0x8] sm:$0xff] (!%p138_p2)  ;;  %vm329_vm1 = vcmask (!%p138_p2), 125952  }
   0x7   : > { %501 = vset.pattern.permute.xlu1 (!%p138_p2), %v510_v4  ;;  %500 = vset.pattern.permute.xlu0 (!%p138_p2), %v510_v4  ;;  %v172_v11 = vld [vmem:[%s581_s1 + $0x8] sm:$0xff] (!%p138_p2)  ;;  %v174_v12 = vld [vmem:[%s581_s1 + $0x18] sm:$0xff] (!%p138_p2) }
   0x8   : > { %207 = vperm.xlu1 (!%p138_p2), %501, %v193_v2   ;;  %197 = vperm.xlu0 (!%p138_p2), %500, %v191_v3  }
   0xc   : > { %212 = vperm.xlu1 (!%p138_p2), %501, %v194_v7   ;;  %202 = vperm.xlu0 (!%p138_p2), %500, %v192_v8  }
   0xd   : > { %s585_s13 = smov (!%p161_p3, %s389_s13), 1 }
   0xe   : > { %s408_s22 = sshll.u32 %s585_s13, 5  ;;  %s409_s7 = sshll.u32 %s585_s13, 4 }
   0xf   : > { %s165_s25 = scalar_lea.vmem %s580_s0, %s408_s22  ;;  %s170_s10 = scalar_lea.vmem %s583_s3, %s409_s7 }
  0x10   : > { %v415_v5 = vld [vmem:[%s165_s25] sm:$0xff]   ;;  %v430_v6 = vld [vmem:[%s165_s25 + $0x8] sm:$0xff]   ;;  %v431_v9 = vld [vmem:[%s165_s25 + $0x10] sm:$0xff]  }
  0x11   : > { %468 = vmatprep.subr.bf16.mxu0 %v415_v5  ;;  %483 = vmatprep.subr.bf16.mxu1 %v415_v5  ;;  %v432_v10 = vld [vmem:[%s165_s25 + $0x18] sm:$0xff]  }
  0x12   : > { %470 = vmatpush3.bf16.msra.mxu0 %v415_v5  ;;  %487 = vmatpush3.bf16.msra.mxu1 %v415_v5 }
  0x13   : > { %472 = vmatprep.subr.bf16.mxu0 %v430_v6  ;;  %484 = vmatprep.subr.bf16.mxu1 %v430_v6 }
  0x16   : > { %474 = vmatpush3.bf16.msra.mxu0 %v430_v6  ;;  %488 = vmatpush3.bf16.msra.mxu1 %v430_v6 }
  0x17   : > { %476 = vmatprep.subr.bf16.mxu0 %v431_v9  ;;  %485 = vmatprep.subr.bf16.mxu1 %v431_v9 }
  0x1a   : > { %478 = vmatpush3.bf16.msra.mxu0 %v431_v9  ;;  %489 = vmatpush3.bf16.msra.mxu1 %v431_v9 }
  0x1b   : > { %480 = vmatprep.subr.bf16.mxu0 %v432_v10  ;;  %486 = vmatprep.subr.bf16.mxu1 %v432_v10 }
  0x1e   : > { %482 = vmatpush3.bf16.msra.mxu0 %v432_v10  ;;  %490 = vmatpush3.bf16.msra.mxu1 %v432_v10 }
  0x21   : > { %462 = vmatmul.mubr.msk.f32.vlgmr.msra.gmra.mrb[0].mxu0 %vm215_vm0, %v172_v11  ;;  %465 = vmatmul.mubr.msk.f32.vlgmr.msra.gmra.mrb[0].mxu1 %vm215_vm0, %v174_v12 }
  0x87   : > { %v208_v13 = vpop.permute.xlu1 %207  ;;  %v198_v14 = vpop.permute.xlu0 %197 }
  0x8b   : > { %v213_v15 = vpop.permute.xlu1 %212  ;;  %v203_v16 = vpop.permute.xlu0 %202 }
  0xf4   : > { %v463_v17 = vpop.f32.mrb[0].mxu0  ;;  %v466_v18 = vpop.f32.mrb[0].mxu1 }
  0xf5   : > { %v300_v19 = vadd.f32 %v463_v17, %v203_v16  ;;  %v310_v20 = vadd.f32 %v466_v18, %v213_v15  ;;  %v294_v21 = vpop.f32.mrb[1].mxu0  ;;  %v304_v22 = vpop.f32.mrb[1].mxu1 }
  0xf6   : > { %v295_v23 = vadd.f32 %v294_v21, %v198_v14  ;;  %v305_v24 = vadd.f32 %v304_v22, %v208_v13 }
  0xf7   : > { %v411_v25 = vpack.c.bf16 %v300_v19, %v300_v19  ;;  %v413_v26 = vpack.c.bf16 %v310_v20, %v310_v20 }
  0xf8   : > { %v410_v27 = vpack.c.bf16 %v295_v23, %v295_v23  ;;  %v412_v28 = vpack.c.bf16 %v305_v24, %v305_v24 }
  0xf9   : > { %331 = vst.msk [vmem:[%s170_s10 + $0x4] sm:$0xf] %vm329_vm1, %v411_v25  ;;  %333 = vst.msk [vmem:[%s170_s10 + $0xc] sm:$0xf] %vm329_vm1, %v413_v26 }
  0xfa   : > { %330 = vst.msk [vmem:[%s170_s10] sm:$0xf] %vm329_vm1, %v410_v27  ;;  %332 = vst.msk [vmem:[%s170_s10 + $0x8] sm:$0xf] %vm329_vm1, %v412_v28 }
  0xfb PF: > { %s13_s12 = sadd.s32 1, %s508_s12  }
  0xfc   : > { %p10_p4 = scmp.ge.s32.totalorder %s13_s12, 4  }
  0xfe   :  { %12 = sbr.rel (!%p10_p4) target bundleno = 1 (0x1), region = 62 }

// kernel: nafnet_refine_forward.17
= control target key start
LH: loop header
LB: loop body
LE: loop exit
PB: predicated region body
PF: predicated region fallthrough
CT: control target
= control target key end

     0   :  { %s507_s9 = smov 0   ;;  %s564_s0 = inlined_call_operand.vmem [shape: bf16[2,32,16], index: 0, kind: input, shape index: {}]   ;;  %s565_s1 = inlined_call_operand.vmem [shape: f32[64,32], index: 1, kind: input, shape index: {}]   ;;  %s566_s2 = inlined_call_operand.vmem [shape: bf16[2,64,16], index: 2, kind: output, shape index: {}]  }
   0x1 LB: > { %s386_s10 = sadd.s32 4294967295, %s490_s9   ;;  %p390_p0 = scmp.ge.s32.totalorder %s490_s9, 1  ;;  %s490_s9 = sphi %s507_s9, %s12_s9  }
   0x2   : > { %p112_p1 = scmp.lt.s32.totalorder %s490_s9, 3 }
   0x4   : > { %p113_p2 = pnand %p390_p0, %p112_p1 }
   0x5   : > { %p134_p3 = scmp.lt.s32.totalorder (!%p113_p2), %s386_s10, 1  ;;  %v144_v0 = vld [vmem:[%s565_s1] sm:$0xff] (!%p113_p2)  ;;  %vm160_vm0 = vcmask (!%p113_p2), 261120   ;;  %v145_v4 = vld [vmem:[%s565_s1 + $0x8] sm:$0xff] (!%p113_p2)  ;;  %v146_v6 = vld [vmem:[%s565_s1 + $0x10] sm:$0xff] (!%p113_p2)  ;;  %vm322_vm1 = vcmask (!%p113_p2), 125952  }
   0x6   : > { %116 = sbr.rel (%p113_p2) target bundleno = 245 (0xf5), region = 28  ;;  %v148_v1 = vld [vmem:[%s565_s1 + $0x20] sm:$0xff] (!%p113_p2)  ;;  %452 = vmatprep.mubr.msk.f32.mxu0 (!%p113_p2), %vm160_vm0, %v144_v0  ;;  %v149_v5 = vld [vmem:[%s565_s1 + $0x28] sm:$0xff] (!%p113_p2)  ;;  %v150_v7 = vld [vmem:[%s565_s1 + $0x30] sm:$0xff] (!%p113_p2) }
   0x7   : > { %458 = vmatprep.mubr.msk.f32.mxu1 (!%p113_p2), %vm160_vm0, %v148_v1  ;;  %v147_v8 = vld [vmem:[%s565_s1 + $0x18] sm:$0xff] (!%p113_p2) }
   0x8   : > { %v151_v9 = vld [vmem:[%s565_s1 + $0x38] sm:$0xff] (!%p113_p2) }
   0xd   : > { %s568_s10 = smov (!%p134_p3, %s386_s10), 1 }
   0xe   : > { %s413_s15 = sshll.u32 %s568_s10, 4  ;;  %s414_s3 = sshll.u32 %s568_s10, 5 }
   0xf   : > { %s138_s18 = scalar_lea.vmem %s564_s0, %s413_s15  ;;  %s143_s6 = scalar_lea.vmem %s566_s2, %s414_s3 }
  0x10   : > { %v424_v2 = vld [vmem:[%s138_s18] sm:$0xff]   ;;  %v431_v3 = vld [vmem:[%s138_s18 + $0x8] sm:$0xff]  }
  0x11   : > { %465 = vmatprep.subr.bf16.mxu0 %v424_v2  ;;  %472 = vmatprep.subr.bf16.mxu1 %v424_v2 }
  0x12   : > { %467 = vmatpush3.bf16.msra.mxu0 %v424_v2  ;;  %474 = vmatpush3.bf16.msra.mxu1 %v424_v2 }
  0x13   : > { %469 = vmatprep.subr.bf16.mxu0 %v431_v3  ;;  %473 = vmatprep.subr.bf16.mxu1 %v431_v3 }
  0x16   : > { %471 = vmatpush3.bf16.msra.mxu0 %v431_v3  ;;  %475 = vmatpush3.bf16.msra.mxu1 %v431_v3 }
  0x19   : > { %453 = vmatmul.mubr.msk.f32.vlgmr.msra.gmra.mrb[0].mxu0 %vm160_vm0, %v145_v4  ;;  %459 = vmatmul.mubr.msk.f32.vlgmr.msra.gmra.mrb[0].mxu1 %vm160_vm0, %v149_v5 }
  0x1a   : > { %455 = vmatprep.mubr.msk.f32.mxu0 %vm160_vm0, %v146_v6  ;;  %461 = vmatprep.mubr.msk.f32.mxu1 %vm160_vm0, %v150_v7 }
  0x1d   : > { %456 = vmatmul.mubr.msk.f32.gmra.mrb[2].mxu0 %vm160_vm0, %v147_v8  ;;  %462 = vmatmul.mubr.msk.f32.gmra.mrb[2].mxu1 %vm160_vm0, %v151_v9 }
  0xec   : > { %v454_v10 = vpop.f32.mrb[0].mxu0  ;;  %v460_v11 = vpop.f32.mrb[0].mxu1 }
  0xed   : > { %v416_v12 = vpack.c.bf16 %v454_v10, %v454_v10  ;;  %v420_v13 = vpack.c.bf16 %v460_v11, %v460_v11  ;;  %v251_v14 = vpop.f32.mrb[1].mxu0  ;;  %v271_v15 = vpop.f32.mrb[1].mxu1 }
  0xee   : > { %v415_v16 = vpack.c.bf16 %v251_v14, %v251_v14  ;;  %v419_v17 = vpack.c.bf16 %v271_v15, %v271_v15 }
  0xef   : > { %324 = vst.msk [vmem:[%s143_s6 + $0x4] sm:$0xf] %vm322_vm1, %v416_v12  ;;  %328 = vst.msk [vmem:[%s143_s6 + $0x14] sm:$0xf] %vm322_vm1, %v420_v13 }
  0xf0   : > { %323 = vst.msk [vmem:[%s143_s6] sm:$0xf] %vm322_vm1, %v415_v16  ;;  %327 = vst.msk [vmem:[%s143_s6 + $0x10] sm:$0xf] %vm322_vm1, %v419_v17  ;;  %v457_v18 = vpop.f32.mrb[2].mxu0  ;;  %v463_v19 = vpop.f32.mrb[2].mxu1 }
  0xf1   : > { %v418_v20 = vpack.c.bf16 %v457_v18, %v457_v18  ;;  %v422_v21 = vpack.c.bf16 %v463_v19, %v463_v19  ;;  %v261_v22 = vpop.f32.mrb[3].mxu0  ;;  %v281_v23 = vpop.f32.mrb[3].mxu1 }
  0xf2   : > { %v417_v24 = vpack.c.bf16 %v261_v22, %v261_v22  ;;  %v421_v25 = vpack.c.bf16 %v281_v23, %v281_v23 }
  0xf3   : > { %326 = vst.msk [vmem:[%s143_s6 + $0xc] sm:$0xf] %vm322_vm1, %v418_v20  ;;  %330 = vst.msk [vmem:[%s143_s6 + $0x1c] sm:$0xf] %vm322_vm1, %v422_v21 }
  0xf4   : > { %325 = vst.msk [vmem:[%s143_s6 + $0x8] sm:$0xf] %vm322_vm1, %v417_v24  ;;  %329 = vst.msk [vmem:[%s143_s6 + $0x18] sm:$0xf] %vm322_vm1, %v421_v25 }
  0xf5 PF: > { %s12_s9 = sadd.s32 1, %s490_s9  }
  0xf6   : > { %p9_p4 = scmp.ge.s32.totalorder %s12_s9, 4  }
  0xf8   :  { %11 = sbr.rel (!%p9_p4) target bundleno = 1 (0x1), region = 58 }

// kernel: nafnet_refine_forward.14
= control target key start
LH: loop header
LB: loop body
LE: loop exit
PB: predicated region body
PF: predicated region fallthrough
CT: control target
= control target key end

     0   :  { %s2796_s0 = inlined_call_operand.vmem [shape: bf16[2,16,64], index: 0, kind: input, shape index: {}]   ;;  %s2797_s1 = inlined_call_operand.vmem [shape: f32[1,64], index: 1, kind: input, shape index: {}]   ;;  %s2798_s2 = inlined_call_operand.vmem [shape: f32[1,64], index: 2, kind: input, shape index: {}]   ;;  %s2799_s3 = inlined_call_operand.vmem [shape: f32[16,1], index: 3, kind: input, shape index: {}, may-alias: {3,14}]   ;;  %s2800_s4 = inlined_call_operand.vmem [shape: f32[16,1], index: 4, kind: input, shape index: {}, may-alias: {4,15}]   ;;  %s2801_s5 = inlined_call_operand.vmem [shape: f32[32,16], index: 5, kind: input, shape index: {}]   ;;  %s2802_s6 = inlined_call_operand.vmem [shape: f32[32,1], index: 6, kind: input, shape index: {}]   ;;  %s2803_s7 = inlined_call_operand.vmem [shape: f32[9,32,1], index: 7, kind: input, shape index: {}]   ;;  %s2804_s8 = inlined_call_operand.vmem [shape: f32[32,1], index: 8, kind: input, shape index: {}]   ;;  %s2805_s9 = inlined_call_operand.vmem [shape: f32[16,16], index: 9, kind: input, shape index: {}]   ;;  %s2806_s10 = inlined_call_operand.vmem [shape: f32[16,1], index: 10, kind: input, shape index: {}]   ;;  %s2807_s11 = inlined_call_operand.vmem [shape: f32[16,16], index: 11, kind: input, shape index: {}]   ;;  %s2808_s12 = inlined_call_operand.vmem [shape: f32[16,1], index: 12, kind: input, shape index: {}]   ;;  %s2809_s13 = inlined_call_operand.vmem [shape: f32[16,1], index: 13, kind: input, shape index: {}]   ;;  %s2810_s14 = inlined_call_operand.vmem [shape: f32[16,1], index: 14, kind: input, shape index: {}, may-alias: {3,14}]   ;;  %s2811_s15 = inlined_call_operand.vmem [shape: f32[16,1], index: 15, kind: input, shape index: {}, may-alias: {4,15}]   ;;  %s2812_s16 = inlined_call_operand.vmem [shape: f32[32,16], index: 16, kind: input, shape index: {}]   ;;  %s2813_s17 = inlined_call_operand.vmem [shape: f32[32,1], index: 17, kind: input, shape index: {}]   ;;  %s2814_s18 = inlined_call_operand.vmem [shape: f32[16,16], index: 18, kind: input, shape index: {}]   ;;  %s2815_s19 = inlined_call_operand.vmem [shape: f32[16,1], index: 19, kind: input, shape index: {}]   ;;  %s2816_s20 = inlined_call_operand.vmem [shape: f32[16,1], index: 20, kind: input, shape index: {}]   ;;  %s2817_s21 = inlined_call_operand.vmem [shape: bf16[2,16,64], index: 21, kind: output, shape index: {}]  }
   0x1   :  { %2823 = sst [smem:[#allocation2_spill]] %s2796_s0 }
   0x2   :  { %2824 = sst [smem:[#allocation3_spill]] %s2797_s1 }
   0x3   :  { %2825 = sst [smem:[#allocation4_spill]] %s2798_s2  ;;  %s2230_s2 = smov 0  }
   0x4   :  { %2826 = sst [smem:[#allocation5_spill]] %s2799_s3 }
   0x5   :  { %2827 = sst [smem:[#allocation6_spill]] %s2800_s4 }
   0x6   :  { %2828 = sst [smem:[#allocation7_spill]] %s2801_s5 }
   0x7   :  { %2829 = sst [smem:[#allocation8_spill]] %s2802_s6 }
   0x8 LB: > { %s1926_s25 = sadd.s32 4294967295, %s2109_s2   ;;  %p1930_p0 = scmp.ge.s32.totalorder %s2109_s2, 1  ;;  %s2109_s2 = sphi %s2230_s2, %s31_s2  }
   0x9   : > { %p587_p1 = scmp.lt.s32.totalorder %s2109_s2, 3 }
   0xb   : > { %p588_p2 = pnand %p1930_p0, %p587_p1 }
   0xc   : > { %s2830_s3 = sld [smem:[#allocation6_spill]] (!%p588_p2)  ;;  %s2831_s0 = sld [smem:[#allocation5_spill]] (!%p588_p2)  ;;  %v2111_v2 = vmov (!%p588_p2), 0   ;;  %vm749_vm0 = vcmask (!%p588_p2), 130048   ;;  %v879_v9 = vld [vmem:[%s2803_s7 + $0x8] sm:$0xff] (!%p588_p2)  ;;  %v878_v10 = vld [vmem:[%s2803_s7] sm:$0xff] (!%p588_p2) }
   0xd   : > { %591 = sbr.rel (%p588_p2) target bundleno = 1806 (0x70e), region = 104  ;;  %2098 = vset.pattern.permute.xlu1 (!%p588_p2), %v2111_v2  ;;  %2097 = vset.pattern.permute.xlu0 (!%p588_p2), %v2111_v2  ;;  %s2832_s6 = sld [smem:[#allocation8_spill]] (!%p588_p2)  ;;  %v881_v12 = vld [vmem:[%s2803_s7 + $0x18] sm:$0xff] (!%p588_p2)  ;;  %v880_v13 = vld [vmem:[%s2803_s7 + $0x10] sm:$0xff] (!%p588_p2)  ;;  %v1941_v14 = vld [vmem:[%s2803_s7 + $0x28] sm:$0xff] (!%p588_p2)  ;;  %vm663_vm1 = vcmask (!%p588_p2), 523264  }
   0xe   : > { %p647_p3 = scmp.lt.s32.totalorder (!%p588_p2), %s1926_s25, 1  ;;  %s2833_s26 = sld [smem:[#allocation7_spill]] (!%p588_p2)  ;;  %v1940_v15 = vld [vmem:[%s2803_s7 + $0x20] sm:$0xff] (!%p588_p2)  ;;  %v1943_v17 = vld [vmem:[%s2803_s7 + $0x38] sm:$0xff] (!%p588_p2)  ;;  %v1942_v18 = vld [vmem:[%s2803_s7 + $0x30] sm:$0xff] (!%p588_p2)  ;;  %vm863_vm2 = vcmask (!%p588_p2), 72704  }
   0xf   : > { %s2834_s27 = sld [smem:[#allocation2_spill]] (!%p588_p2)  ;;  %v1946_v21 = vld [vmem:[%s2803_s7 + $0x48] sm:$0xff] (!%p588_p2)  ;;  %v1945_v22 = vld [vmem:[%s2803_s7 + $0x40] sm:$0xff] (!%p588_p2)  ;;  %v1948_v25 = vld [vmem:[%s2803_s7 + $0x58] sm:$0xff] (!%p588_p2)  ;;  %s2112_s1 = smov (!%p588_p2), 9   ;;  %vm922_vm3 = vcmask (!%p588_p2), 64512  }
  0x10   : > { %v1947_v26 = vld [vmem:[%s2803_s7 + $0x50] sm:$0xff] (!%p588_p2)  ;;  %v1950_v28 = vld [vmem:[%s2803_s7 + $0x68] sm:$0xff] (!%p588_p2)  ;;  %v1949_v29 = vld [vmem:[%s2803_s7 + $0x60] sm:$0xff] (!%p588_p2)  ;;  %s2113_s24 = smov (!%p588_p2), 8   ;;  %s2116_s29 = smov (!%p588_p2), 127   ;;  %vm972_vm4 = vcmask (!%p588_p2), 56320  }
  0x11   : > { %v1952_v31 = vld [vmem:[%s2803_s7 + $0x78] sm:$0xff] (!%p588_p2)  ;;  %v1951_v32 = vld [vmem:[%s2803_s7 + $0x70] sm:$0xff] (!%p588_p2)  ;;  %v1954_v34 = vld [vmem:[%s2803_s7 + $0x88] sm:$0xff] (!%p588_p2)  ;;  %s2117_s4 = smov (!%p588_p2), 121   ;;  %s2119_s5 = smov (!%p588_p2), 119   ;;  %vm1032_vm5 = vcmask (!%p588_p2), 7168  }
  0x12   : > { %v707_v0 = vld [vmem:[%s2830_s3] sm:$0xff] (!%p588_p2)  ;;  %v708_v3 = vld [vmem:[%s2830_s3 + $0x8] sm:$0xff] (!%p588_p2)  ;;  %v1956_v37 = vld [vmem:[%s2803_s7 + $0x98] sm:$0xff] (!%p588_p2)  ;;  %vm1119_vm6 = vcmask (!%p588_p2), 515072   ;;  %vm1173_vm7 = vcmask (!%p588_p2), 465920   ;;  %vm1227_vm8 = vcmask (!%p588_p2), 457728  }
  0x13   : > { %v693_v1 = vld [vmem:[%s2831_s0] sm:$0xff] (!%p588_p2)  ;;  %711 = vperm.xlu1 (!%p588_p2), %2098, %v707_v0   ;;  %v694_v4 = vld [vmem:[%s2831_s0 + $0x8] sm:$0xff] (!%p588_p2)  ;;  %v728_v7 = vld [vmem:[%s2832_s6 + $0x18] sm:$0xff] (!%p588_p2)  ;;  %s2118_s0 = smov (!%p588_p2), 120   ;;  %vm1277_vm9 = vcmask (!%p588_p2), 449536   ;;  %vm1868_vm10 = vcmask (!%p588_p2), 519168  }
  0x14   : > { %697 = vperm.xlu0 %2097, %v693_v1   ;;  %v726_v5 = vld [vmem:[%s2832_s6 + $0x8] sm:$0xff]  ;;  %v725_v6 = vld [vmem:[%s2832_s6] sm:$0xff]  ;;  %v727_v8 = vld [vmem:[%s2832_s6 + $0x10] sm:$0xff]  ;;  %s2838_s25 = smov (!%p647_p3, %s1926_s25), 1 }
  0x15   : > { %v721_v11 = vld [vmem:[%s2833_s26] sm:$0xff]  ;;  %s1987_s30 = sshll.u32 %s2838_s25, 3  ;;  %v1955_v38 = vld [vmem:[%s2803_s7 + $0x90] sm:$0xff]  ;;  %v1958_v40 = vld [vmem:[%s2803_s7 + $0xa8] sm:$0xff] }
  0x16   : > { %2023 = vmatprep.mubr.msk.f32.mxu0 %vm749_vm0, %v721_v11  ;;  %s651_s28 = scalar_lea.vmem %s2834_s27, %s1987_s30  ;;  %v1953_v35 = vld [vmem:[%s2803_s7 + $0x80] sm:$0xff]  ;;  %v1960_v43 = vld [vmem:[%s2803_s7 + $0xb8] sm:$0xff]  ;;  %v1959_v44 = vld [vmem:[%s2803_s7 + $0xb0] sm:$0xff]  ;;  %s2114_s27 = smov 7  }
  0x17   : > { %716 = vperm.xlu1 %2098, %v708_v3   ;;  %v1992_v16 = vld [vmem:[%s651_s28] sm:$0xff]   ;;  %v1962_v46 = vld [vmem:[%s2803_s7 + $0xc8] sm:$0xff]  ;;  %v1964_v49 = vld [vmem:[%s2803_s7 + $0xd8] sm:$0xff]  ;;  %s2115_s28 = smov 1  }
  0x18   : > { %702 = vperm.xlu0 %2097, %v694_v4   ;;  %v2298_v19 = vunpack.c.l.bf16 %v1992_v16  ;;  %v2300_v20 = vunpack.c.h.bf16 %v1992_v16  ;;  %v1957_v41 = vld [vmem:[%s2803_s7 + $0xa0] sm:$0xff]  ;;  %v1963_v50 = vld [vmem:[%s2803_s7 + $0xd0] sm:$0xff]  ;;  %v1966_v53 = vld [vmem:[%s2803_s7 + $0xe8] sm:$0xff] }
  0x19   : > { %v1961_v47 = vld [vmem:[%s2803_s7 + $0xc0] sm:$0xff]  ;;  %v1968_v57 = vld [vmem:[%s2803_s7 + $0xf8] sm:$0xff]  ;;  %v1967_v58 = vld [vmem:[%s2803_s7 + $0xf0] sm:$0xff] }
  0x1a   : > { %v664_v23 = vsel %vm663_vm1, %v2298_v19, 0.0  ;;  %v665_v24 = vsel %vm663_vm1, %v2300_v20, 0.0  ;;  %v1965_v54 = vld [vmem:[%s2803_s7 + $0xe0] sm:$0xff]  ;;  %v1970_v61 = vld [vmem:[%s2803_s7 + $0x108] sm:$0xff]  ;;  %v1972_v0 = vld [vmem:[%s2803_s7 + $0x118] sm:$0xff] }
  0x1b   : > { %736 = vperm.xlu1 %2098, %v726_v5   ;;  %v666_v27 = vadd.f32 %v665_v24, %v664_v23  ;;  %v1969_v62 = vld [vmem:[%s2803_s7 + $0x100] sm:$0xff]  ;;  %v1971_v1 = vld [vmem:[%s2803_s7 + $0x110] sm:$0xff]  ;;  %v1320_v3 = vld [vmem:[%s2804_s8 + $0x8] sm:$0xff] }
  0x1c   : > { %731 = vperm.xlu0 %2097, %v725_v6   ;;  %v1319_v4 = vld [vmem:[%s2804_s8] sm:$0xff] }
  0x1d   : > { %v667_v30 = vrot.slane %v666_v27, 4 }
  0x1f   : > { %746 = vperm.xlu1 %2098, %v728_v7   ;;  %v668_v33 = vadd.f32 %v667_v30, %v666_v27  ;;  %v723_v27 = vld [vmem:[%s2833_s26 + $0x10] sm:$0xff] }
  0x20   : > { %741 = vperm.xlu0 %2097, %v727_v8  }
  0x21   : > { %v669_v36 = vrot.slane %v668_v33, 2 }
  0x23   : > { %889 = vperm.xlu1 %2098, %v879_v9   ;;  %v670_v39 = vadd.f32 %v669_v36, %v668_v33 }
  0x24   : > { %884 = vperm.xlu0 %2097, %v878_v10  }
  0x25   : > { %v671_v42 = vrot.slane %v670_v39, 1 }
  0x27   : > { %899 = vperm.xlu1 %2098, %v881_v12   ;;  %v672_v45 = vadd.f32 %v671_v42, %v670_v39 }
  0x28   : > { %894 = vperm.xlu0 %2097, %v880_v13  }
  0x29   : > { %v674_v48 = vmul.f32 0.0625, %v672_v45 }
  0x2b   : > { %939 = vperm.xlu1 %2098, %v1941_v14   ;;  %v675_v51 = vsub.f32 %v2298_v19, %v674_v48  ;;  %v676_v52 = vsub.f32 %v2300_v20, %v674_v48 }
  0x2c   : > { %934 = vperm.xlu0 %2097, %v1940_v15  }
  0x2d   : > { %v677_v55 = vmul.f32 %v675_v51, %v675_v51  ;;  %v678_v56 = vmul.f32 %v676_v52, %v676_v52 }
  0x2f   : > { %949 = vperm.xlu1 %2098, %v1943_v17   ;;  %v679_v59 = vsel %vm663_vm1, %v677_v55, 0.0  ;;  %v680_v60 = vsel %vm663_vm1, %v678_v56, 0.0 }
  0x30   : > { %944 = vperm.xlu0 %2097, %v1942_v18   ;;  %v681_v63 = vadd.f32 %v680_v60, %v679_v59 }
  0x32   : > { %v682_v2 = vrot.slane %v681_v63, 4 }
  0x33   : > { %999 = vperm.xlu1 %2098, %v1946_v21  }
  0x34   : > { %994 = vperm.xlu0 %2097, %v1945_v22   ;;  %v683_v5 = vadd.f32 %v682_v2, %v681_v63  ;;  %v1321_v63 = vld [vmem:[%s2804_s8 + $0x10] sm:$0xff] }
  0x36   : > { %v684_v6 = vrot.slane %v683_v5, 2 }
  0x37   : > { %1009 = vperm.xlu1 %2098, %v1948_v25  }
  0x38   : > { %1004 = vperm.xlu0 %2097, %v1947_v26   ;;  %v685_v7 = vadd.f32 %v684_v6, %v683_v5  ;;  %v722_v26 = vld [vmem:[%s2833_s26 + $0x8] sm:$0xff] }
  0x3a   : > { %v686_v8 = vrot.slane %v685_v7, 1 }
  0x3b   : > { %1053 = vperm.xlu1 %2098, %v1950_v28   ;;  %v724_v28 = vld [vmem:[%s2833_s26 + $0x18] sm:$0xff] }
  0x3c   : > { %1048 = vperm.xlu0 %2097, %v1949_v29   ;;  %v687_v9 = vadd.f32 %v686_v8, %v685_v7 }
  0x3e   : > { %v688_v10 = vmul.f32 0.0625, %v687_v9 }
  0x3f   : > { %1063 = vperm.xlu1 %2098, %v1952_v31  }
  0x40   : > { %1058 = vperm.xlu0 %2097, %v1951_v32   ;;  %v689_v11 = vadd.f32 1e-06, %v688_v10 }
  0x42   : > { %2099 = vrsqrt.f32 %v689_v11 }
  0x43   : > { %1086 = vperm.xlu1 %2098, %v1954_v34  }
  0x44   : > { %1081 = vperm.xlu0 %2097, %v1953_v35  }
  0x47   : > { %1096 = vperm.xlu1 %2098, %v1956_v37  }
  0x48   : > { %1091 = vperm.xlu0 %2097, %v1955_v38  }
  0x4b   : > { %1140 = vperm.xlu1 %2098, %v1958_v40  }
  0x4c   : > { %1135 = vperm.xlu0 %2097, %v1957_v41   ;;  %v2100_v12 = vpop.eup %2099 }
  0x4d   : > { %v691_v13 = vmul.f32 %v2100_v12, %v675_v51  ;;  %v692_v16 = vmul.f32 %v2100_v12, %v676_v52 }
  0x4f   : > { %1150 = vperm.xlu1 %2098, %v1960_v43  }
  0x50   : > { %1145 = vperm.xlu0 %2097, %v1959_v44  }
  0x53   : > { %1194 = vperm.xlu1 %2098, %v1962_v46  }
  0x54   : > { %1189 = vperm.xlu0 %2097, %v1961_v47  }
  0x57   : > { %1204 = vperm.xlu1 %2098, %v1964_v49  }
  0x58   : > { %1199 = vperm.xlu0 %2097, %v1963_v50  }
  0x5b   : > { %1244 = vperm.xlu1 %2098, %v1966_v53  }
  0x5c   : > { %1239 = vperm.xlu0 %2097, %v1965_v54  }
  0x5f   : > { %1254 = vperm.xlu1 %2098, %v1968_v57  }
  0x60   : > { %1249 = vperm.xlu0 %2097, %v1967_v58  }
  0x63   : > { %1298 = vperm.xlu1 %2098, %v1970_v61   ;;  %v1322_v61 = vld [vmem:[%s2804_s8 + $0x18] sm:$0xff] }
  0x64   : > { %1293 = vperm.xlu0 %2097, %v1969_v62  }
  0x67   : > { %1308 = vperm.xlu1 %2098, %v1972_v0  }
  0x68   : > { %1303 = vperm.xlu0 %2097, %v1971_v1  }
  0x6b   : > { %1330 = vperm.xlu1 %2098, %v1320_v3  }
  0x6c   : > { %1325 = vperm.xlu0 %2097, %v1319_v4  }
  0x92   : > { %v712_v14 = vpop.permute.xlu1 %711 }
  0x93   : > { %v698_v15 = vpop.permute.xlu0 %697 }
  0x94   : > { %v705_v17 = vmul.f32 %v698_v15, %v691_v13 }
  0x96   : > { %v717_v22 = vpop.permute.xlu1 %716  ;;  %v719_v24 = vadd.f32 %v712_v14, %v705_v17 }
  0x97   : > { %v703_v18 = vpop.permute.xlu0 %702 }
  0x98   : > { %v706_v21 = vmul.f32 %v703_v18, %v692_v16 }
  0x9a   : > { %v720_v23 = vadd.f32 %v717_v22, %v706_v21  ;;  %v737_v29 = vpop.permute.xlu1 %736 }
  0x9b   : > { %v732_v30 = vpop.permute.xlu0 %731 }
  0x9c   : > { %v2060_v25 = vpack.c.bf16 %v720_v23, %v719_v24 }
  0x9e   : > { %2061 = vmatprep.subr.bf16.mxu0 %v2060_v25  ;;  %v747_v31 = vpop.permute.xlu1 %746 }
  0x9f   : > { %2063 = vmatpush3.bf16.msra.mxu0 %v2060_v25  ;;  %v742_v32 = vpop.permute.xlu0 %741 }
  0xa2   : > { %2024 = vmatmul.mubr.msk.f32.vlgmr.msra.gmra.mrb[0].mxu0 %vm749_vm0, %v722_v26  ;;  %v2420_v38 = vpop.permute.xlu1 %889 }
  0xa3   : > { %2026 = vmatprep.mubr.msk.f32.mxu0 %vm749_vm0, %v723_v27  ;;  %v2422_v40 = vpop.permute.xlu0 %884 }
  0xa6   : > { %2027 = vmatmul.mubr.msk.f32.gmra.mrb[2].mxu0 %vm749_vm0, %v724_v28  ;;  %v2428_v41 = vpop.permute.xlu1 %899 }
  0xa7   : > { %v2432_v42 = vpop.permute.xlu0 %894 }
  0xaa   : > { %v2440_v43 = vpop.permute.xlu1 %939 }
  0xab   : > { %v2442_v44 = vpop.permute.xlu0 %934 }
  0xae   : > { %v2448_v45 = vpop.permute.xlu1 %949 }
  0xaf   : > { %v2452_v46 = vpop.permute.xlu0 %944 }
  0xb2   : > { %v2460_v47 = vpop.permute.xlu1 %999 }
  0xb3   : > { %v2462_v48 = vpop.permute.xlu0 %994 }
  0xb6   : > { %v2470_v51 = vpop.permute.xlu1 %1009 }
  0xb7   : > { %v2474_v52 = vpop.permute.xlu0 %1004 }
  0xba   : > { %v2482_v53 = vpop.permute.xlu1 %1053 }
  0xbb   : > { %v2484_v54 = vpop.permute.xlu0 %1048 }
  0xbe   : > { %v2490_v55 = vpop.permute.xlu1 %1063 }
  0xbf   : > { %v2494_v56 = vpop.permute.xlu0 %1058 }
  0xc2   : > { %v2502_v57 = vpop.permute.xlu1 %1086 }
  0xc3   : > { %v2504_v58 = vpop.permute.xlu0 %1081 }
  0xc6   : > { %v2510_v59 = vpop.permute.xlu1 %1096 }
  0xc7   : > { %v2514_v60 = vpop.permute.xlu0 %1091 }
  0xca   : > { %v2523_v62 = vpop.permute.xlu1 %1140 }
  0xcb   : > { %v2528_v0 = vpop.permute.xlu0 %1135 }
  0xce   : > { %v2530_v1 = vpop.permute.xlu1 %1150 }
  0xcf   : > { %v2532_v2 = vpop.permute.xlu0 %1145 }
  0xd2   : > { %v2534_v3 = vpop.permute.xlu1 %1194 }
  0xd3   : > { %v2536_v4 = vpop.permute.xlu0 %1189 }
  0xd6   : > { %v2538_v5 = vpop.permute.xlu1 %1204 }
  0xd7   : > { %v2540_v6 = vpop.permute.xlu0 %1199 }
  0xda   : > { %v2542_v7 = vpop.permute.xlu1 %1244 }
  0xdb   : > { %v2544_v8 = vpop.permute.xlu0 %1239 }
  0xde   : > { %v2546_v9 = vpop.permute.xlu1 %1254 }
  0xdf   : > { %v2548_v10 = vpop.permute.xlu0 %1249 }
  0xe2   : > { %v2550_v11 = vpop.permute.xlu1 %1298 }
  0xe3   : > { %v2552_v12 = vpop.permute.xlu0 %1293 }
  0xe6   : > { %v2554_v13 = vpop.permute.xlu1 %1308 }
  0xe7   : > { %v2556_v14 = vpop.permute.xlu0 %1303 }
  0xea   : > { %v2558_v15 = vpop.permute.xlu1 %1330 }
  0xeb   : > { %v2560_v16 = vpop.permute.xlu0 %1325 }
 0x175   : > { %v2025_v33 = vpop.f32.mrb[0].mxu0 }
 0x176   : > { %v2412_v34 = vadd.f32 %v2025_v33, %v737_v29  ;;  %v828_v35 = vpop.f32.mrb[1].mxu0 }
 0x177   : > { %v2414_v36 = vadd.f32 %v828_v35, %v732_v30 }
 0x178   : > { %853 = vrot.lane.b32.xlu1 %v2412_v34, %s2112_s1 }
 0x179   : > { %v2028_v37 = vpop.f32.mrb[2].mxu0  ;;  %851 = vrot.lane.b32.xlu0 %v2414_v36, %s2112_s1 }
 0x17a   : > { %v838_v39 = vpop.f32.mrb[3].mxu0  ;;  %v2466_v49 = vadd.f32 %v2028_v37, %v747_v31 }
 0x17b   : > { %v2468_v50 = vadd.f32 %v838_v39, %v742_v32 }
 0x17c   : > { %912 = vrot.lane.b32.xlu1 %v2412_v34, %s2113_s24 }
 0x17d   : > { %910 = vrot.lane.b32.xlu0 %v2414_v36, %s2113_s24 }
 0x180   : > { %962 = vrot.lane.b32.xlu1 %v2412_v34, %s2114_s27 }
 0x181   : > { %960 = vrot.lane.b32.xlu0 %v2414_v36, %s2114_s27 }
 0x184   : > { %1022 = vrot.lane.b32.xlu1 %v2412_v34, %s2115_s28 }
 0x185   : > { %1020 = vrot.lane.b32.xlu0 %v2414_v36, %s2115_s28 }
 0x188   : > { %1109 = vrot.lane.b32.xlu1 %v2412_v34, %s2116_s29 }
 0x189   : > { %1107 = vrot.lane.b32.xlu0 %v2414_v36, %s2116_s29 }
 0x18c   : > { %1163 = vrot.lane.b32.xlu1 %v2412_v34, %s2117_s4 }
 0x18d   : > { %1161 = vrot.lane.b32.xlu0 %v2414_v36, %s2117_s4 }
 0x190   : > { %1217 = vrot.lane.b32.xlu1 %v2412_v34, %s2118_s0 }
 0x191   : > { %1215 = vrot.lane.b32.xlu0 %v2414_v36, %s2118_s0 }
 0x194   : > { %1267 = vrot.lane.b32.xlu1 %v2412_v34, %s2119_s5 }
 0x195   : > { %1265 = vrot.lane.b32.xlu0 %v2414_v36, %s2119_s5 }
 0x198   : > { %857 = vrot.lane.b32.xlu1 %v2466_v49, %s2112_s1 }
 0x199   : > { %855 = vrot.lane.b32.xlu0 %v2468_v50, %s2112_s1 }
 0x19c   : > { %916 = vrot.lane.b32.xlu1 %v2466_v49, %s2113_s24 }
 0x19d   : > { %914 = vrot.lane.b32.xlu0 %v2468_v50, %s2113_s24 }
 0x1a0   : > { %966 = vrot.lane.b32.xlu1 %v2466_v49, %s2114_s27 }
 0x1a1   : > { %964 = vrot.lane.b32.xlu0 %v2468_v50, %s2114_s27  ;;  %s2835_s27 = sld [smem:[#allocation3_spill]] }
 0x1a4   : > { %1026 = vrot.lane.b32.xlu1 %v2466_v49, %s2115_s28 }
 0x1a5   : > { %1024 = vrot.lane.b32.xlu0 %v2468_v50, %s2115_s28 }
 0x1a7   : > { %v2565_v22 = vld [vmem:[%s2835_s27] ss:$0 sm:$0xff] }
 0x1a8   : > { %1113 = vrot.lane.b32.xlu1 %v2466_v49, %s2116_s29 }
 0x1a9   : > { %1111 = vrot.lane.b32.xlu0 %v2468_v50, %s2116_s29  ;;  %s656_s29 = scalar_lea.vmem %s2817_s21, %s1987_s30 }
 0x1ac   : > { %1167 = vrot.lane.b32.xlu1 %v2466_v49, %s2117_s4 }
 0x1ad   : > { %1165 = vrot.lane.b32.xlu0 %v2468_v50, %s2117_s4  ;;  %s2836_s4 = sld [smem:[#allocation4_spill]] }
 0x1b0   : > { %1221 = vrot.lane.b32.xlu1 %v2466_v49, %s2118_s0 }
 0x1b1   : > { %1219 = vrot.lane.b32.xlu0 %v2468_v50, %s2118_s0 }
 0x1b3   : > { %v2573_v27 = vld [vmem:[%s2836_s4] ss:$0 sm:$0xff] }
 0x1b4   : > { %1271 = vrot.lane.b32.xlu1 %v2466_v49, %s2119_s5 }
 0x1b5   : > { %1269 = vrot.lane.b32.xlu0 %v2468_v50, %s2119_s5 }
 0x1b8   : > { %1340 = vperm.xlu1 %2098, %v1322_v61  }
 0x1b9   : > { %1335 = vperm.xlu0 %2097, %v1321_v63  }
 0x1ea   : > { %v854_v17 = vpop.permute.xlu1 %853 }
 0x1eb   : > { %v852_v18 = vpop.permute.xlu0 %851  ;;  %v865_v23 = vsel %vm863_vm2, 0.0, %v854_v17 }
 0x1ec   : > { %v864_v25 = vsel %vm863_vm2, 0.0, %v852_v18  ;;  %v875_v28 = vmul.f32 %v2565_v22, %v865_v23 }
 0x1ed   : > { %v874_v31 = vmul.f32 %v2565_v22, %v864_v25 }
 0x1ee   : > { %v913_v21 = vpop.permute.xlu1 %912  ;;  %v903_v17 = vmul.f32 %v2420_v38, %v875_v28 }
 0x1ef   : > { %v911_v24 = vpop.permute.xlu0 %910  ;;  %v924_v26 = vsel %vm922_vm3, 0.0, %v913_v21  ;;  %v902_v23 = vmul.f32 %v2422_v40, %v874_v31 }
 0x1f0   : > { %v923_v29 = vsel %vm922_vm3, 0.0, %v911_v24  ;;  %v953_v35 = vmul.f32 %v2440_v43, %v924_v26 }
 0x1f1   : > { %v952_v61 = vmul.f32 %v2442_v44, %v923_v29 }
 0x1f2   : > { %v963_v30 = vpop.permute.xlu1 %962  ;;  %v957_v26 = vadd.f32 %v953_v35, %v903_v17  ;;  %v1100_v17 = vmul.f32 %v2502_v57, %v2412_v34 }
 0x1f3   : > { %v974_v32 = vsel %vm972_vm4, 0.0, %v963_v30  ;;  %v961_v33 = vpop.permute.xlu0 %960  ;;  %v956_v44 = vadd.f32 %v952_v61, %v902_v23 }
 0x1f4   : > { %v984_v37 = vmul.f32 %v2573_v27, %v974_v32  ;;  %v973_v39 = vsel %vm972_vm4, 0.0, %v961_v33 }
 0x1f5   : > { %v983_v63 = vmul.f32 %v2573_v27, %v973_v39 }
 0x1f6   : > { %v1013_v18 = vmul.f32 %v2460_v47, %v984_v37  ;;  %v1023_v21 = vpop.permute.xlu1 %1022 }
 0x1f7   : > { %v1012_v24 = vmul.f32 %v2462_v48, %v983_v63  ;;  %v1034_v43 = vsel %vm1032_vm5, 0.0, %v1023_v21  ;;  %v1021_v25 = vpop.permute.xlu0 %1020 }
 0x1f8   : > { %v1038_v30 = vmul.f32 %v2565_v22, %v1034_v43  ;;  %v1033_v32 = vsel %vm1032_vm5, 0.0, %v1021_v25  ;;  %v1017_v38 = vadd.f32 %v1013_v18, %v957_v26  ;;  %v1099_v18 = vmul.f32 %v2504_v58, %v2414_v36 }
 0x1f9   : > { %v1037_v29 = vmul.f32 %v2565_v22, %v1033_v32  ;;  %v1016_v33 = vadd.f32 %v1012_v24, %v956_v44 }
 0x1fa   : > { %v1067_v47 = vmul.f32 %v2482_v53, %v1038_v30  ;;  %v1110_v28 = vpop.permute.xlu1 %1109 }
 0x1fb   : > { %v1066_v40 = vmul.f32 %v2484_v54, %v1037_v29  ;;  %v1121_v48 = vsel %vm1119_vm6, %v1110_v28, 0.0  ;;  %v1108_v31 = vpop.permute.xlu0 %1107 }
 0x1fc   : > { %v1071_v37 = vadd.f32 %v1067_v47, %v1017_v38  ;;  %v1125_v35 = vmul.f32 %v2573_v27, %v1121_v48  ;;  %v1120_v39 = vsel %vm1119_vm6, %v1108_v31, 0.0 }
 0x1fd   : > { %v1070_v63 = vadd.f32 %v1066_v40, %v1016_v33  ;;  %v1124_v61 = vmul.f32 %v2573_v27, %v1120_v39 }
 0x1fe   : > { %v1164_v53 = vpop.permute.xlu1 %1163  ;;  %v1104_v23 = vadd.f32 %v1100_v17, %v1071_v37  ;;  %v1154_v24 = vmul.f32 %v2523_v62, %v1125_v35 }
 0x1ff   : > { %v1175_v54 = vsel %vm1173_vm7, %v1164_v53, 0.0  ;;  %v1162_v21 = vpop.permute.xlu0 %1161  ;;  %v1103_v26 = vadd.f32 %v1099_v18, %v1070_v63  ;;  %v1153_v30 = vmul.f32 %v2528_v0, %v1124_v61 }
 0x200   : > { %v1179_v43 = vmul.f32 %v2565_v22, %v1175_v54  ;;  %v1174_v25 = vsel %vm1173_vm7, %v1162_v21, 0.0  ;;  %v1158_v29 = vadd.f32 %v1154_v24, %v1104_v23 }
 0x201   : > { %v1178_v34 = vmul.f32 %v2565_v22, %v1174_v25  ;;  %v1157_v38 = vadd.f32 %v1153_v30, %v1103_v26 }
 0x202   : > { %v1208_v57 = vmul.f32 %v2534_v3, %v1179_v43  ;;  %v1218_v32 = vpop.permute.xlu1 %1217 }
 0x203   : > { %v1207_v36 = vmul.f32 %v2536_v4, %v1178_v34  ;;  %v1229_v58 = vsel %vm1227_vm8, %v1218_v32, 0.0  ;;  %v1216_v44 = vpop.permute.xlu0 %1215 }
 0x204   : > { %v1228_v62 = vsel %vm1227_vm8, %v1216_v44, 0.0  ;;  %v1212_v47 = vadd.f32 %v1208_v57, %v1158_v29  ;;  %v1258_v28 = vmul.f32 %v2542_v7, %v1229_v58 }
 0x205   : > { %v1211_v0 = vadd.f32 %v1207_v36, %v1157_v38  ;;  %v1257_v40 = vmul.f32 %v2544_v8, %v1228_v62 }
 0x206   : > { %v1268_v33 = vpop.permute.xlu1 %1267  ;;  %v1262_v35 = vadd.f32 %v1258_v28, %v1212_v47 }
 0x207   : > { %v1279_v3 = vsel %vm1277_vm9, %v1268_v33, 0.0  ;;  %v1266_v48 = vpop.permute.xlu0 %1265  ;;  %v1261_v61 = vadd.f32 %v1257_v40, %v1211_v0 }
 0x208   : > { %v1283_v4 = vmul.f32 %v2573_v27, %v1279_v3  ;;  %v1278_v31 = vsel %vm1277_vm9, %v1266_v48, 0.0 }
 0x209   : > { %v1282_v37 = vmul.f32 %v2573_v27, %v1278_v31 }
 0x20a   : > { %v1312_v39 = vmul.f32 %v2550_v11, %v1283_v4  ;;  %v858_v63 = vpop.permute.xlu1 %857 }
 0x20b   : > { %v1311_v7 = vmul.f32 %v2552_v12, %v1282_v37  ;;  %v856_v17 = vpop.permute.xlu0 %855  ;;  %v867_v11 = vsel %vm863_vm2, 0.0, %v858_v63 }
 0x20c   : > { %v1316_v53 = vadd.f32 %v1312_v39, %v1262_v35  ;;  %v866_v12 = vsel %vm863_vm2, 0.0, %v856_v17 }
 0x20d   : > { %v1315_v18 = vadd.f32 %v1311_v7, %v1261_v61  ;;  %v876_v62 = vmul.f32 %v2565_v22, %v866_v12 }
 0x20e   : > { %v917_v8 = vpop.permute.xlu1 %916  ;;  %v2621_v54 = vadd.f32 %v2558_v15, %v1316_v53 }
 0x20f   : > { %v915_v21 = vpop.permute.xlu0 %914  ;;  %v2624_v23 = vadd.f32 %v2560_v16, %v1315_v18  ;;  %v926_v15 = vsel %vm922_vm3, 0.0, %v917_v8  ;;  %v877_v16 = vmul.f32 %v2565_v22, %v867_v11  ;;  %v904_v31 = vmul.f32 %v2432_v42, %v876_v62 }
 0x210   : > { %v925_v58 = vsel %vm922_vm3, 0.0, %v915_v21  ;;  %v955_v47 = vmul.f32 %v2448_v45, %v926_v15 }
 0x211   : > { %v954_v0 = vmul.f32 %v2452_v46, %v925_v58  ;;  %v905_v48 = vmul.f32 %v2428_v41, %v877_v16 }
 0x212   : > { %v967_v24 = vpop.permute.xlu1 %966 }
 0x213   : > { %v965_v43 = vpop.permute.xlu0 %964  ;;  %v976_v30 = vsel %vm972_vm4, 0.0, %v967_v24  ;;  %v959_v35 = vadd.f32 %v955_v47, %v905_v48  ;;  %v958_v63 = vadd.f32 %v954_v0, %v904_v31 }
 0x214   : > { %v975_v34 = vsel %vm972_vm4, 0.0, %v965_v43  ;;  %v986_v44 = vmul.f32 %v2573_v27, %v976_v30  ;;  %v1101_v43 = vmul.f32 %v2514_v60, %v2468_v50 }
 0x215   : > { %v985_v38 = vmul.f32 %v2573_v27, %v975_v34 }
 0x216   : > { %v1027_v25 = vpop.permute.xlu1 %1026  ;;  %v1015_v4 = vmul.f32 %v2470_v51, %v986_v44 }
 0x217   : > { %v1025_v26 = vpop.permute.xlu0 %1024  ;;  %v1036_v32 = vsel %vm1032_vm5, 0.0, %v1027_v25  ;;  %v1014_v37 = vmul.f32 %v2474_v52, %v985_v38 }
 0x218   : > { %v1035_v29 = vsel %vm1032_vm5, 0.0, %v1025_v26  ;;  %v1040_v28 = vmul.f32 %v2565_v22, %v1036_v32  ;;  %v1019_v17 = vadd.f32 %v1015_v4, %v959_v35  ;;  %v1360_v35 = vld [vmem:[%s2806_s10] sm:$0xff] }
 0x219   : > { %v1039_v40 = vmul.f32 %v2565_v22, %v1035_v29  ;;  %v1018_v41 = vadd.f32 %v1014_v37, %v958_v63 }
 0x21a   : > { %v1114_v57 = vpop.permute.xlu1 %1113  ;;  %v1069_v39 = vmul.f32 %v2490_v55, %v1040_v28 }
 0x21b   : > { %v1112_v36 = vpop.permute.xlu0 %1111  ;;  %v1068_v61 = vmul.f32 %v2494_v56, %v1039_v40  ;;  %v1123_v46 = vsel %vm1119_vm6, %v1114_v57, 0.0  ;;  %v1102_v56 = vmul.f32 %v2510_v59, %v2466_v49 }
 0x21c   : > { %v1122_v53 = vsel %vm1119_vm6, %v1112_v36, 0.0  ;;  %v1073_v18 = vadd.f32 %v1069_v39, %v1019_v17  ;;  %v1127_v42 = vmul.f32 %v2573_v27, %v1123_v46  ;;  %v1458_v46 = vld [vmem:[%s2808_s12 + $0x8] sm:$0xff] }
 0x21d   : > { %v1072_v8 = vadd.f32 %v1068_v61, %v1018_v41  ;;  %v1126_v55 = vmul.f32 %v2573_v27, %v1122_v53  ;;  %v1551_v17 = vld [vmem:[%s2809_s13 + $0x8] sm:$0xff]  ;;  %v1550_v53 = vld [vmem:[%s2809_s13] sm:$0xff] }
 0x21e   : > { %v1168_v33 = vpop.permute.xlu1 %1167  ;;  %v1106_v11 = vadd.f32 %v1102_v56, %v1073_v18  ;;  %v1156_v30 = vmul.f32 %v2530_v1, %v1127_v42  ;;  %v1455_v41 = vld [vmem:[%s2807_s11] sm:$0xff]  ;;  %v1609_v42 = vld [vmem:[%s2811_s15 + $0x8] sm:$0xff]  ;;  %v1629_v56 = vld [vmem:[%s2813_s17 + $0x18] sm:$0xff] }
 0x21f   : > { %v1166_v3 = vpop.permute.xlu0 %1165  ;;  %v1177_v51 = vsel %vm1173_vm7, %v1168_v33, 0.0  ;;  %v1105_v12 = vadd.f32 %v1101_v43, %v1072_v8  ;;  %v1155_v34 = vmul.f32 %v2532_v2, %v1126_v55  ;;  %v1594_v18 = vld [vmem:[%s2810_s14] sm:$0xff]  ;;  %v1627_v8 = vld [vmem:[%s2813_s17 + $0x8] sm:$0xff] }
 0x220   : > { %v1176_v52 = vsel %vm1173_vm7, %v1166_v3, 0.0  ;;  %v1181_v21 = vmul.f32 %v2565_v22, %v1177_v51  ;;  %v1160_v50 = vadd.f32 %v1156_v30, %v1106_v11  ;;  %v1595_v51 = vld [vmem:[%s2810_s14 + $0x8] sm:$0xff]  ;;  %v1626_v55 = vld [vmem:[%s2813_s17] sm:$0xff] }
 0x221   : > { %v1180_v25 = vmul.f32 %v2565_v22, %v1176_v52  ;;  %v1159_v36 = vadd.f32 %v1155_v34, %v1105_v12  ;;  %v1608_v52 = vld [vmem:[%s2811_s15] sm:$0xff] }
 0x222   : > { %v1222_v45 = vpop.permute.xlu1 %1221  ;;  %v1210_v15 = vmul.f32 %v2538_v5, %v1181_v21  ;;  %v1628_v21 = vld [vmem:[%s2813_s17 + $0x10] sm:$0xff]  ;;  %v1751_v43 = vld [vmem:[%s2815_s19] sm:$0xff] }
 0x223   : > { %v1220_v7 = vpop.permute.xlu0 %1219  ;;  %v1209_v59 = vmul.f32 %v2540_v6, %v1180_v25  ;;  %v1231_v32 = vsel %vm1227_vm8, %v1222_v45, 0.0  ;;  %v1845_v25 = vld [vmem:[%s2816_s20 + $0x8] sm:$0xff] }
 0x224   : > { %v1230_v60 = vsel %vm1227_vm8, %v1220_v7, 0.0  ;;  %v1214_v16 = vadd.f32 %v1210_v15, %v1160_v50  ;;  %v1260_v2 = vmul.f32 %v2546_v9, %v1231_v32  ;;  %v1457_v7 = vld [vmem:[%s2808_s12] sm:$0xff]  ;;  %v1456_v15 = vld [vmem:[%s2807_s11 + $0x8] sm:$0xff] }
 0x225   : > { %v1213_v58 = vadd.f32 %v1209_v59, %v1159_v36  ;;  %v1259_v5 = vmul.f32 %v2548_v10, %v1230_v60 }
 0x226   : > { %v1272_v24 = vpop.permute.xlu1 %1271  ;;  %v1264_v29 = vadd.f32 %v1260_v2, %v1214_v16 }
 0x227   : > { %v1270_v26 = vpop.permute.xlu0 %1269  ;;  %v1281_v57 = vsel %vm1277_vm9, %v1272_v24, 0.0  ;;  %v1263_v62 = vadd.f32 %v1259_v5, %v1213_v58  ;;  %v1752_v24 = vld [vmem:[%s2815_s19 + $0x8] sm:$0xff] }
 0x228   : > { %v1280_v49 = vsel %vm1277_vm9, %v1270_v26, 0.0  ;;  %v1285_v22 = vmul.f32 %v2573_v27, %v1281_v57  ;;  %v1844_v26 = vld [vmem:[%s2816_s20] sm:$0xff] }
 0x229   : > { %v1284_v1 = vmul.f32 %v2573_v27, %v1280_v49  ;;  %v1622_v49 = vld [vmem:[%s2812_s16] sm:$0xff] }
 0x22a   : > { %v1314_v44 = vmul.f32 %v2554_v13, %v1285_v22  ;;  %v1358_v13 = vld [vmem:[%s2805_s9] sm:$0xff]  ;;  %2047 = vmatprep.mubr.msk.f32.mxu0 %vm749_vm0, %v1622_v49 }
 0x22b   : > { %v1313_v6 = vmul.f32 %v2556_v14, %v1284_v1  ;;  %2033 = vmatprep.mubr.msk.f32.mxu1 %vm749_vm0, %v1358_v13 }
 0x22c   : > { %v1318_v38 = vadd.f32 %v1314_v44, %v1264_v29 }
 0x22d   : > { %v1317_v28 = vadd.f32 %v1313_v6, %v1263_v62 }
 0x237   : > { %v1341_v47 = vpop.permute.xlu1 %1340 }
 0x238   : > { %v1346_v33 = vadd.f32 %v1341_v47, %v1318_v38  ;;  %v1336_v0 = vpop.permute.xlu0 %1335 }
 0x239   : > { %v1345_v40 = vadd.f32 %v1336_v0, %v1317_v28 }
 0x23a   : > { %v1348_v27 = vmul.f32 %v1346_v33, %v2621_v54  ;;  %v1359_v54 = vld [vmem:[%s2805_s9 + $0x8] sm:$0xff] }
 0x23b   : > { %v1347_v3 = vmul.f32 %v1345_v40, %v2624_v23  ;;  %v1361_v23 = vld [vmem:[%s2806_s10 + $0x8] sm:$0xff] }
 0x23c   : > { %v1352_v9 = vsel %vm663_vm1, %v1348_v27, 0.0 }
 0x23d   : > { %1353 = vadd.xlane.f32.xlu1 %v1352_v9  ;;  %v1349_v10 = vsel %vm663_vm1, %v1347_v3, 0.0 }
 0x23e   : > { %1350 = vadd.xlane.f32.xlu0 %v1349_v10 }
 0x2ca   : > { %v1354_v14 = vpop.xlane.xlu1 %1353 }
 0x2cb   : > { %v1357_v48 = vmul.f32 0.015625, %v1354_v14  ;;  %v1351_v4 = vpop.xlane.xlu0 %1350 }
 0x2cc   : > { %v1356_v31 = vmul.f32 0.015625, %v1351_v4 }
 0x2ce   : > { %v2064_v37 = vpack.c.bf16 %v1357_v48, %v1356_v31 }
 0x2d0   : > { %2065 = vmatprep.subr.bf16.mxu1 %v2064_v37 }
 0x2d1   : > { %2067 = vmatpush3.bf16.msra.mxu1 %v2064_v37 }
 0x2d4   : > { %2034 = vmatmul.mubr.msk.f32.vlgmr.msra.gmra.mrb[0].mxu1 %vm749_vm0, %v1359_v54 }
 0x2d5   : > { %2040 = vmatprep.mubr.msk.f32.mxu1 %vm749_vm0, %v1455_v41 }
 0x3a7   : > { %v2035_v39 = vpop.f32.mrb[0].mxu1 }
 0x3a8   : > { %v1440_v45 = vadd.f32 %v2035_v39, %v1361_v23  ;;  %v1434_v63 = vpop.f32.mrb[1].mxu1 }
 0x3a9   : > { %v1435_v61 = vadd.f32 %v1434_v63, %v1360_v35 }
 0x3aa   : > { %1450 = vperm.xlu1 %2098, %v1440_v45  }
 0x3ab   : > { %1445 = vperm.xlu0 %2097, %v1435_v61  }
 0x3ae   : > { %1466 = vperm.xlu1 %2098, %v1458_v46  }
 0x3af   : > { %1461 = vperm.xlu0 %2097, %v1457_v7  }
 0x3b2   : > { %1559 = vperm.xlu1 %2098, %v1551_v17  }
 0x3b3   : > { %1554 = vperm.xlu0 %2097, %v1550_v53  }
 0x3b6   : > { %1603 = vperm.xlu1 %2098, %v1595_v51  }
 0x3b7   : > { %1598 = vperm.xlu0 %2097, %v1594_v18  }
 0x3ba   : > { %1617 = vperm.xlu1 %2098, %v1609_v42  }
 0x3bb   : > { %1612 = vperm.xlu0 %2097, %v1608_v52  }
 0x3be   : > { %1637 = vperm.xlu1 %2098, %v1627_v8   ;;  %v1623_v8 = vld [vmem:[%s2812_s16 + $0x8] sm:$0xff] }
 0x3bf   : > { %1632 = vperm.xlu0 %2097, %v1626_v55   ;;  %v1624_v55 = vld [vmem:[%s2812_s16 + $0x10] sm:$0xff] }
 0x3c2   : > { %1647 = vperm.xlu1 %2098, %v1629_v56   ;;  %v1625_v56 = vld [vmem:[%s2812_s16 + $0x18] sm:$0xff] }
 0x3c3   : > { %1642 = vperm.xlu0 %2097, %v1628_v21   ;;  %v1749_v21 = vld [vmem:[%s2814_s18] sm:$0xff] }
 0x3c6   : > { %1760 = vperm.xlu1 %2098, %v1752_v24  }
 0x3c7   : > { %1755 = vperm.xlu0 %2097, %v1751_v43  }
 0x3ca   : > { %1853 = vperm.xlu1 %2098, %v1845_v25  }
 0x3cb   : > { %1848 = vperm.xlu0 %2097, %v1844_v26  }
 0x429   : > { %v1451_v11 = vpop.permute.xlu1 %1450 }
 0x42a   : > { %v1454_v30 = vmul.f32 %v1451_v11, %v1348_v27  ;;  %v1446_v12 = vpop.permute.xlu0 %1445 }
 0x42b   : > { %v1453_v34 = vmul.f32 %v1446_v12, %v1347_v3 }
 0x42d   : > { %v2068_v57 = vpack.c.bf16 %v1454_v30, %v1453_v34  ;;  %v1467_v59 = vpop.permute.xlu1 %1466 }
 0x42e   : > { %v1462_v32 = vpop.permute.xlu0 %1461 }
 0x42f   : > { %2069 = vmatprep.subr.bf16.mxu1 %v2068_v57 }
 0x430   : > { %2071 = vmatpush3.bf16.msra.mxu1 %v2068_v57 }
 0x431   : > { %v1560_v36 = vpop.permute.xlu1 %1559 }
 0x432   : > { %v1555_v16 = vpop.permute.xlu0 %1554 }
 0x433   : > { %2041 = vmatmul.mubr.msk.f32.vlgmr.msra.gmra.mrb[2].mxu1 %vm749_vm0, %v1456_v15 }
 0x434   : > { %2057 = vmatprep.mubr.msk.f32.mxu1 %vm749_vm0, %v1749_v21 }
 0x435   : > { %v1604_v45 = vpop.permute.xlu1 %1603 }
 0x436   : > { %v1599_v63 = vpop.permute.xlu0 %1598 }
 0x439   : > { %v1618_v41 = vpop.permute.xlu1 %1617 }
 0x43a   : > { %v1613_v51 = vpop.permute.xlu0 %1612 }
 0x43d   : > { %v1638_v24 = vpop.permute.xlu1 %1637 }
 0x43e   : > { %v1633_v43 = vpop.permute.xlu0 %1632 }
 0x441   : > { %v1648_v11 = vpop.permute.xlu1 %1647 }
 0x442   : > { %v1643_v12 = vpop.permute.xlu0 %1642 }
 0x506   : > { %v2042_v50 = vpop.f32.mrb[2].mxu1 }
 0x507   : > { %v1547_v60 = vadd.f32 %v2042_v50, %v1467_v59  ;;  %v1541_v22 = vpop.f32.mrb[3].mxu1 }
 0x508   : > { %v1542_v1 = vadd.f32 %v1541_v22, %v1462_v32  ;;  %v1750_v22 = vld [vmem:[%s2814_s18 + $0x8] sm:$0xff] }
 0x509   : > { %v1563_v2 = vmul.f32 %v1560_v36, %v1547_v60  ;;  %v1761_v36 = vpop.permute.xlu1 %1760 }
 0x50a   : > { %v1562_v58 = vmul.f32 %v1555_v16, %v1542_v1  ;;  %v1756_v1 = vpop.permute.xlu0 %1755 }
 0x50b   : > { %v2753_v5 = vadd.f32 %v2300_v20, %v1563_v2 }
 0x50c   : > { %v2756_v44 = vadd.f32 %v2298_v19, %v1562_v58 }
 0x50d   : > { %v1567_v6 = vsel %vm663_vm1, %v2753_v5, 0.0 }
 0x50e   : > { %v1566_v29 = vsel %vm663_vm1, %v2756_v44, 0.0 }
 0x50f   : > { %v1568_v62 = vadd.f32 %v1567_v6, %v1566_v29  ;;  %v1854_v6 = vpop.permute.xlu1 %1853 }
 0x511   : > { %v1569_v38 = vrot.slane %v1568_v62, 4 }
 0x513   : > { %v1570_v47 = vadd.f32 %v1569_v38, %v1568_v62  ;;  %v1849_v62 = vpop.permute.xlu0 %1848 }
 0x515   : > { %v1571_v28 = vrot.slane %v1570_v47, 2 }
 0x517   : > { %v1572_v33 = vadd.f32 %v1571_v28, %v1570_v47 }
 0x519   : > { %v1573_v0 = vrot.slane %v1572_v33, 1 }
 0x51b   : > { %v1574_v40 = vadd.f32 %v1573_v0, %v1572_v33 }
 0x51d   : > { %v1575_v27 = vmul.f32 0.0625, %v1574_v40 }
 0x51f   : > { %v1576_v20 = vsub.f32 %v2756_v44, %v1575_v27  ;;  %v1577_v3 = vsub.f32 %v2753_v5, %v1575_v27 }
 0x521   : > { %v1578_v19 = vmul.f32 %v1576_v20, %v1576_v20  ;;  %v1579_v9 = vmul.f32 %v1577_v3, %v1577_v3 }
 0x523   : > { %v1580_v10 = vsel %vm663_vm1, %v1578_v19, 0.0  ;;  %v1581_v13 = vsel %vm663_vm1, %v1579_v9, 0.0 }
 0x524   : > { %v1582_v14 = vadd.f32 %v1581_v13, %v1580_v10 }
 0x526   : > { %v1583_v48 = vrot.slane %v1582_v14, 4 }
 0x528   : > { %v1584_v4 = vadd.f32 %v1583_v48, %v1582_v14 }
 0x52a   : > { %v1585_v31 = vrot.slane %v1584_v4, 2 }
 0x52c   : > { %v1586_v37 = vadd.f32 %v1585_v31, %v1584_v4 }
 0x52e   : > { %v1587_v54 = vrot.slane %v1586_v37, 1 }
 0x530   : > { %v1588_v23 = vadd.f32 %v1587_v54, %v1586_v37 }
 0x532   : > { %v1589_v35 = vmul.f32 0.0625, %v1588_v23 }
 0x534   : > { %v1590_v39 = vadd.f32 1e-06, %v1589_v35 }
 0x536   : > { %2101 = vrsqrt.f32 %v1590_v39 }
 0x540   : > { %v2102_v61 = vpop.eup %2101 }
 0x541   : > { %v1592_v46 = vmul.f32 %v2102_v61, %v1576_v20  ;;  %v1593_v7 = vmul.f32 %v2102_v61, %v1577_v3 }
 0x543   : > { %v1606_v17 = vmul.f32 %v1599_v63, %v1592_v46  ;;  %v1607_v53 = vmul.f32 %v1604_v45, %v1593_v7 }
 0x545   : > { %v1620_v18 = vadd.f32 %v1613_v51, %v1606_v17  ;;  %v1621_v42 = vadd.f32 %v1618_v41, %v1607_v53 }
 0x547   : > { %v2072_v52 = vpack.c.bf16 %v1621_v42, %v1620_v18 }
 0x549   : > { %2073 = vmatprep.subr.bf16.mxu0 %v2072_v52 }
 0x54a   : > { %2075 = vmatpush3.bf16.msra.mxu0 %v2072_v52 }
 0x54d   : > { %2048 = vmatmul.mubr.msk.f32.vlgmr.msra.gmra.mrb[4].mxu0 %vm749_vm0, %v1623_v8 }
 0x54e   : > { %2050 = vmatprep.mubr.msk.f32.mxu0 %vm749_vm0, %v1624_v55 }
 0x551   : > { %2051 = vmatmul.mubr.msk.f32.gmra.mrb[6].mxu0 %vm749_vm0, %v1625_v56 }
 0x620   : > { %v2049_v25 = vpop.f32.mrb[4].mxu0 }
 0x621   : > { %v1728_v26 = vpop.f32.mrb[5].mxu0  ;;  %v1734_v34 = vadd.f32 %v2049_v25, %v1638_v24 }
 0x622   : > { %v1729_v49 = vadd.f32 %v1728_v26, %v1633_v43 }
 0x624   : > { %v2052_v30 = vpop.f32.mrb[6].mxu0 }
 0x625   : > { %v1744_v57 = vadd.f32 %v2052_v30, %v1648_v11  ;;  %v1738_v15 = vpop.f32.mrb[7].mxu0 }
 0x626   : > { %v1739_v59 = vadd.f32 %v1738_v15, %v1643_v12 }
 0x627   : > { %v1748_v32 = vmul.f32 %v1744_v57, %v1734_v34 }
 0x628   : > { %v1747_v50 = vmul.f32 %v1739_v59, %v1729_v49 }
 0x62a   : > { %v2076_v60 = vpack.c.bf16 %v1748_v32, %v1747_v50 }
 0x62c   : > { %2077 = vmatprep.subr.bf16.mxu1 %v2076_v60 }
 0x62d   : > { %2079 = vmatpush3.bf16.msra.mxu1 %v2076_v60 }
 0x630   : > { %2058 = vmatmul.mubr.msk.f32.vlgmr.msra.gmra.mrb[4].mxu1 %vm749_vm0, %v1750_v22 }
 0x703   : > { %v2059_v16 = vpop.f32.mrb[4].mxu1 }
 0x704   : > { %v1841_v2 = vadd.f32 %v2059_v16, %v1761_v36  ;;  %v1835_v58 = vpop.f32.mrb[5].mxu1 }
 0x705   : > { %v1836_v29 = vadd.f32 %v1835_v58, %v1756_v1 }
 0x706   : > { %v1857_v38 = vmul.f32 %v1854_v6, %v1841_v2 }
 0x707   : > { %v1856_v47 = vmul.f32 %v1849_v62, %v1836_v29 }
 0x708   : > { %v1859_v28 = vadd.f32 %v1857_v38, %v2753_v5 }
 0x709   : > { %v1858_v33 = vadd.f32 %v1856_v47, %v2756_v44 }
 0x70a   : > { %v1990_v0 = vpack.c.bf16 %v1859_v28, %v1859_v28 }
 0x70b   : > { %v1989_v40 = vpack.c.bf16 %v1858_v33, %v1858_v33 }
 0x70c   : > { %1870 = vst.msk [vmem:[%s656_s29 + $0x4] sm:$0xf] %vm1868_vm10, %v1990_v0 }
 0x70d   : > { %1869 = vst.msk [vmem:[%s656_s29] sm:$0xf] %vm1868_vm10, %v1989_v40 }
 0x70e PF: > { %s31_s2 = sadd.s32 1, %s2109_s2  }
 0x70f   : > { %p28_p4 = scmp.ge.s32.totalorder %s31_s2, 4  }
 0x711   :  { %30 = sbr.rel (!%p28_p4) target bundleno = 8 (0x8), region = 142 }

// kernel: nafnet_refine_forward.19
= control target key start
LH: loop header
LB: loop body
LE: loop exit
PB: predicated region body
PF: predicated region fallthrough
CT: control target
= control target key end

     0   :  { %s408_s9 = smov 0   ;;  %s437_s0 = inlined_call_operand.vmem [shape: bf16[2,16,64], index: 0, kind: input, shape index: {}]   ;;  %s438_s1 = inlined_call_operand.vmem [shape: f32[32,16], index: 1, kind: input, shape index: {}]   ;;  %s439_s2 = inlined_call_operand.vmem [shape: bf16[2,32,64], index: 2, kind: output, shape index: {}]  }
   0x1 LB: > { %s326_s10 = sadd.s32 4294967295, %s391_s9   ;;  %p330_p0 = scmp.ge.s32.totalorder %s391_s9, 1  ;;  %s391_s9 = sphi %s408_s9, %s12_s9  }
   0x2   : > { %p112_p1 = scmp.lt.s32.totalorder %s391_s9, 3 }
   0x4   : > { %p113_p2 = pnand %p330_p0, %p112_p1 }
   0x5   : > { %p134_p3 = scmp.lt.s32.totalorder (!%p113_p2), %s326_s10, 1  ;;  %v144_v0 = vld [vmem:[%s438_s1] sm:$0xff] (!%p113_p2)  ;;  %vm152_vm0 = vcmask (!%p113_p2), 130048   ;;  %v146_v1 = vld [vmem:[%s438_s1 + $0x10] sm:$0xff] (!%p113_p2)  ;;  %v145_v3 = vld [vmem:[%s438_s1 + $0x8] sm:$0xff] (!%p113_p2)  ;;  %vm266_vm1 = vcmask (!%p113_p2), 519168  }
   0x6   : > { %116 = sbr.rel (%p113_p2) target bundleno = 237 (0xed), region = 28  ;;  %365 = vmatprep.mubr.msk.f32.mxu0 (!%p113_p2), %vm152_vm0, %v144_v0  ;;  %368 = vmatprep.mubr.msk.f32.mxu1 (!%p113_p2), %vm152_vm0, %v146_v1  ;;  %v147_v4 = vld [vmem:[%s438_s1 + $0x18] sm:$0xff] (!%p113_p2) }
   0xd   : > { %s441_s10 = smov (!%p134_p3, %s326_s10), 1 }
   0xe   : > { %s345_s15 = sshll.u32 %s441_s10, 3  ;;  %s346_s23 = sshll.u32 %s441_s10, 4 }
   0xf   : > { %s138_s18 = scalar_lea.vmem %s437_s0, %s345_s15  ;;  %s143_s26 = scalar_lea.vmem %s439_s2, %s346_s23 }
  0x10   : > { %v352_v2 = vld [vmem:[%s138_s18] sm:$0xff]  }
  0x11   : > { %372 = vmatprep.subr.bf16.mxu0 %v352_v2  ;;  %375 = vmatprep.subr.bf16.mxu1 %v352_v2 }
  0x12   : > { %374 = vmatpush3.bf16.msra.mxu0 %v352_v2  ;;  %376 = vmatpush3.bf16.msra.mxu1 %v352_v2 }
  0x15   : > { %366 = vmatmul.mubr.msk.f32.vlgmr.msra.gmra.mrb[0].mxu0 %vm152_vm0, %v145_v3  ;;  %369 = vmatmul.mubr.msk.f32.vlgmr.msra.gmra.mrb[0].mxu1 %vm152_vm0, %v147_v4 }
  0xe8   : > { %v367_v5 = vpop.f32.mrb[0].mxu0  ;;  %v370_v6 = vpop.f32.mrb[0].mxu1 }
  0xe9   : > { %v348_v7 = vpack.c.bf16 %v367_v5, %v367_v5  ;;  %v350_v8 = vpack.c.bf16 %v370_v6, %v370_v6  ;;  %v231_v9 = vpop.f32.mrb[1].mxu0  ;;  %v241_v10 = vpop.f32.mrb[1].mxu1 }
  0xea   : > { %v347_v11 = vpack.c.bf16 %v231_v9, %v231_v9  ;;  %v349_v12 = vpack.c.bf16 %v241_v10, %v241_v10 }
  0xeb   : > { %268 = vst.msk [vmem:[%s143_s26 + $0x4] sm:$0xf] %vm266_vm1, %v348_v7  ;;  %270 = vst.msk [vmem:[%s143_s26 + $0xc] sm:$0xf] %vm266_vm1, %v350_v8 }
  0xec   : > { %267 = vst.msk [vmem:[%s143_s26] sm:$0xf] %vm266_vm1, %v347_v11  ;;  %269 = vst.msk [vmem:[%s143_s26 + $0x8] sm:$0xf] %vm266_vm1, %v349_v12 }
  0xed PF: > { %s12_s9 = sadd.s32 1, %s391_s9  }
  0xee   : > { %p9_p4 = scmp.ge.s32.totalorder %s12_s9, 4  }
  0xf0   :  { %11 = sbr.rel (!%p9_p4) target bundleno = 1 (0x1), region = 58 }

// kernel: nafnet_refine_forward.16
= control target key start
LH: loop header
LB: loop body
LE: loop exit
PB: predicated region body
PF: predicated region fallthrough
CT: control target
= control target key end

     0   :  { %s4368_s0 = inlined_call_operand.vmem [shape: bf16[2,32,16], index: 0, kind: input, shape index: {}]   ;;  %s4369_s1 = inlined_call_operand.vmem [shape: f32[1,16], index: 1, kind: input, shape index: {}]   ;;  %s4370_s2 = inlined_call_operand.vmem [shape: f32[1,16], index: 2, kind: input, shape index: {}]   ;;  %s4371_s3 = inlined_call_operand.vmem [shape: f32[32,1], index: 3, kind: input, shape index: {}, may-alias: {3,14}]   ;;  %s4372_s4 = inlined_call_operand.vmem [shape: f32[32,1], index: 4, kind: input, shape index: {}, may-alias: {4,15}]   ;;  %s4373_s5 = inlined_call_operand.vmem [shape: f32[64,32], index: 5, kind: input, shape index: {}]   ;;  %s4374_s6 = inlined_call_operand.vmem [shape: f32[64,1], index: 6, kind: input, shape index: {}]   ;;  %s4375_s7 = inlined_call_operand.vmem [shape: f32[9,64,1], index: 7, kind: input, shape index: {}]   ;;  %s4376_s8 = inlined_call_operand.vmem [shape: f32[64,1], index: 8, kind: input, shape index: {}]   ;;  %s4377_s9 = inlined_call_operand.vmem [shape: f32[32,32], index: 9, kind: input, shape index: {}]   ;;  %s4378_s10 = inlined_call_operand.vmem [shape: f32[32,1], index: 10, kind: input, shape index: {}]   ;;  %s4379_s11 = inlined_call_operand.vmem [shape: f32[32,32], index: 11, kind: input, shape index: {}]   ;;  %s4380_s12 = inlined_call_operand.vmem [shape: f32[32,1], index: 12, kind: input, shape index: {}]   ;;  %s4381_s13 = inlined_call_operand.vmem [shape: f32[32,1], index: 13, kind: input, shape index: {}]   ;;  %s4382_s14 = inlined_call_operand.vmem [shape: f32[32,1], index: 14, kind: input, shape index: {}, may-alias: {3,14}]   ;;  %s4383_s15 = inlined_call_operand.vmem [shape: f32[32,1], index: 15, kind: input, shape index: {}, may-alias: {4,15}]   ;;  %s4384_s16 = inlined_call_operand.vmem [shape: f32[64,32], index: 16, kind: input, shape index: {}]   ;;  %s4385_s17 = inlined_call_operand.vmem [shape: f32[64,1], index: 17, kind: input, shape index: {}]   ;;  %s4386_s18 = inlined_call_operand.vmem [shape: f32[32,32], index: 18, kind: input, shape index: {}]   ;;  %s4387_s19 = inlined_call_operand.vmem [shape: f32[32,1], index: 19, kind: input, shape index: {}]   ;;  %s4388_s20 = inlined_call_operand.vmem [shape: f32[32,1], index: 20, kind: input, shape index: {}]   ;;  %s4389_s21 = inlined_call_operand.vmem [shape: bf16[2,32,16], index: 21, kind: output, shape index: {}]  }
   0x1   :  { %4403 = sst [smem:[#allocation46_spill]] %s4368_s0 }
   0x2   :  { %4404 = sst [smem:[#allocation47_spill]] %s4369_s1 }
   0x3   :  { %4405 = sst [smem:[#allocation48_spill]] %s4370_s2  ;;  %s3196_s2 = smov 0  }
   0x4   :  { %4406 = sst [smem:[#allocation49_spill]] %s4371_s3 }
   0x5   :  { %4407 = sst [smem:[#allocation50_spill]] %s4372_s4 }
   0x6   :  { %4408 = sst [smem:[#allocation51_spill]] %s4373_s5 }
   0x7 LB: > { %s2752_s25 = sadd.s32 4294967295, %s3075_s2   ;;  %p2756_p0 = scmp.ge.s32.totalorder %s3075_s2, 1  ;;  %s3075_s2 = sphi %s3196_s2, %s31_s2  }
   0x8   : > { %p587_p1 = scmp.lt.s32.totalorder %s3075_s2, 3 }
   0xa   : > { %p588_p2 = pnand %p2756_p0, %p587_p1 }
   0xc   : > { %591 = sbr.rel (%p588_p2) target bundleno = 1921 (0x781), region = 104 }
  0x13   : > { %s4409_s3 = sld [smem:[#allocation50_spill]]  ;;  %s4410_s0 = sld [smem:[#allocation49_spill]]  ;;  %v3077_v2 = vmov 0   ;;  %v776_v9 = vld [vmem:[%s4374_s6 + $0x8] sm:$0xff]  ;;  %v775_v10 = vld [vmem:[%s4374_s6] sm:$0xff]  ;;  %vm667_vm0 = vcmask 130048  }
  0x14   : > { %3064 = vset.pattern.permute.xlu1 %v3077_v2  ;;  %3063 = vset.pattern.permute.xlu0 %v3077_v2  ;;  %p647_p3 = scmp.lt.s32.totalorder %s2752_s25, 1  ;;  %s4411_s27 = sld [smem:[#allocation46_spill]]  ;;  %v780_v11 = vld [vmem:[%s4374_s6 + $0x28] sm:$0xff]  ;;  %v779_v12 = vld [vmem:[%s4374_s6 + $0x20] sm:$0xff]  ;;  %v778_v19 = vld [vmem:[%s4374_s6 + $0x18] sm:$0xff]  ;;  %vm823_vm1 = vcmask 261120  }
  0x15   : > { %v777_v20 = vld [vmem:[%s4374_s6 + $0x10] sm:$0xff]  ;;  %s4416_s24 = sld [smem:[#allocation51_spill]]  ;;  %v782_v27 = vld [vmem:[%s4374_s6 + $0x38] sm:$0xff]  ;;  %v1009_v31 = vld [vmem:[%s4375_s7 + $0x8] sm:$0xff]  ;;  %s3079_s23 = smov 4   ;;  %vm985_vm2 = vcmask 39936  }
  0x16   : > { %s4504_s25 = smov (!%p647_p3, %s2752_s25), 1  ;;  %v781_v28 = vld [vmem:[%s4374_s6 + $0x30] sm:$0xff]  ;;  %v1008_v32 = vld [vmem:[%s4375_s7] sm:$0xff]  ;;  %v1013_v34 = vld [vmem:[%s4375_s7 + $0x28] sm:$0xff]  ;;  %s3080_s26 = smov 3   ;;  %vm1096_vm3 = vcmask 31744  }
  0x17   : > { %s2861_s1 = sshll.u32 %s4504_s25, 4  ;;  %v1012_v35 = vld [vmem:[%s4375_s7 + $0x20] sm:$0xff]  ;;  %v2771_v37 = vld [vmem:[%s4375_s7 + $0x48] sm:$0xff]  ;;  %v1011_v49 = vld [vmem:[%s4375_s7 + $0x18] sm:$0xff]  ;;  %s3083_s29 = smov 125   ;;  %vm1194_vm4 = vcmask 23552  }
  0x18   : > { %v2770_v38 = vld [vmem:[%s4375_s7 + $0x40] sm:$0xff]  ;;  %v2775_v40 = vld [vmem:[%s4375_s7 + $0x68] sm:$0xff]  ;;  %v1010_v50 = vld [vmem:[%s4375_s7 + $0x10] sm:$0xff]  ;;  %s3084_s4 = smov 124   ;;  %s3085_s30 = smov 123   ;;  %vm1306_vm5 = vcmask 7168  }
  0x19   : > { %v739_v0 = vld [vmem:[%s4409_s3] sm:$0xff]  ;;  %v740_v3 = vld [vmem:[%s4409_s3 + $0x8] sm:$0xff]  ;;  %v714_v5 = vld [vmem:[%s4410_s0 + $0x18] sm:$0xff]  ;;  %vm1477_vm6 = vcmask 121856   ;;  %vm1583_vm7 = vcmask 105472   ;;  %vm1689_vm8 = vcmask 97280  }
  0x1a   : > { %v711_v1 = vld [vmem:[%s4410_s0] sm:$0xff]  ;;  %745 = vperm.xlu1 %3064, %v739_v0   ;;  %v712_v4 = vld [vmem:[%s4410_s0 + $0x8] sm:$0xff]  ;;  %v713_v6 = vld [vmem:[%s4410_s0 + $0x10] sm:$0xff]  ;;  %s651_s28 = scalar_lea.vmem %s4411_s27, %s2861_s1  ;;  %s3078_s0 = smov 5   ;;  %vm1787_vm9 = vcmask 89088   ;;  %vm2692_vm10 = vcmask 125952  }
  0x1b   : > { %717 = vperm.xlu0 %3063, %v711_v1   ;;  %v742_v7 = vld [vmem:[%s4409_s3 + $0x18] sm:$0xff]  ;;  %v741_v8 = vld [vmem:[%s4409_s3 + $0x10] sm:$0xff]  ;;  %v2868_v13 = vld [vmem:[%s651_s28] sm:$0xff]   ;;  %s3081_s27 = smov 1   ;;  %s4457_s3 = sld [smem:[#allocation47_spill]] }
  0x1c   : > { %v2875_v14 = vld [vmem:[%s651_s28 + $0x8] sm:$0xff]   ;;  %v3248_v15 = vunpack.c.l.bf16 %v2868_v13  ;;  %v3250_v16 = vunpack.c.h.bf16 %v2868_v13  ;;  %v767_v25 = vld [vmem:[%s4416_s24] sm:$0xff]  ;;  %v1015_v52 = vld [vmem:[%s4375_s7 + $0x38] sm:$0xff]  ;;  %s3082_s28 = smov 127  }
  0x1d   : > { %v3252_v17 = vunpack.c.l.bf16 %v2875_v14  ;;  %v3254_v18 = vunpack.c.h.bf16 %v2875_v14  ;;  %2932 = vmatprep.mubr.msk.f32.mxu0 %vm823_vm1, %v767_v25  ;;  %v2774_v41 = vld [vmem:[%s4375_s7 + $0x60] sm:$0xff]  ;;  %v2780_v43 = vld [vmem:[%s4375_s7 + $0x88] sm:$0xff]  ;;  %v1014_v53 = vld [vmem:[%s4375_s7 + $0x30] sm:$0xff] }
  0x1e   : > { %750 = vperm.xlu1 %3064, %v740_v3   ;;  %4412 = vst [vmem:[#allocation2_spill] sm:$0xff] %v3248_v15  ;;  %4413 = vst [vmem:[#allocation3_spill] sm:$0xff] %v3250_v16  ;;  %v668_v21 = vsel %vm667_vm0, %v3248_v15, 0.0  ;;  %v669_v22 = vsel %vm667_vm0, %v3250_v16, 0.0  ;;  %v2779_v44 = vld [vmem:[%s4375_s7 + $0x80] sm:$0xff]  ;;  %v2784_v46 = vld [vmem:[%s4375_s7 + $0xa8] sm:$0xff] }
  0x1f   : > { %722 = vperm.xlu0 %3063, %v712_v4   ;;  %4414 = vst [vmem:[#allocation4_spill] sm:$0xff] %v3252_v17  ;;  %4415 = vst [vmem:[#allocation5_spill] sm:$0xff] %v3254_v18  ;;  %v671_v23 = vsel %vm667_vm0, %v3252_v17, 0.0  ;;  %v670_v24 = vadd.f32 %v669_v22, %v668_v21  ;;  %v673_v26 = vsel %vm667_vm0, %v3254_v18, 0.0  ;;  %v2783_v47 = vld [vmem:[%s4375_s7 + $0xa0] sm:$0xff]  ;;  %v2773_v56 = vld [vmem:[%s4375_s7 + $0x58] sm:$0xff] }
  0x20   : > { %v2772_v57 = vld [vmem:[%s4375_s7 + $0x50] sm:$0xff]  ;;  %v2777_v61 = vld [vmem:[%s4375_s7 + $0x78] sm:$0xff]  ;;  %v2788_v3 = vld [vmem:[%s4375_s7 + $0xc8] sm:$0xff] }
  0x21   : > { %v672_v29 = vadd.f32 %v671_v23, %v670_v24  ;;  %v2776_v62 = vld [vmem:[%s4375_s7 + $0x70] sm:$0xff]  ;;  %v2787_v4 = vld [vmem:[%s4375_s7 + $0xc0] sm:$0xff]  ;;  %v2796_v22 = vld [vmem:[%s4375_s7 + $0x108] sm:$0xff] }
  0x22   : > { %732 = vperm.xlu1 %3064, %v714_v5   ;;  %v2781_v13 = vld [vmem:[%s4375_s7 + $0x90] sm:$0xff]  ;;  %v2795_v23 = vld [vmem:[%s4375_s7 + $0x100] sm:$0xff]  ;;  %v2800_v25 = vld [vmem:[%s4375_s7 + $0x128] sm:$0xff] }
  0x23   : > { %727 = vperm.xlu0 %3063, %v713_v6   ;;  %v674_v30 = vadd.f32 %v673_v26, %v672_v29  ;;  %v2799_v26 = vld [vmem:[%s4375_s7 + $0x120] sm:$0xff]  ;;  %v2789_v29 = vld [vmem:[%s4375_s7 + $0xd0] sm:$0xff] }
  0x25   : > { %v675_v33 = vrot.slane %v674_v30, 4 }
  0x26   : > { %760 = vperm.xlu1 %3064, %v742_v7  }
  0x27   : > { %755 = vperm.xlu0 %3063, %v741_v8   ;;  %v676_v36 = vadd.f32 %v675_v33, %v674_v30  ;;  %v2792_v8 = vld [vmem:[%s4375_s7 + $0xe8] sm:$0xff] }
  0x29   : > { %v677_v39 = vrot.slane %v676_v36, 2 }
  0x2a   : > { %790 = vperm.xlu1 %3064, %v776_v9   ;;  %v2791_v9 = vld [vmem:[%s4375_s7 + $0xe0] sm:$0xff] }
  0x2b   : > { %785 = vperm.xlu0 %3063, %v775_v10   ;;  %v678_v42 = vadd.f32 %v677_v39, %v676_v36 }
  0x2d   : > { %v679_v45 = vrot.slane %v678_v42, 1 }
  0x2e   : > { %810 = vperm.xlu1 %3064, %v780_v11  }
  0x2f   : > { %805 = vperm.xlu0 %3063, %v779_v12   ;;  %v680_v48 = vadd.f32 %v679_v45, %v678_v42  ;;  %v2782_v12 = vld [vmem:[%s4375_s7 + $0x98] sm:$0xff]  ;;  %v2812_v45 = vld [vmem:[%s4375_s7 + $0x188] sm:$0xff] }
  0x31   : > { %v682_v51 = vmul.f32 0.03125, %v680_v48  ;;  %v2815_v48 = vld [vmem:[%s4375_s7 + $0x1a0] sm:$0xff] }
  0x32   : > { %800 = vperm.xlu1 %3064, %v778_v19   ;;  %v2786_v19 = vld [vmem:[%s4375_s7 + $0xb8] sm:$0xff] }
  0x33   : > { %795 = vperm.xlu0 %3063, %v777_v20   ;;  %v3329_v54 = vsub.f32 %v3248_v15, %v682_v51  ;;  %v3332_v55 = vsub.f32 %v3250_v16, %v682_v51  ;;  %v3341_v58 = vsub.f32 %v3252_v17, %v682_v51  ;;  %v3354_v63 = vsub.f32 %v3254_v18, %v682_v51  ;;  %v2785_v20 = vld [vmem:[%s4375_s7 + $0xb0] sm:$0xff] }
  0x34   : > { %v2805_v51 = vld [vmem:[%s4375_s7 + $0x150] sm:$0xff] }
  0x35   : > { %v687_v59 = vmul.f32 %v3329_v54, %v3329_v54  ;;  %v688_v60 = vmul.f32 %v3332_v55, %v3332_v55  ;;  %v689_v0 = vmul.f32 %v3341_v58, %v3341_v58  ;;  %v690_v6 = vmul.f32 %v3354_v63, %v3354_v63 }
  0x36   : > { %820 = vperm.xlu1 %3064, %v782_v27  }
  0x37   : > { %815 = vperm.xlu0 %3063, %v781_v28   ;;  %v691_v1 = vsel %vm667_vm0, %v687_v59, 0.0  ;;  %v692_v2 = vsel %vm667_vm0, %v688_v60, 0.0  ;;  %v694_v7 = vsel %vm667_vm0, %v689_v0, 0.0  ;;  %v696_v11 = vsel %vm667_vm0, %v690_v6, 0.0  ;;  %v2790_v28 = vld [vmem:[%s4375_s7 + $0xd8] sm:$0xff]  ;;  %v2809_v60 = vld [vmem:[%s4375_s7 + $0x170] sm:$0xff] }
  0x38   : > { %v693_v5 = vadd.f32 %v692_v2, %v691_v1  ;;  %v2810_v59 = vld [vmem:[%s4375_s7 + $0x178] sm:$0xff] }
  0x3a   : > { %1023 = vperm.xlu1 %3064, %v1009_v31   ;;  %v695_v10 = vadd.f32 %v694_v7, %v693_v5  ;;  %v2794_v31 = vld [vmem:[%s4375_s7 + $0xf8] sm:$0xff] }
  0x3b   : > { %1018 = vperm.xlu0 %3063, %v1008_v32   ;;  %v2793_v32 = vld [vmem:[%s4375_s7 + $0xf0] sm:$0xff] }
  0x3c   : > { %v697_v14 = vadd.f32 %v696_v11, %v695_v10  ;;  %v2823_v10 = vld [vmem:[%s4375_s7 + $0x1e0] sm:$0xff] }
  0x3e   : > { %1043 = vperm.xlu1 %3064, %v1013_v34   ;;  %v698_v21 = vrot.slane %v697_v14, 4  ;;  %v2804_v34 = vld [vmem:[%s4375_s7 + $0x148] sm:$0xff] }
  0x3f   : > { %1038 = vperm.xlu0 %3063, %v1012_v35   ;;  %v2803_v35 = vld [vmem:[%s4375_s7 + $0x140] sm:$0xff] }
  0x40   : > { %v699_v24 = vadd.f32 %v698_v21, %v697_v14 }
  0x42   : > { %1121 = vperm.xlu1 %3064, %v2771_v37   ;;  %v700_v27 = vrot.slane %v699_v24, 2  ;;  %v2808_v37 = vld [vmem:[%s4375_s7 + $0x168] sm:$0xff] }
  0x43   : > { %1116 = vperm.xlu0 %3063, %v2770_v38   ;;  %v2807_v38 = vld [vmem:[%s4375_s7 + $0x160] sm:$0xff] }
  0x44   : > { %v701_v30 = vadd.f32 %v700_v27, %v699_v24  ;;  %v768_v24 = vld [vmem:[%s4416_s24 + $0x8] sm:$0xff]  ;;  %v2827_v27 = vld [vmem:[%s4375_s7 + $0x200] sm:$0xff] }
  0x46   : > { %1141 = vperm.xlu1 %3064, %v2775_v40   ;;  %v702_v33 = vrot.slane %v701_v30, 1  ;;  %v2798_v40 = vld [vmem:[%s4375_s7 + $0x118] sm:$0xff] }
  0x47   : > { %1136 = vperm.xlu0 %3063, %v2774_v41   ;;  %v2797_v41 = vld [vmem:[%s4375_s7 + $0x110] sm:$0xff] }
  0x48   : > { %v703_v36 = vadd.f32 %v702_v33, %v701_v30  ;;  %v2832_v30 = vld [vmem:[%s4375_s7 + $0x228] sm:$0xff]  ;;  %v773_v33 = vld [vmem:[%s4416_s24 + $0x30] sm:$0xff] }
  0x4a   : > { %1233 = vperm.xlu1 %3064, %v2780_v43   ;;  %v704_v39 = vmul.f32 0.03125, %v703_v36  ;;  %v2802_v43 = vld [vmem:[%s4375_s7 + $0x138] sm:$0xff] }
  0x4b   : > { %1228 = vperm.xlu0 %3063, %v2779_v44   ;;  %v2801_v44 = vld [vmem:[%s4375_s7 + $0x130] sm:$0xff]  ;;  %v774_v36 = vld [vmem:[%s4416_s24 + $0x38] sm:$0xff] }
  0x4c   : > { %v705_v42 = vadd.f32 1e-06, %v704_v39  ;;  %v2830_v39 = vld [vmem:[%s4375_s7 + $0x218] sm:$0xff] }
  0x4e   : > { %1253 = vperm.xlu1 %3064, %v2784_v46   ;;  %3065 = vrsqrt.f32 %v705_v42  ;;  %v2811_v46 = vld [vmem:[%s4375_s7 + $0x180] sm:$0xff]  ;;  %v2833_v42 = vld [vmem:[%s4375_s7 + $0x230] sm:$0xff] }
  0x4f   : > { %1248 = vperm.xlu0 %3063, %v2783_v47   ;;  %v2816_v47 = vld [vmem:[%s4375_s7 + $0x1a8] sm:$0xff] }
  0x52   : > { %1033 = vperm.xlu1 %3064, %v1011_v49  }
  0x53   : > { %1028 = vperm.xlu0 %3063, %v1010_v50   ;;  %v2806_v50 = vld [vmem:[%s4375_s7 + $0x158] sm:$0xff] }
  0x56   : > { %1053 = vperm.xlu1 %3064, %v1015_v52  }
  0x57   : > { %1048 = vperm.xlu0 %3063, %v1014_v53  }
  0x58   : > { %v3066_v49 = vpop.eup %3065 }
  0x59   : > { %v707_v52 = vmul.f32 %v3066_v49, %v3329_v54  ;;  %v2820_v54 = vld [vmem:[%s4375_s7 + $0x1c8] sm:$0xff]  ;;  %v710_v2 = vmul.f32 %v3066_v49, %v3354_v63 }
  0x5a   : > { %1131 = vperm.xlu1 %3064, %v2773_v56  }
  0x5b   : > { %1126 = vperm.xlu0 %3063, %v2772_v57   ;;  %v708_v57 = vmul.f32 %v3066_v49, %v3332_v55  ;;  %v2819_v55 = vld [vmem:[%s4375_s7 + $0x1c0] sm:$0xff] }
  0x5e   : > { %1151 = vperm.xlu1 %3064, %v2777_v61  }
  0x5f   : > { %1146 = vperm.xlu0 %3063, %v2776_v62  }
  0x62   : > { %1339 = vperm.xlu1 %3064, %v2788_v3   ;;  %v709_v3 = vmul.f32 %v3066_v49, %v3341_v58 }
  0x63   : > { %1334 = vperm.xlu0 %3063, %v2787_v4  }
  0x66   : > { %1359 = vperm.xlu1 %3064, %v2792_v8  }
  0x67   : > { %1354 = vperm.xlu0 %3063, %v2791_v9   ;;  %v2824_v9 = vld [vmem:[%s4375_s7 + $0x1e8] sm:$0xff] }
  0x6a   : > { %1243 = vperm.xlu1 %3064, %v2782_v12  }
  0x6b   : > { %1238 = vperm.xlu0 %3063, %v2781_v13  }
  0x6e   : > { %1263 = vperm.xlu1 %3064, %v2786_v19   ;;  %v2814_v19 = vld [vmem:[%s4375_s7 + $0x198] sm:$0xff] }
  0x6f   : > { %1258 = vperm.xlu0 %3063, %v2785_v20   ;;  %v2813_v20 = vld [vmem:[%s4375_s7 + $0x190] sm:$0xff] }
  0x72   : > { %1404 = vperm.xlu1 %3064, %v2796_v22   ;;  %v2818_v22 = vld [vmem:[%s4375_s7 + $0x1b8] sm:$0xff] }
  0x73   : > { %1399 = vperm.xlu0 %3063, %v2795_v23   ;;  %v2817_v23 = vld [vmem:[%s4375_s7 + $0x1b0] sm:$0xff] }
  0x76   : > { %1424 = vperm.xlu1 %3064, %v2800_v25   ;;  %v769_v25 = vld [vmem:[%s4416_s24 + $0x10] sm:$0xff] }
  0x77   : > { %1419 = vperm.xlu0 %3063, %v2799_v26   ;;  %v2828_v26 = vld [vmem:[%s4375_s7 + $0x208] sm:$0xff] }
  0x7a   : > { %1349 = vperm.xlu1 %3064, %v2790_v28   ;;  %v770_v28 = vld [vmem:[%s4416_s24 + $0x18] sm:$0xff] }
  0x7b   : > { %1344 = vperm.xlu0 %3063, %v2789_v29   ;;  %v771_v29 = vld [vmem:[%s4416_s24 + $0x20] sm:$0xff] }
  0x7e   : > { %1369 = vperm.xlu1 %3064, %v2794_v31   ;;  %v2831_v31 = vld [vmem:[%s4375_s7 + $0x220] sm:$0xff] }
  0x7f   : > { %1364 = vperm.xlu0 %3063, %v2793_v32   ;;  %v772_v32 = vld [vmem:[%s4416_s24 + $0x28] sm:$0xff] }
  0x82   : > { %1510 = vperm.xlu1 %3064, %v2804_v34   ;;  %v2822_v34 = vld [vmem:[%s4375_s7 + $0x1d8] sm:$0xff] }
  0x83   : > { %1505 = vperm.xlu0 %3063, %v2803_v35   ;;  %v2821_v35 = vld [vmem:[%s4375_s7 + $0x1d0] sm:$0xff] }
  0x86   : > { %1530 = vperm.xlu1 %3064, %v2808_v37   ;;  %v2826_v37 = vld [vmem:[%s4375_s7 + $0x1f8] sm:$0xff] }
  0x87   : > { %1525 = vperm.xlu0 %3063, %v2807_v38   ;;  %v2825_v38 = vld [vmem:[%s4375_s7 + $0x1f0] sm:$0xff] }
  0x8a   : > { %1414 = vperm.xlu1 %3064, %v2798_v40   ;;  %v2829_v40 = vld [vmem:[%s4375_s7 + $0x210] sm:$0xff] }
  0x8b   : > { %1409 = vperm.xlu0 %3063, %v2797_v41   ;;  %v2834_v41 = vld [vmem:[%s4375_s7 + $0x238] sm:$0xff] }
  0x8e   : > { %1434 = vperm.xlu1 %3064, %v2802_v43   ;;  %v1870_v43 = vld [vmem:[%s4376_s8 + $0x8] sm:$0xff] }
  0x8f   : > { %1429 = vperm.xlu0 %3063, %v2801_v44   ;;  %v1869_v44 = vld [vmem:[%s4376_s8] sm:$0xff] }
  0x92   : > { %1616 = vperm.xlu1 %3064, %v2812_v45   ;;  %v1874_v45 = vld [vmem:[%s4376_s8 + $0x28] sm:$0xff] }
  0x93   : > { %1611 = vperm.xlu0 %3063, %v2811_v46   ;;  %v1873_v46 = vld [vmem:[%s4376_s8 + $0x20] sm:$0xff] }
  0x96   : > { %1636 = vperm.xlu1 %3064, %v2816_v47   ;;  %v1872_v47 = vld [vmem:[%s4376_s8 + $0x18] sm:$0xff] }
  0x97   : > { %1631 = vperm.xlu0 %3063, %v2815_v48   ;;  %v1871_v48 = vld [vmem:[%s4376_s8 + $0x10] sm:$0xff] }
  0x99   : > { %v746_v53 = vpop.permute.xlu1 %745 }
  0x9a   : > { %v718_v56 = vpop.permute.xlu0 %717  ;;  %1520 = vperm.xlu1 %3064, %v2806_v50  }
  0x9b   : > { %1515 = vperm.xlu0 %3063, %v2805_v51   ;;  %v735_v61 = vmul.f32 %v718_v56, %v707_v52 }
  0x9d   : > { %v751_v62 = vpop.permute.xlu1 %750  ;;  %v763_v4 = vadd.f32 %v746_v53, %v735_v61 }
  0x9e   : > { %v723_v0 = vpop.permute.xlu0 %722  ;;  %1540 = vperm.xlu1 %3064, %v2810_v59  }
  0x9f   : > { %v736_v1 = vmul.f32 %v723_v0, %v708_v57  ;;  %1535 = vperm.xlu0 %3063, %v2809_v60  }
  0xa1   : > { %v764_v5 = vadd.f32 %v751_v62, %v736_v1  ;;  %v733_v6 = vpop.permute.xlu1 %732 }
  0xa2   : > { %v728_v7 = vpop.permute.xlu0 %727  ;;  %1714 = vperm.xlu1 %3064, %v2820_v54   ;;  %v738_v11 = vmul.f32 %v733_v6, %v710_v2 }
  0xa3   : > { %1709 = vperm.xlu0 %3063, %v2819_v55   ;;  %v3006_v8 = vpack.c.bf16 %v764_v5, %v763_v4  ;;  %v737_v12 = vmul.f32 %v728_v7, %v709_v3 }
  0xa5   : > { %3007 = vmatprep.subr.bf16.mxu0 %v3006_v8  ;;  %v761_v63 = vpop.permute.xlu1 %760 }
  0xa6   : > { %v756_v58 = vpop.permute.xlu0 %755  ;;  %3009 = vmatpush3.bf16.msra.mxu0 %v3006_v8  ;;  %v766_v13 = vadd.f32 %v761_v63, %v738_v11  ;;  %1734 = vperm.xlu1 %3064, %v2824_v9  }
  0xa7   : > { %v765_v14 = vadd.f32 %v756_v58, %v737_v12  ;;  %1729 = vperm.xlu0 %3063, %v2823_v10  }
  0xa9   : > { %v3010_v21 = vpack.c.bf16 %v766_v13, %v765_v14  ;;  %v791_v49 = vpop.permute.xlu1 %790 }
  0xaa   : > { %1626 = vperm.xlu1 %3064, %v2814_v19   ;;  %v786_v50 = vpop.permute.xlu0 %785 }
  0xab   : > { %1621 = vperm.xlu0 %3063, %v2813_v20   ;;  %3011 = vmatprep.subr.bf16.mxu0 %v3010_v21 }
  0xac   : > { %3013 = vmatpush3.bf16.msra.mxu0 %v3010_v21 }
  0xad   : > { %v3570_v51 = vpop.permute.xlu1 %810 }
  0xae   : > { %1646 = vperm.xlu1 %3064, %v2818_v22   ;;  %v3572_v52 = vpop.permute.xlu0 %805 }
  0xaf   : > { %1641 = vperm.xlu0 %3063, %v2817_v23   ;;  %2933 = vmatmul.mubr.msk.f32.vlgmr.msra.gmra.mrb[0].mxu0 %vm823_vm1, %v768_v24 }
  0xb0   : > { %2935 = vmatprep.mubr.msk.f32.mxu0 %vm823_vm1, %v769_v25 }
  0xb1   : > { %v3574_v53 = vpop.permute.xlu1 %800 }
  0xb2   : > { %1820 = vperm.xlu1 %3064, %v2828_v26   ;;  %v3576_v56 = vpop.permute.xlu0 %795 }
  0xb3   : > { %1815 = vperm.xlu0 %3063, %v2827_v27   ;;  %2936 = vmatmul.mubr.msk.f32.gmra.mrb[2].mxu0 %vm823_vm1, %v770_v28 }
  0xb4   : > { %2938 = vmatprep.mubr.msk.f32.mxu0 %vm823_vm1, %v771_v29 }
  0xb5   : > { %v3578_v57 = vpop.permute.xlu1 %820 }
  0xb6   : > { %1840 = vperm.xlu1 %3064, %v2832_v30   ;;  %v3580_v59 = vpop.permute.xlu0 %815 }
  0xb7   : > { %1835 = vperm.xlu0 %3063, %v2831_v31   ;;  %2939 = vmatmul.mubr.msk.f32.gmra.mrb[4].mxu0 %vm823_vm1, %v772_v32 }
  0xb8   : > { %2941 = vmatprep.mubr.msk.f32.mxu0 %vm823_vm1, %v773_v33 }
  0xb9   : > { %v3582_v60 = vpop.permute.xlu1 %1023 }
  0xba   : > { %1724 = vperm.xlu1 %3064, %v2822_v34   ;;  %v3584_v61 = vpop.permute.xlu0 %1018 }
  0xbb   : > { %1719 = vperm.xlu0 %3063, %v2821_v35   ;;  %2942 = vmatmul.mubr.msk.f32.gmra.mrb[6].mxu0 %vm823_vm1, %v774_v36 }
  0xbd   : > { %v3586_v62 = vpop.permute.xlu1 %1043 }
  0xbe   : > { %1744 = vperm.xlu1 %3064, %v2826_v37   ;;  %v3588_v0 = vpop.permute.xlu0 %1038 }
  0xbf   : > { %1739 = vperm.xlu0 %3063, %v2825_v38  }
  0xc1   : > { %v3590_v1 = vpop.permute.xlu1 %1121 }
  0xc2   : > { %1830 = vperm.xlu1 %3064, %v2830_v39   ;;  %v3592_v54 = vpop.permute.xlu0 %1116 }
  0xc3   : > { %1825 = vperm.xlu0 %3063, %v2829_v40  }
  0xc5   : > { %v3594_v55 = vpop.permute.xlu1 %1141 }
  0xc6   : > { %1850 = vperm.xlu1 %3064, %v2834_v41   ;;  %v3596_v2 = vpop.permute.xlu0 %1136 }
  0xc7   : > { %1845 = vperm.xlu0 %3063, %v2833_v42  }
  0xc9   : > { %v3598_v3 = vpop.permute.xlu1 %1233 }
  0xca   : > { %1884 = vperm.xlu1 %3064, %v1870_v43   ;;  %v3600_v4 = vpop.permute.xlu0 %1228 }
  0xcb   : > { %1879 = vperm.xlu0 %3063, %v1869_v44  }
  0xcd   : > { %v3602_v5 = vpop.permute.xlu1 %1253 }
  0xce   : > { %1904 = vperm.xlu1 %3064, %v1874_v45   ;;  %v3604_v6 = vpop.permute.xlu0 %1248 }
  0xcf   : > { %1899 = vperm.xlu0 %3063, %v1873_v46  }
  0xd1   : > { %v3606_v7 = vpop.permute.xlu1 %1033 }
  0xd2   : > { %1894 = vperm.xlu1 %3064, %v1872_v47   ;;  %v3608_v8 = vpop.permute.xlu0 %1028 }
  0xd3   : > { %1889 = vperm.xlu0 %3063, %v1871_v48  }
  0xd5   : > { %v3610_v9 = vpop.permute.xlu1 %1053 }
  0xd6   : > { %4417 = vst [vmem:[#allocation6_spill] sm:$0xff] %v3610_v9  ;;  %v3612_v10 = vpop.permute.xlu0 %1048 }
  0xd7   : > { %4418 = vst [vmem:[#allocation7_spill] sm:$0xff] %v3612_v10 }
  0xd9   : > { %v3614_v11 = vpop.permute.xlu1 %1131 }
  0xda   : > { %v3616_v12 = vpop.permute.xlu0 %1126 }
  0xdd   : > { %v3618_v63 = vpop.permute.xlu1 %1151 }
  0xde   : > { %4419 = vst [vmem:[#allocation8_spill] sm:$0xff] %v3618_v63  ;;  %v3620_v58 = vpop.permute.xlu0 %1146 }
  0xdf   : > { %4420 = vst [vmem:[#allocation9_spill] sm:$0xff] %v3620_v58 }
  0xe1   : > { %v3622_v13 = vpop.permute.xlu1 %1339 }
  0xe2   : > { %v3624_v14 = vpop.permute.xlu0 %1334 }
  0xe5   : > { %v3626_v19 = vpop.permute.xlu1 %1359 }
  0xe6   : > { %4421 = vst [vmem:[#allocation10_spill] sm:$0xff] %v3626_v19  ;;  %v3628_v20 = vpop.permute.xlu0 %1354 }
  0xe7   : > { %4422 = vst [vmem:[#allocation11_spill] sm:$0xff] %v3628_v20 }
  0xe9   : > { %v3630_v21 = vpop.permute.xlu1 %1243 }
  0xea   : > { %v3632_v22 = vpop.permute.xlu0 %1238 }
  0xed   : > { %v3634_v23 = vpop.permute.xlu1 %1263 }
  0xee   : > { %4423 = vst [vmem:[#allocation12_spill] sm:$0xff] %v3634_v23  ;;  %v3636_v24 = vpop.permute.xlu0 %1258 }
  0xef   : > { %4424 = vst [vmem:[#allocation13_spill] sm:$0xff] %v3636_v24 }
  0xf1   : > { %v3638_v25 = vpop.permute.xlu1 %1404 }
  0xf2   : > { %v3640_v26 = vpop.permute.xlu0 %1399 }
  0xf5   : > { %v3642_v27 = vpop.permute.xlu1 %1424 }
  0xf6   : > { %4425 = vst [vmem:[#allocation14_spill] sm:$0xff] %v3642_v27  ;;  %v3644_v28 = vpop.permute.xlu0 %1419 }
  0xf7   : > { %4426 = vst [vmem:[#allocation15_spill] sm:$0xff] %v3644_v28 }
  0xf9   : > { %v3646_v29 = vpop.permute.xlu1 %1349 }
  0xfa   : > { %v3648_v30 = vpop.permute.xlu0 %1344 }
  0xfd   : > { %v3650_v31 = vpop.permute.xlu1 %1369 }
  0xfe   : > { %4427 = vst [vmem:[#allocation16_spill] sm:$0xff] %v3650_v31  ;;  %v3652_v32 = vpop.permute.xlu0 %1364 }
  0xff   : > { %4428 = vst [vmem:[#allocation17_spill] sm:$0xff] %v3652_v32 }
 0x101   : > { %v3654_v33 = vpop.permute.xlu1 %1510 }
 0x102   : > { %v3656_v34 = vpop.permute.xlu0 %1505 }
 0x105   : > { %v3658_v35 = vpop.permute.xlu1 %1530 }
 0x106   : > { %4429 = vst [vmem:[#allocation18_spill] sm:$0xff] %v3658_v35  ;;  %v3660_v36 = vpop.permute.xlu0 %1525 }
 0x107   : > { %4430 = vst [vmem:[#allocation19_spill] sm:$0xff] %v3660_v36 }
 0x109   : > { %v3670_v42 = vpop.permute.xlu1 %1414 }
 0x10a   : > { %v3672_v44 = vpop.permute.xlu0 %1409 }
 0x10d   : > { %v3678_v47 = vpop.permute.xlu1 %1434 }
 0x10e   : > { %4431 = vst [vmem:[#allocation20_spill] sm:$0xff] %v3678_v47  ;;  %v3682_v48 = vpop.permute.xlu0 %1429 }
 0x10f   : > { %4432 = vst [vmem:[#allocation21_spill] sm:$0xff] %v3682_v48 }
 0x182   : > { %v2934_v37 = vpop.f32.mrb[0].mxu0 }
 0x183   : > { %v3662_v38 = vadd.f32 %v2934_v37, %v791_v49  ;;  %v914_v39 = vpop.f32.mrb[1].mxu0  ;;  %v3694_v37 = vpop.permute.xlu1 %1616 }
 0x184   : > { %v3664_v40 = vadd.f32 %v914_v39, %v786_v50  ;;  %v3696_v39 = vpop.permute.xlu0 %1611 }
 0x185   : > { %963 = vrot.lane.b32.xlu1 %v3662_v38, %s3078_s0 }
 0x186   : > { %v2937_v41 = vpop.f32.mrb[2].mxu0  ;;  %961 = vrot.lane.b32.xlu0 %v3664_v40, %s3078_s0 }
 0x187   : > { %v924_v43 = vpop.f32.mrb[3].mxu0  ;;  %v3702_v17 = vpop.permute.xlu1 %1636  ;;  %v3723_v48 = vadd.f32 %v2937_v41, %v3574_v53 }
 0x188   : > { %4433 = vst [vmem:[#allocation22_spill] sm:$0xff] %v3702_v17  ;;  %v3706_v18 = vpop.permute.xlu0 %1631  ;;  %v3726_v47 = vadd.f32 %v924_v43, %v3576_v56 }
 0x189   : > { %1074 = vrot.lane.b32.xlu1 %v3662_v38, %s3079_s23  ;;  %4434 = vst [vmem:[#allocation23_spill] sm:$0xff] %v3706_v18 }
 0x18a   : > { %v2940_v45 = vpop.f32.mrb[4].mxu0  ;;  %1072 = vrot.lane.b32.xlu0 %v3664_v40, %s3079_s23 }
 0x18b   : > { %v934_v46 = vpop.f32.mrb[5].mxu0  ;;  %v3714_v15 = vpop.permute.xlu1 %1520  ;;  %v3783_v9 = vadd.f32 %v2940_v45, %v3570_v51 }
 0x18c   : > { %v3716_v16 = vpop.permute.xlu0 %1515  ;;  %v3788_v58 = vadd.f32 %v934_v46, %v3572_v52 }
 0x18d   : > { %1172 = vrot.lane.b32.xlu1 %v3662_v38, %s3080_s26  ;;  %4441 = vst [vmem:[#allocation30_spill] sm:$0xff] %v3783_v9 }
 0x18e   : > { %v3684_v49 = vpop.f32.mrb[6].mxu0  ;;  %1170 = vrot.lane.b32.xlu0 %v3664_v40, %s3080_s26  ;;  %4442 = vst [vmem:[#allocation31_spill] sm:$0xff] %v3788_v58 }
 0x18f   : > { %v3688_v50 = vpop.f32.mrb[7].mxu0  ;;  %v3728_v32 = vpop.permute.xlu1 %1540 }
 0x190   : > { %4435 = vst [vmem:[#allocation24_spill] sm:$0xff] %v3728_v32  ;;  %v3732_v31 = vpop.permute.xlu0 %1535 }
 0x191   : > { %1284 = vrot.lane.b32.xlu1 %v3662_v38, %s3081_s27  ;;  %4436 = vst [vmem:[#allocation25_spill] sm:$0xff] %v3732_v31 }
 0x192   : > { %1282 = vrot.lane.b32.xlu0 %v3664_v40, %s3081_s27 }
 0x193   : > { %v3740_v53 = vpop.permute.xlu1 %1714 }
 0x194   : > { %v3742_v56 = vpop.permute.xlu0 %1709 }
 0x195   : > { %1455 = vrot.lane.b32.xlu1 %v3662_v38, %s3082_s28 }
 0x196   : > { %1453 = vrot.lane.b32.xlu0 %v3664_v40, %s3082_s28 }
 0x197   : > { %v3748_v41 = vpop.permute.xlu1 %1734 }
 0x198   : > { %4437 = vst [vmem:[#allocation26_spill] sm:$0xff] %v3748_v41  ;;  %v3752_v43 = vpop.permute.xlu0 %1729  ;;  %v3848_v41 = vadd.f32 %v3688_v50, %v3580_v59 }
 0x199   : > { %1561 = vrot.lane.b32.xlu1 %v3662_v38, %s3083_s29  ;;  %4438 = vst [vmem:[#allocation27_spill] sm:$0xff] %v3752_v43  ;;  %v3844_v43 = vadd.f32 %v3684_v49, %v3578_v57 }
 0x19a   : > { %1559 = vrot.lane.b32.xlu0 %v3664_v40, %s3083_s29  ;;  %4450 = vst [vmem:[#allocation39_spill] sm:$0xff] %v3848_v41 }
 0x19b   : > { %v3760_v31 = vpop.permute.xlu1 %1626  ;;  %4449 = vst [vmem:[#allocation38_spill] sm:$0xff] %v3844_v43 }
 0x19c   : > { %v3762_v32 = vpop.permute.xlu0 %1621 }
 0x19d   : > { %1667 = vrot.lane.b32.xlu1 %v3662_v38, %s3084_s4 }
 0x19e   : > { %1665 = vrot.lane.b32.xlu0 %v3664_v40, %s3084_s4 }
 0x19f   : > { %v3768_v24 = vpop.permute.xlu1 %1646 }
 0x1a0   : > { %4439 = vst [vmem:[#allocation28_spill] sm:$0xff] %v3768_v24  ;;  %v3772_v23 = vpop.permute.xlu0 %1641 }
 0x1a1   : > { %1765 = vrot.lane.b32.xlu1 %v3662_v38, %s3085_s30  ;;  %4440 = vst [vmem:[#allocation29_spill] sm:$0xff] %v3772_v23 }
 0x1a2   : > { %1763 = vrot.lane.b32.xlu0 %v3664_v40, %s3085_s30 }
 0x1a3   : > { %v3780_v10 = vpop.permute.xlu1 %1820 }
 0x1a4   : > { %v3785_v24 = vpop.permute.xlu0 %1815 }
 0x1a5   : > { %967 = vrot.lane.b32.xlu1 %v3723_v48, %s3078_s0 }
 0x1a6   : > { %965 = vrot.lane.b32.xlu0 %v3726_v47, %s3078_s0 }
 0x1a7   : > { %v3794_v23 = vpop.permute.xlu1 %1840 }
 0x1a8   : > { %4443 = vst [vmem:[#allocation32_spill] sm:$0xff] %v3794_v23  ;;  %v3798_v63 = vpop.permute.xlu0 %1835 }
 0x1a9   : > { %1078 = vrot.lane.b32.xlu1 %v3723_v48, %s3079_s23  ;;  %4444 = vst [vmem:[#allocation33_spill] sm:$0xff] %v3798_v63 }
 0x1aa   : > { %1076 = vrot.lane.b32.xlu0 %v3726_v47, %s3079_s23 }
 0x1ab   : > { %v3806_v51 = vpop.permute.xlu1 %1724 }
 0x1ac   : > { %v3808_v52 = vpop.permute.xlu0 %1719 }
 0x1ad   : > { %1176 = vrot.lane.b32.xlu1 %v3723_v48, %s3080_s26 }
 0x1ae   : > { %1174 = vrot.lane.b32.xlu0 %v3726_v47, %s3080_s26 }
 0x1af   : > { %v3814_v45 = vpop.permute.xlu1 %1744 }
 0x1b0   : > { %4445 = vst [vmem:[#allocation34_spill] sm:$0xff] %v3814_v45  ;;  %v3818_v46 = vpop.permute.xlu0 %1739 }
 0x1b1   : > { %1288 = vrot.lane.b32.xlu1 %v3723_v48, %s3081_s27  ;;  %4446 = vst [vmem:[#allocation35_spill] sm:$0xff] %v3818_v46 }
 0x1b2   : > { %1286 = vrot.lane.b32.xlu0 %v3726_v47, %s3081_s27 }
 0x1b3   : > { %v3826_v63 = vpop.permute.xlu1 %1830 }
 0x1b4   : > { %v3828_v23 = vpop.permute.xlu0 %1825 }
 0x1b5   : > { %1459 = vrot.lane.b32.xlu1 %v3723_v48, %s3082_s28 }
 0x1b6   : > { %1457 = vrot.lane.b32.xlu0 %v3726_v47, %s3082_s28 }
 0x1b7   : > { %v3834_v46 = vpop.permute.xlu1 %1850 }
 0x1b8   : > { %4447 = vst [vmem:[#allocation36_spill] sm:$0xff] %v3834_v46  ;;  %v3838_v45 = vpop.permute.xlu0 %1845 }
 0x1b9   : > { %1565 = vrot.lane.b32.xlu1 %v3723_v48, %s3083_s29  ;;  %4448 = vst [vmem:[#allocation37_spill] sm:$0xff] %v3838_v45 }
 0x1ba   : > { %1563 = vrot.lane.b32.xlu0 %v3726_v47, %s3083_s29 }
 0x1bb   : > { %v3854_v46 = vpop.permute.xlu1 %1884 }
 0x1bc   : > { %4451 = vst [vmem:[#allocation40_spill] sm:$0xff] %v3854_v46  ;;  %v3856_v45 = vpop.permute.xlu0 %1879 }
 0x1bd   : > { %1671 = vrot.lane.b32.xlu1 %v3723_v48, %s3084_s4  ;;  %4452 = vst [vmem:[#allocation41_spill] sm:$0xff] %v3856_v45 }
 0x1be   : > { %1669 = vrot.lane.b32.xlu0 %v3726_v47, %s3084_s4 }
 0x1bf   : > { %v3862_v57 = vpop.permute.xlu1 %1904 }
 0x1c0   : > { %4453 = vst [vmem:[#allocation42_spill] sm:$0xff] %v3862_v57  ;;  %v3866_v59 = vpop.permute.xlu0 %1899 }
 0x1c1   : > { %1769 = vrot.lane.b32.xlu1 %v3723_v48, %s3085_s30  ;;  %4454 = vst [vmem:[#allocation43_spill] sm:$0xff] %v3866_v59 }
 0x1c2   : > { %1767 = vrot.lane.b32.xlu0 %v3726_v47, %s3085_s30 }
 0x1c3   : > { %v3874_v49 = vpop.permute.xlu1 %1894 }
 0x1c4   : > { %4455 = vst [vmem:[#allocation44_spill] sm:$0xff] %v3874_v49  ;;  %v3876_v50 = vpop.permute.xlu0 %1889  ;;  %v3889_v49 = vld [vmem:[%s4457_s3] ss:$0 sm:$0xff] }
 0x1c5   : > { %971 = vrot.lane.b32.xlu1 %v3783_v9, %s3078_s0  ;;  %4456 = vst [vmem:[#allocation45_spill] sm:$0xff] %v3876_v50 }
 0x1c6   : > { %969 = vrot.lane.b32.xlu0 %v3788_v58, %s3078_s0 }
 0x1c9   : > { %1082 = vrot.lane.b32.xlu1 %v3783_v9, %s3079_s23 }
 0x1ca   : > { %1080 = vrot.lane.b32.xlu0 %v3788_v58, %s3079_s23 }
 0x1cd   : > { %1180 = vrot.lane.b32.xlu1 %v3783_v9, %s3080_s26 }
 0x1ce   : > { %1178 = vrot.lane.b32.xlu0 %v3788_v58, %s3080_s26 }
 0x1d1   : > { %1292 = vrot.lane.b32.xlu1 %v3783_v9, %s3081_s27 }
 0x1d2   : > { %1290 = vrot.lane.b32.xlu0 %v3788_v58, %s3081_s27 }
 0x1d5   : > { %1463 = vrot.lane.b32.xlu1 %v3783_v9, %s3082_s28 }
 0x1d6   : > { %1461 = vrot.lane.b32.xlu0 %v3788_v58, %s3082_s28 }
 0x1d9   : > { %1569 = vrot.lane.b32.xlu1 %v3783_v9, %s3083_s29 }
 0x1da   : > { %1567 = vrot.lane.b32.xlu0 %v3788_v58, %s3083_s29 }
 0x1dd   : > { %1675 = vrot.lane.b32.xlu1 %v3783_v9, %s3084_s4 }
 0x1de   : > { %1673 = vrot.lane.b32.xlu0 %v3788_v58, %s3084_s4 }
 0x1e1   : > { %1773 = vrot.lane.b32.xlu1 %v3783_v9, %s3085_s30 }
 0x1e2   : > { %1771 = vrot.lane.b32.xlu0 %v3788_v58, %s3085_s30 }
 0x1e5   : > { %975 = vrot.lane.b32.xlu1 %v3844_v43, %s3078_s0 }
 0x1e6   : > { %973 = vrot.lane.b32.xlu0 %v3848_v41, %s3078_s0  ;;  %s656_s0 = scalar_lea.vmem %s4389_s21, %s2861_s1 }
 0x1e9   : > { %1086 = vrot.lane.b32.xlu1 %v3844_v43, %s3079_s23 }
 0x1ea   : > { %1084 = vrot.lane.b32.xlu0 %v3848_v41, %s3079_s23 }
 0x1ed   : > { %1184 = vrot.lane.b32.xlu1 %v3844_v43, %s3080_s26 }
 0x1ee   : > { %1182 = vrot.lane.b32.xlu0 %v3848_v41, %s3080_s26  ;;  %s4458_s26 = sld [smem:[#allocation48_spill]] }
 0x1f1   : > { %1296 = vrot.lane.b32.xlu1 %v3844_v43, %s3081_s27 }
 0x1f2   : > { %1294 = vrot.lane.b32.xlu0 %v3848_v41, %s3081_s27 }
 0x1f4   : > { %v3901_v36 = vld [vmem:[%s4458_s26] ss:$0 sm:$0xff] }
 0x1f5   : > { %1467 = vrot.lane.b32.xlu1 %v3844_v43, %s3082_s28 }
 0x1f6   : > { %1465 = vrot.lane.b32.xlu0 %v3848_v41, %s3082_s28 }
 0x1f7   : > { %v964_v59 = vpop.permute.xlu1 %963 }
 0x1f8   : > { %v962_v45 = vpop.permute.xlu0 %961  ;;  %v987_v50 = vsel %vm985_vm2, 0.0, %v964_v59 }
 0x1f9   : > { %1573 = vrot.lane.b32.xlu1 %v3844_v43, %s3083_s29  ;;  %v986_v18 = vsel %vm985_vm2, 0.0, %v962_v45  ;;  %v1001_v35 = vmul.f32 %v3889_v49, %v987_v50 }
 0x1fa   : > { %1571 = vrot.lane.b32.xlu0 %v3848_v41, %s3083_s29  ;;  %v1000_v45 = vmul.f32 %v3889_v49, %v986_v18  ;;  %v1876_v18 = vld [vmem:[%s4376_s8 + $0x38] sm:$0xff] }
 0x1fb   : > { %v1075_v57 = vpop.permute.xlu1 %1074 }
 0x1fc   : > { %v1073_v46 = vpop.permute.xlu0 %1072  ;;  %v1098_v17 = vsel %vm1096_vm3, 0.0, %v1075_v57 }
 0x1fd   : > { %1679 = vrot.lane.b32.xlu1 %v3844_v43, %s3084_s4  ;;  %v1097_v59 = vsel %vm1096_vm3, 0.0, %v1073_v46  ;;  %v1155_v57 = vmul.f32 %v3590_v1, %v1098_v17  ;;  %v1057_v17 = vmul.f32 %v3582_v60, %v1001_v35 }
 0x1fe   : > { %1677 = vrot.lane.b32.xlu0 %v3848_v41, %s3084_s4  ;;  %v1154_v50 = vmul.f32 %v3592_v54, %v1097_v59  ;;  %v1056_v54 = vmul.f32 %v3584_v61, %v1000_v45 }
 0x1ff   : > { %v1173_v28 = vpop.permute.xlu1 %1172 }
 0x200   : > { %v1196_v58 = vsel %vm1194_vm4, 0.0, %v1173_v28  ;;  %v1171_v27 = vpop.permute.xlu0 %1170  ;;  %v1162_v60 = vadd.f32 %v1154_v50, %v1056_v54 }
 0x201   : > { %v1210_v9 = vmul.f32 %v3901_v36, %v1196_v58  ;;  %v1195_v20 = vsel %vm1194_vm4, 0.0, %v1171_v27  ;;  %1777 = vrot.lane.b32.xlu1 %v3844_v43, %s3085_s30  ;;  %v1875_v27 = vld [vmem:[%s4376_s8 + $0x30] sm:$0xff] }
 0x202   : > { %v1209_v46 = vmul.f32 %v3901_v36, %v1195_v20  ;;  %1775 = vrot.lane.b32.xlu0 %v3848_v41, %s3085_s30  ;;  %v1163_v41 = vadd.f32 %v1155_v57, %v1057_v17  ;;  %v1438_v57 = vmul.f32 %v3638_v25, %v3662_v38 }
 0x203   : > { %v1267_v1 = vmul.f32 %v3598_v3, %v1210_v9  ;;  %v1285_v58 = vpop.permute.xlu1 %1284 }
 0x204   : > { %v1266_v20 = vmul.f32 %v3600_v4, %v1209_v46  ;;  %v1308_v28 = vsel %vm1306_vm5, 0.0, %v1285_v58  ;;  %v1283_v59 = vpop.permute.xlu0 %1282 }
 0x205   : > { %v1316_v43 = vmul.f32 %v3889_v49, %v1308_v28  ;;  %v1307_v19 = vsel %vm1306_vm5, 0.0, %v1283_v59  ;;  %1914 = vperm.xlu1 %3064, %v1876_v18   ;;  %v1275_v9 = vadd.f32 %v1267_v1, %v1163_v41 }
 0x206   : > { %v1315_v3 = vmul.f32 %v3889_v49, %v1307_v19  ;;  %1909 = vperm.xlu0 %3063, %v1875_v27   ;;  %v1274_v45 = vadd.f32 %v1266_v20, %v1162_v60 }
 0x207   : > { %v1373_v35 = vmul.f32 %v3622_v13, %v1316_v43  ;;  %v1456_v61 = vpop.permute.xlu1 %1455  ;;  %v1437_v13 = vmul.f32 %v3640_v26, %v3664_v40 }
 0x208   : > { %v1372_v4 = vmul.f32 %v3624_v14, %v1315_v3  ;;  %v1479_v46 = vsel %vm1477_vm6, %v1456_v61, 0.0  ;;  %v1454_v17 = vpop.permute.xlu0 %1453 }
 0x209   : > { %v1381_v58 = vadd.f32 %v1373_v35, %v1275_v9  ;;  %v1487_v18 = vmul.f32 %v3901_v36, %v1479_v46  ;;  %v1478_v50 = vsel %vm1477_vm6, %v1454_v17, 0.0 }
 0x20a   : > { %v1380_v19 = vadd.f32 %v1372_v4, %v1274_v45  ;;  %v1486_v41 = vmul.f32 %v3901_v36, %v1478_v50 }
 0x20b   : > { %v1446_v43 = vadd.f32 %v1438_v57, %v1381_v58  ;;  %v1544_v14 = vmul.f32 %v3654_v33, %v1487_v18  ;;  %v1562_v1 = vpop.permute.xlu1 %1561 }
 0x20c   : > { %v1445_v25 = vadd.f32 %v1437_v13, %v1380_v19  ;;  %v1543_v38 = vmul.f32 %v3656_v34, %v1486_v41  ;;  %v1585_v27 = vsel %vm1583_vm7, %v1562_v1, 0.0  ;;  %v1560_v54 = vpop.permute.xlu0 %1559 }
 0x20d   : > { %v1552_v20 = vadd.f32 %v1544_v14, %v1446_v43  ;;  %v1593_v28 = vmul.f32 %v3889_v49, %v1585_v27  ;;  %v1584_v59 = vsel %vm1583_vm7, %v1560_v54, 0.0 }
 0x20e   : > { %v1551_v60 = vadd.f32 %v1543_v38, %v1445_v25  ;;  %v1592_v26 = vmul.f32 %v3889_v49, %v1584_v59 }
 0x20f   : > { %v1650_v40 = vmul.f32 %v3694_v37, %v1593_v28  ;;  %v1668_v3 = vpop.permute.xlu1 %1667 }
 0x210   : > { %v1649_v33 = vmul.f32 %v3696_v39, %v1592_v26  ;;  %v1691_v9 = vsel %vm1689_vm8, %v1668_v3, 0.0  ;;  %v1666_v34 = vpop.permute.xlu0 %1665 }
 0x211   : > { %v1658_v35 = vadd.f32 %v1650_v40, %v1552_v20  ;;  %v1748_v61 = vmul.f32 %v3740_v53, %v1691_v9  ;;  %v1690_v45 = vsel %vm1689_vm8, %v1666_v34, 0.0 }
 0x212   : > { %v1657_v4 = vadd.f32 %v1649_v33, %v1551_v60  ;;  %v1747_v57 = vmul.f32 %v3742_v56, %v1690_v45 }
 0x213   : > { %v1756_v46 = vadd.f32 %v1748_v61, %v1658_v35  ;;  %v1766_v17 = vpop.permute.xlu1 %1765 }
 0x214   : > { %v1755_v58 = vadd.f32 %v1747_v57, %v1657_v4  ;;  %v1789_v37 = vsel %vm1787_vm9, %v1766_v17, 0.0  ;;  %v1764_v18 = vpop.permute.xlu0 %1763 }
 0x215   : > { %v1797_v39 = vmul.f32 %v3901_v36, %v1789_v37  ;;  %v1788_v50 = vsel %vm1787_vm9, %v1764_v18, 0.0 }
 0x216   : > { %v1796_v19 = vmul.f32 %v3901_v36, %v1788_v50 }
 0x217   : > { %v1854_v53 = vmul.f32 %v3780_v10, %v1797_v39  ;;  %v968_v13 = vpop.permute.xlu1 %967 }
 0x218   : > { %v1853_v41 = vmul.f32 %v3785_v24, %v1796_v19  ;;  %v989_v43 = vsel %vm985_vm2, 0.0, %v968_v13  ;;  %v966_v56 = vpop.permute.xlu0 %965 }
 0x219   : > { %v3959_v14 = vadd.f32 %v1854_v53, %v1756_v46  ;;  %v1003_v1 = vmul.f32 %v3889_v49, %v989_v43  ;;  %v988_v25 = vsel %vm985_vm2, 0.0, %v966_v56  ;;  %v1440_v53 = vmul.f32 %v3670_v42, %v3723_v48 }
 0x21a   : > { %v3963_v38 = vadd.f32 %v1853_v41, %v1755_v58  ;;  %v1002_v27 = vmul.f32 %v3889_v49, %v988_v25  ;;  %v1439_v56 = vmul.f32 %v3672_v44, %v3726_v47 }
 0x21b   : > { %v1079_v54 = vpop.permute.xlu1 %1078  ;;  %v1059_v28 = vmul.f32 %v3606_v7, %v1003_v1 }
 0x21c   : > { %v1100_v20 = vsel %vm1096_vm3, 0.0, %v1079_v54  ;;  %v1077_v10 = vpop.permute.xlu0 %1076  ;;  %v1058_v60 = vmul.f32 %v3608_v8, %v1002_v27 }
 0x21d   : > { %v1157_v24 = vmul.f32 %v3614_v11, %v1100_v20  ;;  %v1099_v59 = vsel %vm1096_vm3, 0.0, %v1077_v10 }
 0x21e   : > { %v1156_v26 = vmul.f32 %v3616_v12, %v1099_v59 }
 0x21f   : > { %v1165_v40 = vadd.f32 %v1157_v24, %v1059_v28  ;;  %v1177_v3 = vpop.permute.xlu1 %1176 }
 0x220   : > { %v1164_v33 = vadd.f32 %v1156_v26, %v1058_v60  ;;  %v1198_v9 = vsel %vm1194_vm4, 0.0, %v1177_v3  ;;  %v1175_v34 = vpop.permute.xlu0 %1174 }
 0x221   : > { %v1212_v35 = vmul.f32 %v3901_v36, %v1198_v9  ;;  %v1197_v61 = vsel %vm1194_vm4, 0.0, %v1175_v34 }
 0x222   : > { %v1211_v7 = vmul.f32 %v3901_v36, %v1197_v61 }
 0x223   : > { %v1269_v11 = vmul.f32 %v3630_v21, %v1212_v35  ;;  %v1289_v45 = vpop.permute.xlu1 %1288 }
 0x224   : > { %v1268_v4 = vmul.f32 %v3632_v22, %v1211_v7  ;;  %v1310_v8 = vsel %vm1306_vm5, 0.0, %v1289_v45  ;;  %v1287_v12 = vpop.permute.xlu0 %1286 }
 0x225   : > { %v1277_v57 = vadd.f32 %v1269_v11, %v1165_v40  ;;  %v1318_v46 = vmul.f32 %v3889_v49, %v1310_v8  ;;  %v1309_v17 = vsel %vm1306_vm5, 0.0, %v1287_v12 }
 0x226   : > { %v1276_v58 = vadd.f32 %v1268_v4, %v1164_v33  ;;  %v1317_v37 = vmul.f32 %v3889_v49, %v1309_v17 }
 0x227   : > { %v1375_v18 = vmul.f32 %v3646_v29, %v1318_v46  ;;  %v1460_v39 = vpop.permute.xlu1 %1459 }
 0x228   : > { %v1374_v50 = vmul.f32 %v3648_v30, %v1317_v37  ;;  %v1481_v21 = vsel %vm1477_vm6, %v1460_v39, 0.0  ;;  %v1458_v19 = vpop.permute.xlu0 %1457 }
 0x229   : > { %v1383_v22 = vadd.f32 %v1375_v18, %v1277_v57  ;;  %v1489_v13 = vmul.f32 %v3901_v36, %v1481_v21  ;;  %v1480_v41 = vsel %vm1477_vm6, %v1458_v19, 0.0 }
 0x22a   : > { %v1382_v43 = vadd.f32 %v1374_v50, %v1276_v58  ;;  %v1488_v29 = vmul.f32 %v3901_v36, %v1480_v41 }
 0x22b   : > { %v1448_v1 = vadd.f32 %v1440_v53, %v1383_v22  ;;  %v1546_v30 = vmul.f32 %v3714_v15, %v1489_v13  ;;  %v1566_v25 = vpop.permute.xlu1 %1565 }
 0x22c   : > { %v1447_v27 = vadd.f32 %v1439_v56, %v1382_v43  ;;  %v1545_v54 = vmul.f32 %v3716_v16, %v1488_v29  ;;  %v1587_v20 = vsel %vm1583_vm7, %v1566_v25, 0.0  ;;  %v1564_v42 = vpop.permute.xlu0 %1563 }
 0x22d   : > { %v1554_v48 = vadd.f32 %v1546_v30, %v1448_v1  ;;  %v1595_v10 = vmul.f32 %v3889_v49, %v1587_v20  ;;  %v1586_v28 = vsel %vm1583_vm7, %v1564_v42, 0.0 }
 0x22e   : > { %v1553_v24 = vadd.f32 %v1545_v54, %v1447_v27  ;;  %v1594_v44 = vmul.f32 %v3889_v49, %v1586_v28 }
 0x22f   : > { %v1652_v47 = vmul.f32 %v3760_v31, %v1595_v10  ;;  %v1672_v59 = vpop.permute.xlu1 %1671 }
 0x230   : > { %v1651_v15 = vmul.f32 %v3762_v32, %v1594_v44  ;;  %v1693_v60 = vsel %vm1689_vm8, %v1672_v59, 0.0  ;;  %v1670_v26 = vpop.permute.xlu0 %1669  ;;  %v4460_v44 = vld [vmem:[#allocation11_spill] sm:$0xff] }
 0x231   : > { %v1660_v16 = vadd.f32 %v1652_v47, %v1554_v48  ;;  %v1750_v40 = vmul.f32 %v3806_v51, %v1693_v60  ;;  %v1692_v3 = vsel %vm1689_vm8, %v1670_v26, 0.0 }
 0x232   : > { %v1659_v33 = vadd.f32 %v1651_v15, %v1553_v24  ;;  %v1749_v9 = vmul.f32 %v3808_v52, %v1692_v3  ;;  %v4462_v3 = vld [vmem:[#allocation14_spill] sm:$0xff] }
 0x233   : > { %v1758_v34 = vadd.f32 %v1750_v40, %v1660_v16  ;;  %v1770_v35 = vpop.permute.xlu1 %1769  ;;  %v4461_v40 = vld [vmem:[#allocation30_spill] sm:$0xff] }
 0x234   : > { %v1757_v61 = vadd.f32 %v1749_v9, %v1659_v33  ;;  %v1791_v7 = vsel %vm1787_vm9, %v1770_v35, 0.0  ;;  %v1768_v31 = vpop.permute.xlu0 %1767  ;;  %v1442_v33 = vmul.f32 %v4462_v3, %v4461_v40  ;;  %v4464_v35 = vld [vmem:[#allocation15_spill] sm:$0xff] }
 0x235   : > { %v1799_v11 = vmul.f32 %v3901_v36, %v1791_v7  ;;  %v1790_v32 = vsel %vm1787_vm9, %v1768_v31, 0.0  ;;  %v4476_v40 = vld [vmem:[#allocation43_spill] sm:$0xff] }
 0x236   : > { %v1798_v45 = vmul.f32 %v3901_v36, %v1790_v32  ;;  %v4465_v32 = vld [vmem:[#allocation18_spill] sm:$0xff] }
 0x237   : > { %v1856_v4 = vmul.f32 %v3826_v63, %v1799_v11  ;;  %v972_v51 = vpop.permute.xlu1 %971 }
 0x238   : > { %v1855_v8 = vmul.f32 %v3828_v23, %v1798_v45  ;;  %v970_v12 = vpop.permute.xlu0 %969  ;;  %v991_v17 = vsel %vm985_vm2, 0.0, %v972_v51 }
 0x239   : > { %v4010_v57 = vadd.f32 %v1856_v4, %v1758_v34  ;;  %v990_v37 = vsel %vm985_vm2, 0.0, %v970_v12  ;;  %v1005_v39 = vmul.f32 %v3889_v49, %v991_v17  ;;  %v4463_v34 = vld [vmem:[#allocation31_spill] sm:$0xff] }
 0x23a   : > { %v4012_v52 = vadd.f32 %v1855_v8, %v1757_v61  ;;  %v1004_v23 = vmul.f32 %v3889_v49, %v990_v37  ;;  %v1441_v61 = vmul.f32 %v4464_v35, %v4463_v34  ;;  %v4466_v12 = vld [vmem:[#allocation19_spill] sm:$0xff] }
 0x23b   : > { %v1083_v46 = vpop.permute.xlu1 %1082  ;;  %v1061_v56 = vmul.f32 %v3586_v62, %v1005_v39  ;;  %v4459_v62 = vld [vmem:[#allocation10_spill] sm:$0xff]  ;;  %v4468_v39 = vld [vmem:[#allocation23_spill] sm:$0xff] }
 0x23c   : > { %v1081_v58 = vpop.permute.xlu0 %1080  ;;  %v1102_v18 = vsel %vm1096_vm3, 0.0, %v1083_v46  ;;  %v1060_v30 = vmul.f32 %v3588_v0, %v1004_v23 }
 0x23d   : > { %v1101_v63 = vsel %vm1096_vm3, 0.0, %v1081_v58  ;;  %v1159_v22 = vmul.f32 %v3594_v55, %v1102_v18  ;;  %v4467_v58 = vld [vmem:[#allocation22_spill] sm:$0xff] }
 0x23e   : > { %v1158_v41 = vmul.f32 %v3596_v2, %v1101_v63 }
 0x23f   : > { %v1181_v50 = vpop.permute.xlu1 %1180  ;;  %v1167_v54 = vadd.f32 %v1159_v22, %v1061_v56 }
 0x240   : > { %v1200_v21 = vsel %vm1194_vm4, 0.0, %v1181_v50  ;;  %v1179_v19 = vpop.permute.xlu0 %1178  ;;  %v1166_v2 = vadd.f32 %v1158_v41, %v1060_v30 }
 0x241   : > { %v1214_v53 = vmul.f32 %v3901_v36, %v1200_v21  ;;  %v1199_v13 = vsel %vm1194_vm4, 0.0, %v1179_v19 }
 0x242   : > { %v1213_v43 = vmul.f32 %v3901_v36, %v1199_v13  ;;  %v4469_v13 = vld [vmem:[#allocation26_spill] sm:$0xff] }
 0x243   : > { %v1271_v29 = vmul.f32 %v3602_v5, %v1214_v53  ;;  %v1293_v1 = vpop.permute.xlu1 %1292 }
 0x244   : > { %v1270_v25 = vmul.f32 %v3604_v6, %v1213_v43  ;;  %v1312_v27 = vsel %vm1306_vm5, 0.0, %v1293_v1  ;;  %v1291_v55 = vpop.permute.xlu0 %1290 }
 0x245   : > { %v1320_v20 = vmul.f32 %v3889_v49, %v1312_v27  ;;  %v1311_v42 = vsel %vm1306_vm5, 0.0, %v1291_v55  ;;  %v1279_v10 = vadd.f32 %v1271_v29, %v1167_v54  ;;  %v4470_v29 = vld [vmem:[#allocation27_spill] sm:$0xff] }
 0x246   : > { %v1319_v48 = vmul.f32 %v3889_v49, %v1311_v42  ;;  %v1278_v24 = vadd.f32 %v1270_v25, %v1166_v2  ;;  %v4471_v42 = vld [vmem:[#allocation32_spill] sm:$0xff] }
 0x247   : > { %v1377_v28 = vmul.f32 %v4459_v62, %v1320_v20  ;;  %v1464_v5 = vpop.permute.xlu1 %1463  ;;  %v4472_v62 = vld [vmem:[#allocation33_spill] sm:$0xff] }
 0x248   : > { %v1376_v0 = vmul.f32 %v4460_v44, %v1319_v48  ;;  %v1483_v6 = vsel %vm1477_vm6, %v1464_v5, 0.0  ;;  %v1462_v47 = vpop.permute.xlu0 %1461 }
 0x249   : > { %v1385_v59 = vadd.f32 %v1377_v28, %v1279_v10  ;;  %v1491_v15 = vmul.f32 %v3901_v36, %v1483_v6  ;;  %v1482_v60 = vsel %vm1477_vm6, %v1462_v47, 0.0  ;;  %v4473_v6 = vld [vmem:[#allocation40_spill] sm:$0xff] }
 0x24a   : > { %v1384_v26 = vadd.f32 %v1376_v0, %v1278_v24  ;;  %v1490_v16 = vmul.f32 %v3901_v36, %v1482_v60  ;;  %v1918_v47 = vadd.f32 %v4473_v6, %v3959_v14 }
 0x24b   : > { %v1570_v9 = vpop.permute.xlu1 %1569  ;;  %v1450_v11 = vadd.f32 %v1442_v33, %v1385_v59  ;;  %v1548_v45 = vmul.f32 %v4465_v32, %v1491_v15  ;;  %v4474_v59 = vld [vmem:[#allocation42_spill] sm:$0xff] }
 0x24c   : > { %v1589_v7 = vsel %vm1583_vm7, %v1570_v9, 0.0  ;;  %v1568_v31 = vpop.permute.xlu0 %1567  ;;  %v1449_v8 = vadd.f32 %v1441_v61, %v1384_v26  ;;  %v1547_v46 = vmul.f32 %v4466_v12, %v1490_v16  ;;  %v4475_v26 = vld [vmem:[#allocation41_spill] sm:$0xff] }
 0x24d   : > { %v1597_v4 = vmul.f32 %v3889_v49, %v1589_v7  ;;  %v1588_v51 = vsel %vm1583_vm7, %v1568_v31, 0.0  ;;  %v1556_v21 = vadd.f32 %v1548_v45, %v1450_v11  ;;  %v1917_v16 = vadd.f32 %v4475_v26, %v3963_v38  ;;  %v4485_v26 = vld [vmem:[#allocation38_spill] sm:$0xff] }
 0x24e   : > { %v1596_v17 = vmul.f32 %v3889_v49, %v1588_v51  ;;  %v1555_v22 = vadd.f32 %v1547_v46, %v1449_v8 }
 0x24f   : > { %v1654_v37 = vmul.f32 %v4467_v58, %v1597_v4  ;;  %v1676_v18 = vpop.permute.xlu1 %1675 }
 0x250   : > { %v1653_v63 = vmul.f32 %v4468_v39, %v1596_v17  ;;  %v1695_v50 = vsel %vm1689_vm8, %v1676_v18, 0.0  ;;  %v1674_v23 = vpop.permute.xlu0 %1673 }
 0x251   : > { %v1694_v19 = vsel %vm1689_vm8, %v1674_v23, 0.0  ;;  %v1662_v53 = vadd.f32 %v1654_v37, %v1556_v21  ;;  %v1752_v41 = vmul.f32 %v4469_v13, %v1695_v50  ;;  %v4477_v50 = vld [vmem:[#allocation8_spill] sm:$0xff]  ;;  %v4478_v21 = vld [vmem:[#allocation9_spill] sm:$0xff] }
 0x252   : > { %v1661_v56 = vadd.f32 %v1653_v63, %v1555_v22  ;;  %v1751_v1 = vmul.f32 %v4470_v29, %v1694_v19 }
 0x253   : > { %v1774_v43 = vpop.permute.xlu1 %1773  ;;  %v1760_v20 = vadd.f32 %v1752_v41, %v1662_v53  ;;  %v4479_v41 = vld [vmem:[#allocation6_spill] sm:$0xff] }
 0x254   : > { %v1793_v30 = vsel %vm1787_vm9, %v1774_v43, 0.0  ;;  %v1772_v25 = vpop.permute.xlu0 %1771  ;;  %v1759_v10 = vadd.f32 %v1751_v1, %v1661_v56  ;;  %v4480_v56 = vld [vmem:[#allocation7_spill] sm:$0xff]  ;;  %v4481_v1 = vld [vmem:[#allocation12_spill] sm:$0xff] }
 0x255   : > { %v1801_v27 = vmul.f32 %v3901_v36, %v1793_v30  ;;  %v1792_v55 = vsel %vm1787_vm9, %v1772_v25, 0.0  ;;  %v4482_v25 = vld [vmem:[#allocation13_spill] sm:$0xff] }
 0x256   : > { %v1800_v54 = vmul.f32 %v3901_v36, %v1792_v55 }
 0x257   : > { %v1858_v2 = vmul.f32 %v4471_v42, %v1801_v27  ;;  %v976_v48 = vpop.permute.xlu1 %975 }
 0x258   : > { %v1857_v28 = vmul.f32 %v4472_v62, %v1800_v54  ;;  %v974_v5 = vpop.permute.xlu0 %973  ;;  %v993_v38 = vsel %vm985_vm2, 0.0, %v976_v48 }
 0x259   : > { %v1866_v24 = vadd.f32 %v1858_v2, %v1760_v20  ;;  %v992_v11 = vsel %vm985_vm2, 0.0, %v974_v5  ;;  %v1007_v58 = vmul.f32 %v3889_v49, %v993_v38  ;;  %v4483_v20 = vld [vmem:[#allocation16_spill] sm:$0xff]  ;;  %v4484_v2 = vld [vmem:[#allocation17_spill] sm:$0xff] }
 0x25a   : > { %v1865_v44 = vadd.f32 %v1857_v28, %v1759_v10  ;;  %v1006_v37 = vmul.f32 %v3889_v49, %v992_v11  ;;  %v4489_v11 = vld [vmem:[#allocation24_spill] sm:$0xff] }
 0x25b   : > { %v1087_v0 = vpop.permute.xlu1 %1086  ;;  %v1922_v15 = vadd.f32 %v4474_v59, %v1866_v24  ;;  %v1063_v43 = vmul.f32 %v4479_v41, %v1007_v58  ;;  %v4492_v58 = vld [vmem:[#allocation29_spill] sm:$0xff] }
 0x25c   : > { %v1085_v60 = vpop.permute.xlu0 %1084  ;;  %v1921_v3 = vadd.f32 %v4476_v40, %v1865_v44  ;;  %v1104_v8 = vsel %vm1096_vm3, 0.0, %v1087_v0  ;;  %v1062_v29 = vmul.f32 %v4480_v56, %v1006_v37 }
 0x25d   : > { %v4068_v33 = vmul.f32 %v1922_v15, %v1918_v47  ;;  %v1103_v12 = vsel %vm1096_vm3, 0.0, %v1085_v60  ;;  %v1161_v23 = vmul.f32 %v4477_v50, %v1104_v8 }
 0x25e   : > { %v4070_v9 = vmul.f32 %v1921_v3, %v1917_v16  ;;  %v1160_v19 = vmul.f32 %v4478_v21, %v1103_v12  ;;  %v4486_v16 = vld [vmem:[#allocation20_spill] sm:$0xff]  ;;  %v4487_v3 = vld [vmem:[#allocation39_spill] sm:$0xff] }
 0x25f   : > { %v1185_v34 = vpop.permute.xlu1 %1184  ;;  %v1932_v35 = vsel %vm667_vm0, %v4068_v33, 0.0  ;;  %v1169_v55 = vadd.f32 %v1161_v23, %v1063_v43  ;;  %v1444_v40 = vmul.f32 %v4486_v16, %v4485_v26  ;;  %v4495_v43 = vld [vmem:[#allocation36_spill] sm:$0xff] }
 0x260   : > { %1933 = vadd.xlane.f32.xlu1 %v1932_v35  ;;  %v1183_v61 = vpop.permute.xlu0 %1182  ;;  %v1929_v14 = vsel %vm667_vm0, %v4070_v9, 0.0  ;;  %v1202_v32 = vsel %vm1194_vm4, 0.0, %v1185_v34  ;;  %v1168_v54 = vadd.f32 %v1160_v19, %v1062_v29  ;;  %v4488_v34 = vld [vmem:[#allocation21_spill] sm:$0xff]  ;;  %v4493_v19 = vld [vmem:[#allocation34_spill] sm:$0xff] }
 0x261   : > { %1930 = vadd.xlane.f32.xlu0 %v1929_v14  ;;  %v1201_v45 = vsel %vm1194_vm4, 0.0, %v1183_v61  ;;  %v1216_v18 = vmul.f32 %v3901_v36, %v1202_v32  ;;  %v1443_v35 = vmul.f32 %v4488_v34, %v4487_v3  ;;  %v4496_v29 = vld [vmem:[#allocation37_spill] sm:$0xff]  ;;  %v1947_v3 = vld [vmem:[%s4377_s9 + $0x8] sm:$0xff]  ;;  %v1948_v34 = vld [vmem:[%s4377_s9 + $0x10] sm:$0xff] }
 0x262   : > { %v1215_v39 = vmul.f32 %v3901_v36, %v1201_v45 }
 0x263   : > { %v1297_v7 = vpop.permute.xlu1 %1296  ;;  %v1273_v30 = vmul.f32 %v4481_v1, %v1216_v18 }
 0x264   : > { %v1295_v31 = vpop.permute.xlu0 %1294  ;;  %v1314_v46 = vsel %vm1306_vm5, 0.0, %v1297_v7  ;;  %v1272_v27 = vmul.f32 %v4482_v25, %v1215_v39 }
 0x265   : > { %v1313_v17 = vsel %vm1306_vm5, 0.0, %v1295_v31  ;;  %v1322_v22 = vmul.f32 %v3889_v49, %v1314_v46  ;;  %v1281_v24 = vadd.f32 %v1273_v30, %v1169_v55  ;;  %v4491_v46 = vld [vmem:[#allocation28_spill] sm:$0xff] }
 0x266   : > { %v1321_v53 = vmul.f32 %v3889_v49, %v1313_v17  ;;  %v1280_v44 = vadd.f32 %v1272_v27, %v1168_v54 }
 0x267   : > { %v1468_v4 = vpop.permute.xlu1 %1467  ;;  %v1379_v42 = vmul.f32 %v4483_v20, %v1322_v22 }
 0x268   : > { %v1466_v51 = vpop.permute.xlu0 %1465  ;;  %v1378_v48 = vmul.f32 %v4484_v2, %v1321_v53  ;;  %v1485_v28 = vsel %vm1477_vm6, %v1468_v4, 0.0  ;;  %v4490_v4 = vld [vmem:[#allocation25_spill] sm:$0xff] }
 0x269   : > { %v1484_v5 = vsel %vm1477_vm6, %v1466_v51, 0.0  ;;  %v1387_v47 = vadd.f32 %v1379_v42, %v1281_v24  ;;  %v1493_v15 = vmul.f32 %v3901_v36, %v1485_v28  ;;  %v4497_v2 = vld [vmem:[#allocation45_spill] sm:$0xff] }
 0x26a   : > { %v1386_v59 = vadd.f32 %v1378_v48, %v1280_v44  ;;  %v1492_v60 = vmul.f32 %v3901_v36, %v1484_v5 }
 0x26b   : > { %v1574_v63 = vpop.permute.xlu1 %1573  ;;  %v1452_v38 = vadd.f32 %v1444_v40, %v1387_v47  ;;  %v1550_v32 = vmul.f32 %v4489_v11, %v1493_v15 }
 0x26c   : > { %v1572_v13 = vpop.permute.xlu0 %1571  ;;  %v1591_v0 = vsel %vm1583_vm7, %v1574_v63, 0.0  ;;  %v1451_v45 = vadd.f32 %v1443_v35, %v1386_v59  ;;  %v1549_v51 = vmul.f32 %v4490_v4, %v1492_v60  ;;  %v1949_v35 = vld [vmem:[%s4377_s9 + $0x18] sm:$0xff]  ;;  %v2079_v4 = vld [vmem:[%s4380_s12] sm:$0xff] }
 0x26d   : > { %v1590_v6 = vsel %vm1583_vm7, %v1572_v13, 0.0  ;;  %v1599_v61 = vmul.f32 %v3889_v49, %v1591_v0  ;;  %v1558_v39 = vadd.f32 %v1550_v32, %v1452_v38  ;;  %v4494_v13 = vld [vmem:[#allocation35_spill] sm:$0xff]  ;;  %v1952_v32 = vld [vmem:[%s4378_s10 + $0x10] sm:$0xff] }
 0x26e   : > { %v1598_v14 = vmul.f32 %v3889_v49, %v1590_v6  ;;  %v1557_v63 = vadd.f32 %v1549_v51, %v1451_v45 }
 0x26f   : > { %v1680_v10 = vpop.permute.xlu1 %1679  ;;  %v1656_v17 = vmul.f32 %v4491_v46, %v1599_v61  ;;  %v1951_v61 = vld [vmem:[%s4378_s10 + $0x8] sm:$0xff]  ;;  %v2081_v46 = vld [vmem:[%s4380_s12 + $0x10] sm:$0xff] }
 0x270   : > { %v1678_v62 = vpop.permute.xlu0 %1677  ;;  %v1655_v37 = vmul.f32 %v4492_v58, %v1598_v14  ;;  %v1697_v18 = vsel %vm1689_vm8, %v1680_v10, 0.0  ;;  %v4498_v10 = vld [vmem:[#allocation44_spill] sm:$0xff]  ;;  %v1950_v14 = vld [vmem:[%s4378_s10] sm:$0xff]  ;;  %v2201_v58 = vld [vmem:[%s4381_s13 + $0x8] sm:$0xff] }
 0x271   : > { %v1696_v49 = vsel %vm1689_vm8, %v1678_v62, 0.0  ;;  %v1664_v21 = vadd.f32 %v1656_v17, %v1558_v39  ;;  %v1754_v22 = vmul.f32 %v4493_v19, %v1697_v18  ;;  %v1920_v62 = vadd.f32 %v4498_v10, %v4010_v57  ;;  %v2202_v18 = vld [vmem:[%s4381_s13 + $0x10] sm:$0xff]  ;;  %v2075_v39 = vld [vmem:[%s4379_s11] sm:$0xff]  ;;  %v2526_v10 = vld [vmem:[%s4387_s19 + $0x18] sm:$0xff] }
 0x272   : > { %v1663_v53 = vadd.f32 %v1655_v37, %v1557_v63  ;;  %v1753_v41 = vmul.f32 %v4494_v13, %v1696_v49  ;;  %v2080_v37 = vld [vmem:[%s4380_s12 + $0x8] sm:$0xff]  ;;  %v2200_v49 = vld [vmem:[%s4381_s13] sm:$0xff]  ;;  %v2276_v19 = vld [vmem:[%s4382_s14 + $0x10] sm:$0xff] }
 0x273   : > { %v1778_v7 = vpop.permute.xlu1 %1777  ;;  %v1762_v30 = vadd.f32 %v1754_v22, %v1664_v21  ;;  %v2274_v63 = vld [vmem:[%s4382_s14] sm:$0xff]  ;;  %v2203_v21 = vld [vmem:[%s4381_s13 + $0x18] sm:$0xff]  ;;  %v2275_v22 = vld [vmem:[%s4382_s14 + $0x8] sm:$0xff] }
 0x274   : > { %v1776_v31 = vpop.permute.xlu0 %1775  ;;  %v1795_v8 = vsel %vm1787_vm9, %v1778_v7, 0.0  ;;  %v1761_v25 = vadd.f32 %v1753_v41, %v1663_v53  ;;  %v2304_v53 = vld [vmem:[%s4383_s15 + $0x10] sm:$0xff]  ;;  %v2303_v13 = vld [vmem:[%s4383_s15 + $0x8] sm:$0xff]  ;;  %v2338_v41 = vld [vmem:[%s4385_s17] sm:$0xff] }
 0x275   : > { %v1794_v12 = vsel %vm1787_vm9, %v1776_v31, 0.0  ;;  %v1803_v50 = vmul.f32 %v3901_v36, %v1795_v8 }
 0x276   : > { %v1802_v23 = vmul.f32 %v3901_v36, %v1794_v12  ;;  %v1919_v36 = vadd.f32 %v4497_v2, %v4012_v52  ;;  %v1946_v52 = vld [vmem:[%s4377_s9] sm:$0xff]  ;;  %v1953_v12 = vld [vmem:[%s4378_s10 + $0x18] sm:$0xff] }
 0x277   : > { %v1860_v56 = vmul.f32 %v4495_v43, %v1803_v50  ;;  %2952 = vmatprep.mubr.msk.f32.mxu1 %vm823_vm1, %v1946_v52  ;;  %v2082_v50 = vld [vmem:[%s4380_s12 + $0x18] sm:$0xff]  ;;  %v2644_v2 = vld [vmem:[%s4388_s20] sm:$0xff] }
 0x278   : > { %v1859_v1 = vmul.f32 %v4496_v29, %v1802_v23  ;;  %v2302_v23 = vld [vmem:[%s4383_s15] sm:$0xff]  ;;  %v2277_v43 = vld [vmem:[%s4382_s14 + $0x18] sm:$0xff] }
 0x279   : > { %v1868_v55 = vadd.f32 %v1860_v56, %v1762_v30  ;;  %v2342_v56 = vld [vmem:[%s4385_s17 + $0x20] sm:$0xff]  ;;  %v2305_v29 = vld [vmem:[%s4383_s15 + $0x18] sm:$0xff]  ;;  %v2339_v30 = vld [vmem:[%s4385_s17 + $0x8] sm:$0xff] }
 0x27a   : > { %v1867_v54 = vadd.f32 %v1859_v1, %v1761_v25  ;;  %v2340_v1 = vld [vmem:[%s4385_s17 + $0x10] sm:$0xff] }
 0x27b   : > { %v2344_v25 = vld [vmem:[%s4385_s17 + $0x30] sm:$0xff] }
 0x284   : > { %v1915_v27 = vpop.permute.xlu1 %1914 }
 0x285   : > { %v1910_v20 = vpop.permute.xlu0 %1909  ;;  %v1924_v42 = vadd.f32 %v1915_v27, %v1868_v55  ;;  %v2343_v27 = vld [vmem:[%s4385_s17 + $0x28] sm:$0xff]  ;;  %v2523_v55 = vld [vmem:[%s4387_s19] sm:$0xff] }
 0x286   : > { %v1923_v48 = vadd.f32 %v1910_v20, %v1867_v54  ;;  %v2341_v54 = vld [vmem:[%s4385_s17 + $0x18] sm:$0xff]  ;;  %v2525_v20 = vld [vmem:[%s4387_s19 + $0x10] sm:$0xff] }
 0x287   : > { %v4130_v5 = vmul.f32 %v1924_v42, %v1920_v62  ;;  %v2345_v42 = vld [vmem:[%s4385_s17 + $0x38] sm:$0xff]  ;;  %v2645_v62 = vld [vmem:[%s4388_s20 + $0x8] sm:$0xff] }
 0x288   : > { %v4128_v28 = vmul.f32 %v1923_v48, %v1919_v36  ;;  %v2524_v36 = vld [vmem:[%s4387_s19 + $0x8] sm:$0xff]  ;;  %v2646_v48 = vld [vmem:[%s4388_s20 + $0x10] sm:$0xff] }
 0x289   : > { %v1938_v44 = vsel %vm667_vm0, %v4130_v5, 0.0 }
 0x28a   : > { %v1935_v24 = vsel %vm667_vm0, %v4128_v28, 0.0 }
 0x28b   : > { %1936 = vadd.xlane.f32.xlu0 %v1935_v24  ;;  %v2647_v24 = vld [vmem:[%s4388_s20 + $0x18] sm:$0xff] }
 0x28f   : > { %1939 = vadd.xlane.f32.xlu0 %v1938_v44 }
 0x2ed   : > { %v1934_v0 = vpop.xlane.xlu1 %1933 }
 0x2ee   : > { %v1943_v57 = vmul.f32 0.0625, %v1934_v0  ;;  %v1931_v6 = vpop.xlane.xlu0 %1930 }
 0x2ef   : > { %v1942_v47 = vmul.f32 0.0625, %v1931_v6 }
 0x2f1   : > { %v3014_v59 = vpack.c.bf16 %v1943_v57, %v1942_v47 }
 0x2f3   : > { %3015 = vmatprep.subr.bf16.mxu1 %v3014_v59 }
 0x2f4   : > { %3017 = vmatpush3.bf16.msra.mxu1 %v3014_v59 }
 0x318   : > { %v1937_v15 = vpop.xlane.xlu0 %1936 }
 0x319   : > { %v1944_v26 = vmul.f32 0.0625, %v1937_v15 }
 0x31c   : > { %v1940_v60 = vpop.xlane.xlu0 %1939 }
 0x31d   : > { %v1945_v16 = vmul.f32 0.0625, %v1940_v60 }
 0x31f   : > { %v3018_v40 = vpack.c.bf16 %v1945_v16, %v1944_v26  ;;  %v2076_v16 = vld [vmem:[%s4379_s11 + $0x8] sm:$0xff] }
 0x321   : > { %3019 = vmatprep.subr.bf16.mxu1 %v3018_v40 }
 0x322   : > { %3021 = vmatpush3.bf16.msra.mxu1 %v3018_v40 }
 0x325   : > { %2953 = vmatmul.mubr.msk.f32.vlgmr.msra.gmra.mrb[0].mxu1 %vm823_vm1, %v1947_v3 }
 0x326   : > { %2955 = vmatprep.mubr.msk.f32.mxu1 %vm823_vm1, %v1948_v34 }
 0x329   : > { %2956 = vmatmul.mubr.msk.f32.gmra.mrb[2].mxu1 %vm823_vm1, %v1949_v35 }
 0x32a   : > { %2966 = vmatprep.mubr.msk.f32.mxu1 %vm823_vm1, %v2075_v39 }
 0x3f8   : > { %v2954_v7 = vpop.f32.mrb[0].mxu1 }
 0x3f9   : > { %v2038_v31 = vadd.f32 %v2954_v7, %v1951_v61  ;;  %v2032_v38 = vpop.f32.mrb[1].mxu1 }
 0x3fa   : > { %v2033_v11 = vadd.f32 %v2032_v38, %v1950_v14 }
 0x3fb   : > { %2058 = vperm.xlu0 %3063, %v2038_v31  }
 0x3fc   : > { %v2957_v45 = vpop.f32.mrb[2].mxu1  ;;  %2053 = vperm.xlu1 %3064, %v2033_v11  }
 0x3fd   : > { %v2042_v51 = vpop.f32.mrb[3].mxu1  ;;  %v2048_v17 = vadd.f32 %v2957_v45, %v1953_v12 }
 0x3fe   : > { %v2043_v8 = vadd.f32 %v2042_v51, %v1952_v32 }
 0x3ff   : > { %2085 = vperm.xlu0 %3063, %v2079_v4   ;;  %v4499_v4 = vld [vmem:[#allocation3_spill] sm:$0xff] }
 0x400   : > { %2063 = vperm.xlu1 %3064, %v2043_v8  }
 0x403   : > { %2095 = vperm.xlu0 %3063, %v2081_v46  }
 0x404   : > { %2068 = vperm.xlu1 %3064, %v2048_v17   ;;  %v4500_v17 = vld [vmem:[#allocation2_spill] sm:$0xff] }
 0x407   : > { %2211 = vperm.xlu0 %3063, %v2201_v58  }
 0x408   : > { %2090 = vperm.xlu1 %3064, %v2080_v37  }
 0x40b   : > { %2216 = vperm.xlu0 %3063, %v2202_v18  }
 0x40c   : > { %2206 = vperm.xlu1 %3064, %v2200_v49  }
 0x40f   : > { %2280 = vperm.xlu0 %3063, %v2274_v63  }
 0x410   : > { %2100 = vperm.xlu1 %3064, %v2082_v50  }
 0x413   : > { %2308 = vperm.xlu0 %3063, %v2302_v23   ;;  %v4501_v23 = vld [vmem:[#allocation5_spill] sm:$0xff] }
 0x414   : > { %2221 = vperm.xlu1 %3064, %v2203_v21  }
 0x417   : > { %2290 = vperm.xlu0 %3063, %v2276_v19   ;;  %v4502_v19 = vld [vmem:[#allocation4_spill] sm:$0xff] }
 0x418   : > { %2285 = vperm.xlu1 %3064, %v2275_v22  }
 0x41b   : > { %2318 = vperm.xlu0 %3063, %v2304_v53  }
 0x41c   : > { %2313 = vperm.xlu1 %3064, %v2303_v13  }
 0x41f   : > { %2348 = vperm.xlu0 %3063, %v2338_v41  }
 0x420   : > { %2295 = vperm.xlu1 %3064, %v2277_v43  }
 0x423   : > { %2368 = vperm.xlu0 %3063, %v2342_v56  }
 0x424   : > { %2323 = vperm.xlu1 %3064, %v2305_v29  }
 0x427   : > { %2358 = vperm.xlu0 %3063, %v2340_v1  }
 0x428   : > { %2353 = vperm.xlu1 %3064, %v2339_v30  }
 0x42b   : > { %2378 = vperm.xlu0 %3063, %v2344_v25  }
 0x42c   : > { %2373 = vperm.xlu1 %3064, %v2343_v27  }
 0x42f   : > { %2529 = vperm.xlu0 %3063, %v2523_v55  }
 0x430   : > { %2363 = vperm.xlu1 %3064, %v2341_v54  }
 0x433   : > { %2539 = vperm.xlu0 %3063, %v2525_v20  }
 0x434   : > { %2383 = vperm.xlu1 %3064, %v2345_v42  }
 0x437   : > { %2650 = vperm.xlu0 %3063, %v2644_v2  }
 0x438   : > { %2534 = vperm.xlu1 %3064, %v2524_v36  }
 0x43b   : > { %2660 = vperm.xlu0 %3063, %v2646_v48  }
 0x43c   : > { %2544 = vperm.xlu1 %3064, %v2526_v10  }
 0x440   : > { %2655 = vperm.xlu1 %3064, %v2645_v62  }
 0x444   : > { %2665 = vperm.xlu1 %3064, %v2647_v24  }
 0x47a   : > { %v2059_v44 = vpop.permute.xlu0 %2058 }
 0x47b   : > { %v2072_v52 = vmul.f32 %v2059_v44, %v4068_v33  ;;  %v2054_v0 = vpop.permute.xlu1 %2053  ;;  %v2077_v33 = vld [vmem:[%s4379_s11 + $0x10] sm:$0xff] }
 0x47c   : > { %v2071_v57 = vmul.f32 %v2054_v0, %v4070_v9  ;;  %v2078_v9 = vld [vmem:[%s4379_s11 + $0x18] sm:$0xff] }
 0x47e   : > { %v3022_v6 = vpack.c.bf16 %v2072_v52, %v2071_v57  ;;  %v2086_v40 = vpop.permute.xlu0 %2085 }
 0x47f   : > { %v2064_v47 = vpop.permute.xlu1 %2063 }
 0x480   : > { %3023 = vmatprep.subr.bf16.mxu1 %v3022_v6  ;;  %v2073_v15 = vmul.f32 %v2064_v47, %v4128_v28  ;;  %v2330_v28 = vld [vmem:[%s4384_s16] sm:$0xff] }
 0x481   : > { %3025 = vmatpush3.bf16.msra.mxu1 %v3022_v6  ;;  %2980 = vmatprep.mubr.msk.f32.mxu0 %vm823_vm1, %v2330_v28 }
 0x482   : > { %v2096_v34 = vpop.permute.xlu0 %2095 }
 0x483   : > { %v2069_v59 = vpop.permute.xlu1 %2068 }
 0x484   : > { %v2074_v60 = vmul.f32 %v2069_v59, %v4130_v5 }
 0x486   : > { %v3026_v26 = vpack.c.bf16 %v2074_v60, %v2073_v15  ;;  %v2212_v14 = vpop.permute.xlu0 %2211 }
 0x487   : > { %v2091_v5 = vpop.permute.xlu1 %2090 }
 0x488   : > { %3027 = vmatprep.subr.bf16.mxu1 %v3026_v26 }
 0x489   : > { %3029 = vmatpush3.bf16.msra.mxu1 %v3026_v26 }
 0x48a   : > { %v2217_v18 = vpop.permute.xlu0 %2216 }
 0x48b   : > { %v2207_v3 = vpop.permute.xlu1 %2206 }
 0x48c   : > { %2967 = vmatmul.mubr.msk.f32.vlgmr.msra.gmra.mrb[4].mxu1 %vm823_vm1, %v2076_v16 }
 0x48d   : > { %2969 = vmatprep.mubr.msk.f32.mxu1 %vm823_vm1, %v2077_v33 }
 0x48e   : > { %v2281_v28 = vpop.permute.xlu0 %2280 }
 0x48f   : > { %v2101_v35 = vpop.permute.xlu1 %2100 }
 0x490   : > { %2970 = vmatmul.mubr.msk.f32.gmra.mrb[6].mxu1 %vm823_vm1, %v2078_v9 }
 0x493   : > { %v2222_v46 = vpop.permute.xlu1 %2221 }
 0x55f   : > { %v2968_v61 = vpop.f32.mrb[4].mxu1 }
 0x560   : > { %v2187_v7 = vadd.f32 %v2968_v61, %v2091_v5  ;;  %v2181_v31 = vpop.f32.mrb[5].mxu1  ;;  %v2286_v5 = vpop.permute.xlu1 %2285 }
 0x561   : > { %v2182_v38 = vadd.f32 %v2181_v31, %v2086_v40 }
 0x562   : > { %v2225_v11 = vmul.f32 %v2212_v14, %v2187_v7 }
 0x563   : > { %v2224_v32 = vmul.f32 %v2207_v3, %v2182_v38  ;;  %v2971_v45 = vpop.f32.mrb[6].mxu1 }
 0x564   : > { %v4285_v51 = vadd.f32 %v4499_v4, %v2225_v11  ;;  %v2197_v8 = vadd.f32 %v2971_v45, %v2101_v35  ;;  %v2191_v12 = vpop.f32.mrb[7].mxu1  ;;  %v2314_v35 = vpop.permute.xlu1 %2313 }
 0x565   : > { %v4288_v58 = vadd.f32 %v4500_v17, %v2224_v32  ;;  %v2192_v37 = vadd.f32 %v2191_v12, %v2096_v34  ;;  %v2309_v34 = vpop.permute.xlu0 %2308 }
 0x566   : > { %v2227_v49 = vmul.f32 %v2222_v46, %v2197_v8  ;;  %v2233_v39 = vsel %vm667_vm0, %v4285_v51, 0.0 }
 0x567   : > { %v2232_v63 = vsel %vm667_vm0, %v4288_v58, 0.0  ;;  %v2226_v50 = vmul.f32 %v2217_v18, %v2192_v37 }
 0x568   : > { %v4295_v21 = vadd.f32 %v4501_v23, %v2227_v49  ;;  %v2234_v53 = vadd.f32 %v2233_v39, %v2232_v63  ;;  %v2296_v14 = vpop.permute.xlu1 %2295  ;;  %v2331_v23 = vld [vmem:[%s4384_s16 + $0x8] sm:$0xff] }
 0x569   : > { %v4298_v22 = vadd.f32 %v4502_v19, %v2226_v50  ;;  %v2291_v61 = vpop.permute.xlu0 %2290  ;;  %v2332_v19 = vld [vmem:[%s4384_s16 + $0x10] sm:$0xff] }
 0x56a   : > { %v2237_v43 = vsel %vm667_vm0, %v4295_v21, 0.0 }
 0x56b   : > { %v2235_v13 = vsel %vm667_vm0, %v4298_v22, 0.0 }
 0x56c   : > { %v2236_v41 = vadd.f32 %v2235_v13, %v2234_v53  ;;  %v2324_v17 = vpop.permute.xlu1 %2323  ;;  %v2333_v53 = vld [vmem:[%s4384_s16 + $0x18] sm:$0xff]  ;;  %v2334_v13 = vld [vmem:[%s4384_s16 + $0x20] sm:$0xff] }
 0x56d   : > { %v2319_v46 = vpop.permute.xlu0 %2318 }
 0x56e   : > { %v2238_v56 = vadd.f32 %v2237_v43, %v2236_v41  ;;  %v2335_v41 = vld [vmem:[%s4384_s16 + $0x28] sm:$0xff]  ;;  %v2336_v43 = vld [vmem:[%s4384_s16 + $0x30] sm:$0xff] }
 0x570   : > { %v2239_v29 = vrot.slane %v2238_v56, 4 }
 0x572   : > { %v2240_v1 = vadd.f32 %v2239_v29, %v2238_v56  ;;  %v2337_v56 = vld [vmem:[%s4384_s16 + $0x38] sm:$0xff]  ;;  %v2519_v29 = vld [vmem:[%s4386_s18] sm:$0xff] }
 0x573   : > { %3000 = vmatprep.mubr.msk.f32.mxu1 %vm823_vm1, %v2519_v29 }
 0x574   : > { %v2241_v30 = vrot.slane %v2240_v1, 2 }
 0x576   : > { %v2242_v25 = vadd.f32 %v2241_v30, %v2240_v1  ;;  %v2354_v1 = vpop.permute.xlu1 %2353  ;;  %v2349_v30 = vpop.permute.xlu0 %2348 }
 0x578   : > { %v2243_v27 = vrot.slane %v2242_v25, 1 }
 0x57a   : > { %v2244_v55 = vadd.f32 %v2243_v27, %v2242_v25  ;;  %v2374_v25 = vpop.permute.xlu1 %2373 }
 0x57c   : > { %v2245_v54 = vmul.f32 0.03125, %v2244_v55  ;;  %v2369_v55 = vpop.permute.xlu0 %2368 }
 0x57e   : > { %v2248_v20 = vsub.f32 %v4298_v22, %v2245_v54  ;;  %v2249_v42 = vsub.f32 %v4295_v21, %v2245_v54  ;;  %v2246_v2 = vsub.f32 %v4288_v58, %v2245_v54  ;;  %v2247_v36 = vsub.f32 %v4285_v51, %v2245_v54 }
 0x580   : > { %v2252_v48 = vmul.f32 %v2248_v20, %v2248_v20  ;;  %v2250_v10 = vmul.f32 %v2246_v2, %v2246_v2  ;;  %v2251_v62 = vmul.f32 %v2247_v36, %v2247_v36  ;;  %v2253_v24 = vmul.f32 %v2249_v42, %v2249_v42 }
 0x582   : > { %v2254_v44 = vsel %vm667_vm0, %v2250_v10, 0.0  ;;  %v2255_v52 = vsel %vm667_vm0, %v2251_v62, 0.0  ;;  %v2257_v57 = vsel %vm667_vm0, %v2252_v48, 0.0  ;;  %v2259_v47 = vsel %vm667_vm0, %v2253_v24, 0.0 }
 0x583   : > { %v2256_v0 = vadd.f32 %v2255_v52, %v2254_v44 }
 0x585   : > { %v2258_v6 = vadd.f32 %v2257_v57, %v2256_v0 }
 0x587   : > { %v2260_v59 = vadd.f32 %v2259_v47, %v2258_v6 }
 0x589   : > { %v2261_v15 = vrot.slane %v2260_v59, 4 }
 0x58b   : > { %v2262_v60 = vadd.f32 %v2261_v15, %v2260_v59 }
 0x58d   : > { %v2263_v26 = vrot.slane %v2262_v60, 2 }
 0x58f   : > { %v2264_v16 = vadd.f32 %v2263_v26, %v2262_v60 }
 0x591   : > { %v2265_v33 = vrot.slane %v2264_v16, 1 }
 0x593   : > { %v2266_v9 = vadd.f32 %v2265_v33, %v2264_v16 }
 0x595   : > { %v2267_v40 = vmul.f32 0.03125, %v2266_v9 }
 0x597   : > { %v2268_v3 = vadd.f32 1e-06, %v2267_v40 }
 0x599   : > { %3067 = vrsqrt.f32 %v2268_v3  ;;  %v2520_v3 = vld [vmem:[%s4386_s18 + $0x8] sm:$0xff] }
 0x5a3   : > { %v3068_v7 = vpop.eup %3067 }
 0x5a4   : > { %v2270_v31 = vmul.f32 %v3068_v7, %v2246_v2  ;;  %v2271_v38 = vmul.f32 %v3068_v7, %v2247_v36  ;;  %v2272_v11 = vmul.f32 %v3068_v7, %v2248_v20  ;;  %v2273_v32 = vmul.f32 %v3068_v7, %v2249_v42  ;;  %v2364_v2 = vpop.permute.xlu1 %2363  ;;  %v2359_v36 = vpop.permute.xlu0 %2358 }
 0x5a6   : > { %v2298_v45 = vmul.f32 %v2281_v28, %v2270_v31  ;;  %v2299_v4 = vmul.f32 %v2286_v5, %v2271_v38  ;;  %v2300_v8 = vmul.f32 %v2291_v61, %v2272_v11  ;;  %v2301_v12 = vmul.f32 %v2296_v14, %v2273_v32 }
 0x5a8   : > { %v2326_v37 = vadd.f32 %v2309_v34, %v2298_v45  ;;  %v2327_v18 = vadd.f32 %v2314_v35, %v2299_v4  ;;  %v2328_v49 = vadd.f32 %v2319_v46, %v2300_v8  ;;  %v2329_v39 = vadd.f32 %v2324_v17, %v2301_v12  ;;  %v2384_v57 = vpop.permute.xlu1 %2383  ;;  %v2379_v59 = vpop.permute.xlu0 %2378  ;;  %v2521_v34 = vld [vmem:[%s4386_s18 + $0x10] sm:$0xff]  ;;  %v2522_v35 = vld [vmem:[%s4386_s18 + $0x18] sm:$0xff] }
 0x5aa   : > { %v3030_v63 = vpack.c.bf16 %v2327_v18, %v2326_v37  ;;  %v3034_v50 = vpack.c.bf16 %v2329_v39, %v2328_v49 }
 0x5ac   : > { %3031 = vmatprep.subr.bf16.mxu0 %v3030_v63  ;;  %v2535_v61 = vpop.permute.xlu1 %2534  ;;  %v2530_v14 = vpop.permute.xlu0 %2529 }
 0x5ad   : > { %3033 = vmatpush3.bf16.msra.mxu0 %v3030_v63 }
 0x5ae   : > { %3035 = vmatprep.subr.bf16.mxu0 %v3034_v50 }
 0x5b0   : > { %v2545_v7 = vpop.permute.xlu1 %2544  ;;  %v2540_v31 = vpop.permute.xlu0 %2539 }
 0x5b1   : > { %3037 = vmatpush3.bf16.msra.mxu0 %v3034_v50 }
 0x5b4   : > { %2981 = vmatmul.mubr.msk.f32.vlgmr.msra.gmra.mrb[8].mxu0 %vm823_vm1, %v2331_v23  ;;  %v2656_v38 = vpop.permute.xlu1 %2655  ;;  %v2651_v32 = vpop.permute.xlu0 %2650 }
 0x5b5   : > { %2983 = vmatprep.mubr.msk.f32.mxu0 %vm823_vm1, %v2332_v19 }
 0x5b8   : > { %2984 = vmatmul.mubr.msk.f32.gmra.mrb[10].mxu0 %vm823_vm1, %v2333_v53  ;;  %v2666_v39 = vpop.permute.xlu1 %2665  ;;  %v2661_v23 = vpop.permute.xlu0 %2660 }
 0x5b9   : > { %2986 = vmatprep.mubr.msk.f32.mxu0 %vm823_vm1, %v2334_v13 }
 0x5bc   : > { %2987 = vmatmul.mubr.msk.f32.gmra.mrb[12].mxu0 %vm823_vm1, %v2335_v41 }
 0x5bd   : > { %2989 = vmatprep.mubr.msk.f32.mxu0 %vm823_vm1, %v2336_v43 }
 0x5c0   : > { %2990 = vmatmul.mubr.msk.f32.gmra.mrb[14].mxu0 %vm823_vm1, %v2337_v56 }
 0x687   : > { %v2982_v27 = vpop.f32.mrb[8].mxu0 }
 0x688   : > { %v2476_v54 = vpop.f32.mrb[9].mxu0  ;;  %v2482_v10 = vadd.f32 %v2982_v27, %v2354_v1 }
 0x689   : > { %v2477_v44 = vadd.f32 %v2476_v54, %v2349_v30 }
 0x68b   : > { %v2985_v20 = vpop.f32.mrb[10].mxu0 }
 0x68c   : > { %v2486_v42 = vpop.f32.mrb[11].mxu0  ;;  %v2492_v15 = vadd.f32 %v2985_v20, %v2364_v2 }
 0x68d   : > { %v2487_v16 = vadd.f32 %v2486_v42, %v2359_v36 }
 0x68f   : > { %v2988_v48 = vpop.f32.mrb[12].mxu0 }
 0x690   : > { %v2502_v62 = vadd.f32 %v2988_v48, %v2374_v25  ;;  %v2496_v24 = vpop.f32.mrb[13].mxu0 }
 0x691   : > { %v2497_v52 = vadd.f32 %v2496_v24, %v2369_v55 }
 0x692   : > { %v2516_v0 = vmul.f32 %v2502_v62, %v2482_v10 }
 0x693   : > { %v2515_v6 = vmul.f32 %v2497_v52, %v2477_v44  ;;  %v2991_v47 = vpop.f32.mrb[14].mxu0 }
 0x694   : > { %v2512_v60 = vadd.f32 %v2991_v47, %v2384_v57  ;;  %v2506_v26 = vpop.f32.mrb[15].mxu0 }
 0x695   : > { %v2507_v33 = vadd.f32 %v2506_v26, %v2379_v59  ;;  %v3038_v9 = vpack.c.bf16 %v2516_v0, %v2515_v6 }
 0x696   : > { %v2518_v28 = vmul.f32 %v2512_v60, %v2492_v15 }
 0x697   : > { %v2517_v5 = vmul.f32 %v2507_v33, %v2487_v16  ;;  %3039 = vmatprep.subr.bf16.mxu1 %v3038_v9 }
 0x698   : > { %3041 = vmatpush3.bf16.msra.mxu1 %v3038_v9 }
 0x699   : > { %v3042_v40 = vpack.c.bf16 %v2518_v28, %v2517_v5 }
 0x69b   : > { %3043 = vmatprep.subr.bf16.mxu1 %v3042_v40 }
 0x69c   : > { %3045 = vmatpush3.bf16.msra.mxu1 %v3042_v40 }
 0x69f   : > { %3001 = vmatmul.mubr.msk.f32.vlgmr.msra.gmra.mrb[8].mxu1 %vm823_vm1, %v2520_v3 }
 0x6a0   : > { %3003 = vmatprep.mubr.msk.f32.mxu1 %vm823_vm1, %v2521_v34 }
 0x6a3   : > { %3004 = vmatmul.mubr.msk.f32.gmra.mrb[10].mxu1 %vm823_vm1, %v2522_v35 }
 0x772   : > { %v3002_v11 = vpop.f32.mrb[8].mxu1 }
 0x773   : > { %v2631_v45 = vadd.f32 %v3002_v11, %v2535_v61  ;;  %v2625_v4 = vpop.f32.mrb[9].mxu1 }
 0x774   : > { %v2626_v8 = vadd.f32 %v2625_v4, %v2530_v14 }
 0x775   : > { %v2669_v12 = vmul.f32 %v2656_v38, %v2631_v45 }
 0x776   : > { %v2668_v46 = vmul.f32 %v2651_v32, %v2626_v8  ;;  %v3005_v17 = vpop.f32.mrb[10].mxu1 }
 0x777   : > { %v2673_v37 = vadd.f32 %v2669_v12, %v4285_v51  ;;  %v2641_v18 = vadd.f32 %v3005_v17, %v2545_v7  ;;  %v2635_v49 = vpop.f32.mrb[11].mxu1 }
 0x778   : > { %v2672_v63 = vadd.f32 %v2668_v46, %v4288_v58  ;;  %v2636_v50 = vadd.f32 %v2635_v49, %v2540_v31 }
 0x779   : > { %v2864_v19 = vpack.c.bf16 %v2673_v37, %v2673_v37  ;;  %v2671_v53 = vmul.f32 %v2666_v39, %v2641_v18 }
 0x77a   : > { %v2863_v13 = vpack.c.bf16 %v2672_v63, %v2672_v63  ;;  %v2670_v41 = vmul.f32 %v2661_v23, %v2636_v50 }
 0x77b   : > { %2694 = vst.msk [vmem:[%s656_s0 + $0x4] sm:$0xf] %vm2692_vm10, %v2864_v19  ;;  %v2675_v51 = vadd.f32 %v2671_v53, %v4295_v21 }
 0x77c   : > { %2693 = vst.msk [vmem:[%s656_s0] sm:$0xf] %vm2692_vm10, %v2863_v13  ;;  %v2674_v43 = vadd.f32 %v2670_v41, %v4298_v22 }
 0x77d   : > { %v2866_v56 = vpack.c.bf16 %v2675_v51, %v2675_v51 }
 0x77e   : > { %v2865_v29 = vpack.c.bf16 %v2674_v43, %v2674_v43 }
 0x77f   : > { %2696 = vst.msk [vmem:[%s656_s0 + $0xc] sm:$0xf] %vm2692_vm10, %v2866_v56 }
 0x780   : > { %2695 = vst.msk [vmem:[%s656_s0 + $0x8] sm:$0xf] %vm2692_vm10, %v2865_v29 }
 0x781 PF: > { %s31_s2 = sadd.s32 1, %s3075_s2  }
 0x782   : > { %p28_p4 = scmp.ge.s32.totalorder %s31_s2, 4  }
 0x784   :  { %30 = sbr.rel (!%p28_p4) target bundleno = 7 (0x7), region = 142 }

// kernel: nafnet_refine_forward.18
= control target key start
LH: loop header
LB: loop body
LE: loop exit
PB: predicated region body
PF: predicated region fallthrough
CT: control target
= control target key end

     0   :  { %s2874_s0 = inlined_call_operand.vmem [shape: bf16[2,16,64], index: 0, kind: input, shape index: {}]   ;;  %s2875_s1 = inlined_call_operand.vmem [shape: bf16[2,16,64], index: 1, kind: input, shape index: {}]   ;;  %s2876_s2 = inlined_call_operand.vmem [shape: f32[1,64], index: 2, kind: input, shape index: {}]   ;;  %s2877_s3 = inlined_call_operand.vmem [shape: f32[1,64], index: 3, kind: input, shape index: {}]   ;;  %s2878_s4 = inlined_call_operand.vmem [shape: f32[16,1], index: 4, kind: input, shape index: {}, may-alias: {4,15}]   ;;  %s2879_s5 = inlined_call_operand.vmem [shape: f32[16,1], index: 5, kind: input, shape index: {}, may-alias: {5,16}]   ;;  %s2880_s6 = inlined_call_operand.vmem [shape: f32[32,16], index: 6, kind: input, shape index: {}]   ;;  %s2881_s7 = inlined_call_operand.vmem [shape: f32[32,1], index: 7, kind: input, shape index: {}]   ;;  %s2882_s8 = inlined_call_operand.vmem [shape: f32[9,32,1], index: 8, kind: input, shape index: {}]   ;;  %s2883_s9 = inlined_call_operand.vmem [shape: f32[32,1], index: 9, kind: input, shape index: {}]   ;;  %s2884_s10 = inlined_call_operand.vmem [shape: f32[16,16], index: 10, kind: input, shape index: {}]   ;;  %s2885_s11 = inlined_call_operand.vmem [shape: f32[16,1], index: 11, kind: input, shape index: {}]   ;;  %s2886_s12 = inlined_call_operand.vmem [shape: f32[16,16], index: 12, kind: input, shape index: {}]   ;;  %s2887_s13 = inlined_call_operand.vmem [shape: f32[16,1], index: 13, kind: input, shape index: {}]   ;;  %s2888_s14 = inlined_call_operand.vmem [shape: f32[16,1], index: 14, kind: input, shape index: {}]   ;;  %s2889_s15 = inlined_call_operand.vmem [shape: f32[16,1], index: 15, kind: input, shape index: {}, may-alias: {4,15}]   ;;  %s2890_s16 = inlined_call_operand.vmem [shape: f32[16,1], index: 16, kind: input, shape index: {}, may-alias: {5,16}]   ;;  %s2891_s17 = inlined_call_operand.vmem [shape: f32[32,16], index: 17, kind: input, shape index: {}]   ;;  %s2892_s18 = inlined_call_operand.vmem [shape: f32[32,1], index: 18, kind: input, shape index: {}]   ;;  %s2893_s19 = inlined_call_operand.vmem [shape: f32[16,16], index: 19, kind: input, shape index: {}]   ;;  %s2894_s20 = inlined_call_operand.vmem [shape: f32[16,1], index: 20, kind: input, shape index: {}]   ;;  %s2895_s21 = inlined_call_operand.vmem [shape: f32[16,1], index: 21, kind: input, shape index: {}]   ;;  %s2896_s22 = inlined_call_operand.vmem [shape: bf16[2,16,64], index: 22, kind: output, shape index: {}]  }
   0x1   :  { %2903 = sst [smem:[#allocation3_spill]] %s2874_s0 }
   0x2   :  { %2904 = sst [smem:[#allocation4_spill]] %s2875_s1 }
   0x3   :  { %2905 = sst [smem:[#allocation5_spill]] %s2876_s2 }
   0x4   :  { %2906 = sst [smem:[#allocation6_spill]] %s2877_s3  ;;  %s2307_s3 = smov 0  }
   0x5   :  { %2907 = sst [smem:[#allocation7_spill]] %s2878_s4 }
   0x6   :  { %2908 = sst [smem:[#allocation8_spill]] %s2879_s5 }
   0x7   :  { %2909 = sst [smem:[#allocation9_spill]] %s2880_s6 }
   0x8   :  { %2910 = sst [smem:[#allocation10_spill]] %s2881_s7 }
   0x9 LB: > { %2911 = sst [smem:[#allocation2_spill]] %s2181_s3  ;;  %s1991_s28 = sadd.s32 4294967295, %s2181_s3   ;;  %s2181_s3 = sphi %s2307_s3, %s32_s3  }
   0xa   : > { %p1995_p0 = scmp.ge.s32.totalorder %s2181_s3, 1  ;;  %p622_p1 = scmp.lt.s32.totalorder %s2181_s3, 3 }
   0xc   : > { %p623_p2 = pnand %p1995_p0, %p622_p1 }
   0xd   : > { %s2912_s4 = sld [smem:[#allocation8_spill]] (!%p623_p2)  ;;  %s2913_s1 = sld [smem:[#allocation7_spill]] (!%p623_p2)  ;;  %v2183_v2 = vmov (!%p623_p2), 0   ;;  %vm802_vm0 = vcmask (!%p623_p2), 130048   ;;  %v932_v9 = vld [vmem:[%s2882_s8 + $0x8] sm:$0xff] (!%p623_p2)  ;;  %v931_v10 = vld [vmem:[%s2882_s8] sm:$0xff] (!%p623_p2) }
   0xe   : > { %626 = sbr.rel (%p623_p2) target bundleno = 1807 (0x70f), region = 108  ;;  %2170 = vset.pattern.permute.xlu1 (!%p623_p2), %v2183_v2  ;;  %2169 = vset.pattern.permute.xlu0 (!%p623_p2), %v2183_v2  ;;  %s2914_s7 = sld [smem:[#allocation10_spill]] (!%p623_p2)  ;;  %v934_v12 = vld [vmem:[%s2882_s8 + $0x18] sm:$0xff] (!%p623_p2)  ;;  %v933_v13 = vld [vmem:[%s2882_s8 + $0x10] sm:$0xff] (!%p623_p2)  ;;  %v2008_v16 = vld [vmem:[%s2882_s8 + $0x28] sm:$0xff] (!%p623_p2)  ;;  %vm716_vm1 = vcmask (!%p623_p2), 523264  }
   0xf   : > { %p689_p3 = scmp.lt.s32.totalorder (!%p623_p2), %s1991_s28, 1  ;;  %s2915_s30 = sld [smem:[#allocation9_spill]] (!%p623_p2)  ;;  %v2007_v17 = vld [vmem:[%s2882_s8 + $0x20] sm:$0xff] (!%p623_p2)  ;;  %v2010_v22 = vld [vmem:[%s2882_s8 + $0x38] sm:$0xff] (!%p623_p2)  ;;  %v2009_v23 = vld [vmem:[%s2882_s8 + $0x30] sm:$0xff] (!%p623_p2)  ;;  %vm916_vm2 = vcmask (!%p623_p2), 72704  }
  0x10   : > { %s2916_s25 = sld [smem:[#allocation3_spill]] (!%p623_p2)  ;;  %v2013_v26 = vld [vmem:[%s2882_s8 + $0x48] sm:$0xff] (!%p623_p2)  ;;  %v2012_v27 = vld [vmem:[%s2882_s8 + $0x40] sm:$0xff] (!%p623_p2)  ;;  %v2015_v30 = vld [vmem:[%s2882_s8 + $0x58] sm:$0xff] (!%p623_p2)  ;;  %s2184_s5 = smov (!%p623_p2), 9   ;;  %vm975_vm3 = vcmask (!%p623_p2), 64512  }
  0x11   : > { %v2014_v31 = vld [vmem:[%s2882_s8 + $0x50] sm:$0xff] (!%p623_p2)  ;;  %v2017_v33 = vld [vmem:[%s2882_s8 + $0x68] sm:$0xff] (!%p623_p2)  ;;  %v2016_v34 = vld [vmem:[%s2882_s8 + $0x60] sm:$0xff] (!%p623_p2)  ;;  %s2186_s24 = smov (!%p623_p2), 7   ;;  %s2189_s3 = smov (!%p623_p2), 121   ;;  %vm1025_vm4 = vcmask (!%p623_p2), 56320  }
  0x12   : > { %v2019_v36 = vld [vmem:[%s2882_s8 + $0x78] sm:$0xff] (!%p623_p2)  ;;  %v2018_v37 = vld [vmem:[%s2882_s8 + $0x70] sm:$0xff] (!%p623_p2)  ;;  %v2021_v39 = vld [vmem:[%s2882_s8 + $0x88] sm:$0xff] (!%p623_p2)  ;;  %s2191_s6 = smov (!%p623_p2), 119   ;;  %vm1085_vm5 = vcmask (!%p623_p2), 7168   ;;  %vm1172_vm6 = vcmask (!%p623_p2), 515072  }
  0x13   : > { %v760_v0 = vld [vmem:[%s2912_s4] sm:$0xff] (!%p623_p2)  ;;  %v761_v3 = vld [vmem:[%s2912_s4 + $0x8] sm:$0xff] (!%p623_p2)  ;;  %v2023_v42 = vld [vmem:[%s2882_s8 + $0x98] sm:$0xff] (!%p623_p2)  ;;  %vm1226_vm7 = vcmask (!%p623_p2), 465920   ;;  %vm1280_vm8 = vcmask (!%p623_p2), 457728   ;;  %vm1330_vm9 = vcmask (!%p623_p2), 449536  }
  0x14   : > { %v746_v1 = vld [vmem:[%s2913_s1] sm:$0xff] (!%p623_p2)  ;;  %764 = vperm.xlu1 (!%p623_p2), %2170, %v760_v0   ;;  %v747_v4 = vld [vmem:[%s2913_s1 + $0x8] sm:$0xff] (!%p623_p2)  ;;  %v781_v7 = vld [vmem:[%s2914_s7 + $0x18] sm:$0xff] (!%p623_p2)  ;;  %s2917_s1 = sld [smem:[#allocation4_spill]] (!%p623_p2)  ;;  %vm1921_vm10 = vcmask (!%p623_p2), 519168  }
  0x15   : > { %750 = vperm.xlu0 %2169, %v746_v1   ;;  %v779_v5 = vld [vmem:[%s2914_s7 + $0x8] sm:$0xff]  ;;  %v778_v6 = vld [vmem:[%s2914_s7] sm:$0xff]  ;;  %v780_v8 = vld [vmem:[%s2914_s7 + $0x10] sm:$0xff]  ;;  %s2922_s28 = smov (!%p689_p3, %s1991_s28), 1  ;;  %s2188_s7 = smov 127  }
  0x16   : > { %s2345_s2 = sshll.u32 %s2922_s28, 3  ;;  %v774_v11 = vld [vmem:[%s2915_s30] sm:$0xff]  ;;  %v2022_v43 = vld [vmem:[%s2882_s8 + $0x90] sm:$0xff]  ;;  %v2025_v45 = vld [vmem:[%s2882_s8 + $0xa8] sm:$0xff]  ;;  %s2190_s28 = smov 120  }
  0x17   : > { %2095 = vmatprep.mubr.msk.f32.mxu0 %vm802_vm0, %v774_v11  ;;  %s693_s26 = scalar_lea.vmem %s2916_s25, %s2345_s2  ;;  %v2020_v40 = vld [vmem:[%s2882_s8 + $0x80] sm:$0xff]  ;;  %v2027_v48 = vld [vmem:[%s2882_s8 + $0xb8] sm:$0xff]  ;;  %v2026_v49 = vld [vmem:[%s2882_s8 + $0xb0] sm:$0xff] }
  0x18   : > { %769 = vperm.xlu1 %2170, %v761_v3   ;;  %v2060_v14 = vld [vmem:[%s693_s26] sm:$0xff]   ;;  %v2029_v51 = vld [vmem:[%s2882_s8 + $0xc8] sm:$0xff]  ;;  %v2031_v54 = vld [vmem:[%s2882_s8 + $0xd8] sm:$0xff] }
  0x19   : > { %755 = vperm.xlu0 %2169, %v747_v4   ;;  %v2061_v18 = vunpack.c.l.bf16 %v2060_v14  ;;  %v2062_v19 = vunpack.c.h.bf16 %v2060_v14  ;;  %v2024_v46 = vld [vmem:[%s2882_s8 + $0xa0] sm:$0xff]  ;;  %v2030_v55 = vld [vmem:[%s2882_s8 + $0xd0] sm:$0xff]  ;;  %v2033_v58 = vld [vmem:[%s2882_s8 + $0xe8] sm:$0xff] }
  0x1a   : > { %s698_s4 = scalar_lea.vmem %s2917_s1, %s2345_s2  ;;  %v2028_v52 = vld [vmem:[%s2882_s8 + $0xc0] sm:$0xff]  ;;  %v2035_v62 = vld [vmem:[%s2882_s8 + $0xf8] sm:$0xff]  ;;  %v2034_v63 = vld [vmem:[%s2882_s8 + $0xf0] sm:$0xff]  ;;  %s2185_s1 = smov 8  }
  0x1b   : > { %v2064_v15 = vld [vmem:[%s698_s4] sm:$0xff]   ;;  %v2037_v2 = vld [vmem:[%s2882_s8 + $0x108] sm:$0xff]  ;;  %s2187_s4 = smov 1  }
  0x1c   : > { %789 = vperm.xlu1 %2170, %v779_v5   ;;  %v2065_v20 = vunpack.c.l.bf16 %v2064_v15  ;;  %v2066_v21 = vunpack.c.h.bf16 %v2064_v15  ;;  %v2032_v59 = vld [vmem:[%s2882_s8 + $0xe0] sm:$0xff]  ;;  %v2039_v5 = vld [vmem:[%s2882_s8 + $0x118] sm:$0xff] }
  0x1d   : > { %784 = vperm.xlu0 %2169, %v778_v6   ;;  %v2036_v3 = vld [vmem:[%s2882_s8 + $0x100] sm:$0xff]  ;;  %v2038_v6 = vld [vmem:[%s2882_s8 + $0x110] sm:$0xff] }
  0x1e   : > { %v2377_v24 = vadd.f32 %v2065_v20, %v2061_v18  ;;  %v2379_v25 = vadd.f32 %v2066_v21, %v2062_v19 }
  0x20   : > { %799 = vperm.xlu1 %2170, %v781_v7   ;;  %v717_v28 = vsel %vm716_vm1, %v2377_v24, 0.0  ;;  %v718_v29 = vsel %vm716_vm1, %v2379_v25, 0.0 }
  0x21   : > { %794 = vperm.xlu0 %2169, %v780_v8   ;;  %v719_v32 = vadd.f32 %v718_v29, %v717_v28  ;;  %v1373_v8 = vld [vmem:[%s2883_s9 + $0x8] sm:$0xff] }
  0x23   : > { %v720_v35 = vrot.slane %v719_v32, 4 }
  0x24   : > { %942 = vperm.xlu1 %2170, %v932_v9   ;;  %v1372_v9 = vld [vmem:[%s2883_s9] sm:$0xff] }
  0x25   : > { %937 = vperm.xlu0 %2169, %v931_v10   ;;  %v721_v38 = vadd.f32 %v720_v35, %v719_v32  ;;  %v776_v32 = vld [vmem:[%s2915_s30 + $0x10] sm:$0xff] }
  0x27   : > { %v722_v41 = vrot.slane %v721_v38, 2 }
  0x28   : > { %952 = vperm.xlu1 %2170, %v934_v12  }
  0x29   : > { %947 = vperm.xlu0 %2169, %v933_v13   ;;  %v723_v44 = vadd.f32 %v722_v41, %v721_v38 }
  0x2b   : > { %v724_v47 = vrot.slane %v723_v44, 1 }
  0x2c   : > { %992 = vperm.xlu1 %2170, %v2008_v16  }
  0x2d   : > { %987 = vperm.xlu0 %2169, %v2007_v17   ;;  %v725_v50 = vadd.f32 %v724_v47, %v723_v44 }
  0x2f   : > { %v727_v53 = vmul.f32 0.0625, %v725_v50 }
  0x30   : > { %1002 = vperm.xlu1 %2170, %v2010_v22  }
  0x31   : > { %997 = vperm.xlu0 %2169, %v2009_v23   ;;  %v728_v56 = vsub.f32 %v2377_v24, %v727_v53  ;;  %v729_v57 = vsub.f32 %v2379_v25, %v727_v53 }
  0x33   : > { %v730_v60 = vmul.f32 %v728_v56, %v728_v56  ;;  %v731_v61 = vmul.f32 %v729_v57, %v729_v57 }
  0x34   : > { %1052 = vperm.xlu1 %2170, %v2013_v26  }
  0x35   : > { %1047 = vperm.xlu0 %2169, %v2012_v27   ;;  %v732_v0 = vsel %vm716_vm1, %v730_v60, 0.0  ;;  %v733_v1 = vsel %vm716_vm1, %v731_v61, 0.0 }
  0x36   : > { %v734_v4 = vadd.f32 %v733_v1, %v732_v0 }
  0x38   : > { %1062 = vperm.xlu1 %2170, %v2015_v30   ;;  %v735_v7 = vrot.slane %v734_v4, 4 }
  0x39   : > { %1057 = vperm.xlu0 %2169, %v2014_v31   ;;  %v775_v31 = vld [vmem:[%s2915_s30 + $0x8] sm:$0xff] }
  0x3a   : > { %v736_v10 = vadd.f32 %v735_v7, %v734_v4  ;;  %v1374_v4 = vld [vmem:[%s2883_s9 + $0x10] sm:$0xff] }
  0x3c   : > { %1106 = vperm.xlu1 %2170, %v2017_v33   ;;  %v737_v11 = vrot.slane %v736_v10, 2  ;;  %v777_v33 = vld [vmem:[%s2915_s30 + $0x18] sm:$0xff] }
  0x3d   : > { %1101 = vperm.xlu0 %2169, %v2016_v34  }
  0x3e   : > { %v738_v12 = vadd.f32 %v737_v11, %v736_v10 }
  0x40   : > { %1116 = vperm.xlu1 %2170, %v2019_v36   ;;  %v739_v13 = vrot.slane %v738_v12, 1 }
  0x41   : > { %1111 = vperm.xlu0 %2169, %v2018_v37  }
  0x42   : > { %v740_v14 = vadd.f32 %v739_v13, %v738_v12 }
  0x44   : > { %1139 = vperm.xlu1 %2170, %v2021_v39   ;;  %v741_v15 = vmul.f32 0.0625, %v740_v14 }
  0x45   : > { %1134 = vperm.xlu0 %2169, %v2020_v40  }
  0x46   : > { %v742_v16 = vadd.f32 1e-06, %v741_v15 }
  0x48   : > { %1149 = vperm.xlu1 %2170, %v2023_v42   ;;  %2171 = vrsqrt.f32 %v742_v16 }
  0x49   : > { %1144 = vperm.xlu0 %2169, %v2022_v43  }
  0x4c   : > { %1193 = vperm.xlu1 %2170, %v2025_v45  }
  0x4d   : > { %1188 = vperm.xlu0 %2169, %v2024_v46  }
  0x50   : > { %1203 = vperm.xlu1 %2170, %v2027_v48  }
  0x51   : > { %1198 = vperm.xlu0 %2169, %v2026_v49  }
  0x52   : > { %v2172_v17 = vpop.eup %2171 }
  0x53   : > { %v744_v18 = vmul.f32 %v2172_v17, %v728_v56  ;;  %v745_v21 = vmul.f32 %v2172_v17, %v729_v57 }
  0x54   : > { %1247 = vperm.xlu1 %2170, %v2029_v51  }
  0x55   : > { %1242 = vperm.xlu0 %2169, %v2028_v52  }
  0x58   : > { %1257 = vperm.xlu1 %2170, %v2031_v54  }
  0x59   : > { %1252 = vperm.xlu0 %2169, %v2030_v55  }
  0x5c   : > { %1297 = vperm.xlu1 %2170, %v2033_v58  }
  0x5d   : > { %1292 = vperm.xlu0 %2169, %v2032_v59  }
  0x60   : > { %1307 = vperm.xlu1 %2170, %v2035_v62  }
  0x61   : > { %1302 = vperm.xlu0 %2169, %v2034_v63  }
  0x64   : > { %1351 = vperm.xlu1 %2170, %v2037_v2   ;;  %v1375_v2 = vld [vmem:[%s2883_s9 + $0x18] sm:$0xff] }
  0x65   : > { %1346 = vperm.xlu0 %2169, %v2036_v3  }
  0x68   : > { %1361 = vperm.xlu1 %2170, %v2039_v5  }
  0x69   : > { %1356 = vperm.xlu0 %2169, %v2038_v6  }
  0x6c   : > { %1383 = vperm.xlu1 %2170, %v1373_v8  }
  0x6d   : > { %1378 = vperm.xlu0 %2169, %v1372_v9  }
  0x93   : > { %v765_v19 = vpop.permute.xlu1 %764 }
  0x94   : > { %v751_v20 = vpop.permute.xlu0 %750 }
  0x95   : > { %v758_v22 = vmul.f32 %v751_v20, %v744_v18 }
  0x97   : > { %v770_v27 = vpop.permute.xlu1 %769  ;;  %v772_v29 = vadd.f32 %v765_v19, %v758_v22 }
  0x98   : > { %v756_v23 = vpop.permute.xlu0 %755 }
  0x99   : > { %v759_v26 = vmul.f32 %v756_v23, %v745_v21 }
  0x9b   : > { %v773_v28 = vadd.f32 %v770_v27, %v759_v26  ;;  %v790_v34 = vpop.permute.xlu1 %789 }
  0x9c   : > { %v785_v35 = vpop.permute.xlu0 %784 }
  0x9d   : > { %v2132_v30 = vpack.c.bf16 %v773_v28, %v772_v29 }
  0x9f   : > { %2133 = vmatprep.subr.bf16.mxu0 %v2132_v30  ;;  %v800_v36 = vpop.permute.xlu1 %799 }
  0xa0   : > { %2135 = vmatpush3.bf16.msra.mxu0 %v2132_v30  ;;  %v795_v37 = vpop.permute.xlu0 %794 }
  0xa3   : > { %2096 = vmatmul.mubr.msk.f32.vlgmr.msra.gmra.mrb[0].mxu0 %vm802_vm0, %v775_v31  ;;  %v2499_v43 = vpop.permute.xlu1 %942 }
  0xa4   : > { %2098 = vmatprep.mubr.msk.f32.mxu0 %vm802_vm0, %v776_v32  ;;  %v2501_v45 = vpop.permute.xlu0 %937 }
  0xa7   : > { %2099 = vmatmul.mubr.msk.f32.gmra.mrb[2].mxu0 %vm802_vm0, %v777_v33  ;;  %v2507_v46 = vpop.permute.xlu1 %952 }
  0xa8   : > { %v2511_v47 = vpop.permute.xlu0 %947 }
  0xab   : > { %v2519_v48 = vpop.permute.xlu1 %992 }
  0xac   : > { %v2521_v49 = vpop.permute.xlu0 %987 }
  0xaf   : > { %v2527_v50 = vpop.permute.xlu1 %1002 }
  0xb0   : > { %v2531_v51 = vpop.permute.xlu0 %997 }
  0xb3   : > { %v2539_v52 = vpop.permute.xlu1 %1052 }
  0xb4   : > { %v2541_v53 = vpop.permute.xlu0 %1047 }
  0xb7   : > { %v2549_v56 = vpop.permute.xlu1 %1062 }
  0xb8   : > { %v2553_v57 = vpop.permute.xlu0 %1057 }
  0xbb   : > { %v2561_v58 = vpop.permute.xlu1 %1106 }
  0xbc   : > { %v2563_v59 = vpop.permute.xlu0 %1101 }
  0xbf   : > { %v2569_v60 = vpop.permute.xlu1 %1116 }
  0xc0   : > { %v2573_v61 = vpop.permute.xlu0 %1111 }
  0xc3   : > { %v2581_v62 = vpop.permute.xlu1 %1139 }
  0xc4   : > { %v2583_v63 = vpop.permute.xlu0 %1134 }
  0xc7   : > { %v2589_v0 = vpop.permute.xlu1 %1149 }
  0xc8   : > { %v2593_v1 = vpop.permute.xlu0 %1144 }
  0xcb   : > { %v2602_v3 = vpop.permute.xlu1 %1193 }
  0xcc   : > { %v2607_v5 = vpop.permute.xlu0 %1188 }
  0xcf   : > { %v2609_v6 = vpop.permute.xlu1 %1203 }
  0xd0   : > { %v2611_v7 = vpop.permute.xlu0 %1198 }
  0xd3   : > { %v2613_v8 = vpop.permute.xlu1 %1247 }
  0xd4   : > { %v2615_v9 = vpop.permute.xlu0 %1242 }
  0xd7   : > { %v2617_v10 = vpop.permute.xlu1 %1257 }
  0xd8   : > { %v2619_v11 = vpop.permute.xlu0 %1252 }
  0xdb   : > { %v2621_v12 = vpop.permute.xlu1 %1297 }
  0xdc   : > { %v2623_v13 = vpop.permute.xlu0 %1292 }
  0xdf   : > { %v2625_v14 = vpop.permute.xlu1 %1307 }
  0xe0   : > { %v2627_v15 = vpop.permute.xlu0 %1302 }
  0xe3   : > { %v2629_v16 = vpop.permute.xlu1 %1351 }
  0xe4   : > { %v2631_v17 = vpop.permute.xlu0 %1346 }
  0xe7   : > { %v2633_v18 = vpop.permute.xlu1 %1361 }
  0xe8   : > { %v2635_v19 = vpop.permute.xlu0 %1356 }
  0xeb   : > { %v2637_v20 = vpop.permute.xlu1 %1383 }
  0xec   : > { %v2639_v21 = vpop.permute.xlu0 %1378 }
 0x176   : > { %v2097_v38 = vpop.f32.mrb[0].mxu0 }
 0x177   : > { %v2491_v39 = vadd.f32 %v2097_v38, %v790_v34  ;;  %v881_v40 = vpop.f32.mrb[1].mxu0 }
 0x178   : > { %v2493_v41 = vadd.f32 %v881_v40, %v785_v35 }
 0x179   : > { %906 = vrot.lane.b32.xlu1 %v2491_v39, %s2184_s5 }
 0x17a   : > { %v2100_v42 = vpop.f32.mrb[2].mxu0  ;;  %904 = vrot.lane.b32.xlu0 %v2493_v41, %s2184_s5 }
 0x17b   : > { %v891_v44 = vpop.f32.mrb[3].mxu0  ;;  %v2545_v54 = vadd.f32 %v2100_v42, %v800_v36 }
 0x17c   : > { %v2547_v55 = vadd.f32 %v891_v44, %v795_v37 }
 0x17d   : > { %965 = vrot.lane.b32.xlu1 %v2491_v39, %s2185_s1 }
 0x17e   : > { %963 = vrot.lane.b32.xlu0 %v2493_v41, %s2185_s1 }
 0x181   : > { %1015 = vrot.lane.b32.xlu1 %v2491_v39, %s2186_s24 }
 0x182   : > { %1013 = vrot.lane.b32.xlu0 %v2493_v41, %s2186_s24 }
 0x185   : > { %1075 = vrot.lane.b32.xlu1 %v2491_v39, %s2187_s4 }
 0x186   : > { %1073 = vrot.lane.b32.xlu0 %v2493_v41, %s2187_s4 }
 0x189   : > { %1162 = vrot.lane.b32.xlu1 %v2491_v39, %s2188_s7 }
 0x18a   : > { %1160 = vrot.lane.b32.xlu0 %v2493_v41, %s2188_s7 }
 0x18d   : > { %1216 = vrot.lane.b32.xlu1 %v2491_v39, %s2189_s3 }
 0x18e   : > { %1214 = vrot.lane.b32.xlu0 %v2493_v41, %s2189_s3 }
 0x191   : > { %1270 = vrot.lane.b32.xlu1 %v2491_v39, %s2190_s28 }
 0x192   : > { %1268 = vrot.lane.b32.xlu0 %v2493_v41, %s2190_s28 }
 0x195   : > { %1320 = vrot.lane.b32.xlu1 %v2491_v39, %s2191_s6 }
 0x196   : > { %1318 = vrot.lane.b32.xlu0 %v2493_v41, %s2191_s6 }
 0x199   : > { %910 = vrot.lane.b32.xlu1 %v2545_v54, %s2184_s5 }
 0x19a   : > { %908 = vrot.lane.b32.xlu0 %v2547_v55, %s2184_s5  ;;  %s2918_s5 = sld [smem:[#allocation5_spill]] }
 0x19d   : > { %969 = vrot.lane.b32.xlu1 %v2545_v54, %s2185_s1 }
 0x19e   : > { %967 = vrot.lane.b32.xlu0 %v2547_v55, %s2185_s1 }
 0x1a0   : > { %v2644_v27 = vld [vmem:[%s2918_s5] ss:$0 sm:$0xff] }
 0x1a1   : > { %1019 = vrot.lane.b32.xlu1 %v2545_v54, %s2186_s24 }
 0x1a2   : > { %1017 = vrot.lane.b32.xlu0 %v2547_v55, %s2186_s24 }
 0x1a5   : > { %1079 = vrot.lane.b32.xlu1 %v2545_v54, %s2187_s4 }
 0x1a6   : > { %1077 = vrot.lane.b32.xlu0 %v2547_v55, %s2187_s4  ;;  %s2919_s4 = sld [smem:[#allocation6_spill]] }
 0x1a9   : > { %1166 = vrot.lane.b32.xlu1 %v2545_v54, %s2188_s7 }
 0x1aa   : > { %1164 = vrot.lane.b32.xlu0 %v2547_v55, %s2188_s7 }
 0x1ac   : > { %v2652_v32 = vld [vmem:[%s2919_s4] ss:$0 sm:$0xff] }
 0x1ad   : > { %1220 = vrot.lane.b32.xlu1 %v2545_v54, %s2189_s3 }
 0x1ae   : > { %1218 = vrot.lane.b32.xlu0 %v2547_v55, %s2189_s3 }
 0x1b1   : > { %1274 = vrot.lane.b32.xlu1 %v2545_v54, %s2190_s28 }
 0x1b2   : > { %1272 = vrot.lane.b32.xlu0 %v2547_v55, %s2190_s28  ;;  %s703_s28 = scalar_lea.vmem %s2896_s22, %s2345_s2 }
 0x1b5   : > { %1324 = vrot.lane.b32.xlu1 %v2545_v54, %s2191_s6 }
 0x1b6   : > { %1322 = vrot.lane.b32.xlu0 %v2547_v55, %s2191_s6 }
 0x1b9   : > { %1393 = vperm.xlu1 %2170, %v1375_v2  }
 0x1ba   : > { %1388 = vperm.xlu0 %2169, %v1374_v4  }
 0x1eb   : > { %v907_v22 = vpop.permute.xlu1 %906 }
 0x1ec   : > { %v905_v23 = vpop.permute.xlu0 %904  ;;  %v918_v28 = vsel %vm916_vm2, 0.0, %v907_v22 }
 0x1ed   : > { %v917_v30 = vsel %vm916_vm2, 0.0, %v905_v23  ;;  %v928_v33 = vmul.f32 %v2644_v27, %v918_v28 }
 0x1ee   : > { %v927_v36 = vmul.f32 %v2644_v27, %v917_v30 }
 0x1ef   : > { %v966_v26 = vpop.permute.xlu1 %965  ;;  %v956_v22 = vmul.f32 %v2499_v43, %v928_v33 }
 0x1f0   : > { %v964_v29 = vpop.permute.xlu0 %963  ;;  %v977_v31 = vsel %vm975_vm3, 0.0, %v966_v26  ;;  %v955_v28 = vmul.f32 %v2501_v45, %v927_v36 }
 0x1f1   : > { %v976_v34 = vsel %vm975_vm3, 0.0, %v964_v29  ;;  %v1006_v40 = vmul.f32 %v2519_v48, %v977_v31 }
 0x1f2   : > { %v1005_v2 = vmul.f32 %v2521_v49, %v976_v34 }
 0x1f3   : > { %v1016_v35 = vpop.permute.xlu1 %1015  ;;  %v1010_v31 = vadd.f32 %v1006_v40, %v956_v22  ;;  %v1153_v22 = vmul.f32 %v2581_v62, %v2491_v39 }
 0x1f4   : > { %v1027_v37 = vsel %vm1025_vm4, 0.0, %v1016_v35  ;;  %v1014_v38 = vpop.permute.xlu0 %1013  ;;  %v1009_v49 = vadd.f32 %v1005_v2, %v955_v28 }
 0x1f5   : > { %v1037_v42 = vmul.f32 %v2652_v32, %v1027_v37  ;;  %v1026_v44 = vsel %vm1025_vm4, 0.0, %v1014_v38 }
 0x1f6   : > { %v1036_v4 = vmul.f32 %v2652_v32, %v1026_v44 }
 0x1f7   : > { %v1066_v23 = vmul.f32 %v2539_v52, %v1037_v42  ;;  %v1076_v26 = vpop.permute.xlu1 %1075 }
 0x1f8   : > { %v1065_v29 = vmul.f32 %v2541_v53, %v1036_v4  ;;  %v1087_v48 = vsel %vm1085_vm5, 0.0, %v1076_v26  ;;  %v1074_v30 = vpop.permute.xlu0 %1073 }
 0x1f9   : > { %v1091_v35 = vmul.f32 %v2644_v27, %v1087_v48  ;;  %v1086_v37 = vsel %vm1085_vm5, 0.0, %v1074_v30  ;;  %v1070_v43 = vadd.f32 %v1066_v23, %v1010_v31  ;;  %v1152_v23 = vmul.f32 %v2583_v63, %v2493_v41 }
 0x1fa   : > { %v1090_v34 = vmul.f32 %v2644_v27, %v1086_v37  ;;  %v1069_v38 = vadd.f32 %v1065_v29, %v1009_v49 }
 0x1fb   : > { %v1120_v52 = vmul.f32 %v2561_v58, %v1091_v35  ;;  %v1163_v33 = vpop.permute.xlu1 %1162 }
 0x1fc   : > { %v1119_v45 = vmul.f32 %v2563_v59, %v1090_v34  ;;  %v1174_v53 = vsel %vm1172_vm6, %v1163_v33, 0.0  ;;  %v1161_v36 = vpop.permute.xlu0 %1160 }
 0x1fd   : > { %v1124_v42 = vadd.f32 %v1120_v52, %v1070_v43  ;;  %v1178_v40 = vmul.f32 %v2652_v32, %v1174_v53  ;;  %v1173_v44 = vsel %vm1172_vm6, %v1161_v36, 0.0 }
 0x1fe   : > { %v1123_v4 = vadd.f32 %v1119_v45, %v1069_v38  ;;  %v1177_v2 = vmul.f32 %v2652_v32, %v1173_v44 }
 0x1ff   : > { %v1217_v58 = vpop.permute.xlu1 %1216  ;;  %v1157_v28 = vadd.f32 %v1153_v22, %v1124_v42  ;;  %v1207_v29 = vmul.f32 %v2602_v3, %v1178_v40 }
 0x200   : > { %v1228_v59 = vsel %vm1226_vm7, %v1217_v58, 0.0  ;;  %v1215_v26 = vpop.permute.xlu0 %1214  ;;  %v1156_v31 = vadd.f32 %v1152_v23, %v1123_v4  ;;  %v1206_v35 = vmul.f32 %v2607_v5, %v1177_v2 }
 0x201   : > { %v1232_v48 = vmul.f32 %v2644_v27, %v1228_v59  ;;  %v1227_v30 = vsel %vm1226_vm7, %v1215_v26, 0.0  ;;  %v1211_v34 = vadd.f32 %v1207_v29, %v1157_v28 }
 0x202   : > { %v1231_v39 = vmul.f32 %v2644_v27, %v1227_v30  ;;  %v1210_v43 = vadd.f32 %v1206_v35, %v1156_v31 }
 0x203   : > { %v1261_v62 = vmul.f32 %v2613_v8, %v1232_v48  ;;  %v1271_v37 = vpop.permute.xlu1 %1270 }
 0x204   : > { %v1260_v41 = vmul.f32 %v2615_v9, %v1231_v39  ;;  %v1282_v63 = vsel %vm1280_vm8, %v1271_v37, 0.0  ;;  %v1269_v49 = vpop.permute.xlu0 %1268 }
 0x205   : > { %v1281_v3 = vsel %vm1280_vm8, %v1269_v49, 0.0  ;;  %v1265_v52 = vadd.f32 %v1261_v62, %v1211_v34  ;;  %v1311_v33 = vmul.f32 %v2621_v12, %v1282_v63 }
 0x206   : > { %v1264_v5 = vadd.f32 %v1260_v41, %v1210_v43  ;;  %v1310_v45 = vmul.f32 %v2623_v13, %v1281_v3 }
 0x207   : > { %v1321_v38 = vpop.permute.xlu1 %1320  ;;  %v1315_v40 = vadd.f32 %v1311_v33, %v1265_v52 }
 0x208   : > { %v1332_v8 = vsel %vm1330_vm9, %v1321_v38, 0.0  ;;  %v1319_v53 = vpop.permute.xlu0 %1318  ;;  %v1314_v2 = vadd.f32 %v1310_v45, %v1264_v5 }
 0x209   : > { %v1336_v9 = vmul.f32 %v2652_v32, %v1332_v8  ;;  %v1331_v36 = vsel %vm1330_vm9, %v1319_v53, 0.0 }
 0x20a   : > { %v1335_v42 = vmul.f32 %v2652_v32, %v1331_v36 }
 0x20b   : > { %v1365_v44 = vmul.f32 %v2629_v16, %v1336_v9  ;;  %v911_v4 = vpop.permute.xlu1 %910 }
 0x20c   : > { %v1364_v12 = vmul.f32 %v2631_v17, %v1335_v42  ;;  %v909_v22 = vpop.permute.xlu0 %908  ;;  %v920_v16 = vsel %vm916_vm2, 0.0, %v911_v4 }
 0x20d   : > { %v1369_v58 = vadd.f32 %v1365_v44, %v1315_v40  ;;  %v919_v17 = vsel %vm916_vm2, 0.0, %v909_v22 }
 0x20e   : > { %v1368_v23 = vadd.f32 %v1364_v12, %v1314_v2  ;;  %v929_v3 = vmul.f32 %v2644_v27, %v919_v17 }
 0x20f   : > { %v970_v13 = vpop.permute.xlu1 %969  ;;  %v2700_v59 = vadd.f32 %v2637_v20, %v1369_v58 }
 0x210   : > { %v968_v26 = vpop.permute.xlu0 %967  ;;  %v2703_v28 = vadd.f32 %v2639_v21, %v1368_v23  ;;  %v979_v20 = vsel %vm975_vm3, 0.0, %v970_v13  ;;  %v930_v21 = vmul.f32 %v2644_v27, %v920_v16  ;;  %v957_v36 = vmul.f32 %v2511_v47, %v929_v3 }
 0x211   : > { %v978_v63 = vsel %vm975_vm3, 0.0, %v968_v26  ;;  %v1008_v52 = vmul.f32 %v2527_v50, %v979_v20 }
 0x212   : > { %v1007_v5 = vmul.f32 %v2531_v51, %v978_v63  ;;  %v958_v53 = vmul.f32 %v2507_v46, %v930_v21 }
 0x213   : > { %v1020_v29 = vpop.permute.xlu1 %1019 }
 0x214   : > { %v1018_v48 = vpop.permute.xlu0 %1017  ;;  %v1029_v35 = vsel %vm1025_vm4, 0.0, %v1020_v29  ;;  %v1012_v40 = vadd.f32 %v1008_v52, %v958_v53  ;;  %v1011_v4 = vadd.f32 %v1007_v5, %v957_v36 }
 0x215   : > { %v1028_v39 = vsel %vm1025_vm4, 0.0, %v1018_v48  ;;  %v1039_v49 = vmul.f32 %v2652_v32, %v1029_v35  ;;  %v1154_v48 = vmul.f32 %v2593_v1, %v2547_v55 }
 0x216   : > { %v1038_v43 = vmul.f32 %v2652_v32, %v1028_v39 }
 0x217   : > { %v1080_v30 = vpop.permute.xlu1 %1079  ;;  %v1068_v9 = vmul.f32 %v2549_v56, %v1039_v49 }
 0x218   : > { %v1078_v31 = vpop.permute.xlu0 %1077  ;;  %v1089_v37 = vsel %vm1085_vm5, 0.0, %v1080_v30  ;;  %v1067_v42 = vmul.f32 %v2553_v57, %v1038_v43 }
 0x219   : > { %v1088_v34 = vsel %vm1085_vm5, 0.0, %v1078_v31  ;;  %v1093_v33 = vmul.f32 %v2644_v27, %v1089_v37  ;;  %v1072_v22 = vadd.f32 %v1068_v9, %v1012_v40  ;;  %v1413_v40 = vld [vmem:[%s2885_s11] sm:$0xff] }
 0x21a   : > { %v1092_v45 = vmul.f32 %v2644_v27, %v1088_v34  ;;  %v1071_v46 = vadd.f32 %v1067_v42, %v1011_v4 }
 0x21b   : > { %v1167_v62 = vpop.permute.xlu1 %1166  ;;  %v1122_v44 = vmul.f32 %v2569_v60, %v1093_v33 }
 0x21c   : > { %v1165_v41 = vpop.permute.xlu0 %1164  ;;  %v1121_v2 = vmul.f32 %v2573_v61, %v1092_v45  ;;  %v1176_v51 = vsel %vm1172_vm6, %v1167_v62, 0.0  ;;  %v1155_v61 = vmul.f32 %v2589_v0, %v2545_v54 }
 0x21d   : > { %v1175_v58 = vsel %vm1172_vm6, %v1165_v41, 0.0  ;;  %v1126_v23 = vadd.f32 %v1122_v44, %v1072_v22  ;;  %v1180_v47 = vmul.f32 %v2652_v32, %v1176_v51  ;;  %v1511_v51 = vld [vmem:[%s2887_s13 + $0x8] sm:$0xff] }
 0x21e   : > { %v1125_v13 = vadd.f32 %v1121_v2, %v1071_v46  ;;  %v1179_v60 = vmul.f32 %v2652_v32, %v1175_v58  ;;  %v1604_v22 = vld [vmem:[%s2888_s14 + $0x8] sm:$0xff]  ;;  %v1603_v58 = vld [vmem:[%s2888_s14] sm:$0xff] }
 0x21f   : > { %v1221_v38 = vpop.permute.xlu1 %1220  ;;  %v1159_v16 = vadd.f32 %v1155_v61, %v1126_v23  ;;  %v1209_v35 = vmul.f32 %v2609_v6, %v1180_v47  ;;  %v1508_v46 = vld [vmem:[%s2886_s12] sm:$0xff]  ;;  %v1662_v47 = vld [vmem:[%s2890_s16 + $0x8] sm:$0xff]  ;;  %v1682_v61 = vld [vmem:[%s2892_s18 + $0x18] sm:$0xff] }
 0x220   : > { %v1219_v8 = vpop.permute.xlu0 %1218  ;;  %v1230_v56 = vsel %vm1226_vm7, %v1221_v38, 0.0  ;;  %v1158_v17 = vadd.f32 %v1154_v48, %v1125_v13  ;;  %v1208_v39 = vmul.f32 %v2611_v7, %v1179_v60  ;;  %v1647_v23 = vld [vmem:[%s2889_s15] sm:$0xff]  ;;  %v1680_v13 = vld [vmem:[%s2892_s18 + $0x8] sm:$0xff] }
 0x221   : > { %v1229_v57 = vsel %vm1226_vm7, %v1219_v8, 0.0  ;;  %v1234_v26 = vmul.f32 %v2644_v27, %v1230_v56  ;;  %v1213_v55 = vadd.f32 %v1209_v35, %v1159_v16  ;;  %v1648_v56 = vld [vmem:[%s2889_s15 + $0x8] sm:$0xff]  ;;  %v1679_v60 = vld [vmem:[%s2892_s18] sm:$0xff] }
 0x222   : > { %v1233_v30 = vmul.f32 %v2644_v27, %v1229_v57  ;;  %v1212_v41 = vadd.f32 %v1208_v39, %v1158_v17  ;;  %v1661_v57 = vld [vmem:[%s2890_s16] sm:$0xff] }
 0x223   : > { %v1275_v50 = vpop.permute.xlu1 %1274  ;;  %v1263_v20 = vmul.f32 %v2617_v10, %v1234_v26  ;;  %v1681_v26 = vld [vmem:[%s2892_s18 + $0x10] sm:$0xff]  ;;  %v1804_v48 = vld [vmem:[%s2894_s20] sm:$0xff] }
 0x224   : > { %v1273_v12 = vpop.permute.xlu0 %1272  ;;  %v1262_v0 = vmul.f32 %v2619_v11, %v1233_v30  ;;  %v1284_v37 = vsel %vm1280_vm8, %v1275_v50, 0.0  ;;  %v1898_v30 = vld [vmem:[%s2895_s21 + $0x8] sm:$0xff] }
 0x225   : > { %v1283_v1 = vsel %vm1280_vm8, %v1273_v12, 0.0  ;;  %v1267_v21 = vadd.f32 %v1263_v20, %v1213_v55  ;;  %v1313_v7 = vmul.f32 %v2625_v14, %v1284_v37  ;;  %v1510_v12 = vld [vmem:[%s2887_s13] sm:$0xff]  ;;  %v1509_v20 = vld [vmem:[%s2886_s12 + $0x8] sm:$0xff] }
 0x226   : > { %v1266_v63 = vadd.f32 %v1262_v0, %v1212_v41  ;;  %v1312_v10 = vmul.f32 %v2627_v15, %v1283_v1 }
 0x227   : > { %v1325_v29 = vpop.permute.xlu1 %1324  ;;  %v1317_v34 = vadd.f32 %v1313_v7, %v1267_v21 }
 0x228   : > { %v1323_v31 = vpop.permute.xlu0 %1322  ;;  %v1334_v62 = vsel %vm1330_vm9, %v1325_v29, 0.0  ;;  %v1316_v3 = vadd.f32 %v1312_v10, %v1266_v63  ;;  %v1805_v29 = vld [vmem:[%s2894_s20 + $0x8] sm:$0xff] }
 0x229   : > { %v1333_v54 = vsel %vm1330_vm9, %v1323_v31, 0.0  ;;  %v1338_v27 = vmul.f32 %v2652_v32, %v1334_v62  ;;  %v1897_v31 = vld [vmem:[%s2895_s21] sm:$0xff] }
 0x22a   : > { %v1337_v6 = vmul.f32 %v2652_v32, %v1333_v54  ;;  %v1675_v54 = vld [vmem:[%s2891_s17] sm:$0xff] }
 0x22b   : > { %v1367_v49 = vmul.f32 %v2633_v18, %v1338_v27  ;;  %v1411_v18 = vld [vmem:[%s2884_s10] sm:$0xff]  ;;  %2119 = vmatprep.mubr.msk.f32.mxu0 %vm802_vm0, %v1675_v54 }
 0x22c   : > { %v1366_v11 = vmul.f32 %v2635_v19, %v1337_v6  ;;  %2105 = vmatprep.mubr.msk.f32.mxu1 %vm802_vm0, %v1411_v18 }
 0x22d   : > { %v1371_v43 = vadd.f32 %v1367_v49, %v1317_v34 }
 0x22e   : > { %v1370_v33 = vadd.f32 %v1366_v11, %v1316_v3 }
 0x238   : > { %v1394_v52 = vpop.permute.xlu1 %1393 }
 0x239   : > { %v1399_v38 = vadd.f32 %v1394_v52, %v1371_v43  ;;  %v1389_v5 = vpop.permute.xlu0 %1388 }
 0x23a   : > { %v1398_v45 = vadd.f32 %v1389_v5, %v1370_v33 }
 0x23b   : > { %v1401_v32 = vmul.f32 %v1399_v38, %v2700_v59  ;;  %v1412_v59 = vld [vmem:[%s2884_s10 + $0x8] sm:$0xff] }
 0x23c   : > { %v1400_v8 = vmul.f32 %v1398_v45, %v2703_v28  ;;  %v1414_v28 = vld [vmem:[%s2885_s11 + $0x8] sm:$0xff] }
 0x23d   : > { %v1405_v14 = vsel %vm716_vm1, %v1401_v32, 0.0 }
 0x23e   : > { %1406 = vadd.xlane.f32.xlu1 %v1405_v14  ;;  %v1402_v15 = vsel %vm716_vm1, %v1400_v8, 0.0 }
 0x23f   : > { %1403 = vadd.xlane.f32.xlu0 %v1402_v15 }
 0x2cb   : > { %v1407_v19 = vpop.xlane.xlu1 %1406 }
 0x2cc   : > { %v1410_v53 = vmul.f32 0.015625, %v1407_v19  ;;  %v1404_v9 = vpop.xlane.xlu0 %1403 }
 0x2cd   : > { %v1409_v36 = vmul.f32 0.015625, %v1404_v9 }
 0x2cf   : > { %v2136_v42 = vpack.c.bf16 %v1410_v53, %v1409_v36 }
 0x2d1   : > { %2137 = vmatprep.subr.bf16.mxu1 %v2136_v42 }
 0x2d2   : > { %2139 = vmatpush3.bf16.msra.mxu1 %v2136_v42 }
 0x2d5   : > { %2106 = vmatmul.mubr.msk.f32.vlgmr.msra.gmra.mrb[0].mxu1 %vm802_vm0, %v1412_v59 }
 0x2d6   : > { %2112 = vmatprep.mubr.msk.f32.mxu1 %vm802_vm0, %v1508_v46 }
 0x3a8   : > { %v2107_v44 = vpop.f32.mrb[0].mxu1 }
 0x3a9   : > { %v1493_v50 = vadd.f32 %v2107_v44, %v1414_v28  ;;  %v1487_v4 = vpop.f32.mrb[1].mxu1 }
 0x3aa   : > { %v1488_v2 = vadd.f32 %v1487_v4, %v1413_v40 }
 0x3ab   : > { %1503 = vperm.xlu1 %2170, %v1493_v50  }
 0x3ac   : > { %1498 = vperm.xlu0 %2169, %v1488_v2  }
 0x3af   : > { %1519 = vperm.xlu1 %2170, %v1511_v51  }
 0x3b0   : > { %1514 = vperm.xlu0 %2169, %v1510_v12  }
 0x3b3   : > { %1612 = vperm.xlu1 %2170, %v1604_v22  }
 0x3b4   : > { %1607 = vperm.xlu0 %2169, %v1603_v58  }
 0x3b7   : > { %1656 = vperm.xlu1 %2170, %v1648_v56  }
 0x3b8   : > { %1651 = vperm.xlu0 %2169, %v1647_v23  }
 0x3bb   : > { %1670 = vperm.xlu1 %2170, %v1662_v47  }
 0x3bc   : > { %1665 = vperm.xlu0 %2169, %v1661_v57  }
 0x3bf   : > { %1690 = vperm.xlu1 %2170, %v1680_v13   ;;  %v1676_v13 = vld [vmem:[%s2891_s17 + $0x8] sm:$0xff] }
 0x3c0   : > { %1685 = vperm.xlu0 %2169, %v1679_v60   ;;  %v1677_v60 = vld [vmem:[%s2891_s17 + $0x10] sm:$0xff] }
 0x3c3   : > { %1700 = vperm.xlu1 %2170, %v1682_v61   ;;  %v1678_v61 = vld [vmem:[%s2891_s17 + $0x18] sm:$0xff] }
 0x3c4   : > { %1695 = vperm.xlu0 %2169, %v1681_v26   ;;  %v1802_v26 = vld [vmem:[%s2893_s19] sm:$0xff] }
 0x3c7   : > { %1813 = vperm.xlu1 %2170, %v1805_v29  }
 0x3c8   : > { %1808 = vperm.xlu0 %2169, %v1804_v48  }
 0x3cb   : > { %1906 = vperm.xlu1 %2170, %v1898_v30  }
 0x3cc   : > { %1901 = vperm.xlu0 %2169, %v1897_v31  }
 0x42a   : > { %v1504_v16 = vpop.permute.xlu1 %1503 }
 0x42b   : > { %v1507_v35 = vmul.f32 %v1504_v16, %v1401_v32  ;;  %v1499_v17 = vpop.permute.xlu0 %1498 }
 0x42c   : > { %v1506_v39 = vmul.f32 %v1499_v17, %v1400_v8 }
 0x42e   : > { %v2140_v62 = vpack.c.bf16 %v1507_v35, %v1506_v39  ;;  %v1520_v0 = vpop.permute.xlu1 %1519 }
 0x42f   : > { %v1515_v37 = vpop.permute.xlu0 %1514 }
 0x430   : > { %2141 = vmatprep.subr.bf16.mxu1 %v2140_v62 }
 0x431   : > { %2143 = vmatpush3.bf16.msra.mxu1 %v2140_v62 }
 0x432   : > { %v1613_v41 = vpop.permute.xlu1 %1612 }
 0x433   : > { %v1608_v21 = vpop.permute.xlu0 %1607 }
 0x434   : > { %2113 = vmatmul.mubr.msk.f32.vlgmr.msra.gmra.mrb[2].mxu1 %vm802_vm0, %v1509_v20 }
 0x435   : > { %2129 = vmatprep.mubr.msk.f32.mxu1 %vm802_vm0, %v1802_v26 }
 0x436   : > { %v1657_v50 = vpop.permute.xlu1 %1656 }
 0x437   : > { %v1652_v4 = vpop.permute.xlu0 %1651 }
 0x43a   : > { %v1671_v46 = vpop.permute.xlu1 %1670 }
 0x43b   : > { %v1666_v56 = vpop.permute.xlu0 %1665 }
 0x43e   : > { %v1691_v29 = vpop.permute.xlu1 %1690 }
 0x43f   : > { %v1686_v48 = vpop.permute.xlu0 %1685 }
 0x442   : > { %v1701_v16 = vpop.permute.xlu1 %1700 }
 0x443   : > { %v1696_v17 = vpop.permute.xlu0 %1695 }
 0x507   : > { %v2114_v55 = vpop.f32.mrb[2].mxu1 }
 0x508   : > { %v1600_v1 = vadd.f32 %v2114_v55, %v1520_v0  ;;  %v1594_v27 = vpop.f32.mrb[3].mxu1 }
 0x509   : > { %v1595_v6 = vadd.f32 %v1594_v27, %v1515_v37  ;;  %v1803_v27 = vld [vmem:[%s2893_s19 + $0x8] sm:$0xff] }
 0x50a   : > { %v1616_v7 = vmul.f32 %v1613_v41, %v1600_v1  ;;  %v1814_v41 = vpop.permute.xlu1 %1813 }
 0x50b   : > { %v1615_v63 = vmul.f32 %v1608_v21, %v1595_v6  ;;  %v1809_v6 = vpop.permute.xlu0 %1808 }
 0x50c   : > { %v2832_v10 = vadd.f32 %v1616_v7, %v2379_v25 }
 0x50d   : > { %v2835_v49 = vadd.f32 %v1615_v63, %v2377_v24 }
 0x50e   : > { %v1620_v11 = vsel %vm716_vm1, %v2832_v10, 0.0 }
 0x50f   : > { %v1619_v34 = vsel %vm716_vm1, %v2835_v49, 0.0 }
 0x510   : > { %v1621_v3 = vadd.f32 %v1620_v11, %v1619_v34  ;;  %v1907_v11 = vpop.permute.xlu1 %1906 }
 0x512   : > { %v1622_v43 = vrot.slane %v1621_v3, 4 }
 0x514   : > { %v1623_v52 = vadd.f32 %v1622_v43, %v1621_v3  ;;  %v1902_v3 = vpop.permute.xlu0 %1901 }
 0x516   : > { %v1624_v33 = vrot.slane %v1623_v52, 2 }
 0x518   : > { %v1625_v38 = vadd.f32 %v1624_v33, %v1623_v52 }
 0x51a   : > { %v1626_v5 = vrot.slane %v1625_v38, 1 }
 0x51c   : > { %v1627_v45 = vadd.f32 %v1626_v5, %v1625_v38 }
 0x51e   : > { %v1628_v32 = vmul.f32 0.0625, %v1627_v45 }
 0x520   : > { %v1629_v25 = vsub.f32 %v2835_v49, %v1628_v32  ;;  %v1630_v8 = vsub.f32 %v2832_v10, %v1628_v32 }
 0x522   : > { %v1631_v24 = vmul.f32 %v1629_v25, %v1629_v25  ;;  %v1632_v14 = vmul.f32 %v1630_v8, %v1630_v8 }
 0x524   : > { %v1633_v15 = vsel %vm716_vm1, %v1631_v24, 0.0  ;;  %v1634_v18 = vsel %vm716_vm1, %v1632_v14, 0.0 }
 0x525   : > { %v1635_v19 = vadd.f32 %v1634_v18, %v1633_v15 }
 0x527   : > { %v1636_v53 = vrot.slane %v1635_v19, 4 }
 0x529   : > { %v1637_v9 = vadd.f32 %v1636_v53, %v1635_v19 }
 0x52b   : > { %v1638_v36 = vrot.slane %v1637_v9, 2 }
 0x52d   : > { %v1639_v42 = vadd.f32 %v1638_v36, %v1637_v9 }
 0x52f   : > { %v1640_v59 = vrot.slane %v1639_v42, 1 }
 0x531   : > { %v1641_v28 = vadd.f32 %v1640_v59, %v1639_v42 }
 0x533   : > { %v1642_v40 = vmul.f32 0.0625, %v1641_v28 }
 0x535   : > { %v1643_v44 = vadd.f32 1e-06, %v1642_v40 }
 0x537   : > { %2173 = vrsqrt.f32 %v1643_v44 }
 0x541   : > { %v2174_v2 = vpop.eup %2173 }
 0x542   : > { %v1645_v51 = vmul.f32 %v2174_v2, %v1629_v25  ;;  %v1646_v12 = vmul.f32 %v2174_v2, %v1630_v8 }
 0x544   : > { %v1659_v22 = vmul.f32 %v1652_v4, %v1645_v51  ;;  %v1660_v58 = vmul.f32 %v1657_v50, %v1646_v12 }
 0x546   : > { %v1673_v23 = vadd.f32 %v1666_v56, %v1659_v22  ;;  %v1674_v47 = vadd.f32 %v1671_v46, %v1660_v58 }
 0x548   : > { %v2144_v57 = vpack.c.bf16 %v1674_v47, %v1673_v23 }
 0x54a   : > { %2145 = vmatprep.subr.bf16.mxu0 %v2144_v57 }
 0x54b   : > { %2147 = vmatpush3.bf16.msra.mxu0 %v2144_v57 }
 0x54e   : > { %2120 = vmatmul.mubr.msk.f32.vlgmr.msra.gmra.mrb[4].mxu0 %vm802_vm0, %v1676_v13 }
 0x54f   : > { %2122 = vmatprep.mubr.msk.f32.mxu0 %vm802_vm0, %v1677_v60 }
 0x552   : > { %2123 = vmatmul.mubr.msk.f32.gmra.mrb[6].mxu0 %vm802_vm0, %v1678_v61 }
 0x621   : > { %v2121_v30 = vpop.f32.mrb[4].mxu0 }
 0x622   : > { %v1781_v31 = vpop.f32.mrb[5].mxu0  ;;  %v1787_v39 = vadd.f32 %v2121_v30, %v1691_v29 }
 0x623   : > { %v1782_v54 = vadd.f32 %v1781_v31, %v1686_v48 }
 0x625   : > { %v2124_v35 = vpop.f32.mrb[6].mxu0 }
 0x626   : > { %v1797_v62 = vadd.f32 %v2124_v35, %v1701_v16  ;;  %v1791_v20 = vpop.f32.mrb[7].mxu0 }
 0x627   : > { %v1792_v0 = vadd.f32 %v1791_v20, %v1696_v17 }
 0x628   : > { %v1801_v37 = vmul.f32 %v1797_v62, %v1787_v39 }
 0x629   : > { %v1800_v55 = vmul.f32 %v1792_v0, %v1782_v54 }
 0x62b   : > { %v2148_v1 = vpack.c.bf16 %v1801_v37, %v1800_v55 }
 0x62d   : > { %2149 = vmatprep.subr.bf16.mxu1 %v2148_v1 }
 0x62e   : > { %2151 = vmatpush3.bf16.msra.mxu1 %v2148_v1 }
 0x631   : > { %2130 = vmatmul.mubr.msk.f32.vlgmr.msra.gmra.mrb[4].mxu1 %vm802_vm0, %v1803_v27 }
 0x704   : > { %v2131_v21 = vpop.f32.mrb[4].mxu1 }
 0x705   : > { %v1894_v7 = vadd.f32 %v2131_v21, %v1814_v41  ;;  %v1888_v63 = vpop.f32.mrb[5].mxu1 }
 0x706   : > { %v1889_v34 = vadd.f32 %v1888_v63, %v1809_v6 }
 0x707   : > { %v1910_v43 = vmul.f32 %v1907_v11, %v1894_v7 }
 0x708   : > { %v1909_v52 = vmul.f32 %v1902_v3, %v1889_v34 }
 0x709   : > { %v1912_v33 = vadd.f32 %v1910_v43, %v2832_v10 }
 0x70a   : > { %v1911_v38 = vadd.f32 %v1909_v52, %v2835_v49 }
 0x70b   : > { %v2058_v5 = vpack.c.bf16 %v1912_v33, %v1912_v33 }
 0x70c   : > { %v2057_v45 = vpack.c.bf16 %v1911_v38, %v1911_v38 }
 0x70d   : > { %1923 = vst.msk [vmem:[%s703_s28 + $0x4] sm:$0xf] %vm1921_vm10, %v2058_v5 }
 0x70e   : > { %1922 = vst.msk [vmem:[%s703_s28] sm:$0xf] %vm1921_vm10, %v2057_v45 }
 0x70f PF: > { %s2920_s6 = sld [smem:[#allocation2_spill]] }
 0x715   : > { %s32_s3 = sadd.s32 1, %s2920_s6  }
 0x716   : > { %p29_p4 = scmp.ge.s32.totalorder %s32_s3, 4  }
 0x718   :  { %31 = sbr.rel (!%p29_p4) target bundleno = 9 (0x9), region = 149 }

// kernel: nafnet_refine_forward.20
= control target key start
LH: loop header
LB: loop body
LE: loop exit
PB: predicated region body
PF: predicated region fallthrough
CT: control target
= control target key end

     0   :  { %s2328_s0 = inlined_call_operand.vmem [shape: bf16[2,8,256], index: 0, kind: input, shape index: {}]   ;;  %s2329_s1 = inlined_call_operand.vmem [shape: bf16[2,8,256], index: 1, kind: input, shape index: {}]   ;;  %s2330_s2 = inlined_call_operand.vmem [shape: f32[1,256], index: 2, kind: input, shape index: {}]   ;;  %s2331_s3 = inlined_call_operand.vmem [shape: f32[1,256], index: 3, kind: input, shape index: {}]   ;;  %s2332_s4 = inlined_call_operand.vmem [shape: f32[8,1], index: 4, kind: input, shape index: {}, may-alias: {4,15}]   ;;  %s2333_s5 = inlined_call_operand.vmem [shape: f32[8,1], index: 5, kind: input, shape index: {}, may-alias: {5,16}]   ;;  %s2334_s6 = inlined_call_operand.vmem [shape: f32[16,8], index: 6, kind: input, shape index: {}]   ;;  %s2335_s7 = inlined_call_operand.vmem [shape: f32[16,1], index: 7, kind: input, shape index: {}]   ;;  %s2336_s8 = inlined_call_operand.vmem [shape: f32[9,16,1], index: 8, kind: input, shape index: {}]   ;;  %s2337_s9 = inlined_call_operand.vmem [shape: f32[16,1], index: 9, kind: input, shape index: {}]   ;;  %s2338_s10 = inlined_call_operand.vmem [shape: f32[8,8], index: 10, kind: input, shape index: {}]   ;;  %s2339_s11 = inlined_call_operand.vmem [shape: f32[8,1], index: 11, kind: input, shape index: {}]   ;;  %s2340_s12 = inlined_call_operand.vmem [shape: f32[8,8], index: 12, kind: input, shape index: {}]   ;;  %s2341_s13 = inlined_call_operand.vmem [shape: f32[8,1], index: 13, kind: input, shape index: {}]   ;;  %s2342_s14 = inlined_call_operand.vmem [shape: f32[8,1], index: 14, kind: input, shape index: {}]   ;;  %s2343_s15 = inlined_call_operand.vmem [shape: f32[8,1], index: 15, kind: input, shape index: {}, may-alias: {4,15}]   ;;  %s2344_s16 = inlined_call_operand.vmem [shape: f32[8,1], index: 16, kind: input, shape index: {}, may-alias: {5,16}]   ;;  %s2345_s17 = inlined_call_operand.vmem [shape: f32[16,8], index: 17, kind: input, shape index: {}]   ;;  %s2346_s18 = inlined_call_operand.vmem [shape: f32[16,1], index: 18, kind: input, shape index: {}]   ;;  %s2347_s19 = inlined_call_operand.vmem [shape: f32[8,8], index: 19, kind: input, shape index: {}]   ;;  %s2348_s20 = inlined_call_operand.vmem [shape: f32[8,1], index: 20, kind: input, shape index: {}]   ;;  %s2349_s21 = inlined_call_operand.vmem [shape: f32[8,1], index: 21, kind: input, shape index: {}]   ;;  %s2350_s22 = inlined_call_operand.vmem [shape: bf16[2,8,256], index: 22, kind: output, shape index: {}]  }
   0x1   :  { %2352 = sst [smem:[#allocation2_spill]] %s2328_s0 }
   0x2   :  { %2353 = sst [smem:[#allocation3_spill]] %s2329_s1 }
   0x3   :  { %2354 = sst [smem:[#allocation4_spill]] %s2330_s2 }
   0x4   :  { %2355 = sst [smem:[#allocation5_spill]] %s2331_s3  ;;  %s1968_s3 = smov 0  }
   0x5   :  { %2356 = sst [smem:[#allocation6_spill]] %s2332_s4 }
   0x6   :  { %2357 = sst [smem:[#allocation7_spill]] %s2333_s5 }
   0x7   :  { %2358 = sst [smem:[#allocation8_spill]] %s2334_s6 }
   0x8 LB: > { %s1757_s28 = sadd.s32 4294967295, %s1840_s3   ;;  %p1761_p0 = scmp.ge.s32.totalorder %s1840_s3, 1  ;;  %s1840_s3 = sphi %s1968_s3, %s32_s3  }
   0x9   : > { %p622_p1 = scmp.lt.s32.totalorder %s1840_s3, 3 }
   0xb   : > { %p623_p2 = pnand %p1761_p0, %p622_p1 }
   0xc   : > { %s2359_s4 = sld [smem:[#allocation6_spill]] (!%p623_p2)  ;;  %v1842_v1 = vmov (!%p623_p2), 0   ;;  %s2360_s1 = sld [smem:[#allocation7_spill]] (!%p623_p2)  ;;  %v903_v3 = vld [vmem:[%s2336_s8] sm:$0xff] (!%p623_p2)  ;;  %v1843_v4 = vmov (!%p623_p2), 0.0   ;;  %v1770_v5 = vld [vmem:[%s2336_s8 + $0x10] sm:$0xff] (!%p623_p2) }
   0xd   : > { %626 = sbr.rel (%p623_p2) target bundleno = 1776 (0x6f0), region = 108  ;;  %1824 = vset.pattern.permute.xlu0 (!%p623_p2), %v1842_v1  ;;  %1825 = vset.pattern.permute.xlu1 (!%p623_p2), %v1842_v1  ;;  %v1772_v6 = vld [vmem:[%s2336_s8 + $0x20] sm:$0xff] (!%p623_p2)  ;;  %v1774_v7 = vld [vmem:[%s2336_s8 + $0x30] sm:$0xff] (!%p623_p2)  ;;  %p689_p3 = scmp.lt.s32.totalorder (!%p623_p2), %s1757_s28, 1  ;;  %v772_v22 = vld [vmem:[%s2335_s7 + $0x8] sm:$0xff] (!%p623_p2)  ;;  %vm783_vm0 = vcmask (!%p623_p2), 64512  }
   0xe   : > { %854 = vmatprep.mubr.f32.mxu0 (!%p623_p2), %v1843_v4  ;;  %1800 = vmatprep.subr.mxu1 (!%p623_p2), %v1843_v4  ;;  %v1776_v8 = vld [vmem:[%s2336_s8 + $0x40] sm:$0xff] (!%p623_p2)  ;;  %v1778_v9 = vld [vmem:[%s2336_s8 + $0x50] sm:$0xff] (!%p623_p2)  ;;  %s2361_s26 = sld [smem:[#allocation2_spill]] (!%p623_p2)  ;;  %s2362_s30 = sld [smem:[#allocation3_spill]] (!%p623_p2)  ;;  %v904_v25 = vld [vmem:[%s2336_s8 + $0x8] sm:$0xff] (!%p623_p2)  ;;  %vm879_vm1 = vcmask (!%p623_p2), 138240  }
   0xf   : > { %v1780_v10 = vld [vmem:[%s2336_s8 + $0x60] sm:$0xff] (!%p623_p2)  ;;  %v1782_v11 = vld [vmem:[%s2336_s8 + $0x70] sm:$0xff] (!%p623_p2)  ;;  %v1771_v28 = vld [vmem:[%s2336_s8 + $0x18] sm:$0xff] (!%p623_p2)  ;;  %s1844_s6 = smov (!%p623_p2), 17   ;;  %s1845_s25 = smov (!%p623_p2), 16   ;;  %vm931_vm2 = vcmask (!%p623_p2), 130048  }
  0x10   : > { %v1784_v16 = vld [vmem:[%s2336_s8 + $0x80] sm:$0xff] (!%p623_p2)  ;;  %v1773_v31 = vld [vmem:[%s2336_s8 + $0x28] sm:$0xff] (!%p623_p2)  ;;  %v1775_v34 = vld [vmem:[%s2336_s8 + $0x38] sm:$0xff] (!%p623_p2)  ;;  %s1848_s27 = smov (!%p623_p2), 127   ;;  %s1849_s29 = smov (!%p623_p2), 113   ;;  %vm969_vm3 = vcmask (!%p623_p2), 121856  }
  0x11   : > { %v771_v19 = vld [vmem:[%s2335_s7] sm:$0xff] (!%p623_p2)  ;;  %v1777_v37 = vld [vmem:[%s2336_s8 + $0x48] sm:$0xff] (!%p623_p2)  ;;  %v1779_v40 = vld [vmem:[%s2336_s8 + $0x58] sm:$0xff] (!%p623_p2)  ;;  %vm1022_vm4 = vcmask (!%p623_p2), 7168   ;;  %vm1085_vm5 = vcmask (!%p623_p2), 1039360   ;;  %vm1127_vm6 = vcmask (!%p623_p2), 924672  }
  0x12   : > { %v753_v0 = vld [vmem:[%s2359_s4] sm:$0xff] (!%p623_p2)  ;;  %775 = vperm.xlu1 (!%p623_p2), %1825, %v771_v19   ;;  %v1781_v43 = vld [vmem:[%s2336_s8 + $0x68] sm:$0xff] (!%p623_p2)  ;;  %v1783_v46 = vld [vmem:[%s2336_s8 + $0x78] sm:$0xff] (!%p623_p2)  ;;  %vm1169_vm7 = vcmask (!%p623_p2), 916480   ;;  %vm1207_vm8 = vcmask (!%p623_p2), 908288   ;;  %vm1852_vm9 = vmmov (!%p623_p2), 0  }
  0x13   : > { %756 = vperm.xlu0 (!%p623_p2), %1824, %v753_v0   ;;  %v761_v2 = vld [vmem:[%s2360_s1] sm:$0xff] (!%p623_p2)  ;;  %v1785_v49 = vld [vmem:[%s2336_s8 + $0x88] sm:$0xff] (!%p623_p2)  ;;  %1802 = vmatprep.mubr.msk.f32.mxu1 (!%p623_p2), %vm1852_vm9, %v1843_v4 }
  0x14   : > { %s2367_s28 = smov (!%p689_p3, %s1757_s28), 1 }
  0x15   : > { %s2002_s1 = sshll.u32 %s2367_s28, 3  ;;  %s2363_s28 = sld [smem:[#allocation8_spill]] }
  0x16   : > { %s693_s2 = scalar_lea.vmem %s2361_s26, %s2002_s1  ;;  %s698_s4 = scalar_lea.vmem %s2362_s30, %s2002_s1  ;;  %780 = vperm.xlu1 %1825, %v772_v22  }
  0x17   : > { %764 = vperm.xlu0 %1824, %v761_v2   ;;  %v704_v12 = vld [vmem:[%s693_s2] sm:$0xff]  ;;  %s1846_s26 = smov 15   ;;  %s1847_s2 = smov 1  }
  0x18   : > { %v707_v13 = vld [vmem:[%s698_s4] sm:$0xff]  ;;  %v705_v14 = vunpack.c.l.bf16 %v704_v12  ;;  %v706_v17 = vunpack.c.h.bf16 %v704_v12  ;;  %s1850_s30 = smov 112   ;;  %s1851_s4 = smov 111  }
  0x19   : > { %v708_v15 = vunpack.c.l.bf16 %v707_v13  ;;  %v709_v18 = vunpack.c.h.bf16 %v707_v13 }
  0x1a   : > { %912 = vperm.xlu1 %1825, %v904_v25  }
  0x1b   : > { %907 = vperm.xlu0 %1824, %v903_v3   ;;  %v2024_v20 = vadd.f32 %v708_v15, %v705_v14  ;;  %v2026_v21 = vadd.f32 %v709_v18, %v706_v17  ;;  %v769_v13 = vld [vmem:[%s2363_s28] sm:$0xff]  ;;  %v770_v14 = vld [vmem:[%s2363_s28 + $0x8] sm:$0xff] }
  0x1d   : > { %v714_v23 = vrot.slane %v2024_v20, 4  ;;  %v720_v24 = vrot.slane %v2026_v21, 4 }
  0x1e   : > { %950 = vperm.xlu1 %1825, %v1771_v28  }
  0x1f   : > { %945 = vperm.xlu0 %1824, %v1770_v5   ;;  %v715_v26 = vadd.f32 %v714_v23, %v2024_v20  ;;  %v721_v27 = vadd.f32 %v720_v24, %v2026_v21 }
  0x21   : > { %v716_v29 = vrot.slane %v715_v26, 2  ;;  %v722_v30 = vrot.slane %v721_v27, 2 }
  0x22   : > { %1003 = vperm.xlu1 %1825, %v1773_v31  }
  0x23   : > { %998 = vperm.xlu0 %1824, %v1772_v6   ;;  %v717_v32 = vadd.f32 %v716_v29, %v715_v26  ;;  %v723_v33 = vadd.f32 %v722_v30, %v721_v27  ;;  %v1241_v27 = vld [vmem:[%s2337_s9] sm:$0xff]  ;;  %v1242_v29 = vld [vmem:[%s2337_s9 + $0x8] sm:$0xff] }
  0x25   : > { %v718_v35 = vrot.slane %v717_v32, 1  ;;  %v724_v36 = vrot.slane %v723_v33, 1 }
  0x26   : > { %1045 = vperm.xlu1 %1825, %v1775_v34  }
  0x27   : > { %1040 = vperm.xlu0 %1824, %v1774_v7   ;;  %v719_v38 = vadd.f32 %v718_v35, %v717_v32  ;;  %v725_v39 = vadd.f32 %v724_v36, %v723_v33 }
  0x29   : > { %v727_v41 = vmul.f32 0.125, %v719_v38  ;;  %v728_v42 = vmul.f32 0.125, %v725_v39 }
  0x2a   : > { %1066 = vperm.xlu1 %1825, %v1777_v37  }
  0x2b   : > { %1061 = vperm.xlu0 %1824, %v1776_v8   ;;  %v729_v44 = vsub.f32 %v2024_v20, %v727_v41  ;;  %v730_v45 = vsub.f32 %v2026_v21, %v728_v42 }
  0x2d   : > { %v731_v47 = vmul.f32 %v729_v44, %v729_v44  ;;  %v732_v48 = vmul.f32 %v730_v45, %v730_v45 }
  0x2e   : > { %1108 = vperm.xlu1 %1825, %v1779_v40  }
  0x2f   : > { %1103 = vperm.xlu0 %1824, %v1778_v9   ;;  %v733_v50 = vrot.slane %v731_v47, 4  ;;  %v739_v51 = vrot.slane %v732_v48, 4 }
  0x31   : > { %v734_v52 = vadd.f32 %v733_v50, %v731_v47  ;;  %v740_v53 = vadd.f32 %v739_v51, %v732_v48 }
  0x32   : > { %1150 = vperm.xlu1 %1825, %v1781_v43  }
  0x33   : > { %1145 = vperm.xlu0 %1824, %v1780_v10   ;;  %v735_v54 = vrot.slane %v734_v52, 2  ;;  %v741_v55 = vrot.slane %v740_v53, 2 }
  0x35   : > { %v736_v56 = vadd.f32 %v735_v54, %v734_v52  ;;  %v742_v57 = vadd.f32 %v741_v55, %v740_v53 }
  0x36   : > { %1188 = vperm.xlu1 %1825, %v1783_v46  }
  0x37   : > { %1183 = vperm.xlu0 %1824, %v1782_v11   ;;  %v737_v58 = vrot.slane %v736_v56, 1  ;;  %v743_v59 = vrot.slane %v742_v57, 1 }
  0x39   : > { %v738_v60 = vadd.f32 %v737_v58, %v736_v56  ;;  %v744_v61 = vadd.f32 %v743_v59, %v742_v57 }
  0x3a   : > { %1230 = vperm.xlu1 %1825, %v1785_v49  }
  0x3b   : > { %1225 = vperm.xlu0 %1824, %v1784_v16   ;;  %v745_v62 = vmul.f32 0.125, %v738_v60  ;;  %v746_v63 = vmul.f32 0.125, %v744_v61 }
  0x3d   : > { %v747_v0 = vadd.f32 1e-06, %v745_v62  ;;  %v748_v1 = vadd.f32 1e-06, %v746_v63 }
  0x3f   : > { %1826 = vrsqrt.f32 %v747_v0 }
  0x40   : > { %1828 = vrsqrt.f32 %v748_v1 }
  0x49   : > { %v1827_v2 = vpop.eup %1826 }
  0x4a   : > { %v1829_v3 = vpop.eup %1828  ;;  %v751_v5 = vmul.f32 %v1827_v2, %v729_v44 }
  0x4b   : > { %v752_v6 = vmul.f32 %v1829_v3, %v730_v45  ;;  %v889_v45 = vlaneseq }
  0x4d   : > { %v890_v47 = vshrl.u32 %v889_v45, 7 }
  0x4f   : > { %v891_v49 = vsub.s32 0, %v890_v47  ;;  %v895_v52 = vsub.s32 1, %v890_v47 }
  0x91   : > { %v776_v15 = vpop.permute.xlu1 %775 }
  0x92   : > { %v757_v7 = vpop.permute.xlu0 %756 }
  0x93   : > { %v759_v8 = vmul.f32 %v757_v7, %v751_v5  ;;  %v760_v9 = vmul.f32 %v757_v7, %v752_v6 }
  0x95   : > { %v781_v24 = vpop.permute.xlu1 %780 }
  0x96   : > { %v765_v10 = vpop.permute.xlu0 %764 }
  0x97   : > { %v768_v11 = vadd.f32 %v765_v10, %v760_v9  ;;  %v767_v12 = vadd.f32 %v765_v10, %v759_v8 }
  0x99   : > { %790 = vmatprep.subr.mxu0 %v768_v11  ;;  %v2120_v30 = vpop.permute.xlu1 %912 }
  0x9a   : > { %791 = vmatpush1.msra.mxu0 %v767_v12  ;;  %v908_v28 = vpop.permute.xlu0 %907 }
  0x9b   : > { %1768 = vmatmul.mubr.msk.f32.vlgmr.msra.gmra.mrb[0].mxu0 %vm783_vm0, %v769_v13 }
  0x9c   : > { %860 = vmatprep.mubr.f32.mxu0 %v1843_v4 }
  0x9d   : > { %v2122_v32 = vpop.permute.xlu1 %950 }
  0x9e   : > { %v946_v31 = vpop.permute.xlu0 %945 }
  0x9f   : > { %1769 = vmatmul.mubr.msk.f32.gmra.mrb[2].mxu0 %vm783_vm0, %v770_v14 }
  0xa0   : > { %1575 = vmatprep.mubr.f32.mxu0 %v1843_v4 }
  0xa1   : > { %v2124_v34 = vpop.permute.xlu1 %1003 }
  0xa2   : > { %v999_v33 = vpop.permute.xlu0 %998 }
  0xa5   : > { %v2126_v36 = vpop.permute.xlu1 %1045 }
  0xa6   : > { %v1041_v35 = vpop.permute.xlu0 %1040 }
  0xa9   : > { %v2130_v38 = vpop.permute.xlu1 %1066 }
  0xaa   : > { %v2128_v37 = vpop.permute.xlu0 %1061 }
  0xad   : > { %v2134_v40 = vpop.permute.xlu1 %1108 }
  0xae   : > { %v2132_v39 = vpop.permute.xlu0 %1103 }
  0xb1   : > { %v2138_v42 = vpop.permute.xlu1 %1150 }
  0xb2   : > { %v2136_v41 = vpop.permute.xlu0 %1145 }
  0xb5   : > { %v2142_v44 = vpop.permute.xlu1 %1188 }
  0xb6   : > { %v2140_v43 = vpop.permute.xlu0 %1183 }
  0xb9   : > { %v2146_v48 = vpop.permute.xlu1 %1230 }
  0xba   : > { %v2144_v46 = vpop.permute.xlu0 %1225 }
 0x16e   : > { %v856_v16 = vpop.f32.mrb[0].mxu0 }
 0x16f   : > { %v2074_v17 = vadd.f32 %v856_v16, %v776_v15  ;;  %v858_v18 = vpop.f32.mrb[1].mxu0 }
 0x170   : > { %v2076_v19 = vadd.f32 %v858_v18, %v776_v15 }
 0x171   : > { %871 = vrot.lane.b32.xlu0 %v2074_v17, %s1844_s6 }
 0x172   : > { %v862_v22 = vpop.f32.mrb[2].mxu0  ;;  %873 = vrot.lane.b32.xlu1 %v2076_v19, %s1844_s6 }
 0x173   : > { %v864_v23 = vpop.f32.mrb[3].mxu0  ;;  %v2094_v25 = vadd.f32 %v862_v22, %v781_v24 }
 0x174   : > { %v2096_v26 = vadd.f32 %v864_v23, %v781_v24 }
 0x175   : > { %923 = vrot.lane.b32.xlu0 %v2074_v17, %s1845_s25 }
 0x176   : > { %925 = vrot.lane.b32.xlu1 %v2076_v19, %s1845_s25 }
 0x179   : > { %961 = vrot.lane.b32.xlu0 %v2074_v17, %s1846_s26 }
 0x17a   : > { %963 = vrot.lane.b32.xlu1 %v2076_v19, %s1846_s26 }
 0x17d   : > { %1014 = vrot.lane.b32.xlu0 %v2074_v17, %s1847_s2 }
 0x17e   : > { %1016 = vrot.lane.b32.xlu1 %v2076_v19, %s1847_s2 }
 0x181   : > { %1077 = vrot.lane.b32.xlu0 %v2074_v17, %s1848_s27 }
 0x182   : > { %1079 = vrot.lane.b32.xlu1 %v2076_v19, %s1848_s27 }
 0x185   : > { %1119 = vrot.lane.b32.xlu0 %v2074_v17, %s1849_s29 }
 0x186   : > { %1121 = vrot.lane.b32.xlu1 %v2076_v19, %s1849_s29 }
 0x189   : > { %1161 = vrot.lane.b32.xlu0 %v2074_v17, %s1850_s30 }
 0x18a   : > { %1163 = vrot.lane.b32.xlu1 %v2076_v19, %s1850_s30 }
 0x18d   : > { %1199 = vrot.lane.b32.xlu0 %v2074_v17, %s1851_s4 }
 0x18e   : > { %1201 = vrot.lane.b32.xlu1 %v2076_v19, %s1851_s4 }
 0x191   : > { %875 = vrot.lane.b32.xlu0 %v2094_v25, %s1844_s6 }
 0x192   : > { %877 = vrot.lane.b32.xlu1 %v2096_v26, %s1844_s6  ;;  %s703_s6 = scalar_lea.vmem %s2350_s22, %s2002_s1 }
 0x195   : > { %927 = vrot.lane.b32.xlu0 %v2094_v25, %s1845_s25 }
 0x196   : > { %929 = vrot.lane.b32.xlu1 %v2096_v26, %s1845_s25 }
 0x199   : > { %965 = vrot.lane.b32.xlu0 %v2094_v25, %s1846_s26 }
 0x19a   : > { %967 = vrot.lane.b32.xlu1 %v2096_v26, %s1846_s26  ;;  %s2364_s26 = sld [smem:[#allocation4_spill]] }
 0x19d   : > { %1018 = vrot.lane.b32.xlu0 %v2094_v25, %s1847_s2 }
 0x19e   : > { %1020 = vrot.lane.b32.xlu1 %v2096_v26, %s1847_s2 }
 0x1a0   : > { %v712_v51 = vld [vmem:[%s2364_s26] sm:$0x3] }
 0x1a1   : > { %1081 = vrot.lane.b32.xlu0 %v2094_v25, %s1848_s27  ;;  %v2154_v55 = vrot.slane %v712_v51, %v891_v49  ;;  %v2157_v58 = vrot.slane %v712_v51, %v895_v52 }
 0x1a2   : > { %1083 = vrot.lane.b32.xlu1 %v2096_v26, %s1848_s27 }
 0x1a5   : > { %1123 = vrot.lane.b32.xlu0 %v2094_v25, %s1849_s29 }
 0x1a6   : > { %1125 = vrot.lane.b32.xlu1 %v2096_v26, %s1849_s29  ;;  %s2365_s29 = sld [smem:[#allocation5_spill]] }
 0x1a9   : > { %1165 = vrot.lane.b32.xlu0 %v2094_v25, %s1850_s30 }
 0x1aa   : > { %1167 = vrot.lane.b32.xlu1 %v2096_v26, %s1850_s30 }
 0x1ac   : > { %v713_v54 = vld [vmem:[%s2365_s29] sm:$0x3] }
 0x1ad   : > { %1203 = vrot.lane.b32.xlu0 %v2094_v25, %s1851_s4  ;;  %v2160_v61 = vrot.slane %v713_v54, %v891_v49  ;;  %v2163_v63 = vrot.slane %v713_v54, %v895_v52 }
 0x1ae   : > { %1205 = vrot.lane.b32.xlu1 %v2096_v26, %s1851_s4 }
 0x1b1   : > { %1245 = vperm.xlu0 %1824, %v1241_v27  }
 0x1b2   : > { %1250 = vperm.xlu1 %1825, %v1242_v29  }
 0x1e3   : > { %v872_v50 = vpop.permute.xlu0 %871 }
 0x1e4   : > { %v874_v53 = vpop.permute.xlu1 %873  ;;  %v886_v57 = vsel %vm879_vm1, 0.0, %v872_v50 }
 0x1e5   : > { %v880_v60 = vsel %vm879_vm1, %v872_v50, %v874_v53  ;;  %v899_v0 = vmul.f32 %v2154_v55, %v886_v57 }
 0x1e6   : > { %v900_v3 = vmul.f32 %v2157_v58, %v880_v60  ;;  %v1070_v60 = vmul.f32 %v2128_v37, %v2076_v19 }
 0x1e7   : > { %v924_v56 = vpop.permute.xlu0 %923  ;;  %v915_v12 = vmul.f32 %v908_v28, %v899_v0 }
 0x1e8   : > { %v926_v59 = vpop.permute.xlu1 %925  ;;  %v938_v62 = vsel %vm931_vm2, 0.0, %v924_v56  ;;  %v916_v15 = vmul.f32 %v908_v28, %v900_v3 }
 0x1e9   : > { %v932_v1 = vsel %vm931_vm2, %v924_v56, %v926_v59  ;;  %v953_v7 = vmul.f32 %v946_v31, %v938_v62  ;;  %v1069_v59 = vmul.f32 %v2128_v37, %v2074_v17 }
 0x1ea   : > { %v954_v10 = vmul.f32 %v946_v31, %v932_v1 }
 0x1eb   : > { %v962_v2 = vpop.permute.xlu0 %961  ;;  %v957_v23 = vadd.f32 %v953_v7, %v915_v12 }
 0x1ec   : > { %v976_v5 = vsel %vm969_vm3, 0.0, %v962_v2  ;;  %v964_v6 = vpop.permute.xlu1 %963  ;;  %v958_v29 = vadd.f32 %v954_v10, %v916_v15 }
 0x1ed   : > { %v989_v8 = vmul.f32 %v2160_v61, %v976_v5  ;;  %v970_v9 = vsel %vm969_vm3, %v962_v2, %v964_v6 }
 0x1ee   : > { %v990_v11 = vmul.f32 %v2163_v63, %v970_v9 }
 0x1ef   : > { %v1006_v13 = vmul.f32 %v999_v33, %v989_v8  ;;  %v1015_v14 = vpop.permute.xlu0 %1014 }
 0x1f0   : > { %v1007_v16 = vmul.f32 %v999_v33, %v990_v11  ;;  %v1029_v18 = vsel %vm1022_vm4, 0.0, %v1015_v14  ;;  %v1017_v22 = vpop.permute.xlu1 %1016 }
 0x1f1   : > { %v1031_v24 = vmul.f32 %v1029_v18, %v2154_v55  ;;  %v1023_v27 = vsel %vm1022_vm4, %v1015_v14, %v1017_v22  ;;  %v1010_v31 = vadd.f32 %v1006_v13, %v957_v23 }
 0x1f2   : > { %v1032_v45 = vmul.f32 %v1023_v27, %v2157_v58  ;;  %v1011_v50 = vadd.f32 %v1007_v16, %v958_v29 }
 0x1f3   : > { %v1048_v47 = vmul.f32 %v1041_v35, %v1031_v24  ;;  %v1078_v49 = vpop.permute.xlu0 %1077 }
 0x1f4   : > { %v1049_v51 = vmul.f32 %v1041_v35, %v1032_v45  ;;  %v1080_v52 = vpop.permute.xlu1 %1079 }
 0x1f5   : > { %v1052_v28 = vadd.f32 %v1048_v47, %v1010_v31  ;;  %v1086_v33 = vsel %vm1085_vm5, %v1078_v49, %v1080_v52  ;;  %v1092_v53 = vsel %vm1085_vm5, %v1080_v52, 0.0 }
 0x1f6   : > { %v1053_v54 = vadd.f32 %v1049_v51, %v1011_v50  ;;  %v1094_v56 = vmul.f32 %v1086_v33, %v2160_v61  ;;  %v1095_v57 = vmul.f32 %v1092_v53, %v2163_v63 }
 0x1f7   : > { %v1120_v62 = vpop.permute.xlu0 %1119  ;;  %v1073_v0 = vadd.f32 %v1069_v59, %v1052_v28 }
 0x1f8   : > { %v1122_v35 = vpop.permute.xlu1 %1121  ;;  %v1074_v1 = vadd.f32 %v1070_v60, %v1053_v54  ;;  %v1111_v5 = vmul.f32 %v2132_v39, %v1094_v56  ;;  %v1112_v6 = vmul.f32 %v2132_v39, %v1095_v57 }
 0x1f9   : > { %v1128_v2 = vsel %vm1127_vm6, %v1120_v62, %v1122_v35  ;;  %v1134_v3 = vsel %vm1127_vm6, %v1122_v35, 0.0 }
 0x1fa   : > { %v1136_v7 = vmul.f32 %v1128_v2, %v2154_v55  ;;  %v1137_v17 = vmul.f32 %v1134_v3, %v2157_v58  ;;  %v1115_v12 = vadd.f32 %v1111_v5, %v1073_v0  ;;  %v1116_v13 = vadd.f32 %v1112_v6, %v1074_v1 }
 0x1fb   : > { %v1162_v8 = vpop.permute.xlu0 %1161 }
 0x1fc   : > { %v1153_v19 = vmul.f32 %v2136_v41, %v1136_v7  ;;  %v1154_v37 = vmul.f32 %v2136_v41, %v1137_v17  ;;  %v1164_v9 = vpop.permute.xlu1 %1163 }
 0x1fd   : > { %v1170_v10 = vsel %vm1169_vm7, %v1162_v8, %v1164_v9  ;;  %v1176_v11 = vsel %vm1169_vm7, %v1164_v9, 0.0 }
 0x1fe   : > { %v1157_v15 = vadd.f32 %v1153_v19, %v1115_v12  ;;  %v1158_v39 = vadd.f32 %v1154_v37, %v1116_v13  ;;  %v1191_v16 = vmul.f32 %v2140_v43, %v1170_v10  ;;  %v1192_v18 = vmul.f32 %v2140_v43, %v1176_v11 }
 0x1ff   : > { %v1200_v14 = vpop.permute.xlu0 %1199 }
 0x200   : > { %v1202_v22 = vpop.permute.xlu1 %1201  ;;  %v1195_v45 = vadd.f32 %v1191_v16, %v1157_v15  ;;  %v1196_v31 = vadd.f32 %v1192_v18, %v1158_v39 }
 0x201   : > { %v1208_v23 = vsel %vm1207_vm8, %v1200_v14, %v1202_v22  ;;  %v1214_v41 = vsel %vm1207_vm8, %v1202_v22, 0.0 }
 0x202   : > { %v1216_v24 = vmul.f32 %v1208_v23, %v2160_v61  ;;  %v1217_v27 = vmul.f32 %v1214_v41, %v2163_v63 }
 0x203   : > { %v876_v29 = vpop.permute.xlu0 %875 }
 0x204   : > { %v1233_v47 = vmul.f32 %v2144_v46, %v1216_v24  ;;  %v1234_v49 = vmul.f32 %v2144_v46, %v1217_v27  ;;  %v878_v50 = vpop.permute.xlu1 %877  ;;  %v887_v28 = vsel %vm879_vm1, 0.0, %v876_v29  ;;  %v1071_v27 = vmul.f32 %v2130_v38, %v2094_v25 }
 0x205   : > { %v881_v53 = vsel %vm879_vm1, %v876_v29, %v878_v50  ;;  %v901_v56 = vmul.f32 %v2154_v55, %v887_v28  ;;  %v1072_v29 = vmul.f32 %v2130_v38, %v2096_v26 }
 0x206   : > { %v2202_v51 = vadd.f32 %v1234_v49, %v1196_v31  ;;  %v2204_v43 = vadd.f32 %v1233_v47, %v1195_v45  ;;  %v902_v46 = vmul.f32 %v2157_v58, %v881_v53 }
 0x207   : > { %v928_v52 = vpop.permute.xlu0 %927  ;;  %v917_v5 = vmul.f32 %v2120_v30, %v901_v56 }
 0x208   : > { %v930_v33 = vpop.permute.xlu1 %929  ;;  %v939_v54 = vsel %vm931_vm2, 0.0, %v928_v52  ;;  %v918_v17 = vmul.f32 %v2120_v30, %v902_v46 }
 0x209   : > { %v933_v57 = vsel %vm931_vm2, %v928_v52, %v930_v33  ;;  %v955_v35 = vmul.f32 %v2122_v32, %v939_v54 }
 0x20a   : > { %v956_v2 = vmul.f32 %v2122_v32, %v933_v57 }
 0x20b   : > { %v966_v59 = vpop.permute.xlu0 %965  ;;  %v959_v9 = vadd.f32 %v955_v35, %v917_v5 }
 0x20c   : > { %v977_v60 = vsel %vm969_vm3, 0.0, %v966_v59  ;;  %v968_v62 = vpop.permute.xlu1 %967  ;;  %v960_v32 = vadd.f32 %v956_v2, %v918_v17 }
 0x20d   : > { %v991_v0 = vmul.f32 %v2160_v61, %v977_v60  ;;  %v971_v1 = vsel %vm969_vm3, %v966_v59, %v968_v62 }
 0x20e   : > { %v992_v3 = vmul.f32 %v2163_v63, %v971_v1 }
 0x20f   : > { %v1008_v6 = vmul.f32 %v2124_v34, %v991_v0  ;;  %v1019_v7 = vpop.permute.xlu0 %1018 }
 0x210   : > { %v1009_v8 = vmul.f32 %v2124_v34, %v992_v3  ;;  %v1030_v19 = vsel %vm1022_vm4, 0.0, %v1019_v7  ;;  %v1021_v37 = vpop.permute.xlu1 %1020 }
 0x211   : > { %v1033_v10 = vmul.f32 %v1030_v19, %v2154_v55  ;;  %v1024_v11 = vsel %vm1022_vm4, %v1019_v7, %v1021_v37  ;;  %v1012_v13 = vadd.f32 %v1008_v6, %v959_v9 }
 0x212   : > { %v1034_v12 = vmul.f32 %v1024_v11, %v2157_v58  ;;  %v1013_v39 = vadd.f32 %v1009_v8, %v960_v32 }
 0x213   : > { %v1050_v14 = vmul.f32 %v2126_v36, %v1033_v10  ;;  %v1082_v15 = vpop.permute.xlu0 %1081 }
 0x214   : > { %v1051_v30 = vmul.f32 %v2126_v36, %v1034_v12  ;;  %v1084_v16 = vpop.permute.xlu1 %1083 }
 0x215   : > { %v1054_v34 = vadd.f32 %v1050_v14, %v1012_v13  ;;  %v1087_v18 = vsel %vm1085_vm5, %v1082_v15, %v1084_v16  ;;  %v1093_v22 = vsel %vm1085_vm5, %v1084_v16, 0.0  ;;  %v1427_v16 = vld [vmem:[%s2342_s14] sm:$0xff] }
 0x216   : > { %v1055_v23 = vadd.f32 %v1051_v30, %v1013_v39  ;;  %v1096_v41 = vmul.f32 %v1087_v18, %v2160_v61  ;;  %v1097_v24 = vmul.f32 %v1093_v22, %v2163_v63  ;;  %v1347_v30 = vld [vmem:[%s2341_s13] sm:$0xff] }
 0x217   : > { %v1124_v45 = vpop.permute.xlu0 %1123  ;;  %v1075_v36 = vadd.f32 %v1071_v27, %v1054_v34  ;;  %v1475_v34 = vld [vmem:[%s2343_s15] sm:$0xff] }
 0x218   : > { %v1126_v31 = vpop.permute.xlu1 %1125  ;;  %v1076_v47 = vadd.f32 %v1072_v29, %v1055_v23  ;;  %v1113_v52 = vmul.f32 %v2134_v40, %v1096_v41  ;;  %v1114_v28 = vmul.f32 %v2134_v40, %v1097_v24  ;;  %v1483_v18 = vld [vmem:[%s2344_s16] sm:$0xff]  ;;  %v1494_v23 = vld [vmem:[%s2346_s18 + $0x8] sm:$0xff] }
 0x219   : > { %v1129_v49 = vsel %vm1127_vm6, %v1124_v45, %v1126_v31  ;;  %v1135_v50 = vsel %vm1127_vm6, %v1126_v31, 0.0  ;;  %v1493_v22 = vld [vmem:[%s2346_s18] sm:$0xff] }
 0x21a   : > { %v1138_v33 = vmul.f32 %v1129_v49, %v2154_v55  ;;  %v1139_v53 = vmul.f32 %v1135_v50, %v2157_v58  ;;  %v1117_v59 = vadd.f32 %v1113_v52, %v1075_v36  ;;  %v1118_v46 = vadd.f32 %v1114_v28, %v1076_v47  ;;  %v1591_v41 = vld [vmem:[%s2348_s20] sm:$0xff] }
 0x21b   : > { %v1166_v25 = vpop.permute.xlu0 %1165  ;;  %v1346_v45 = vld [vmem:[%s2340_s12] sm:$0xff] }
 0x21c   : > { %v1155_v54 = vmul.f32 %v2138_v42, %v1138_v33  ;;  %v1156_v26 = vmul.f32 %v2138_v42, %v1139_v53  ;;  %v1168_v38 = vpop.permute.xlu1 %1167 }
 0x21d   : > { %v1171_v56 = vsel %vm1169_vm7, %v1166_v25, %v1168_v38  ;;  %v1177_v57 = vsel %vm1169_vm7, %v1168_v38, 0.0 }
 0x21e   : > { %v1159_v62 = vadd.f32 %v1155_v54, %v1117_v59  ;;  %v1160_v35 = vadd.f32 %v1156_v26, %v1118_v46  ;;  %v1193_v40 = vmul.f32 %v2142_v44, %v1171_v56  ;;  %v1194_v55 = vmul.f32 %v2142_v44, %v1177_v57 }
 0x21f   : > { %v1204_v60 = vpop.permute.xlu0 %1203 }
 0x220   : > { %v1206_v58 = vpop.permute.xlu1 %1205  ;;  %v1197_v3 = vadd.f32 %v1193_v40, %v1159_v62  ;;  %v1198_v5 = vadd.f32 %v1194_v55, %v1160_v35 }
 0x221   : > { %v1209_v0 = vsel %vm1207_vm8, %v1204_v60, %v1206_v58  ;;  %v1215_v1 = vsel %vm1207_vm8, %v1206_v58, 0.0 }
 0x222   : > { %v1218_v42 = vmul.f32 %v1209_v0, %v2160_v61  ;;  %v1219_v2 = vmul.f32 %v1215_v1, %v2163_v63 }
 0x224   : > { %v1235_v6 = vmul.f32 %v2146_v48, %v1218_v42  ;;  %v1236_v7 = vmul.f32 %v2146_v48, %v1219_v2  ;;  %v1671_v48 = vld [vmem:[%s2349_s21] sm:$0xff] }
 0x226   : > { %v1239_v17 = vadd.f32 %v1235_v6, %v1197_v3  ;;  %v1240_v8 = vadd.f32 %v1236_v7, %v1198_v5 }
 0x230   : > { %v1246_v19 = vpop.permute.xlu0 %1245 }
 0x231   : > { %v1253_v44 = vadd.f32 %v1246_v19, %v2204_v43  ;;  %v1254_v37 = vadd.f32 %v1246_v19, %v2202_v51  ;;  %v1251_v9 = vpop.permute.xlu1 %1250  ;;  %v1264_v51 = vld [vmem:[%s2338_s10] sm:$0xff] }
 0x232   : > { %v1255_v10 = vadd.f32 %v1251_v9, %v1239_v17  ;;  %v1256_v11 = vadd.f32 %v1251_v9, %v1240_v8  ;;  %v1265_v43 = vld [vmem:[%s2339_s11] sm:$0xff] }
 0x234   : > { %v1257_v32 = vmul.f32 %v1255_v10, %v1253_v44  ;;  %v1258_v61 = vmul.f32 %v1256_v11, %v1254_v37 }
 0x236   : > { %v1259_v12 = vadd.f32 %v1258_v61, %v1257_v32 }
 0x238   : > { %1260 = vadd.xlane.f32.xlu0 %v1259_v12 }
 0x24e   : > { %1674 = vperm.xlu0 %1824, %v1671_v48  }
 0x2c5   : > { %v1261_v63 = vpop.xlane.xlu0 %1260 }
 0x2c6   : > { %v1263_v13 = vmul.f32 0.00390625, %v1261_v63 }
 0x2c8   : > { %1801 = vmatpush3.msra.mxu1 %v1263_v13 }
 0x2c9   : > { %1803 = vmatmul.mubr.msk.f32.vlgmr.msra.gmra.mrb[0].mxu1 %vm783_vm0, %v1264_v51 }
 0x2ca   : > { %1420 = vmatprep.mubr.f32.mxu1 %v1843_v4 }
 0x39c   : > { %v1335_v14 = vpop.f32.mrb[0].mxu1 }
 0x39d   : > { %v1336_v15 = vadd.f32 %v1335_v14, %v1265_v43  ;;  %v1804_v39 = vpop.f32.mrb[1].mxu1 }
 0x39f   : > { %1341 = vperm.xlu1 %1825, %v1336_v15  }
 0x3a3   : > { %1350 = vperm.xlu1 %1825, %v1347_v30  }
 0x3a7   : > { %1430 = vperm.xlu1 %1825, %v1427_v16  }
 0x3ab   : > { %1478 = vperm.xlu1 %1825, %v1475_v34   ;;  %v1491_v34 = vld [vmem:[%s2345_s17] sm:$0xff] }
 0x3af   : > { %1486 = vperm.xlu1 %1825, %v1483_v18   ;;  %v1492_v18 = vld [vmem:[%s2345_s17 + $0x8] sm:$0xff] }
 0x3b3   : > { %1497 = vperm.xlu1 %1825, %v1493_v22  }
 0x3b7   : > { %1502 = vperm.xlu1 %1825, %v1494_v23  }
 0x3bb   : > { %1594 = vperm.xlu1 %1825, %v1591_v41  }
 0x41e   : > { %v1342_v24 = vpop.permute.xlu1 %1341 }
 0x41f   : > { %v1344_v27 = vmul.f32 %v1342_v24, %v1257_v32  ;;  %v1345_v29 = vmul.f32 %v1342_v24, %v1258_v61 }
 0x421   : > { %1356 = vmatprep.subr.mxu1 %v1345_v29 }
 0x422   : > { %1357 = vmatpush1.msra.mxu1 %v1344_v27  ;;  %v1351_v31 = vpop.permute.xlu1 %1350 }
 0x423   : > { %1787 = vmatmul.mubr.msk.f32.vlgmr.msra.gmra.mrb[2].mxu1 %vm783_vm0, %v1346_v45 }
 0x424   : > { %1664 = vmatprep.mubr.f32.mxu1 %v1843_v4 }
 0x426   : > { %v1431_v50 = vpop.permute.xlu1 %1430 }
 0x42a   : > { %v1479_v48 = vpop.permute.xlu1 %1478 }
 0x42e   : > { %v1487_v39 = vpop.permute.xlu1 %1486 }
 0x432   : > { %v1498_v22 = vpop.permute.xlu1 %1497 }
 0x436   : > { %v1503_v24 = vpop.permute.xlu1 %1502 }
 0x4f6   : > { %v1422_v36 = vpop.f32.mrb[2].mxu1 }
 0x4f7   : > { %v1423_v47 = vadd.f32 %v1422_v36, %v1351_v31  ;;  %v1424_v49 = vpop.f32.mrb[3].mxu1 }
 0x4f8   : > { %v1425_v52 = vadd.f32 %v1424_v49, %v1351_v31 }
 0x4f9   : > { %v1433_v28 = vmul.f32 %v1431_v50, %v1423_v47 }
 0x4fa   : > { %v1434_v33 = vmul.f32 %v1431_v50, %v1425_v52  ;;  %v1595_v52 = vpop.permute.xlu1 %1594 }
 0x4fb   : > { %v2295_v53 = vadd.f32 %v1433_v28, %v2024_v20 }
 0x4fc   : > { %v2298_v25 = vadd.f32 %v1434_v33, %v2026_v21 }
 0x4fd   : > { %v1437_v54 = vrot.slane %v2295_v53, 4 }
 0x4fe   : > { %v1443_v26 = vrot.slane %v2298_v25, 4 }
 0x4ff   : > { %v1438_v38 = vadd.f32 %v1437_v54, %v2295_v53 }
 0x500   : > { %v1444_v56 = vadd.f32 %v1443_v26, %v2298_v25  ;;  %v1675_v26 = vpop.permute.xlu0 %1674 }
 0x501   : > { %v1439_v57 = vrot.slane %v1438_v38, 2 }
 0x502   : > { %v1445_v59 = vrot.slane %v1444_v56, 2 }
 0x503   : > { %v1440_v46 = vadd.f32 %v1439_v57, %v1438_v38 }
 0x504   : > { %v1446_v60 = vadd.f32 %v1445_v59, %v1444_v56 }
 0x505   : > { %v1441_v62 = vrot.slane %v1440_v46, 1 }
 0x506   : > { %v1447_v35 = vrot.slane %v1446_v60, 1 }
 0x507   : > { %v1442_v40 = vadd.f32 %v1441_v62, %v1440_v46 }
 0x508   : > { %v1448_v20 = vadd.f32 %v1447_v35, %v1446_v60 }
 0x509   : > { %v1449_v55 = vmul.f32 0.125, %v1442_v40 }
 0x50a   : > { %v1450_v58 = vmul.f32 0.125, %v1448_v20 }
 0x50b   : > { %v1451_v21 = vsub.f32 %v2295_v53, %v1449_v55 }
 0x50c   : > { %v1452_v0 = vsub.f32 %v2298_v25, %v1450_v58 }
 0x50d   : > { %v1453_v1 = vmul.f32 %v1451_v21, %v1451_v21 }
 0x50e   : > { %v1454_v42 = vmul.f32 %v1452_v0, %v1452_v0 }
 0x50f   : > { %v1455_v2 = vrot.slane %v1453_v1, 4 }
 0x510   : > { %v1461_v3 = vrot.slane %v1454_v42, 4 }
 0x511   : > { %v1456_v5 = vadd.f32 %v1455_v2, %v1453_v1 }
 0x512   : > { %v1462_v6 = vadd.f32 %v1461_v3, %v1454_v42 }
 0x513   : > { %v1457_v7 = vrot.slane %v1456_v5, 2 }
 0x514   : > { %v1463_v17 = vrot.slane %v1462_v6, 2 }
 0x515   : > { %v1458_v8 = vadd.f32 %v1457_v7, %v1456_v5 }
 0x516   : > { %v1464_v19 = vadd.f32 %v1463_v17, %v1462_v6 }
 0x517   : > { %v1459_v44 = vrot.slane %v1458_v8, 1 }
 0x518   : > { %v1465_v37 = vrot.slane %v1464_v19, 1 }
 0x519   : > { %v1460_v9 = vadd.f32 %v1459_v44, %v1458_v8 }
 0x51a   : > { %v1466_v10 = vadd.f32 %v1465_v37, %v1464_v19 }
 0x51b   : > { %v1467_v11 = vmul.f32 0.125, %v1460_v9 }
 0x51c   : > { %v1468_v32 = vmul.f32 0.125, %v1466_v10 }
 0x51d   : > { %v1469_v61 = vadd.f32 1e-06, %v1467_v11 }
 0x51e   : > { %v1470_v12 = vadd.f32 1e-06, %v1468_v32 }
 0x51f   : > { %1830 = vrsqrt.f32 %v1469_v61 }
 0x520   : > { %1832 = vrsqrt.f32 %v1470_v12 }
 0x529   : > { %v1831_v63 = vpop.eup %1830 }
 0x52a   : > { %v1833_v13 = vpop.eup %1832  ;;  %v1473_v51 = vmul.f32 %v1831_v63, %v1451_v21 }
 0x52b   : > { %v1474_v43 = vmul.f32 %v1833_v13, %v1452_v0 }
 0x52c   : > { %v1481_v14 = vmul.f32 %v1479_v48, %v1473_v51 }
 0x52d   : > { %v1482_v15 = vmul.f32 %v1479_v48, %v1474_v43 }
 0x52e   : > { %v1489_v16 = vadd.f32 %v1487_v39, %v1481_v14 }
 0x52f   : > { %v1490_v30 = vadd.f32 %v1487_v39, %v1482_v15 }
 0x531   : > { %1511 = vmatprep.subr.mxu0 %v1490_v30 }
 0x532   : > { %1512 = vmatpush1.msra.mxu0 %v1489_v16 }
 0x533   : > { %1788 = vmatmul.mubr.msk.f32.vlgmr.msra.gmra.mrb[4].mxu0 %vm783_vm0, %v1491_v34 }
 0x534   : > { %1581 = vmatprep.mubr.f32.mxu0 %v1843_v4  ;;  %v1590_v4 = vld [vmem:[%s2347_s19] sm:$0xff] }
 0x537   : > { %1789 = vmatmul.mubr.msk.f32.gmra.mrb[6].mxu0 %vm783_vm0, %v1492_v18 }
 0x606   : > { %v1577_v23 = vpop.f32.mrb[4].mxu0 }
 0x607   : > { %v1579_v41 = vpop.f32.mrb[5].mxu0  ;;  %v1578_v29 = vadd.f32 %v1577_v23, %v1498_v22 }
 0x608   : > { %v1580_v36 = vadd.f32 %v1579_v41, %v1498_v22 }
 0x60a   : > { %v1583_v27 = vpop.f32.mrb[6].mxu0 }
 0x60b   : > { %v1584_v45 = vadd.f32 %v1583_v27, %v1503_v24  ;;  %v1585_v31 = vpop.f32.mrb[7].mxu0 }
 0x60c   : > { %v1586_v47 = vadd.f32 %v1585_v31, %v1503_v24 }
 0x60d   : > { %v1588_v49 = vmul.f32 %v1584_v45, %v1578_v29 }
 0x60e   : > { %v1589_v50 = vmul.f32 %v1586_v47, %v1580_v36 }
 0x610   : > { %1600 = vmatprep.subr.mxu1 %v1589_v50 }
 0x611   : > { %1601 = vmatpush1.msra.mxu1 %v1588_v49 }
 0x612   : > { %1790 = vmatmul.mubr.msk.f32.vlgmr.msra.gmra.mrb[4].mxu1 %vm783_vm0, %v1590_v4 }
 0x6e5   : > { %v1666_v28 = vpop.f32.mrb[4].mxu1 }
 0x6e6   : > { %v1667_v33 = vadd.f32 %v1666_v28, %v1595_v52  ;;  %v1668_v54 = vpop.f32.mrb[5].mxu1 }
 0x6e7   : > { %v1669_v38 = vadd.f32 %v1668_v54, %v1595_v52 }
 0x6e8   : > { %v1677_v56 = vmul.f32 %v1675_v26, %v1667_v33 }
 0x6e9   : > { %v1678_v57 = vmul.f32 %v1675_v26, %v1669_v38 }
 0x6ea   : > { %v1679_v59 = vadd.f32 %v1677_v56, %v2295_v53 }
 0x6eb   : > { %v1680_v46 = vadd.f32 %v1678_v57, %v2298_v25 }
 0x6ed   : > { %v1797_v60 = vpack.c.bf16 %v1680_v46, %v1679_v59 }
 0x6ef   : > { %1689 = vst [vmem:[%s703_s6] sm:$0xff] %v1797_v60 }
 0x6f0 PF: > { %s32_s3 = sadd.s32 1, %s1840_s3  }
 0x6f1   : > { %p29_p4 = scmp.ge.s32.totalorder %s32_s3, 4  }
 0x6f3   :  { %31 = sbr.rel (!%p29_p4) target bundleno = 8 (0x8), region = 149 }

// kernel: nafnet_refine_forward.21
= control target key start
LH: loop header
LB: loop body
LE: loop exit
PB: predicated region body
PF: predicated region fallthrough
CT: control target
= control target key end

     0   :  { %s1260_s18 = smov 0   ;;  %s1368_s0 = inlined_call_operand.vmem [shape: bf16[2,8,256], index: 0, kind: input, shape index: {}]   ;;  %s1369_s1 = inlined_call_operand.vmem [shape: f32[1,256], index: 1, kind: input, shape index: {}]   ;;  %s1370_s2 = inlined_call_operand.vmem [shape: f32[1,256], index: 2, kind: input, shape index: {}]   ;;  %s1371_s3 = inlined_call_operand.vmem [shape: f32[9,3,8], index: 3, kind: input, shape index: {}]   ;;  %s1372_s4 = inlined_call_operand.vmem [shape: f32[3,1], index: 4, kind: input, shape index: {}]   ;;  %s1373_s5 = inlined_call_operand.vmem [shape: f32[2,3,256], index: 5, kind: output, shape index: {}]  }
   0x1 LB: > { %s1104_s19 = sadd.s32 4294967295, %s1218_s18   ;;  %p1108_p0 = scmp.ge.s32.totalorder %s1218_s18, 1  ;;  %s1218_s18 = sphi %s1260_s18, %s15_s18  }
   0x2   : > { %p187_p1 = scmp.lt.s32.totalorder %s1218_s18, 3 }
   0x4   : > { %p188_p2 = pnand %p1108_p0, %p187_p1 }
   0x5   : > { %p215_p3 = scmp.lt.s32.totalorder (!%p188_p2), %s1104_s19, 1  ;;  %v1220_v0 = vmov (!%p188_p2), 0.0   ;;  %vm266_vm0 = vcmask (!%p188_p2), 64512   ;;  %v1122_v6 = vld [vmem:[%s1371_s3 + $0x10] sm:$0x7] (!%p188_p2)  ;;  %s1221_s26 = smov (!%p188_p2), 127   ;;  %v243_v9 = vlaneseq (!%p188_p2) }
   0x6   : > { %191 = sbr.rel (%p188_p2) target bundleno = 389 (0x185), region = 40  ;;  %673 = vmatprep.mubr.f32.mxu0 (!%p188_p2), %v1220_v0  ;;  %334 = vmatprep.mubr.f32.mxu1 (!%p188_p2), %v1220_v0  ;;  %s1222_s27 = smov (!%p188_p2), 17   ;;  %v1036_v7 = vld [vmem:[%s1372_s4] sm:$0x7] (!%p188_p2)  ;;  %v1229_v8 = vmov (!%p188_p2), 0   ;;  %vm688_vm1 = vcmask (!%p188_p2), 1039360  }
   0x7   : > { %s1223_s28 = smov (!%p188_p2), 16   ;;  %s1224_s29 = smov (!%p188_p2), 113   ;;  %1211 = vset.pattern.permute.xlu0 (!%p188_p2), %v1229_v8  ;;  %v244_v10 = vshrl.u32 (!%p188_p2), %v243_v9, 7  ;;  %v229_v13 = vld [vmem:[%s1370_s2] sm:$0x3] (!%p188_p2)  ;;  %vm237_vm2 = vcmask (!%p188_p2), 138240  }
   0x8   : > { %s1225_s30 = smov (!%p188_p2), 15   ;;  %s1226_s6 = smov (!%p188_p2), 112   ;;  %v228_v14 = vld [vmem:[%s1369_s1] sm:$0x3] (!%p188_p2)  ;;  %vm261_vm3 = vcmask (!%p188_p2), 130048   ;;  %vm777_vm4 = vcmask (!%p188_p2), 924672  }
   0x9   : > { %s1227_s7 = smov (!%p188_p2), 111   ;;  %s1228_s8 = smov (!%p188_p2), 1   ;;  %v245_v11 = vsub.s32 (!%p188_p2), 0, %v244_v10  ;;  %v249_v12 = vsub.s32 (!%p188_p2), 1, %v244_v10  ;;  %v1124_v37 = vld [vmem:[%s1371_s3 + $0x14] sm:$0x7] (!%p188_p2)  ;;  %vm1114_vm5 = vmneg (!%p188_p2), %vm261_vm3 }
   0xa   : > { %v1113_v43 = vld [vmem:[%s1371_s3 + $0x4] sm:$0x7] (!%p188_p2)  ;;  %vm421_vm6 = vcmask (!%p188_p2), 121856   ;;  %vm866_vm7 = vcmask (!%p188_p2), 916480   ;;  %vm953_vm8 = vcmask (!%p188_p2), 908288   ;;  %vm521_vm9 = vcmask (!%p188_p2), 7168  }
   0xb   : > { %v1292_v15 = vrot.slane (!%p188_p2), %v229_v13, %v245_v11  ;;  %v1294_v18 = vrot.slane (!%p188_p2), %v229_v13, %v249_v12  ;;  %v1296_v23 = vrot.slane (!%p188_p2), %v228_v14, %v249_v12  ;;  %v1298_v26 = vrot.slane (!%p188_p2), %v228_v14, %v245_v11  ;;  %v1126_v57 = vld [vmem:[%s1371_s3 + $0x18] sm:$0x7] (!%p188_p2)  ;;  %v1128_v9 = vld [vmem:[%s1371_s3 + $0x1c] sm:$0x7] (!%p188_p2)  ;;  %v1118_v11 = vld [vmem:[%s1371_s3 + $0x8] sm:$0x7] (!%p188_p2) }
   0xc   : > { %v1131_v12 = vld [vmem:[%s1371_s3 + $0x20] sm:$0x7] (!%p188_p2)  ;;  %v1120_v13 = vld [vmem:[%s1371_s3 + $0xc] sm:$0x7] (!%p188_p2) }
   0xd   : > { %s1375_s19 = smov (!%p215_p3, %s1104_s19), 1 }
   0xe   : > { %s1135_s20 = sshll.u32 %s1375_s19, 3 }
   0xf   : > { %s219_s23 = scalar_lea.vmem %s1368_s0, %s1135_s20  ;;  %s224_s11 = scalar_lea.vmem %s1373_s5, %s1135_s20 }
  0x10   : > { %v225_v1 = vld [vmem:[%s219_s23] sm:$0xff] }
  0x11   : > { %v226_v2 = vunpack.c.l.bf16 %v225_v1  ;;  %v227_v3 = vunpack.c.h.bf16 %v225_v1  ;;  %v230_v1 = vld [vmem:[%s1371_s3] sm:$0x7] }
  0x13   : > { %v1171_v4 = vpack.i.bf16 %v226_v2, %v227_v3  ;;  %v1181_v5 = vpack.i.bf16 %v227_v3, %v226_v2  ;;  %609 = vmatprep.subr.mxu0 %v227_v3 }
  0x14   : > { %610 = vmatpush1.msra.mxu0 %v226_v2 }
  0x15   : > { %1172 = vrot.lane.b32.xlu0 %v1171_v4, %s1221_s26  ;;  %1182 = vrot.lane.b32.xlu1 %v1181_v5, %s1222_s27 }
  0x16   : > { %1123 = vmatmul.mubr.msk.f32.vlgmr.msra.gmra.mrb[0].mxu0 %vm266_vm0, %v1122_v6 }
  0x17   : > { %762 = vmatprep.mubr.f32.mxu0 %v1220_v0 }
  0x19   : > { %1177 = vrot.lane.b32.xlu0 %v1181_v5, %s1223_s28  ;;  %1187 = vrot.lane.b32.xlu1 %v1171_v4, %s1224_s29 }
  0x1d   : > { %1192 = vrot.lane.b32.xlu0 %v1181_v5, %s1225_s30  ;;  %1197 = vrot.lane.b32.xlu1 %v1181_v5, %s1226_s6 }
  0x21   : > { %1207 = vrot.lane.b32.xlu1 %v1171_v4, %s1227_s7  ;;  %1202 = vrot.lane.b32.xlu0 %v1181_v5, %s1228_s8 }
  0x25   : > { %1039 = vperm.xlu0 %1211, %v1036_v7  }
  0x87   : > { %v1173_v16 = vpop.permute.xlu0 %1172  ;;  %v1183_v17 = vpop.permute.xlu1 %1182 }
  0x88   : > { %v1175_v19 = vunpack.i.h.bf16 %v1173_v16  ;;  %v1174_v20 = vunpack.i.l.bf16 %v1173_v16  ;;  %v1185_v21 = vunpack.i.h.bf16 %v1183_v17  ;;  %v1184_v22 = vunpack.i.l.bf16 %v1183_v17 }
  0x8a   : > { %v689_v24 = vsel %vm688_vm1, %v1175_v19, %v1174_v20  ;;  %v692_v25 = vsel %vm688_vm1, %v1174_v20, 0.0  ;;  %v238_v27 = vsel %vm237_vm2, %v1184_v22, %v1185_v21  ;;  %v241_v29 = vsel %vm237_vm2, 0.0, %v1184_v22 }
  0x8b   : > { %v693_v28 = vmul.f32 %v689_v24, %v1292_v15  ;;  %v1178_v30 = vpop.permute.xlu0 %1177  ;;  %v694_v31 = vmul.f32 %v692_v25, %v1294_v18  ;;  %v1188_v32 = vpop.permute.xlu1 %1187  ;;  %v254_v38 = vmul.f32 %v1296_v23, %v238_v27  ;;  %v253_v39 = vmul.f32 %v1298_v26, %v241_v29 }
  0x8c   : > { %v1180_v33 = vunpack.i.h.bf16 %v1178_v30  ;;  %v1179_v34 = vunpack.i.l.bf16 %v1178_v30  ;;  %v1190_v35 = vunpack.i.h.bf16 %v1188_v32  ;;  %v1189_v36 = vunpack.i.l.bf16 %v1188_v32 }
  0x8d   : > { %698 = vmatprep.subr.mxu0 %v694_v31 }
  0x8e   : > { %v778_v40 = vsel %vm777_vm4, %v1190_v35, %v1189_v36  ;;  %v781_v41 = vsel %vm777_vm4, %v1189_v36, 0.0  ;;  %699 = vmatpush1.msra.mxu0 %v693_v28  ;;  %v262_v42 = vsel %vm261_vm3, %v1179_v34, %v1180_v33 }
  0x8f   : > { %v782_v44 = vmul.f32 %v778_v40, %v1298_v26  ;;  %270 = vmatprep.subr.mxu1 %v262_v42  ;;  %1125 = vmatmul.mubr.msk.f32.vlgmr.msra.gmra.mrb[0].mxu0 %vm266_vm0, %v1124_v37  ;;  %v783_v45 = vmul.f32 %v781_v41, %v1296_v23  ;;  %v1193_v46 = vpop.permute.xlu0 %1192  ;;  %v1198_v47 = vpop.permute.xlu1 %1197 }
  0x90   : > { %1115 = vmatpush1.msk.msra.mxu1 %vm1114_vm5, %v1179_v34  ;;  %v1195_v48 = vunpack.i.h.bf16 %v1193_v46  ;;  %v1194_v49 = vunpack.i.l.bf16 %v1193_v46  ;;  %851 = vmatprep.mubr.f32.mxu0 %v1220_v0  ;;  %v1200_v50 = vunpack.i.h.bf16 %v1198_v47  ;;  %v1199_v51 = vunpack.i.l.bf16 %v1198_v47 }
  0x91   : > { %1116 = vmatmul.mubr.msk.f32.vlgmr.msra.gmra.mrb[0].mxu1 %vm266_vm0, %v1113_v43  ;;  %344 = vmatprep.subr.mxu1 %v254_v38 }
  0x92   : > { %345 = vmatpush1.msra.mxu1 %v253_v39  ;;  %787 = vmatprep.subr.mxu0 %v783_v45  ;;  %v422_v52 = vsel %vm421_vm6, %v1194_v49, %v1195_v48  ;;  %v425_v53 = vsel %vm421_vm6, 0.0, %v1194_v49  ;;  %v867_v62 = vsel %vm866_vm7, %v1199_v51, %v1200_v50 }
  0x93   : > { %788 = vmatpush1.msra.mxu0 %v782_v44  ;;  %408 = vmatprep.mubr.f32.mxu1 %v1220_v0  ;;  %v438_v54 = vmul.f32 %v1294_v18, %v422_v52  ;;  %v1208_v55 = vpop.permute.xlu1 %1207  ;;  %v1203_v56 = vpop.permute.xlu0 %1202  ;;  %v437_v63 = vmul.f32 %v1292_v15, %v425_v53 }
  0x94   : > { %1129 = vmatprep.subr.msk.mxu0 %vm866_vm7, %v1200_v50  ;;  %v1209_v58 = vunpack.i.l.bf16 %v1208_v55  ;;  %v1205_v59 = vunpack.i.h.bf16 %v1203_v56  ;;  %v1204_v60 = vunpack.i.l.bf16 %v1203_v56  ;;  %v1210_v61 = vunpack.i.h.bf16 %v1208_v55 }
  0x95   : > { %442 = vmatprep.subr.mxu1 %v438_v54 }
  0x96   : > { %v957_v2 = vsel %vm953_vm8, %v1209_v58, 0.0  ;;  %v522_v3 = vsel %vm521_vm9, %v1204_v60, %v1205_v59  ;;  %v954_v6 = vsel %vm953_vm8, %v1210_v61, %v1209_v58  ;;  %v525_v7 = vsel %vm521_vm9, 0.0, %v1204_v60 }
  0x97   : > { %1127 = vmatmul.mubr.msk.f32.vlgmr.msra.gmra.mrb[0].mxu0 %vm266_vm0, %v1126_v57  ;;  %v959_v4 = vmul.f32 %v957_v2, %v1294_v18  ;;  %v527_v5 = vmul.f32 %v522_v3, %v1296_v23  ;;  %v958_v8 = vmul.f32 %v954_v6, %v1292_v15  ;;  %v526_v10 = vmul.f32 %v525_v7, %v1298_v26 }
  0x98   : > { %875 = vmatpush1.msra.mxu0 %v867_v62  ;;  %938 = vmatprep.mubr.f32.mxu0 %v1220_v0 }
  0x99   : > { %1117 = vmatmul.mubr.msk.f32.vlgmr.msra.gmra.mrb[0].mxu1 %vm266_vm0, %v230_v1  ;;  %963 = vmatprep.subr.mxu0 %v959_v4 }
  0x9a   : > { %443 = vmatpush1.msra.mxu1 %v437_v63  ;;  %506 = vmatprep.mubr.f32.mxu1 %v1220_v0 }
  0x9b   : > { %531 = vmatprep.subr.mxu1 %v527_v5 }
  0x9f   : > { %1130 = vmatmul.mubr.msk.f32.vlgmr.msra.gmra.mrb[0].mxu0 %vm266_vm0, %v1128_v9 }
  0xa0   : > { %964 = vmatpush1.msra.mxu0 %v958_v8  ;;  %1027 = vmatprep.mubr.f32.mxu0 %v1220_v0 }
  0xa1   : > { %1119 = vmatmul.mubr.msk.f32.vlgmr.msra.gmra.mrb[0].mxu1 %vm266_vm0, %v1118_v11 }
  0xa2   : > { %532 = vmatpush1.msra.mxu1 %v526_v10  ;;  %595 = vmatprep.mubr.f32.mxu1 %v1220_v0 }
  0xa4   : > { %v1040_v17 = vpop.permute.xlu0 %1039 }
  0xa7   : > { %1132 = vmatmul.mubr.msk.f32.vlgmr.msra.gmra.mrb[0].mxu0 %vm266_vm0, %v1131_v12 }
  0xa9   : > { %1121 = vmatmul.mubr.msk.f32.vlgmr.msra.gmra.mrb[0].mxu1 %vm266_vm0, %v1120_v13 }
 0x17a   : > { %v1029_v14 = vpop.f32.mrb[0].mxu0 }
 0x17b   : > { %v1031_v15 = vpop.f32.mrb[1].mxu0 }
 0x17c   : > { %v597_v16 = vpop.f32.mrb[0].mxu1 }
 0x17d   : > { %v1137_v18 = vadd.f32 %v1029_v14, %v597_v16  ;;  %v599_v19 = vpop.f32.mrb[1].mxu1 }
 0x17e   : > { %v1138_v20 = vadd.f32 %v1031_v15, %v599_v19 }
 0x17f   : > { %v1042_v0 = vadd.f32 %v1137_v18, %v1040_v17 }
 0x180   : > { %v1043_v21 = vadd.f32 %v1138_v20, %v1040_v17 }
 0x182   : > { %v1046_v22 = vcombine.low %v1042_v0, %v1043_v21 }
 0x184   : > { %1048 = vst [vmem:[%s224_s11] sm:$0x77] %v1046_v22 }
 0x185 PF: > { %s15_s18 = sadd.s32 1, %s1218_s18  }
 0x186   : > { %p12_p4 = scmp.ge.s32.totalorder %s15_s18, 4  }
 0x188   :  { %14 = sbr.rel (!%p12_p4) target bundleno = 1 (0x1), region = 78 }

</bundles_post_ra>
